<compile_context>
chip_gen: v5e
topology: v5e:2x2
jax: 0.10.0
libtpu: 0.0.40
codegen_flags: <defaults>
</compile_context>

<pallas_src>
import functools

import jax
import jax.numpy as jnp
from jax.experimental import pallas as pl
from jax.experimental.pallas import tpu as pltpu


# ----------------------------------------------------------------------------
# Small helpers
# ----------------------------------------------------------------------------
def _round_up(x: int, m: int) -> int:
    return (x + m - 1) // m * m


def _pad_cols(a, multiple: int = 128):
    pad = (-a.shape[1]) % multiple
    return a if pad == 0 else jnp.pad(a, ((0, 0), (0, pad)))


def _pick_row_tile(n: int, max_tile: int) -> int:
    """Row tile: multiple of 8, >= 2 grid steps when possible (v7x megacore),
    >= 256 rows to keep the MXU M axis fed, never (much) larger than the input."""
    if n <= 0:
        return 8
    rt = _round_up(max(1, (n + 1) // 2), 8)   # ~half the rows -> grid of >= 2
    rt = max(rt, 256)                          # MXU-fill floor
    rt = min(rt, max_tile)
    rt = min(rt, _round_up(n, 8))              # tiny inputs: one small tile
    return max(rt, 8)


_COMPILER_PARAMS = pltpu.CompilerParams(
    dimension_semantics=("parallel",),
    vmem_limit_bytes=32 * 1024 * 1024,
)


# ----------------------------------------------------------------------------
# Kernel 1: fused 2-layer MLP with ReLU (the feature_encoder Sequential)
# ----------------------------------------------------------------------------
def _mlp_kernel(x_ref, w1_ref, b1_ref, w2_ref, b2_ref, o_ref):
    cdt = w1_ref.dtype                        # compute dtype (f32 or bf16)
    x = x_ref[...].astype(cdt)
    h = jnp.dot(x, w1_ref[...], preferred_element_type=jnp.float32)
    h = jnp.maximum(h + b1_ref[...], 0.0)     # bias + ReLU in f32 (VPU)
    # Dropout(p=0.1) = identity in eval mode.
    y = jnp.dot(h.astype(cdt), w2_ref[...], preferred_element_type=jnp.float32)
    o_ref[...] = (y + b2_ref[...]).astype(o_ref.dtype)


def feature_encoder_mlp(x, w1, b1, w2, b2, *, max_row_tile=1024):
    n, c_in = x.shape
    hid = w1.shape[1]
    c_out = w2.shape[1]                       # already padded to 128 by caller
    if n == 0:
        return jnp.zeros((0, c_out), x.dtype)
    rt = _pick_row_tile(n, max_row_tile)
    return pl.pallas_call(
        _mlp_kernel,
        out_shape=jax.ShapeDtypeStruct((n, c_out), x.dtype),
        grid_spec=pltpu.PrefetchScalarGridSpec(
            num_scalar_prefetch=0,
            grid=(pl.cdiv(n, rt),),
            in_specs=[
                pl.BlockSpec((rt, c_in), lambda i: (i, 0)),
                pl.BlockSpec((c_in, hid), lambda i: (0, 0)),
                pl.BlockSpec((1, hid), lambda i: (0, 0)),
                pl.BlockSpec((hid, c_out), lambda i: (0, 0)),
                pl.BlockSpec((1, c_out), lambda i: (0, 0)),
            ],
            out_specs=pl.BlockSpec((rt, c_out), lambda i: (i, 0)),
        ),
        compiler_params=_COMPILER_PARAMS,
    )(x, w1, b1, w2, b2)


# ----------------------------------------------------------------------------
# Kernel 2: edge_init Linear(220 -> 1200) + ReLU
# ----------------------------------------------------------------------------
def _edge_kernel(ef_ref, w_ref, b_ref, o_ref):
    ef = ef_ref[...].astype(w_ref.dtype)
    y = jnp.dot(ef, w_ref[...], preferred_element_type=jnp.float32)
    o_ref[...] = jnp.maximum(y + b_ref[...], 0.0).astype(o_ref.dtype)


def edge_init_relu(edge_feat, w, b, *, max_row_tile=1024, out_dtype=None):
    e, c_in = edge_feat.shape
    c_out = w.shape[1]
    out_dtype = edge_feat.dtype if out_dtype is None else out_dtype
    if e == 0:
        return jnp.zeros((0, c_out), out_dtype)
    rt = _pick_row_tile(e, max_row_tile)
    return pl.pallas_call(
        _edge_kernel,
        out_shape=jax.ShapeDtypeStruct((e, c_out), out_dtype),
        grid_spec=pltpu.PrefetchScalarGridSpec(
            num_scalar_prefetch=0,
            grid=(pl.cdiv(e, rt),),
            in_specs=[
                pl.BlockSpec((rt, c_in), lambda i: (i, 0)),
                pl.BlockSpec((c_in, c_out), lambda i: (0, 0)),
                pl.BlockSpec((1, c_out), lambda i: (0, 0)),
            ],
            out_specs=pl.BlockSpec((rt, c_out), lambda i: (i, 0)),
        ),
        compiler_params=_COMPILER_PARAMS,
    )(edge_feat, w, b)


# ----------------------------------------------------------------------------
# Parameter init (deterministic, PyTorch nn.Linear-style uniform fan-in init)
# ----------------------------------------------------------------------------
def init_params(key,
                feature_in_channels=256,
                feature_out_channels=110,
                feature_hidden_channels=128,
                edge_embedding_size=1200,
                modified_in_channels=220,
                dtype=jnp.float32):
    ks = jax.random.split(key, 6)

    def linear(kw, kb, fan_in, fan_out):
        bound = 1.0 / (fan_in ** 0.5)
        w = jax.random.uniform(kw, (fan_in, fan_out), dtype, -bound, bound)
        b = jax.random.uniform(kb, (1, fan_out), dtype, -bound, bound)
        return w, b

    w1, b1 = linear(ks[0], ks[1], feature_in_channels, feature_hidden_channels)
    w2, b2 = linear(ks[2], ks[3], feature_hidden_channels, feature_out_channels)
    w3, b3 = linear(ks[4], ks[5], modified_in_channels, edge_embedding_size)
    return dict(w1=w1, b1=b1, w2=w2, b2=b2, w3=w3, b3=b3)


# ----------------------------------------------------------------------------
# One-time weight preparation (pad + cast ONCE, not per forward call)
# ----------------------------------------------------------------------------
def prepare_params(params, compute_dtype=jnp.float32):
    """Pad the 2nd MLP layer 110->128 output channels (lane-dense stores) and
    cast matmul weights to the compute dtype once.  Biases stay f32 (the
    bias+ReLU epilogue always runs in f32; f32 accumulation is kept on the MXU
    even in bf16 mode — bf16 is recommended on v5e as well)."""
    return dict(
        w1=params["w1"].astype(compute_dtype),
        b1=params["b1"].astype(jnp.float32),
        w2p=_pad_cols(params["w2"]).astype(compute_dtype),
        b2p=_pad_cols(params["b2"]).astype(jnp.float32),
        w3=params["w3"].astype(compute_dtype),
        b3=params["b3"].astype(jnp.float32),
    )


# ----------------------------------------------------------------------------
# Full forward (mirrors FeatureEncoderRelu.forward on a PyG-style Batch)
# ----------------------------------------------------------------------------
@functools.partial(jax.jit, static_argnames=("feature_out_channels", "h0_dtype"))
def feature_encoder_relu_forward(prep, x, extra_atom_features, edge_index,
                                 edge_attr, *, feature_out_channels=110,
                                 h0_dtype=jnp.float32):
    # batch.extra_atom_features = self.feature_encoder(batch.extra_atom_features)
    enc_p = feature_encoder_mlp(extra_atom_features, prep["w1"], prep["b1"],
                                prep["w2p"], prep["b2p"])
    enc = enc_p[:, :feature_out_channels]     # N-sized slice, fuses under jit

    # batch.x1 = torch.cat([batch.x, batch.extra_atom_features], dim=1)
    x1 = jnp.concatenate([x, enc], axis=1)

    # row, col = batch.edge_index ; gather + concat fuse into one XLA op under
    # jit (see TODO at top about fusing this into the edge kernel).
    row = edge_index[0]
    edge_in = jnp.concatenate([x1[row], edge_attr], axis=1)

    # batch.h_0 = F.relu(self.edge_init(...)) ; batch.h = batch.h_0
    h_0 = edge_init_relu(edge_in, prep["w3"], prep["b3"], out_dtype=h0_dtype)
    return dict(extra_atom_features=enc, x1=x1, h_0=h_0, h=h_0)


# ----------------------------------------------------------------------------
# Pure-JAX reference for verification
# ----------------------------------------------------------------------------
def _reference(params, x, extra, edge_index, edge_attr):
    h = jnp.maximum(extra @ params["w1"] + params["b1"], 0.0)
    enc = h @ params["w2"] + params["b2"]
    x1 = jnp.concatenate([x, enc], axis=1)
    row = edge_index[0]
    ei = jnp.concatenate([x1[row], edge_attr], axis=1)
    h0 = jnp.maximum(ei @ params["w3"] + params["b3"], 0.0)
    return enc, x1, h0


if __name__ == "__main__":
    key = jax.random.PRNGKey(0)
    kp, kx, ke, ka, ki = jax.random.split(key, 5)

    # Small synthetic graph consistent with module defaults:
    #   extra_atom_features: [N, 256]; x: [N, 100]; edge_attr: [E, 10]
    #   (100 + 110 + 10 == 220 == modified_in_channels)
    # N, E chosen so both kernels get a >=2-step ragged grid (exercises the
    # masked tail block and the v7x two-TensorCore sharding path).
    N, E = 270, 300
    X_DIM, EDGE_ATTR_DIM = 100, 10

    params = init_params(kp)
    x = jax.random.normal(kx, (N, X_DIM), jnp.float32)
    extra = jax.random.normal(ke, (N, 256), jnp.float32)
    edge_attr = jax.random.normal(ka, (E, EDGE_ATTR_DIM), jnp.float32)
    edge_index = jax.random.randint(ki, (2, E), 0, N, dtype=jnp.int32)

    enc_ref, x1_ref, h0_ref = _reference(params, x, extra, edge_index, edge_attr)

    # --- f32 compute path (matches PyTorch semantics, strict tolerance) ---
    prep = prepare_params(params, jnp.float32)
    out = feature_encoder_relu_forward(prep, x, extra, edge_index, edge_attr)
    jax.block_until_ready(out)
    assert out["extra_atom_features"].shape == (N, 110)
    assert out["x1"].shape == (N, 210)
    assert out["h_0"].shape == (E, 1200)
    assert jnp.allclose(out["extra_atom_features"], enc_ref, atol=1e-4, rtol=1e-4)
    assert jnp.allclose(out["x1"], x1_ref, atol=1e-4, rtol=1e-4)
    assert jnp.allclose(out["h_0"], h0_ref, atol=1e-4, rtol=1e-4)

    # --- bf16 weights + bf16 h_0 output (perf option on all generations,
    #     incl. v5e; f32 accumulation kept) ---
    prep_bf16 = prepare_params(params, jnp.bfloat16)
    out_bf = feature_encoder_relu_forward(prep_bf16, x, extra, edge_index,
                                          edge_attr, h0_dtype=jnp.bfloat16)
    jax.block_until_ready(out_bf)
    assert out_bf["h_0"].dtype == jnp.bfloat16
    assert jnp.allclose(out_bf["h_0"].astype(jnp.float32), h0_ref,
                        atol=2e-1, rtol=5e-2)

    # --- empty-graph guard (N=0, E=0 must not reach pallas_call) ---
    out_empty = feature_encoder_relu_forward(
        prep, x[:0], extra[:0], jnp.zeros((2, 0), jnp.int32), edge_attr[:0])
    jax.block_until_ready(out_empty)
    assert out_empty["h_0"].shape == (0, 1200)
    assert out_empty["x1"].shape == (0, 210)

    print("KERNEL_OK")
</pallas_src>

<mosaic_0001>
module attributes {stable_mosaic.version = 11 : i64} {
  func.func @_mlp_kernel(%arg0: i32, %arg1: memref<256x256xf32, #tpu.memory_space<vmem>>, %arg2: memref<256x128xf32, #tpu.memory_space<vmem>>, %arg3: memref<1x128xf32, #tpu.memory_space<vmem>>, %arg4: memref<128x128xf32, #tpu.memory_space<vmem>>, %arg5: memref<1x128xf32, #tpu.memory_space<vmem>>, %arg6: memref<256x128xf32, #tpu.memory_space<vmem>>) attributes {dimension_semantics = [#tpu.dimension_semantics<parallel>], iteration_bounds = array<i64: 2>, scalar_prefetch = 0 : i64, scratch_operands = 0 : i64, tpu.core_type = #tpu.core_type<tc>, window_params = [{transform_indices = @transform_0, window_bounds = array<i64: 256, 256>}, {pipeline_mode = #tpu.pipeline_mode<synchronous>, transform_indices = @transform_1, window_bounds = array<i64: 256, 128>}, {pipeline_mode = #tpu.pipeline_mode<synchronous>, transform_indices = @transform_2, window_bounds = array<i64: 1, 128>}, {pipeline_mode = #tpu.pipeline_mode<synchronous>, transform_indices = @transform_3, window_bounds = array<i64: 128, 128>}, {pipeline_mode = #tpu.pipeline_mode<synchronous>, transform_indices = @transform_4, window_bounds = array<i64: 1, 128>}, {transform_indices = @transform_5, window_bounds = array<i64: 256, 128>}]} {
    %c0 = arith.constant 0 : index
    %c0_0 = arith.constant 0 : index
    %0 = vector.load %arg1[%c0, %c0_0] : memref<256x256xf32, #tpu.memory_space<vmem>>, vector<256x256xf32>
    %c0_1 = arith.constant 0 : index
    %c0_2 = arith.constant 0 : index
    %1 = vector.load %arg2[%c0_1, %c0_2] : memref<256x128xf32, #tpu.memory_space<vmem>>, vector<256x128xf32>
    %cst = arith.constant dense<0.000000e+00> : vector<256x128xf32>
    %2 = tpu.matmul %0, %1, %cst {dimension_numbers = #tpu.dot_dimension_numbers<[1], [0], [0], [1], [0, 0, 1, 1], [], []>} : vector<256x256xf32>, vector<256x128xf32>, vector<256x128xf32> -> vector<256x128xf32>
    %c0_3 = arith.constant 0 : index
    %c0_4 = arith.constant 0 : index
    %3 = vector.load %arg3[%c0_3, %c0_4] : memref<1x128xf32, #tpu.memory_space<vmem>>, vector<1x128xf32>
    %4 = vector.broadcast %3 : vector<1x128xf32> to vector<256x128xf32>
    %5 = arith.addf %2, %4 : vector<256x128xf32>
    %cst_5 = arith.constant 0.000000e+00 : f32
    %6 = vector.broadcast %cst_5 : f32 to vector<256x128xf32>
    %7 = arith.maximumf %5, %6 : vector<256x128xf32>
    %c0_6 = arith.constant 0 : index
    %c0_7 = arith.constant 0 : index
    %8 = vector.load %arg4[%c0_6, %c0_7] : memref<128x128xf32, #tpu.memory_space<vmem>>, vector<128x128xf32>
    %cst_8 = arith.constant dense<0.000000e+00> : vector<256x128xf32>
    %9 = tpu.matmul %7, %8, %cst_8 {dimension_numbers = #tpu.dot_dimension_numbers<[1], [0], [0], [1], [0, 0, 1, 1], [], []>} : vector<256x128xf32>, vector<128x128xf32>, vector<256x128xf32> -> vector<256x128xf32>
    %c0_9 = arith.constant 0 : index
    %c0_10 = arith.constant 0 : index
    %10 = vector.load %arg5[%c0_9, %c0_10] : memref<1x128xf32, #tpu.memory_space<vmem>>, vector<1x128xf32>
    %11 = vector.broadcast %10 : vector<1x128xf32> to vector<256x128xf32>
    %12 = arith.addf %9, %11 : vector<256x128xf32>
    %c0_11 = arith.constant 0 : index
    %c0_12 = arith.constant 0 : index
    %13 = vector.load %arg6[%c0_11, %c0_12] : memref<256x128xf32, #tpu.memory_space<vmem>>, vector<256x128xf32>
    tpu.vector_store %arg6[%c0_11, %c0_12], %12 {strides = array<i32>} : memref<256x128xf32, #tpu.memory_space<vmem>>, vector<256x128xf32>,
    return
  }
  func.func @transform_0(%arg0: i32) -> (i32, i32) {
    %c0_i32 = arith.constant 0 : i32
    %c0_i32_0 = arith.constant 0 : i32
    return %arg0, %c0_i32 : i32, i32
  }
  func.func @transform_1(%arg0: i32) -> (i32, i32) {
    %c0_i32 = arith.constant 0 : i32
    %c0_i32_0 = arith.constant 0 : i32
    %c0_i32_1 = arith.constant 0 : i32
    return %c0_i32, %c0_i32_0 : i32, i32
  }
  func.func @transform_2(%arg0: i32) -> (i32, i32) {
    %c0_i32 = arith.constant 0 : i32
    %c0_i32_0 = arith.constant 0 : i32
    %c0_i32_1 = arith.constant 0 : i32
    return %c0_i32, %c0_i32_0 : i32, i32
  }
  func.func @transform_3(%arg0: i32) -> (i32, i32) {
    %c0_i32 = arith.constant 0 : i32
    %c0_i32_0 = arith.constant 0 : i32
    %c0_i32_1 = arith.constant 0 : i32
    return %c0_i32, %c0_i32_0 : i32, i32
  }
  func.func @transform_4(%arg0: i32) -> (i32, i32) {
    %c0_i32 = arith.constant 0 : i32
    %c0_i32_0 = arith.constant 0 : i32
    %c0_i32_1 = arith.constant 0 : i32
    return %c0_i32, %c0_i32_0 : i32, i32
  }
  func.func @transform_5(%arg0: i32) -> (i32, i32) {
    %c0_i32 = arith.constant 0 : i32
    %c0_i32_0 = arith.constant 0 : i32
    return %arg0, %c0_i32 : i32, i32
  }
}

module attributes {stable_mosaic.version = 11 : i64} {
  func.func @_edge_kernel(%arg0: i32, %arg1: memref<256x220xf32, #tpu.memory_space<vmem>>, %arg2: memref<220x1200xf32, #tpu.memory_space<vmem>>, %arg3: memref<1x1200xf32, #tpu.memory_space<vmem>>, %arg4: memref<256x1200xf32, #tpu.memory_space<vmem>>) attributes {dimension_semantics = [#tpu.dimension_semantics<parallel>], iteration_bounds = array<i64: 2>, scalar_prefetch = 0 : i64, scratch_operands = 0 : i64, tpu.core_type = #tpu.core_type<tc>, window_params = [{transform_indices = @transform_0, window_bounds = array<i64: 256, 220>}, {pipeline_mode = #tpu.pipeline_mode<synchronous>, transform_indices = @transform_1, window_bounds = array<i64: 220, 1200>}, {pipeline_mode = #tpu.pipeline_mode<synchronous>, transform_indices = @transform_2, window_bounds = array<i64: 1, 1200>}, {transform_indices = @transform_3, window_bounds = array<i64: 256, 1200>}]} {
    %c0 = arith.constant 0 : index
    %c0_0 = arith.constant 0 : index
    %0 = vector.load %arg1[%c0, %c0_0] : memref<256x220xf32, #tpu.memory_space<vmem>>, vector<256x220xf32>
    %c0_1 = arith.constant 0 : index
    %c0_2 = arith.constant 0 : index
    %1 = vector.load %arg2[%c0_1, %c0_2] : memref<220x1200xf32, #tpu.memory_space<vmem>>, vector<220x1200xf32>
    %cst = arith.constant dense<0.000000e+00> : vector<256x1200xf32>
    %2 = tpu.matmul %0, %1, %cst {dimension_numbers = #tpu.dot_dimension_numbers<[1], [0], [0], [1], [0, 0, 1, 1], [], []>} : vector<256x220xf32>, vector<220x1200xf32>, vector<256x1200xf32> -> vector<256x1200xf32>
    %c0_3 = arith.constant 0 : index
    %c0_4 = arith.constant 0 : index
    %3 = vector.load %arg3[%c0_3, %c0_4] : memref<1x1200xf32, #tpu.memory_space<vmem>>, vector<1x1200xf32>
    %4 = vector.broadcast %3 : vector<1x1200xf32> to vector<256x1200xf32>
    %5 = arith.addf %2, %4 : vector<256x1200xf32>
    %cst_5 = arith.constant 0.000000e+00 : f32
    %6 = vector.broadcast %cst_5 : f32 to vector<256x1200xf32>
    %7 = arith.maximumf %5, %6 : vector<256x1200xf32>
    %c0_6 = arith.constant 0 : index
    %c0_7 = arith.constant 0 : index
    %8 = vector.load %arg4[%c0_6, %c0_7] : memref<256x1200xf32, #tpu.memory_space<vmem>>, vector<256x1200xf32>
    tpu.vector_store %arg4[%c0_6, %c0_7], %7 {strides = array<i32>} : memref<256x1200xf32, #tpu.memory_space<vmem>>, vector<256x1200xf32>,
    return
  }
  func.func @transform_0(%arg0: i32) -> (i32, i32) {
    %c0_i32 = arith.constant 0 : i32
    %c0_i32_0 = arith.constant 0 : i32
    return %arg0, %c0_i32 : i32, i32
  }
  func.func @transform_1(%arg0: i32) -> (i32, i32) {
    %c0_i32 = arith.constant 0 : i32
    %c0_i32_0 = arith.constant 0 : i32
    %c0_i32_1 = arith.constant 0 : i32
    return %c0_i32, %c0_i32_0 : i32, i32
  }
  func.func @transform_2(%arg0: i32) -> (i32, i32) {
    %c0_i32 = arith.constant 0 : i32
    %c0_i32_0 = arith.constant 0 : i32
    %c0_i32_1 = arith.constant 0 : i32
    return %c0_i32, %c0_i32_0 : i32, i32
  }
  func.func @transform_3(%arg0: i32) -> (i32, i32) {
    %c0_i32 = arith.constant 0 : i32
    %c0_i32_0 = arith.constant 0 : i32
    return %arg0, %c0_i32 : i32, i32
  }
}

</mosaic_0001>

<bundles_post_ra>
// kernel: feature_encoder_relu_forward.2
= control target key start
LH: loop header
LB: loop body
LE: loop exit
PB: predicated region body
PF: predicated region fallthrough
CT: control target
= control target key end

     0   :  { %s2304_s0 = inlined_call_operand.hbm [shape: f32[270,256], index: 0, kind: input, shape index: {}]   ;;  %s2305_s1 = inlined_call_operand.hbm [shape: f32[256,128], index: 1, kind: input, shape index: {}]   ;;  %s2306_s2 = inlined_call_operand.hbm [shape: f32[1,128], index: 2, kind: input, shape index: {}]   ;;  %s2307_s3 = inlined_call_operand.hbm [shape: f32[128,128], index: 3, kind: input, shape index: {}]   ;;  %s2308_s4 = inlined_call_operand.hbm [shape: f32[1,128], index: 4, kind: input, shape index: {}]   ;;  %s2309_s5 = inlined_call_operand.vmem [shape: f32[270,128], index: 5, kind: output, shape index: {}]  }
   0x1   :  { %2311 = sst [smem:[#allocation14_spill]] %s2305_s1 }
   0x2   :  { %10 = vsyncpa [#allocation3], 0 }
   0x3   :  { %12 = vsyncpa [#allocation3 + $0x1], 0 }
   0x4   :  { %13 = vsyncpa [#allocation5], 0 }
   0x5   :  { %14 = vsyncpa [#allocation8], 0  ;;  %s1779_s18 = smov 0   ;;  %s1781_s19 = smov 0  }
   0x6   :  { %s1783_s20 = smov 0   ;;  %s1785_s21 = smov 0  }
   0x7 LB: > { %s1798_s22 = sadd.s32 4294967295, %s1706_s21   ;;  %s1801_s23 = sadd.s32 1, %s1706_s21   ;;  %s1706_s21 = sphi %s1785_s21, %s2331_s21   ;;  %s1702_s20 = sphi %s1783_s20, %s2330_s20   ;;  %s1698_s19 = sphi %s1781_s19, %s2329_s19   ;;  %s1694_s18 = sphi %s1779_s18, %s2328_s18  }
   0x8   : > { %s24_s24 = ssub.s32 %s1706_s21, %s1801_s23  ;;  %s27_s25 = sadd.s32 1, %s1702_s20 }
   0x9   : > { %p25_p0 = scmp.eq.s32.totalorder %s24_s24, 0  ;;  %p34_p1 = scmp.ne.s32.totalorder %s1702_s20, %s1698_s19 }
   0xa   : > { %p35_p2 = scmp.eq.s32.totalorder %s1706_s21, 0  ;;  %p40_p3 = scmp.ne.s32.totalorder %s1698_s19, %s1694_s18 }
   0xb   : > { %s1811_s26 = scalar_select %p25_p0, %s1702_s20, %s27_s25  }
   0xc   : > { %p1813_p4 = por %p35_p2, %p34_p1  ;;  %p2310_p5 = scmp.eq.s32.totalorder %s1798_s22, 0 }
   0xd   : > { %p148_p6 = scmp.eq.s32.totalorder %s1798_s22, 1  ;;  %p1236_p7 = scmp.ge.s32.totalorder %s1706_s21, 1 }
   0xe   : > { %p1822_p8 = por %p2310_p5, %p40_p3  ;;  %p161_p9 = scmp.lt.s32.totalorder %s1706_s21, 3 }
   0xf   : > { %p1827_p10 = por %p148_p6, %p34_p1  ;;  %s2316_s1 = sld [smem:[#allocation14_spill]] }
  0x10   : > { %p1831_p11 = pnand %p1236_p7, %p161_p9  ;;  %s1740_s9 = smov [#allocation4]  }
  0x11   : > { %s174_s10 = sshll.u32 %s1740_s9, 4  ;;  %s198_s14 = sshll.u32 %s2307_s3, 4  ;;  %s175_s10 = int_to_ptr.vmem [resolvable:$true] %s174_s10  ;;  %s199_s14 = int_to_ptr.hbm [resolvable:$true] %s198_s14 }
  0x12   : > { %p1346_p12 = pneg %p1831_p11  ;;  %s1741_s15 = smov 128  }
  0x13   : > { %s1742_s16 = smov 8   ;;  %s1743_s17 = smov [#allocation7]  }
  0x14   : > { %p1842_p13 = pnand %p1346_p12, %p2310_p5  ;;  %s200_s18 = sshll.u32 %s1743_s17, 4  ;;  %s201_s18 = int_to_ptr.vmem [resolvable:$true] %s200_s18 }
  0x15   : > { %s172_s8 = sshll.u32 %s2316_s1, 4  ;;  %s187_s6 = sshll.u32 %s2306_s2, 4  ;;  %s173_s8 = int_to_ptr.hbm [resolvable:$true] %s172_s8  ;;  %s188_s6 = int_to_ptr.hbm [resolvable:$true] %s187_s6 }
  0x16   : > { %1349 = dma.hbm_to_vmem [thread:$0]  (!%p1842_p13), %s173_s8, 4096, %s175_s10, [#allocation5], %s1741_s15, %s1741_s15, %s1742_s16  }
  0x17   : > { %1355 = dma.hbm_to_vmem [thread:$0]  (!%p1842_p13), %s199_s14, 2048, %s201_s18, [#allocation8], %s1741_s15, %s1741_s15, %s1742_s16  }
  0x18   : > { %s213_s12 = sshll.u32 %s2308_s4, 4  ;;  %s1744_s13 = smov [#allocation6]   ;;  %s214_s12 = int_to_ptr.hbm [resolvable:$true] %s213_s12 }
  0x19   : > { %s189_s1 = sshll.u32 %s1744_s13, 4  ;;  %s1745_s8 = smov [#allocation9]   ;;  %s190_s1 = int_to_ptr.vmem [resolvable:$true] %s189_s1 }
  0x1a   : > { %1352 = dma.hbm_to_vmem [thread:$0]  (!%p1842_p13), %s188_s6, 16, %s190_s1, [#allocation5]  }
  0x1b   : > { %s215_s10 = sshll.u32 %s1745_s8, 4  ;;  %p1241_p0 = scmp.ge.s32.totalorder %s1706_s21, 2  ;;  %s216_s10 = int_to_ptr.vmem [resolvable:$true] %s215_s10 }
  0x1c   : > { %1358 = dma.hbm_to_vmem [thread:$0]  (!%p1842_p13), %s214_s12, 16, %s216_s10, [#allocation8]  }
  0x1d   : > { %222 = sbr.rel (%p1241_p0) target bundleno = 70 (0x46), region = 32 }
  0x22   : > { %225 = sbr.rel (!%p1813_p4) target bundleno = 70 (0x46), region = 36  ;;  %s226_s14 = sand.u32 (%p1813_p4), 1, %s1702_s20  }
  0x23   : > { %s1243_s15 = sshll.u32 (%p1813_p4), %s1706_s21, 5  ;;  %s1242_s16 = sshll.u32 (%p1813_p4), %s226_s14, 9 }
  0x24   : > { %s232_s17 = ssub.s32 (%p1813_p4), 34, %s1243_s15  ;;  %s1871_s24 = scalar_lea.sflag (%p1813_p4), [#allocation3], %s226_s14 }
  0x25   : > { %p233_p1 = scmp.lt.s32.totalorder (%p1813_p4), %s232_s17, 32  ;;  %s230_s25 = scalar_lea.vmem (%p1813_p4), [#allocation2], %s1242_s16 }
  0x27   : > { %s2333_s17 = smov (!%p233_p1, %s232_s17), 32 }
  0x28   : > { %s1275_s1 = sshll.u32 %s2333_s17, 4 }
  0x29   : > { %s237_s18 = ssub.s32 512, %s1275_s1 }
  0x2a   : > { %s238_s11 = sshll.u32 %s237_s18, 4 }
  0x2b   : > { %239 = vsyncadd %s1871_s24, %s238_s11  ;;  %p1874_p2 = scmp.ne.s32.totalorder %s1275_s1, 0  ;;  %s1277_s6 = sshll.u32 %s1706_s21, 9 }
  0x2c   : > { %s243_s12 = scalar_lea.hbm %s2304_s0, %s1277_s6  ;;  %s1882_s13 = sshll.u32 %s230_s25, 4  ;;  %s248_s13 = int_to_ptr.vmem [resolvable:$true] %s1882_s13 }
  0x2d   : > { %s245_s8 = sshll.u32 %s243_s12, 4  ;;  %s1250_s10 = sshll.u32 %s2333_s17, 8  ;;  %s1885_s8 = int_to_ptr.hbm [resolvable:$true] %s245_s8 }
  0x2e   : > { %s1593_s14 = sshra.s32 %s1885_s8, 4  ;;  %s1595_s15 = sshrl.u32 %s1250_s10, 4  ;;  %s1594_s14 = int_to_ptr.hbm [resolvable:$true] %s1593_s14 }
  0x2f   : > { %s1600_s16 = scalar_lea.hbm %s1594_s14, %s1595_s15  ;;  %s1604_s18 = scalar_lea.hbm %s2304_s0, 544 }
  0x30   : > { %p1601_p3 = scmp.ne.s32.totalorder %s1594_s14, %s1600_s16  ;;  %p1605_p7 = scmp.lt.s32.totalorder %s1594_s14, %s2304_s0 }
  0x31   : > { %p1606_p9 = scmp.lt.s32.totalorder %s1604_s18, %s1600_s16 }
  0x32   : > { %p1602_p4 = pnand %p1601_p3, %p1874_p2 }
  0x33   : > { %p1607_p12 = por %p1606_p9, %p1605_p7 }
  0x34   : > { %p1603_p6 = pneg %p1602_p4 }
  0x36   : > { %p1608_p13 = pnand %p1607_p12, %p1603_p6 }
  0x38   : > { %1611 = shalt.err (!%p1608_p13)
}
  0x39   : > { %s1612_s6 = sshra.s32 %s248_s13, 4  ;;  %s1746_s9 = smov [#allocation2]   ;;  %s1613_s6 = int_to_ptr.vmem [resolvable:$true] %s1612_s6 }
  0x3a   : > { %s1619_s7 = scalar_lea.vmem %s1613_s6, %s1595_s15  ;;  %s1623_s12 = scalar_lea.vmem %s1746_s9, 1024 }
  0x3b   : > { %p1620_p0 = scmp.ne.s32.totalorder %s1613_s6, %s1619_s7  ;;  %p1625_p4 = scmp.lt.s32.totalorder %s1623_s12, %s1619_s7 }
  0x3d   : > { %p1621_p1 = pnand %p1620_p0, %p1874_p2 }
  0x3f   : > { %p1622_p3 = pneg %p1621_p1 }
  0x41   : > { %p1627_p5 = pnand %p1625_p4, %p1622_p3 }
  0x43   : > { %1630 = shalt.err (!%p1627_p5)
}
  0x44   : > { %s1747_s14 = smov 256   ;;  %s1748_s16 = smov 16  }
  0x45   : > { %253 = dma.hbm_to_vmem [thread:$0]  (%p1874_p2), %s1885_s8, %s1250_s10, %s248_s13, %s1871_s24, %s1747_s14, %s1747_s14, %s1748_s16  }
  0x46 PF: > { %259 = sbr.rel (%p1831_p11) target bundleno = 629 (0x275), region = 40  ;;  %s1914_s15 = sand.u32 (!%p1831_p11), 1, %s1698_s19  }
  0x47   : > { %s1252_s21 = sshll.u32 (!%p1831_p11), %s1914_s15, 9  ;;  %s262_s1 = scalar_lea.sflag (!%p1831_p11), [#allocation3], %s1914_s15 }
  0x48   : > { %s1918_s18 = scalar_lea.vmem (!%p1831_p11), [#allocation2], %s1252_s21 }
  0x4b   : > { %1681 = dma.done.wait (%p1822_p8), %s262_s1, 8192  }
  0x4c   : > { %1683 = vsyncadd (%p1822_p8), %s262_s1, 4294959104  ;;  %p2319_p5 = scmp.eq.s32.totalorder %s1798_s22, 0 }
  0x4e   : > { %1685 = dma.done.wait (%p2319_p5), [#allocation5], 4112   ;;  %p2320_p11 = pmov %p2319_p5 }
  0x4f   : > { %p2321_p2 = pmov %p2319_p5 }
  0x50   : > { %1687 = vsyncadd (%p2320_p11), [#allocation5], 4294963184 }
  0x51   : > { %1689 = dma.done.wait (%p2321_p2), [#allocation8], 2064   ;;  %p2322_p6 = pmov %p2321_p2 }
  0x52   : > { %v402_v0 = vld [vmem:[#allocation4 + $0x78] sm:$0xff]  ;;  %v401_v1 = vld [vmem:[#allocation4 + $0x70] sm:$0xff]  ;;  %v400_v4 = vld [vmem:[#allocation4 + $0x68] sm:$0xff]  ;;  %s1257_s28 = sshll.u32 %s1914_s15, 8  ;;  %s1259_s17 = sshll.u32 (%p1827_p10), %s1798_s22, 5 }
  0x53   : > { %1691 = vsyncadd (%p2322_p6), [#allocation8], 4294965232  ;;  %v1932_v2 = vld [vmem:[#allocation4 + $0xf8] sm:$0xff]  ;;  %423 = vmatpush.msra.mxu0 %v402_v0  ;;  %1281 = vmatpush.msra.mxu3 %v402_v0  ;;  %v1934_v3 = vld [vmem:[#allocation4 + $0xf0] sm:$0xff]  ;;  %s2088_s30 = scalar_lea.vmem [#allocation10], %s1257_s28   ;;  %s1278_s24 = sshll.u32 (%p1827_p10), %s1798_s22, 8 }
  0x54   : > { %536 = vmatpush.msra.mxu1 %v1932_v2  ;;  %v1937_v5 = vld [vmem:[#allocation4 + $0xe8] sm:$0xff]  ;;  %v399_v6 = vld [vmem:[#allocation4 + $0x60] sm:$0xff]  ;;  %v398_v8 = vld [vmem:[#allocation4 + $0x58] sm:$0xff]  ;;  %s854_s27 = ssub.s32 (%p1827_p10), 34, %s1259_s17  ;;  %s2166_s10 = scalar_lea.vmem (%p1827_p10), %s2309_s5, %s1278_s24  }
  0x55   : > { %424 = vmatpush.msra.mxu0 %v401_v1  ;;  %1282 = vmatpush.msra.mxu3 %v401_v1  ;;  %v1940_v7 = vld [vmem:[#allocation4 + $0xe0] sm:$0xff]  ;;  %v1943_v9 = vld [vmem:[#allocation4 + $0xd8] sm:$0xff]  ;;  %v397_v10 = vld [vmem:[#allocation4 + $0x50] sm:$0xff]  ;;  %p855_p8 = scmp.lt.s32.totalorder (%p1827_p10), %s854_s27, 32 }
  0x56   : > { %537 = vmatpush.msra.mxu1 %v1934_v3  ;;  %v1946_v11 = vld [vmem:[#allocation4 + $0xd0] sm:$0xff]  ;;  %v396_v12 = vld [vmem:[#allocation4 + $0x48] sm:$0xff]  ;;  %v395_v14 = vld [vmem:[#allocation4 + $0x40] sm:$0xff] }
  0x57   : > { %425 = vmatpush.msra.mxu0 %v400_v4  ;;  %1283 = vmatpush.msra.mxu3 %v400_v4  ;;  %v1949_v13 = vld [vmem:[#allocation4 + $0xc8] sm:$0xff]  ;;  %v1952_v15 = vld [vmem:[#allocation4 + $0xc0] sm:$0xff]  ;;  %v394_v16 = vld [vmem:[#allocation4 + $0x38] sm:$0xff] }
  0x58   : > { %538 = vmatpush.msra.mxu1 %v1937_v5  ;;  %v1955_v17 = vld [vmem:[#allocation4 + $0xb8] sm:$0xff]  ;;  %v393_v18 = vld [vmem:[#allocation4 + $0x30] sm:$0xff]  ;;  %v392_v20 = vld [vmem:[#allocation4 + $0x28] sm:$0xff] }
  0x59   : > { %426 = vmatpush.msra.mxu0 %v399_v6  ;;  %1284 = vmatpush.msra.mxu3 %v399_v6  ;;  %v409_v19 = vld [vmem:[#allocation4 + $0xb0] sm:$0xff]  ;;  %v408_v21 = vld [vmem:[#allocation4 + $0xa8] sm:$0xff]  ;;  %v391_v22 = vld [vmem:[#allocation4 + $0x20] sm:$0xff] }
  0x5a   : > { %539 = vmatpush.msra.mxu1 %v1940_v7  ;;  %v407_v23 = vld [vmem:[#allocation4 + $0xa0] sm:$0xff]  ;;  %v390_v24 = vld [vmem:[#allocation4 + $0x18] sm:$0xff]  ;;  %v389_v26 = vld [vmem:[#allocation4 + $0x10] sm:$0xff] }
  0x5b   : > { %427 = vmatpush.msra.mxu0 %v398_v8  ;;  %1285 = vmatpush.msra.mxu3 %v398_v8  ;;  %v406_v25 = vld [vmem:[#allocation4 + $0x98] sm:$0xff]  ;;  %v405_v27 = vld [vmem:[#allocation4 + $0x90] sm:$0xff]  ;;  %v388_v28 = vld [vmem:[#allocation4 + $0x8] sm:$0xff] }
  0x5c   : > { %540 = vmatpush.msra.mxu1 %v1943_v9  ;;  %v404_v29 = vld [vmem:[#allocation4 + $0x88] sm:$0xff]  ;;  %v387_v30 = vld [vmem:[#allocation4] sm:$0xff]  ;;  %v325_v35 = vld [vmem:[%s1918_s18 + $0x10] sm:$0xff] }
  0x5d   : > { %428 = vmatpush.msra.mxu0 %v397_v10  ;;  %1286 = vmatpush.msra.mxu3 %v397_v10  ;;  %v323_v31 = vld [vmem:[%s1918_s18] sm:$0xff]  ;;  %v324_v34 = vld [vmem:[%s1918_s18 + $0x8] sm:$0xff]  ;;  %v373_v36 = vld [vmem:[%s1918_s18 + $0x190] sm:$0xff] }
  0x5e   : > { %541 = vmatpush.msra.mxu1 %v1946_v11  ;;  %v371_v32 = vld [vmem:[%s1918_s18 + $0x180] sm:$0xff]  ;;  %v326_v37 = vld [vmem:[%s1918_s18 + $0x18] sm:$0xff]  ;;  %v328_v40 = vld [vmem:[%s1918_s18 + $0x28] sm:$0xff] }
  0x5f   : > { %429 = vmatpush.msra.mxu0 %v396_v12  ;;  %1287 = vmatpush.msra.mxu3 %v396_v12  ;;  %v403_v33 = vld [vmem:[#allocation4 + $0x80] sm:$0xff]  ;;  %v329_v41 = vld [vmem:[%s1918_s18 + $0x30] sm:$0xff]  ;;  %v330_v43 = vld [vmem:[%s1918_s18 + $0x38] sm:$0xff] }
  0x60   : > { %542 = vmatpush.msra.mxu1 %v1949_v13  ;;  %v327_v38 = vld [vmem:[%s1918_s18 + $0x20] sm:$0xff]  ;;  %v377_v42 = vld [vmem:[%s1918_s18 + $0x1b0] sm:$0xff]  ;;  %v332_v46 = vld [vmem:[%s1918_s18 + $0x48] sm:$0xff] }
  0x61   : > { %430 = vmatpush.msra.mxu0 %v395_v14  ;;  %1288 = vmatpush.msra.mxu3 %v395_v14  ;;  %v375_v39 = vld [vmem:[%s1918_s18 + $0x1a0] sm:$0xff]  ;;  %v333_v47 = vld [vmem:[%s1918_s18 + $0x50] sm:$0xff]  ;;  %v334_v49 = vld [vmem:[%s1918_s18 + $0x58] sm:$0xff] }
  0x62   : > { %543 = vmatpush.msra.mxu1 %v1952_v15  ;;  %v331_v44 = vld [vmem:[%s1918_s18 + $0x40] sm:$0xff]  ;;  %v381_v48 = vld [vmem:[%s1918_s18 + $0x1d0] sm:$0xff]  ;;  %v336_v52 = vld [vmem:[%s1918_s18 + $0x68] sm:$0xff] }
  0x63   : > { %431 = vmatpush.msra.mxu0 %v394_v16  ;;  %1289 = vmatpush.msra.mxu3 %v394_v16  ;;  %v379_v45 = vld [vmem:[%s1918_s18 + $0x1c0] sm:$0xff]  ;;  %v337_v53 = vld [vmem:[%s1918_s18 + $0x70] sm:$0xff]  ;;  %v338_v55 = vld [vmem:[%s1918_s18 + $0x78] sm:$0xff] }
  0x64   : > { %544 = vmatpush.msra.mxu1 %v1955_v17  ;;  %v335_v50 = vld [vmem:[%s1918_s18 + $0x60] sm:$0xff]  ;;  %v385_v54 = vld [vmem:[%s1918_s18 + $0x1f0] sm:$0xff]  ;;  %v372_v57 = vld [vmem:[%s1918_s18 + $0x188] sm:$0xff] }
  0x65   : > { %432 = vmatpush.msra.mxu0 %v393_v18  ;;  %1290 = vmatpush.msra.mxu3 %v393_v18  ;;  %v383_v51 = vld [vmem:[%s1918_s18 + $0x1e0] sm:$0xff]  ;;  %v340_v58 = vld [vmem:[%s1918_s18 + $0x88] sm:$0xff]  ;;  %v695_v60 = vld [vmem:[#allocation7 + $0x70] sm:$0xff] }
  0x66   : > { %545 = vmatpush.msra.mxu1 %v409_v19  ;;  %v339_v56 = vld [vmem:[%s1918_s18 + $0x80] sm:$0xff]  ;;  %v341_v61 = vld [vmem:[%s1918_s18 + $0x90] sm:$0xff]  ;;  %v374_v62 = vld [vmem:[%s1918_s18 + $0x198] sm:$0xff] }
  0x67   : > { %433 = vmatpush.msra.mxu0 %v392_v20  ;;  %1291 = vmatpush.msra.mxu3 %v392_v20  ;;  %v696_v59 = vld [vmem:[#allocation7 + $0x78] sm:$0xff]  ;;  %v694_v0 = vld [vmem:[#allocation7 + $0x68] sm:$0xff]  ;;  %v693_v1 = vld [vmem:[#allocation7 + $0x60] sm:$0xff] }
  0x68   : > { %546 = vmatpush.msra.mxu1 %v408_v21  ;;  %701 = vmatpush.msra.mxu2 %v696_v59  ;;  %v342_v63 = vld [vmem:[%s1918_s18 + $0x98] sm:$0xff]  ;;  %v343_v4 = vld [vmem:[%s1918_s18 + $0xa0] sm:$0xff]  ;;  %v344_v6 = vld [vmem:[%s1918_s18 + $0xa8] sm:$0xff] }
  0x69   : > { %434 = vmatpush.msra.mxu0 %v391_v22  ;;  %1292 = vmatpush.msra.mxu3 %v391_v22  ;;  %v689_v8 = vld [vmem:[#allocation7 + $0x40] sm:$0xff]  ;;  %v687_v10 = vld [vmem:[#allocation7 + $0x30] sm:$0xff]  ;;  %v686_v14 = vld [vmem:[#allocation7 + $0x28] sm:$0xff] }
  0x6a   : > { %547 = vmatpush.msra.mxu1 %v407_v23  ;;  %702 = vmatpush.msra.mxu2 %v695_v60  ;;  %v378_v12 = vld [vmem:[%s1918_s18 + $0x1b8] sm:$0xff]  ;;  %v380_v18 = vld [vmem:[%s1918_s18 + $0x1c8] sm:$0xff] }
  0x6b   : > { %435 = vmatpush.msra.mxu0 %v390_v24  ;;  %1293 = vmatpush.msra.mxu3 %v390_v24  ;;  %v684_v16 = vld [vmem:[#allocation7 + $0x18] sm:$0xff]  ;;  %v348_v20 = vld [vmem:[%s1918_s18 + $0xc8] sm:$0xff] }
  0x6c   : > { %548 = vmatpush.msra.mxu1 %v406_v25  ;;  %703 = vmatpush.msra.mxu2 %v694_v0  ;;  %v681_v22 = vld [vmem:[#allocation7] sm:$0xff]  ;;  %v382_v24 = vld [vmem:[%s1918_s18 + $0x1d8] sm:$0xff] }
  0x6d   : > { %436 = vmatpush.msra.mxu0 %v389_v26  ;;  %1294 = vmatpush.msra.mxu3 %v389_v26  ;;  %v351_v26 = vld [vmem:[%s1918_s18 + $0xe0] sm:$0xff] }
  0x6e   : > { %549 = vmatpush.msra.mxu1 %v405_v27  ;;  %704 = vmatpush.msra.mxu2 %v693_v1 }
  0x6f   : > { %437 = vmatpush.msra.mxu0 %v388_v28  ;;  %1295 = vmatpush.msra.mxu3 %v388_v28  ;;  %v352_v28 = vld [vmem:[%s1918_s18 + $0xe8] sm:$0xff] }
  0x70   : > { %550 = vmatpush.msra.mxu1 %v404_v29 }
  0x71   : > { %438 = vmatpush.msra.mxu0 %v387_v30  ;;  %1296 = vmatpush.msra.mxu3 %v387_v30  ;;  %v386_v30 = vld [vmem:[%s1918_s18 + $0x1f8] sm:$0xff] }
  0x72   : > { %439 = vmatmul.f32.vlgmr.msra.gmra.mxu0 %v323_v31  ;;  %511 = vmatmul.f32.vlgmr.msra.gmra.mxu3 %v371_v32  ;;  %v354_v31 = vld [vmem:[%s1918_s18 + $0xf8] sm:$0xff]  ;;  %v2016_v32 = vld [vmem:[#allocation6] ss:$0 sm:$0xff] }
  0x73   : > { %551 = vmatpush.msra.mxu1 %v403_v33  ;;  %1297 = vmatpush.msrb.mxu3 %v1932_v2  ;;  %v692_v2 = vld [vmem:[#allocation7 + $0x58] sm:$0xff] }
  0x74   : > { %552 = vmatmul.f32.vlgmr.msra.gmra.mxu1 %v324_v34  ;;  %705 = vmatpush.msra.mxu2 %v692_v2  ;;  %v355_v34 = vld [vmem:[%s1918_s18 + $0x100] sm:$0xff] }
  0x75   : > { %1298 = vmatpush.msrb.mxu3 %v1934_v3  ;;  %v691_v3 = vld [vmem:[#allocation7 + $0x50] sm:$0xff] }
  0x76   : > { %706 = vmatpush.msra.mxu2 %v691_v3 }
  0x77   : > { %1299 = vmatpush.msrb.mxu3 %v1937_v5  ;;  %v376_v5 = vld [vmem:[%s1918_s18 + $0x1a8] sm:$0xff] }
  0x79   : > { %1300 = vmatpush.msrb.mxu3 %v1940_v7  ;;  %v690_v7 = vld [vmem:[#allocation7 + $0x48] sm:$0xff] }
  0x7a   : > { %442 = vmatmul.f32.gmra.mxu0 %v325_v35  ;;  %514 = vmatmul.f32.gmra.mxu3 %v373_v36 }
  0x7b   : > { %1301 = vmatpush.msrb.mxu3 %v1943_v9  ;;  %707 = vmatpush.msra.mxu2 %v690_v7  ;;  %v688_v9 = vld [vmem:[#allocation7 + $0x38] sm:$0xff] }
  0x7c   : > { %555 = vmatmul.f32.gmra.mxu1 %v326_v37  ;;  %v356_v37 = vld [vmem:[%s1918_s18 + $0x108] sm:$0xff] }
  0x7d   : > { %1302 = vmatpush.msrb.mxu3 %v1946_v11  ;;  %708 = vmatpush.msra.mxu2 %v689_v8  ;;  %v345_v11 = vld [vmem:[%s1918_s18 + $0xb0] sm:$0xff] }
  0x7f   : > { %1303 = vmatpush.msrb.mxu3 %v1949_v13  ;;  %709 = vmatpush.msra.mxu2 %v688_v9  ;;  %v346_v13 = vld [vmem:[%s1918_s18 + $0xb8] sm:$0xff] }
  0x81   : > { %1304 = vmatpush.msrb.mxu3 %v1952_v15  ;;  %710 = vmatpush.msra.mxu2 %v687_v10  ;;  %v685_v15 = vld [vmem:[#allocation7 + $0x20] sm:$0xff] }
  0x82   : > { %445 = vmatmul.f32.gmra.mxu0 %v327_v38  ;;  %517 = vmatmul.f32.gmra.mxu3 %v375_v39 }
  0x83   : > { %1305 = vmatpush.msrb.mxu3 %v1955_v17  ;;  %711 = vmatpush.msra.mxu2 %v686_v14  ;;  %v347_v17 = vld [vmem:[%s1918_s18 + $0xc0] sm:$0xff] }
  0x84   : > { %558 = vmatmul.f32.gmra.mxu1 %v328_v40 }
  0x85   : > { %1306 = vmatpush.msrb.mxu3 %v409_v19  ;;  %712 = vmatpush.msra.mxu2 %v685_v15  ;;  %v683_v19 = vld [vmem:[#allocation7 + $0x10] sm:$0xff] }
  0x87   : > { %1307 = vmatpush.msrb.mxu3 %v408_v21  ;;  %713 = vmatpush.msra.mxu2 %v684_v16  ;;  %v682_v21 = vld [vmem:[#allocation7 + $0x8] sm:$0xff] }
  0x89   : > { %1308 = vmatpush.msrb.mxu3 %v407_v23  ;;  %714 = vmatpush.msra.mxu2 %v683_v19  ;;  %v349_v23 = vld [vmem:[%s1918_s18 + $0xd0] sm:$0xff] }
  0x8a   : > { %448 = vmatmul.f32.gmra.mxu0 %v329_v41  ;;  %520 = vmatmul.f32.gmra.mxu3 %v377_v42  ;;  %v357_v42 = vld [vmem:[%s1918_s18 + $0x110] sm:$0xff] }
  0x8b   : > { %1309 = vmatpush.msrb.mxu3 %v406_v25  ;;  %715 = vmatpush.msra.mxu2 %v682_v21  ;;  %v350_v25 = vld [vmem:[%s1918_s18 + $0xd8] sm:$0xff] }
  0x8c   : > { %561 = vmatmul.f32.gmra.mxu1 %v330_v43 }
  0x8d   : > { %1310 = vmatpush.msrb.mxu3 %v405_v27  ;;  %716 = vmatpush.msra.mxu2 %v681_v22  ;;  %v384_v27 = vld [vmem:[%s1918_s18 + $0x1e8] sm:$0xff] }
  0x8f   : > { %1311 = vmatpush.msrb.mxu3 %v404_v29  ;;  %v353_v29 = vld [vmem:[%s1918_s18 + $0xf0] sm:$0xff] }
  0x91   : > { %1312 = vmatpush.msrb.mxu3 %v403_v33 }
  0x92   : > { %451 = vmatmul.f32.gmra.mxu0 %v331_v44  ;;  %523 = vmatmul.f32.gmra.mxu3 %v379_v45  ;;  %v358_v45 = vld [vmem:[%s1918_s18 + $0x118] sm:$0xff] }
  0x93   : > { %1313 = vmatpush.msra.mxu3 %v696_v59 }
  0x94   : > { %564 = vmatmul.f32.gmra.mxu1 %v332_v46 }
  0x95   : > { %1314 = vmatpush.msra.mxu3 %v695_v60 }
  0x97   : > { %1315 = vmatpush.msra.mxu3 %v694_v0 }
  0x99   : > { %1316 = vmatpush.msra.mxu3 %v693_v1 }
  0x9a   : > { %454 = vmatmul.f32.gmra.mxu0 %v333_v47  ;;  %526 = vmatmul.f32.gmra.mxu3 %v381_v48 }
  0x9b   : > { %1317 = vmatpush.msra.mxu3 %v692_v2  ;;  %v363_v2 = vld [vmem:[%s1918_s18 + $0x140] sm:$0xff] }
  0x9c   : > { %567 = vmatmul.f32.gmra.mxu1 %v334_v49 }
  0x9d   : > { %1318 = vmatpush.msra.mxu3 %v691_v3 }
  0x9f   : > { %1319 = vmatpush.msra.mxu3 %v690_v7 }
  0xa1   : > { %1320 = vmatpush.msra.mxu3 %v689_v8 }
  0xa2   : > { %457 = vmatmul.f32.gmra.mxu0 %v335_v50  ;;  %529 = vmatmul.f32.gmra.mxu3 %v383_v51  ;;  %v359_v50 = vld [vmem:[%s1918_s18 + $0x120] sm:$0xff] }
  0xa3   : > { %1321 = vmatpush.msra.mxu3 %v688_v9 }
  0xa4   : > { %570 = vmatmul.f32.gmra.mxu1 %v336_v52 }
  0xa5   : > { %1322 = vmatpush.msra.mxu3 %v687_v10  ;;  %v365_v10 = vld [vmem:[%s1918_s18 + $0x150] sm:$0xff] }
  0xa7   : > { %1323 = vmatpush.msra.mxu3 %v686_v14 }
  0xa9   : > { %1324 = vmatpush.msra.mxu3 %v685_v15 }
  0xaa   : > { %460 = vmatmul.f32.gmra.mxu0 %v337_v53  ;;  %532 = vmatmul.f32.gmra.mxu3 %v385_v54  ;;  %v360_v53 = vld [vmem:[%s1918_s18 + $0x128] sm:$0xff] }
  0xab   : > { %1325 = vmatpush.msra.mxu3 %v684_v16 }
  0xac   : > { %573 = vmatmul.f32.gmra.mxu1 %v338_v55 }
  0xad   : > { %1326 = vmatpush.msra.mxu3 %v683_v19 }
  0xaf   : > { %1327 = vmatpush.msra.mxu3 %v682_v21  ;;  %v368_v21 = vld [vmem:[%s1918_s18 + $0x168] sm:$0xff] }
  0xb1   : > { %1328 = vmatpush.msra.mxu3 %v681_v22 }
  0xb2   : > { %463 = vmatmul.f32.gmra.mxu0 %v339_v56  ;;  %624 = vmatmul.f32.vlgmr.msrb.gmra.mxu3 %v372_v57 }
  0xb4   : > { %576 = vmatmul.f32.gmra.mxu1 %v340_v58  ;;  %v361_v58 = vld [vmem:[%s1918_s18 + $0x130] sm:$0xff] }
  0xba   : > { %466 = vmatmul.f32.gmra.mxu0 %v341_v61  ;;  %627 = vmatmul.f32.gmra.mxu3 %v374_v62  ;;  %v362_v61 = vld [vmem:[%s1918_s18 + $0x138] sm:$0xff] }
  0xbc   : > { %579 = vmatmul.f32.gmra.mxu1 %v342_v63 }
  0xc2   : > { %469 = vmatmul.f32.gmra.mxu0 %v343_v4  ;;  %630 = vmatmul.f32.gmra.mxu3 %v376_v5  ;;  %v364_v5 = vld [vmem:[%s1918_s18 + $0x148] sm:$0xff] }
  0xc4   : > { %582 = vmatmul.f32.gmra.mxu1 %v344_v6 }
  0xca   : > { %472 = vmatmul.f32.gmra.mxu0 %v345_v11  ;;  %633 = vmatmul.f32.gmra.mxu3 %v378_v12 }
  0xcc   : > { %585 = vmatmul.f32.gmra.mxu1 %v346_v13  ;;  %v366_v13 = vld [vmem:[%s1918_s18 + $0x158] sm:$0xff] }
  0xd2   : > { %475 = vmatmul.f32.gmra.mxu0 %v347_v17  ;;  %636 = vmatmul.f32.gmra.mxu3 %v380_v18  ;;  %v367_v18 = vld [vmem:[%s1918_s18 + $0x160] sm:$0xff] }
  0xd4   : > { %588 = vmatmul.f32.gmra.mxu1 %v348_v20 }
  0xda   : > { %478 = vmatmul.f32.gmra.mxu0 %v349_v23  ;;  %639 = vmatmul.f32.gmra.mxu3 %v382_v24 }
  0xdc   : > { %591 = vmatmul.f32.gmra.mxu1 %v350_v25 }
  0xe2   : > { %481 = vmatmul.f32.gmra.mxu0 %v351_v26  ;;  %642 = vmatmul.f32.gmra.mxu3 %v384_v27  ;;  %v369_v26 = vld [vmem:[%s1918_s18 + $0x170] sm:$0xff] }
  0xe4   : > { %594 = vmatmul.f32.gmra.mxu1 %v352_v28 }
  0xea   : > { %484 = vmatmul.f32.gmra.mxu0 %v353_v29  ;;  %645 = vmatmul.f32.gmra.mxu3 %v386_v30  ;;  %v370_v29 = vld [vmem:[%s1918_s18 + $0x178] sm:$0xff] }
  0xec   : > { %597 = vmatmul.f32.gmra.mxu1 %v354_v31 }
  0xef   : > { %v440_v33 = vpop.f32.mrf.mxu0 }
  0xf0   : > { %v441_v35 = vadd.f32 %v2016_v32, %v440_v33 }
  0xf1   : > { %v553_v36 = vpop.f32.mrf.mxu1 }
  0xf2   : > { %v554_v38 = vadd.f32 %v553_v36, %v441_v35  ;;  %487 = vmatmul.f32.gmra.mxu0 %v355_v34 }
  0xf4   : > { %v649_v39 = vmax.f32 %v554_v38, 0.0  ;;  %600 = vmatmul.f32.gmra.mxu1 %v356_v37 }
  0xf5   : > { %v2021_v40 = vpop.f32.mrf.mxu3 }
  0xf6   : > { %717 = vmatmul.f32.vlgmr.msra.gmra.mxu2 %v649_v39  ;;  %v513_v38 = vadd.f32 %v2016_v32, %v2021_v40 }
  0xf7   : > { %v443_v41 = vpop.f32.mrf.mxu0 }
  0xf8   : > { %v444_v43 = vadd.f32 %v2016_v32, %v443_v41 }
  0xf9   : > { %v556_v44 = vpop.f32.mrf.mxu1 }
  0xfa   : > { %v557_v46 = vadd.f32 %v556_v44, %v444_v43  ;;  %490 = vmatmul.f32.gmra.mxu0 %v357_v42 }
  0xfc   : > { %v650_v47 = vmax.f32 %v557_v46, 0.0  ;;  %603 = vmatmul.f32.gmra.mxu1 %v358_v45 }
  0xfd   : > { %v2026_v48 = vpop.f32.mrf.mxu3 }
  0xfe   : > { %720 = vmatmul.f32.gmra.mxu2 %v650_v47 }
  0xff   : > { %v446_v49 = vpop.f32.mrf.mxu0 }
 0x100   : > { %v447_v51 = vadd.f32 %v2016_v32, %v446_v49  ;;  %v516_v49 = vadd.f32 %v2016_v32, %v2026_v48 }
 0x101   : > { %v559_v52 = vpop.f32.mrf.mxu1 }
 0x102   : > { %v560_v54 = vadd.f32 %v559_v52, %v447_v51  ;;  %493 = vmatmul.f32.gmra.mxu0 %v359_v50 }
 0x104   : > { %v651_v55 = vmax.f32 %v560_v54, 0.0  ;;  %606 = vmatmul.f32.gmra.mxu1 %v360_v53 }
 0x105   : > { %v2031_v56 = vpop.f32.mrf.mxu3 }
 0x106   : > { %723 = vmatmul.f32.gmra.mxu2 %v651_v55 }
 0x107   : > { %v449_v57 = vpop.f32.mrf.mxu0 }
 0x108   : > { %v450_v59 = vadd.f32 %v2016_v32, %v449_v57 }
 0x109   : > { %v562_v60 = vpop.f32.mrf.mxu1 }
 0x10a   : > { %v563_v62 = vadd.f32 %v562_v60, %v450_v59  ;;  %496 = vmatmul.f32.gmra.mxu0 %v361_v58  ;;  %v519_v58 = vadd.f32 %v2016_v32, %v2031_v56 }
 0x10c   : > { %v652_v63 = vmax.f32 %v563_v62, 0.0  ;;  %609 = vmatmul.f32.gmra.mxu1 %v362_v61 }
 0x10d   : > { %v2036_v0 = vpop.f32.mrf.mxu3 }
 0x10e   : > { %726 = vmatmul.f32.gmra.mxu2 %v652_v63 }
 0x10f   : > { %v452_v1 = vpop.f32.mrf.mxu0 }
 0x110   : > { %v453_v3 = vadd.f32 %v2016_v32, %v452_v1 }
 0x111   : > { %v565_v4 = vpop.f32.mrf.mxu1 }
 0x112   : > { %v566_v6 = vadd.f32 %v565_v4, %v453_v3  ;;  %499 = vmatmul.f32.gmra.mxu0 %v363_v2  ;;  %v522_v3 = vadd.f32 %v2016_v32, %v2036_v0 }
 0x114   : > { %v653_v7 = vmax.f32 %v566_v6, 0.0  ;;  %612 = vmatmul.f32.gmra.mxu1 %v364_v5 }
 0x115   : > { %v2041_v8 = vpop.f32.mrf.mxu3 }
 0x116   : > { %729 = vmatmul.f32.gmra.mxu2 %v653_v7 }
 0x117   : > { %v455_v9 = vpop.f32.mrf.mxu0 }
 0x118   : > { %v456_v11 = vadd.f32 %v2016_v32, %v455_v9 }
 0x119   : > { %v568_v12 = vpop.f32.mrf.mxu1 }
 0x11a   : > { %v569_v14 = vadd.f32 %v568_v12, %v456_v11  ;;  %502 = vmatmul.f32.gmra.mxu0 %v365_v10  ;;  %v525_v12 = vadd.f32 %v2016_v32, %v2041_v8 }
 0x11c   : > { %v654_v15 = vmax.f32 %v569_v14, 0.0  ;;  %615 = vmatmul.f32.gmra.mxu1 %v366_v13 }
 0x11d   : > { %v2046_v16 = vpop.f32.mrf.mxu3 }
 0x11e   : > { %732 = vmatmul.f32.gmra.mxu2 %v654_v15 }
 0x11f   : > { %v458_v17 = vpop.f32.mrf.mxu0 }
 0x120   : > { %v459_v19 = vadd.f32 %v2016_v32, %v458_v17 }
 0x121   : > { %v571_v20 = vpop.f32.mrf.mxu1 }
 0x122   : > { %v572_v22 = vadd.f32 %v571_v20, %v459_v19  ;;  %505 = vmatmul.f32.gmra.mxu0 %v367_v18 }
 0x124   : > { %v655_v23 = vmax.f32 %v572_v22, 0.0  ;;  %618 = vmatmul.f32.gmra.mxu1 %v368_v21  ;;  %v528_v21 = vadd.f32 %v2016_v32, %v2046_v16 }
 0x125   : > { %v2051_v24 = vpop.f32.mrf.mxu3 }
 0x126   : > { %735 = vmatmul.f32.gmra.mxu2 %v655_v23 }
 0x127   : > { %v461_v25 = vpop.f32.mrf.mxu0 }
 0x128   : > { %v462_v27 = vadd.f32 %v2016_v32, %v461_v25 }
 0x129   : > { %v574_v28 = vpop.f32.mrf.mxu1 }
 0x12a   : > { %v575_v30 = vadd.f32 %v574_v28, %v462_v27  ;;  %508 = vmatmul.f32.gmra.mxu0 %v369_v26 }
 0x12c   : > { %v656_v31 = vmax.f32 %v575_v30, 0.0  ;;  %621 = vmatmul.f32.gmra.mxu1 %v370_v29  ;;  %v531_v30 = vadd.f32 %v2016_v32, %v2051_v24 }
 0x12d   : > { %v2056_v33 = vpop.f32.mrf.mxu3 }
 0x12e   : > { %738 = vmatmul.f32.gmra.mxu2 %v656_v31 }
 0x12f   : > { %v464_v34 = vpop.f32.mrf.mxu0 }
 0x130   : > { %v465_v35 = vadd.f32 %v2016_v32, %v464_v34 }
 0x131   : > { %v577_v36 = vpop.f32.mrf.mxu1 }
 0x132   : > { %v578_v37 = vadd.f32 %v577_v36, %v465_v35 }
 0x134   : > { %v657_v39 = vmax.f32 %v578_v37, 0.0 }
 0x135   : > { %v625_v41 = vpop.f32.mrf.mxu3 }
 0x136   : > { %v626_v42 = vadd.f32 %v625_v41, %v513_v38  ;;  %741 = vmatmul.f32.gmra.mxu2 %v657_v39  ;;  %v534_v41 = vadd.f32 %v2016_v32, %v2056_v33 }
 0x137   : > { %v467_v43 = vpop.f32.mrf.mxu0 }
 0x138   : > { %v673_v44 = vmax.f32 %v626_v42, 0.0  ;;  %v468_v45 = vadd.f32 %v2016_v32, %v467_v43 }
 0x139   : > { %v580_v46 = vpop.f32.mrf.mxu1 }
 0x13a   : > { %v581_v47 = vadd.f32 %v580_v46, %v468_v45  ;;  %789 = vmatmul.f32.vlgmr.msra.gmra.mxu3 %v673_v44 }
 0x13c   : > { %v658_v50 = vmax.f32 %v581_v47, 0.0 }
 0x13d   : > { %v628_v51 = vpop.f32.mrf.mxu3 }
 0x13e   : > { %v629_v52 = vadd.f32 %v628_v51, %v516_v49  ;;  %744 = vmatmul.f32.gmra.mxu2 %v658_v50  ;;  %v2084_v51 = vld [vmem:[#allocation9] ss:$0 sm:$0xff] }
 0x13f   : > { %v470_v53 = vpop.f32.mrf.mxu0 }
 0x140   : > { %v674_v40 = vmax.f32 %v629_v52, 0.0  ;;  %v471_v54 = vadd.f32 %v2016_v32, %v470_v53 }
 0x141   : > { %v583_v55 = vpop.f32.mrf.mxu1 }
 0x142   : > { %v584_v57 = vadd.f32 %v583_v55, %v471_v54  ;;  %792 = vmatmul.f32.gmra.mxu3 %v674_v40 }
 0x144   : > { %v659_v59 = vmax.f32 %v584_v57, 0.0 }
 0x145   : > { %v631_v60 = vpop.f32.mrf.mxu3 }
 0x146   : > { %v632_v61 = vadd.f32 %v631_v60, %v519_v58  ;;  %747 = vmatmul.f32.gmra.mxu2 %v659_v59 }
 0x147   : > { %v473_v62 = vpop.f32.mrf.mxu0 }
 0x148   : > { %v675_v48 = vmax.f32 %v632_v61, 0.0  ;;  %v474_v63 = vadd.f32 %v2016_v32, %v473_v62 }
 0x149   : > { %v586_v1 = vpop.f32.mrf.mxu1 }
 0x14a   : > { %v587_v2 = vadd.f32 %v586_v1, %v474_v63  ;;  %795 = vmatmul.f32.gmra.mxu3 %v675_v48 }
 0x14c   : > { %v660_v4 = vmax.f32 %v587_v2, 0.0 }
 0x14d   : > { %v634_v5 = vpop.f32.mrf.mxu3 }
 0x14e   : > { %v635_v6 = vadd.f32 %v634_v5, %v522_v3  ;;  %750 = vmatmul.f32.gmra.mxu2 %v660_v4 }
 0x14f   : > { %v476_v7 = vpop.f32.mrf.mxu0 }
 0x150   : > { %v676_v56 = vmax.f32 %v635_v6, 0.0  ;;  %v477_v9 = vadd.f32 %v2016_v32, %v476_v7 }
 0x151   : > { %v589_v10 = vpop.f32.mrf.mxu1 }
 0x152   : > { %v590_v11 = vadd.f32 %v589_v10, %v477_v9  ;;  %798 = vmatmul.f32.gmra.mxu3 %v676_v56 }
 0x154   : > { %v661_v13 = vmax.f32 %v590_v11, 0.0 }
 0x155   : > { %v637_v14 = vpop.f32.mrf.mxu3 }
 0x156   : > { %v638_v15 = vadd.f32 %v637_v14, %v525_v12  ;;  %753 = vmatmul.f32.gmra.mxu2 %v661_v13 }
 0x157   : > { %v479_v17 = vpop.f32.mrf.mxu0 }
 0x158   : > { %v677_v0 = vmax.f32 %v638_v15, 0.0  ;;  %v480_v18 = vadd.f32 %v2016_v32, %v479_v17 }
 0x159   : > { %v592_v19 = vpop.f32.mrf.mxu1 }
 0x15a   : > { %v593_v20 = vadd.f32 %v592_v19, %v480_v18  ;;  %801 = vmatmul.f32.gmra.mxu3 %v677_v0 }
 0x15c   : > { %v662_v22 = vmax.f32 %v593_v20, 0.0 }
 0x15d   : > { %v640_v23 = vpop.f32.mrf.mxu3 }
 0x15e   : > { %v641_v25 = vadd.f32 %v640_v23, %v528_v21  ;;  %756 = vmatmul.f32.gmra.mxu2 %v662_v22 }
 0x15f   : > { %v482_v26 = vpop.f32.mrf.mxu0 }
 0x160   : > { %v678_v8 = vmax.f32 %v641_v25, 0.0  ;;  %v483_v27 = vadd.f32 %v2016_v32, %v482_v26 }
 0x161   : > { %v595_v28 = vpop.f32.mrf.mxu1 }
 0x162   : > { %v596_v29 = vadd.f32 %v595_v28, %v483_v27  ;;  %804 = vmatmul.f32.gmra.mxu3 %v678_v8 }
 0x164   : > { %v663_v31 = vmax.f32 %v596_v29, 0.0 }
 0x165   : > { %v643_v34 = vpop.f32.mrf.mxu3 }
 0x166   : > { %v644_v35 = vadd.f32 %v643_v34, %v531_v30  ;;  %759 = vmatmul.f32.gmra.mxu2 %v663_v31 }
 0x167   : > { %v485_v36 = vpop.f32.mrf.mxu0 }
 0x168   : > { %v679_v16 = vmax.f32 %v644_v35, 0.0  ;;  %v486_v37 = vadd.f32 %v2016_v32, %v485_v36 }
 0x169   : > { %v598_v38 = vpop.f32.mrf.mxu1 }
 0x16a   : > { %v599_v39 = vadd.f32 %v598_v38, %v486_v37  ;;  %807 = vmatmul.f32.gmra.mxu3 %v679_v16 }
 0x16c   : > { %v664_v42 = vmax.f32 %v599_v39, 0.0 }
 0x16d   : > { %v646_v43 = vpop.f32.mrf.mxu3 }
 0x16e   : > { %v647_v44 = vadd.f32 %v646_v43, %v534_v41  ;;  %762 = vmatmul.f32.gmra.mxu2 %v664_v42 }
 0x16f   : > { %v488_v24 = vpop.f32.mrf.mxu0 }
 0x170   : > { %v680_v45 = vmax.f32 %v647_v44, 0.0  ;;  %v489_v46 = vadd.f32 %v2016_v32, %v488_v24 }
 0x171   : > { %v601_v47 = vpop.f32.mrf.mxu1 }
 0x172   : > { %v602_v49 = vadd.f32 %v601_v47, %v489_v46  ;;  %810 = vmatmul.f32.gmra.mxu3 %v680_v45 }
 0x174   : > { %v665_v50 = vmax.f32 %v602_v49, 0.0 }
 0x176   : > { %765 = vmatmul.f32.gmra.mxu2 %v665_v50 }
 0x177   : > { %v491_v52 = vpop.f32.mrf.mxu0 }
 0x178   : > { %v492_v53 = vadd.f32 %v2016_v32, %v491_v52 }
 0x179   : > { %v604_v33 = vpop.f32.mrf.mxu1  ;;  %v718_v40 = vpop.f32.mrf.mxu2 }
 0x17a   : > { %v605_v54 = vadd.f32 %v604_v33, %v492_v53  ;;  %v719_v55 = vadd.f32 %v2084_v51, %v718_v40 }
 0x17c   : > { %v666_v57 = vmax.f32 %v605_v54, 0.0  ;;  %814 = vst [vmem:[%s2088_s30] sm:$0xff] %v719_v55 }
 0x17e   : > { %768 = vmatmul.f32.gmra.mxu2 %v666_v57 }
 0x17f   : > { %v494_v58 = vpop.f32.mrf.mxu0 }
 0x180   : > { %v495_v59 = vadd.f32 %v2016_v32, %v494_v58 }
 0x181   : > { %v607_v60 = vpop.f32.mrf.mxu1  ;;  %v721_v61 = vpop.f32.mrf.mxu2 }
 0x182   : > { %v608_v62 = vadd.f32 %v607_v60, %v495_v59  ;;  %v722_v48 = vadd.f32 %v2084_v51, %v721_v61 }
 0x184   : > { %v667_v63 = vmax.f32 %v608_v62, 0.0  ;;  %815 = vst [vmem:[%s2088_s30 + $0x8] sm:$0xff] %v722_v48 }
 0x186   : > { %771 = vmatmul.f32.gmra.mxu2 %v667_v63 }
 0x187   : > { %v497_v1 = vpop.f32.mrf.mxu0 }
 0x188   : > { %v498_v2 = vadd.f32 %v2016_v32, %v497_v1 }
 0x189   : > { %v610_v3 = vpop.f32.mrf.mxu1  ;;  %v724_v4 = vpop.f32.mrf.mxu2 }
 0x18a   : > { %v611_v5 = vadd.f32 %v610_v3, %v498_v2  ;;  %v725_v6 = vadd.f32 %v2084_v51, %v724_v4 }
 0x18c   : > { %v668_v7 = vmax.f32 %v611_v5, 0.0  ;;  %816 = vst [vmem:[%s2088_s30 + $0x10] sm:$0xff] %v725_v6 }
 0x18e   : > { %774 = vmatmul.f32.gmra.mxu2 %v668_v7 }
 0x18f   : > { %v500_v56 = vpop.f32.mrf.mxu0 }
 0x190   : > { %v501_v9 = vadd.f32 %v2016_v32, %v500_v56 }
 0x191   : > { %v613_v10 = vpop.f32.mrf.mxu1  ;;  %v727_v11 = vpop.f32.mrf.mxu2 }
 0x192   : > { %v614_v12 = vadd.f32 %v613_v10, %v501_v9  ;;  %v728_v13 = vadd.f32 %v2084_v51, %v727_v11 }
 0x194   : > { %v669_v14 = vmax.f32 %v614_v12, 0.0  ;;  %817 = vst [vmem:[%s2088_s30 + $0x18] sm:$0xff] %v728_v13 }
 0x196   : > { %777 = vmatmul.f32.gmra.mxu2 %v669_v14 }
 0x197   : > { %v503_v15 = vpop.f32.mrf.mxu0 }
 0x198   : > { %v504_v17 = vadd.f32 %v2016_v32, %v503_v15 }
 0x199   : > { %v616_v0 = vpop.f32.mrf.mxu1  ;;  %v730_v18 = vpop.f32.mrf.mxu2 }
 0x19a   : > { %v617_v19 = vadd.f32 %v616_v0, %v504_v17  ;;  %v731_v20 = vadd.f32 %v2084_v51, %v730_v18 }
 0x19c   : > { %v670_v21 = vmax.f32 %v617_v19, 0.0  ;;  %818 = vst [vmem:[%s2088_s30 + $0x20] sm:$0xff] %v731_v20 }
 0x19e   : > { %780 = vmatmul.f32.gmra.mxu2 %v670_v21 }
 0x19f   : > { %v506_v22 = vpop.f32.mrf.mxu0 }
 0x1a0   : > { %v507_v23 = vadd.f32 %v2016_v32, %v506_v22 }
 0x1a1   : > { %v619_v25 = vpop.f32.mrf.mxu1  ;;  %v733_v26 = vpop.f32.mrf.mxu2 }
 0x1a2   : > { %v620_v8 = vadd.f32 %v619_v25, %v507_v23  ;;  %v734_v27 = vadd.f32 %v2084_v51, %v733_v26 }
 0x1a4   : > { %v671_v28 = vmax.f32 %v620_v8, 0.0  ;;  %819 = vst [vmem:[%s2088_s30 + $0x28] sm:$0xff] %v734_v27 }
 0x1a6   : > { %783 = vmatmul.f32.gmra.mxu2 %v671_v28 }
 0x1a7   : > { %v509_v29 = vpop.f32.mrf.mxu0 }
 0x1a8   : > { %v510_v30 = vadd.f32 %v2016_v32, %v509_v29 }
 0x1a9   : > { %v622_v31 = vpop.f32.mrf.mxu1  ;;  %v736_v34 = vpop.f32.mrf.mxu2 }
 0x1aa   : > { %v623_v35 = vadd.f32 %v622_v31, %v510_v30  ;;  %v737_v36 = vadd.f32 %v2084_v51, %v736_v34 }
 0x1ac   : > { %v672_v16 = vmax.f32 %v623_v35, 0.0  ;;  %820 = vst [vmem:[%s2088_s30 + $0x30] sm:$0xff] %v737_v36 }
 0x1ae   : > { %786 = vmatmul.f32.gmra.mxu2 %v672_v16 }
 0x1b1   : > { %v739_v37 = vpop.f32.mrf.mxu2 }
 0x1b2   : > { %v740_v38 = vadd.f32 %v2084_v51, %v739_v37 }
 0x1b4   : > { %821 = vst [vmem:[%s2088_s30 + $0x38] sm:$0xff] %v740_v38 }
 0x1b9   : > { %v742_v39 = vpop.f32.mrf.mxu2 }
 0x1ba   : > { %v743_v41 = vadd.f32 %v2084_v51, %v742_v39 }
 0x1bc   : > { %822 = vst [vmem:[%s2088_s30 + $0x40] sm:$0xff] %v743_v41 }
 0x1bd   : > { %v790_v32 = vpop.f32.mrf.mxu3 }
 0x1be   : > { %v791_v42 = vadd.f32 %v2084_v51, %v790_v32 }
 0x1c0   : > { %838 = vst [vmem:[%s2088_s30 + $0xc0] sm:$0xff] %v791_v42 }
 0x1c1   : > { %v745_v43 = vpop.f32.mrf.mxu2 }
 0x1c2   : > { %v746_v44 = vadd.f32 %v2084_v51, %v745_v43 }
 0x1c4   : > { %823 = vst [vmem:[%s2088_s30 + $0x48] sm:$0xff] %v746_v44 }
 0x1c5   : > { %v793_v24 = vpop.f32.mrf.mxu3 }
 0x1c6   : > { %v794_v45 = vadd.f32 %v2084_v51, %v793_v24 }
 0x1c8   : > { %839 = vst [vmem:[%s2088_s30 + $0xc8] sm:$0xff] %v794_v45 }
 0x1c9   : > { %v748_v46 = vpop.f32.mrf.mxu2 }
 0x1ca   : > { %v749_v47 = vadd.f32 %v2084_v51, %v748_v46 }
 0x1cc   : > { %824 = vst [vmem:[%s2088_s30 + $0x50] sm:$0xff] %v749_v47 }
 0x1cd   : > { %v796_v49 = vpop.f32.mrf.mxu3 }
 0x1ce   : > { %v797_v50 = vadd.f32 %v2084_v51, %v796_v49 }
 0x1d0   : > { %840 = vst [vmem:[%s2088_s30 + $0xd0] sm:$0xff] %v797_v50 }
 0x1d1   : > { %v751_v52 = vpop.f32.mrf.mxu2 }
 0x1d2   : > { %v752_v53 = vadd.f32 %v2084_v51, %v751_v52 }
 0x1d4   : > { %825 = vst [vmem:[%s2088_s30 + $0x58] sm:$0xff] %v752_v53 }
 0x1d5   : > { %v799_v33 = vpop.f32.mrf.mxu3 }
 0x1d6   : > { %v800_v40 = vadd.f32 %v2084_v51, %v799_v33 }
 0x1d8   : > { %841 = vst [vmem:[%s2088_s30 + $0xd8] sm:$0xff] %v800_v40 }
 0x1d9   : > { %v754_v54 = vpop.f32.mrf.mxu2 }
 0x1da   : > { %v755_v55 = vadd.f32 %v2084_v51, %v754_v54 }
 0x1dc   : > { %826 = vst [vmem:[%s2088_s30 + $0x60] sm:$0xff] %v755_v55 }
 0x1dd   : > { %v802_v57 = vpop.f32.mrf.mxu3 }
 0x1de   : > { %v803_v58 = vadd.f32 %v2084_v51, %v802_v57 }
 0x1e0   : > { %842 = vst [vmem:[%s2088_s30 + $0xe0] sm:$0xff] %v803_v58 }
 0x1e1   : > { %v757_v59 = vpop.f32.mrf.mxu2 }
 0x1e2   : > { %v758_v60 = vadd.f32 %v2084_v51, %v757_v59 }
 0x1e4   : > { %827 = vst [vmem:[%s2088_s30 + $0x68] sm:$0xff] %v758_v60 }
 0x1e5   : > { %v805_v61 = vpop.f32.mrf.mxu3 }
 0x1e6   : > { %v806_v62 = vadd.f32 %v2084_v51, %v805_v61 }
 0x1e8   : > { %843 = vst [vmem:[%s2088_s30 + $0xe8] sm:$0xff] %v806_v62 }
 0x1e9   : > { %v760_v48 = vpop.f32.mrf.mxu2 }
 0x1ea   : > { %v761_v63 = vadd.f32 %v2084_v51, %v760_v48 }
 0x1ec   : > { %828 = vst [vmem:[%s2088_s30 + $0x70] sm:$0xff] %v761_v63 }
 0x1ed   : > { %v808_v1 = vpop.f32.mrf.mxu3 }
 0x1ee   : > { %v809_v2 = vadd.f32 %v2084_v51, %v808_v1 }
 0x1f0   : > { %844 = vst [vmem:[%s2088_s30 + $0xf0] sm:$0xff] %v809_v2 }
 0x1f1   : > { %v763_v3 = vpop.f32.mrf.mxu2 }
 0x1f2   : > { %v764_v4 = vadd.f32 %v2084_v51, %v763_v3 }
 0x1f4   : > { %829 = vst [vmem:[%s2088_s30 + $0x78] sm:$0xff] %v764_v4 }
 0x1f5   : > { %v811_v5 = vpop.f32.mrf.mxu3 }
 0x1f6   : > { %v812_v6 = vadd.f32 %v2084_v51, %v811_v5 }
 0x1f8   : > { %845 = vst [vmem:[%s2088_s30 + $0xf8] sm:$0xff] %v812_v6 }
 0x1f9   : > { %v766_v7 = vpop.f32.mrf.mxu2 }
 0x1fa   : > { %v767_v56 = vadd.f32 %v2084_v51, %v766_v7 }
 0x1fc   : > { %830 = vst [vmem:[%s2088_s30 + $0x80] sm:$0xff] %v767_v56 }
 0x201   : > { %v769_v9 = vpop.f32.mrf.mxu2 }
 0x202   : > { %v770_v10 = vadd.f32 %v2084_v51, %v769_v9 }
 0x204   : > { %831 = vst [vmem:[%s2088_s30 + $0x88] sm:$0xff] %v770_v10 }
 0x209   : > { %v772_v11 = vpop.f32.mrf.mxu2 }
 0x20a   : > { %v773_v12 = vadd.f32 %v2084_v51, %v772_v11 }
 0x20c   : > { %832 = vst [vmem:[%s2088_s30 + $0x90] sm:$0xff] %v773_v12 }
 0x211   : > { %v775_v13 = vpop.f32.mrf.mxu2 }
 0x212   : > { %v776_v14 = vadd.f32 %v2084_v51, %v775_v13 }
 0x214   : > { %833 = vst [vmem:[%s2088_s30 + $0x98] sm:$0xff] %v776_v14 }
 0x219   : > { %v778_v15 = vpop.f32.mrf.mxu2 }
 0x21a   : > { %v779_v17 = vadd.f32 %v2084_v51, %v778_v15 }
 0x21c   : > { %834 = vst [vmem:[%s2088_s30 + $0xa0] sm:$0xff] %v779_v17 }
 0x221   : > { %v781_v0 = vpop.f32.mrf.mxu2 }
 0x222   : > { %v782_v18 = vadd.f32 %v2084_v51, %v781_v0 }
 0x224   : > { %835 = vst [vmem:[%s2088_s30 + $0xa8] sm:$0xff] %v782_v18 }
 0x229   : > { %v784_v19 = vpop.f32.mrf.mxu2 }
 0x22a   : > { %v785_v20 = vadd.f32 %v2084_v51, %v784_v19 }
 0x22c   : > { %836 = vst [vmem:[%s2088_s30 + $0xb0] sm:$0xff] %v785_v20 }
 0x230   : > { %852 = sbr.rel (!%p1827_p10) target bundleno = 629 (0x275), region = 64 }
 0x231   : > { %v787_v21 = vpop.f32.mrf.mxu2 }
 0x232   : > { %v788_v22 = vadd.f32 %v2084_v51, %v787_v21 }
 0x234   : > { %837 = vst [vmem:[%s2088_s30 + $0xb8] sm:$0xff] %v788_v22 }
 0x235   : > { %s2335_s27 = smov (!%p855_p8, %s854_s27), 32 }
 0x236   : > { %s1260_s11 = sshll.u32 %s2335_s27, 3 }
 0x237   : > { %p1263_p7 = scmp.eq.s32.totalorder %s1260_s11, 0 }
 0x238   : > { %s2172_s29 = sshrl.u32 (!%p1263_p7), %s2335_s27, 5 }
 0x239   : > { %863 = sbr.rel (%p1263_p7) target bundleno = 629 (0x275), region = 68  ;;  %p1264_p10 = scmp.le.s32.totalorder (!%p1263_p7), %s2172_s29, 0 }
 0x23e   : > { %1152 = sbr.rel (%p1264_p10) target bundleno = 612 (0x264), region = 150  ;;  %s2323_s22 = smov (!%p1264_p10), %s2166_s10 }
 0x23f   : > { %s2324_s25 = smov (!%p1264_p10), %s2088_s30  ;;  %s2181_s6 = smov (!%p1264_p10), 0  }
 0x240   : > { %s2183_s7 = smov (!%p1264_p10), 0  }
 0x243 LB: >> { %v988_v51 = vld [vmem:[%s1714_s25] sm:$0xff]  ;;  %v990_v23 = vld [vmem:[%s1714_s25 + $0x8] sm:$0xff]  ;;  %v992_v25 = vld [vmem:[%s1714_s25 + $0x10] sm:$0xff]  ;;  %s1052_s9 = sadd.s32 1, %s1718_s6  ;;  %s982_s7 = sadd.s32 1, %s1722_s7   ;;  %s1722_s7 = sphi %s2183_s7, %s982_s7   ;;  %s1718_s6 = sphi %s2181_s6, %s2327_s6   ;;  %s1714_s25 = sphi %s2324_s25, %s2326_s25   ;;  %s1710_s22 = sphi %s2323_s22, %s2325_s22  }
 0x244   : >> { %989 = vst [vmem:[%s1710_s22] sm:$0xff] %v988_v51  ;;  %v994_v26 = vld [vmem:[%s1714_s25 + $0x18] sm:$0xff]  ;;  %p1053_p9 = scmp.ge.s32.totalorder %s1052_s9, %s2172_s29  ;;  %v996_v8 = vld [vmem:[%s1714_s25 + $0x20] sm:$0xff]  ;;  %v998_v27 = vld [vmem:[%s1714_s25 + $0x28] sm:$0xff]  ;;  %p981_p12 = scmp.ge.s32.totalorder %s982_s7, %s2172_s29 }
 0x245   : >> { %991 = vst [vmem:[%s1710_s22 + $0x8] sm:$0xff] %v990_v23  ;;  %v1000_v28 = vld [vmem:[%s1714_s25 + $0x30] sm:$0xff]  ;;  %v1002_v29 = vld [vmem:[%s1714_s25 + $0x38] sm:$0xff]  ;;  %v1004_v30 = vld [vmem:[%s1714_s25 + $0x40] sm:$0xff] }
 0x246   : >> { %993 = vst [vmem:[%s1710_s22 + $0x10] sm:$0xff] %v992_v25  ;;  %s2337_s9 = smov (%p1053_p9, %s1052_s9), 0  ;;  %v1006_v31 = vld [vmem:[%s1714_s25 + $0x48] sm:$0xff]  ;;  %v1008_v34 = vld [vmem:[%s1714_s25 + $0x50] sm:$0xff]  ;;  %v1010_v35 = vld [vmem:[%s1714_s25 + $0x58] sm:$0xff] }
 0x247   : >> { %995 = vst [vmem:[%s1710_s22 + $0x18] sm:$0xff] %v994_v26  ;;  %s1265_s12 = sshll.u32 %s2337_s9, 8  ;;  %v1012_v36 = vld [vmem:[%s1714_s25 + $0x60] sm:$0xff]  ;;  %v1014_v16 = vld [vmem:[%s1714_s25 + $0x68] sm:$0xff]  ;;  %v1016_v37 = vld [vmem:[%s1714_s25 + $0x70] sm:$0xff]  ;;  %s2327_s6 = smov %s2337_s9 }
 0x248   : >> { %997 = vst [vmem:[%s1710_s22 + $0x20] sm:$0xff] %v996_v8  ;;  %s2215_s14 = scalar_lea.vmem %s2088_s30, %s1265_s12 [#allocation10]   ;;  %s2218_s16 = scalar_lea.vmem %s2166_s10, %s1265_s12   ;;  %v1018_v38 = vld [vmem:[%s1714_s25 + $0x78] sm:$0xff]  ;;  %v1020_v39 = vld [vmem:[%s1714_s25 + $0x80] sm:$0xff]  ;;  %v1022_v41 = vld [vmem:[%s1714_s25 + $0x88] sm:$0xff] }
 0x249   : >> { %999 = vst [vmem:[%s1710_s22 + $0x28] sm:$0xff] %v998_v27  ;;  %v1024_v32 = vld [vmem:[%s1714_s25 + $0x90] sm:$0xff]  ;;  %v1026_v42 = vld [vmem:[%s1714_s25 + $0x98] sm:$0xff]  ;;  %v1028_v43 = vld [vmem:[%s1714_s25 + $0xa0] sm:$0xff] }
 0x24a   : >> { %1001 = vst [vmem:[%s1710_s22 + $0x30] sm:$0xff] %v1000_v28  ;;  %v1030_v44 = vld [vmem:[%s1714_s25 + $0xa8] sm:$0xff]  ;;  %v1032_v24 = vld [vmem:[%s1714_s25 + $0xb0] sm:$0xff]  ;;  %v1034_v45 = vld [vmem:[%s1714_s25 + $0xb8] sm:$0xff] }
 0x24b   : >> { %1003 = vst [vmem:[%s1710_s22 + $0x38] sm:$0xff] %v1002_v29  ;;  %v1036_v46 = vld [vmem:[%s1714_s25 + $0xc0] sm:$0xff]  ;;  %v1038_v47 = vld [vmem:[%s1714_s25 + $0xc8] sm:$0xff]  ;;  %v1040_v49 = vld [vmem:[%s1714_s25 + $0xd0] sm:$0xff] }
 0x24c   : >> { %1005 = vst [vmem:[%s1710_s22 + $0x40] sm:$0xff] %v1004_v30  ;;  %v1042_v50 = vld [vmem:[%s1714_s25 + $0xd8] sm:$0xff]  ;;  %v1044_v52 = vld [vmem:[%s1714_s25 + $0xe0] sm:$0xff]  ;;  %v1046_v53 = vld [vmem:[%s1714_s25 + $0xe8] sm:$0xff] }
 0x24d   : >> { %1007 = vst [vmem:[%s1710_s22 + $0x48] sm:$0xff] %v1006_v31  ;;  %v1048_v33 = vld [vmem:[%s1714_s25 + $0xf0] sm:$0xff]  ;;  %v1050_v40 = vld [vmem:[%s1714_s25 + $0xf8] sm:$0xff]  ;;  %s2326_s25 = smov %s2215_s14 }
 0x24e   : >> { %1009 = vst [vmem:[%s1710_s22 + $0x50] sm:$0xff] %v1008_v34 }
 0x24f   : >> { %1011 = vst [vmem:[%s1710_s22 + $0x58] sm:$0xff] %v1010_v35 }
 0x250   : >> { %1013 = vst [vmem:[%s1710_s22 + $0x60] sm:$0xff] %v1012_v36 }
 0x251   : >> { %1015 = vst [vmem:[%s1710_s22 + $0x68] sm:$0xff] %v1014_v16 }
 0x252   : >> { %1017 = vst [vmem:[%s1710_s22 + $0x70] sm:$0xff] %v1016_v37 }
 0x253   : >> { %1019 = vst [vmem:[%s1710_s22 + $0x78] sm:$0xff] %v1018_v38 }
 0x254   : >> { %1021 = vst [vmem:[%s1710_s22 + $0x80] sm:$0xff] %v1020_v39 }
 0x255   : >> { %1023 = vst [vmem:[%s1710_s22 + $0x88] sm:$0xff] %v1022_v41 }
 0x256   : >> { %1025 = vst [vmem:[%s1710_s22 + $0x90] sm:$0xff] %v1024_v32 }
 0x257   : >> { %1027 = vst [vmem:[%s1710_s22 + $0x98] sm:$0xff] %v1026_v42 }
 0x258   : >> { %1029 = vst [vmem:[%s1710_s22 + $0xa0] sm:$0xff] %v1028_v43 }
 0x259   : >> { %1031 = vst [vmem:[%s1710_s22 + $0xa8] sm:$0xff] %v1030_v44 }
 0x25a   : >> { %1033 = vst [vmem:[%s1710_s22 + $0xb0] sm:$0xff] %v1032_v24 }
 0x25b   : >> { %1035 = vst [vmem:[%s1710_s22 + $0xb8] sm:$0xff] %v1034_v45 }
 0x25c   : >> { %1037 = vst [vmem:[%s1710_s22 + $0xc0] sm:$0xff] %v1036_v46 }
 0x25d   : >> { %1039 = vst [vmem:[%s1710_s22 + $0xc8] sm:$0xff] %v1038_v47 }
 0x25e   : >> { %1041 = vst [vmem:[%s1710_s22 + $0xd0] sm:$0xff] %v1040_v49 }
 0x25f   : >> { %1043 = vst [vmem:[%s1710_s22 + $0xd8] sm:$0xff] %v1042_v50  ;;  %984 = sbr.rel (!%p981_p12) target bundleno = 579 (0x243), region = 156 }
 0x260   : >> { %1045 = vst [vmem:[%s1710_s22 + $0xe0] sm:$0xff] %v1044_v52 }
 0x261   : >> { %1047 = vst [vmem:[%s1710_s22 + $0xe8] sm:$0xff] %v1046_v53 }
 0x262   : >> { %1049 = vst [vmem:[%s1710_s22 + $0xf0] sm:$0xff] %v1048_v33 }
 0x263   : >> { %1051 = vst [vmem:[%s1710_s22 + $0xf8] sm:$0xff] %v1050_v40  ;;  %s2325_s22 = smov %s2218_s16 }
 0x264 PF: > { %s2283_s15 = sand.u32 31, %s2335_s27   ;;  %s1279_s21 = sshll.u32 %s2172_s29, 8 }
 0x265   : > { %s1063_s1 = scalar_lea.vmem %s2088_s30, %s1279_s21 [#allocation10]   ;;  %s1065_s18 = scalar_lea.vmem %s2166_s10, %s1279_s21  }
 0x266   : > { %p1270_p13 = scmp.le.s32.totalorder %s2283_s15, 0 }
 0x267   : > { %s1724_s28 = smov (!%p1270_p13), %s1065_s18   ;;  %s1728_s17 = smov (!%p1270_p13), %s1063_s1  }
 0x268   : > { %1166 = sbr.rel (%p1270_p13) target bundleno = 629 (0x275), region = 161  ;;  %s1732_s24 = smov (!%p1270_p13), 0  }
 0x269   : > { %s1736_s13 = smov (!%p1270_p13), 0  }
 0x26d LB: >> { %v1075_v54 = vld [vmem:[%s1730_s17] sm:$0xff]  ;;  %s1077_s27 = sadd.s32 1, %s1734_s24  ;;  %s1069_s13 = sadd.s32 1, %s1738_s13   ;;  %s1738_s13 = sphi %s1736_s13, %s1069_s13   ;;  %s1734_s24 = sphi %s1732_s24, %s1733_s24   ;;  %s1730_s17 = sphi %s1728_s17, %s1082_s17   ;;  %s1726_s28 = sphi %s1724_s28, %s1083_s28  }
 0x26e   : >> { %1076 = vst [vmem:[%s1726_s28] sm:$0xff] %v1075_v54  ;;  %p1078_p0 = scmp.ge.s32.totalorder %s1077_s27, %s2283_s15  ;;  %p1068_p1 = scmp.ge.s32.totalorder %s1069_s13, %s2283_s15 }
 0x270   : >> { %s2339_s27 = smov (%p1078_p0, %s1077_s27), 0  ;;  %1071 = sbr.rel (!%p1068_p1) target bundleno = 621 (0x26d), region = 167 }
 0x271   : >> { %s1271_s30 = sshll.u32 %s2339_s27, 3  ;;  %s1733_s24 = smov %s2339_s27  }
 0x272   : >> { %s1082_s17 = scalar_lea.vmem %s1063_s1, %s1271_s30 [#allocation10]   ;;  %s1083_s28 = scalar_lea.vmem %s1065_s18, %s1271_s30  }
 0x275 PF: > { %p17_p3 = scmp.ge.s32.totalorder %s1801_s23, 4   ;;  %s2328_s18 = smov %s1698_s19 }
 0x276   : > { %s2329_s19 = smov %s1702_s20  ;;  %s2330_s20 = smov %s1811_s26 }
 0x277   : > { %s2331_s21 = smov %s1801_s23  ;;  %19 = sbr.rel (!%p17_p3) target bundleno = 7 (0x7), region = 178 }
 0x27c   :  { %1099 = vsyncpa [#allocation3], 1 }
 0x27d   :  { %1101 = vsyncpa [#allocation3 + $0x1], 1 }
 0x27e   :  { %1102 = vsyncpa [#allocation5], 1 }
 0x27f   :  { %1103 = vsyncpa [#allocation8], 1 }

// kernel: feature_encoder_relu_forward.3
= control target key start
LH: loop header
LB: loop body
LE: loop exit
PB: predicated region body
PF: predicated region fallthrough
CT: control target
= control target key end

     0   :  { %s4659_s12 = smov 0   ;;  %s4661_s13 = smov 0   ;;  %s7097_s0 = inlined_call_operand.vmem [shape: f32[300,220], index: 0, kind: input, shape index: {}]   ;;  %s7098_s1 = inlined_call_operand.vmem [shape: f32[220,1200], index: 1, kind: input, shape index: {}]   ;;  %s7099_s2 = inlined_call_operand.vmem [shape: f32[1,1200], index: 2, kind: input, shape index: {}]   ;;  %s7100_s3 = inlined_call_operand.vmem [shape: f32[300,1200], index: 3, kind: output, shape index: {}]  }
   0x1   :  { %s4663_s14 = smov 0  }
   0x2 LB: > { %s4672_s15 = sadd.s32 4294967295, %s4605_s14   ;;  %s4674_s16 = sadd.s32 1, %s4605_s14   ;;  %s4605_s14 = sphi %s4663_s14, %s7113_s14   ;;  %s4601_s13 = sphi %s4661_s13, %s7112_s13   ;;  %s4597_s12 = sphi %s4659_s12, %s7111_s12  }
   0x3   : > { %s85_s17 = ssub.s32 %s4605_s14, %s4674_s16  ;;  %s88_s18 = sadd.s32 1, %s4601_s13 }
   0x4   : > { %p86_p0 = scmp.eq.s32.totalorder %s85_s17, 0  ;;  %p98_p1 = scmp.ne.s32.totalorder %s4601_s13, %s4597_s12 }
   0x5   : > { %p99_p2 = scmp.eq.s32.totalorder %s4672_s15, 1  ;;  %p3853_p3 = scmp.ge.s32.totalorder %s4605_s14, 1 }
   0x6   : > { %s4682_s19 = scalar_select %p86_p0, %s4601_s13, %s88_s18  }
   0x7   : > { %p4684_p4 = por %p99_p2, %p98_p1  ;;  %p149_p5 = scmp.lt.s32.totalorder %s4605_s14, 3 }
   0x9   : > { %p150_p6 = pnand %p3853_p3, %p149_p5 }
   0xa   : > { %s4748_s11 = sshll.u32 (!%p150_p6), %s4672_s15, 5 }
   0xb   : > { %153 = sbr.rel (%p150_p6) target bundleno = 1533 (0x5fd), region = 32  ;;  %p184_p7 = scmp.lt.s32.totalorder (!%p150_p6), %s4748_s11, 37 }
  0x10   : > { %v416_v0 = vld [vmem:[%s7098_s1 + $0x4b8] sm:$0xff]  ;;  %v415_v1 = vld [vmem:[%s7098_s1 + $0x4b0] sm:$0xff]  ;;  %v406_v2 = vld [vmem:[%s7098_s1 + $0x468] sm:$0xff]  ;;  %vm666_vm0 = vcmask 1043456   ;;  %s4796_s26 = scalar_select %p184_p7, %s4748_s11, 37  ;;  %vm569_vm1 = vcmask 752640  }
  0x11   : > { %923 = vmatpush.msra.mxu2 %v416_v0  ;;  %697 = vmatpush.msra.mxu0 %v415_v1  ;;  %v405_v3 = vld [vmem:[%s7098_s1 + $0x460] sm:$0xff]  ;;  %v396_v4 = vld [vmem:[%s7098_s1 + $0x418] sm:$0xff]  ;;  %v395_v5 = vld [vmem:[%s7098_s1 + $0x410] sm:$0xff]  ;;  %vm3286_vm2 = vcmask 392192   ;;  %s4203_s22 = smul.u32 (%p4684_p4), 2560, %s4672_s15 }
  0x12   : > { %v386_v6 = vld [vmem:[%s7098_s1 + $0x3c8] sm:$0xff]  ;;  %v536_v7 = vld [vmem:[%s7098_s1 + $0x878] sm:$0xf]  ;;  %v385_v8 = vld [vmem:[%s7098_s1 + $0x3c0] sm:$0xff]  ;;  %s4201_s23 = sshll.u32 %s4796_s26, 4 }
  0x13   : > { %924 = vmatpush.msra.mxu2 %v406_v2  ;;  %698 = vmatpush.msra.mxu0 %v405_v3  ;;  %v526_v9 = vld [vmem:[%s7098_s1 + $0x828] sm:$0xff]  ;;  %v535_v10 = vld [vmem:[%s7098_s1 + $0x870] sm:$0xf]  ;;  %v516_v11 = vld [vmem:[%s7098_s1 + $0x7d8] sm:$0xff]  ;;  %s4844_s14 = scalar_lea.vmem %s7097_s0, %s4201_s23  ;;  %s175_s23 = sand.u32 1, %s4597_s12  }
  0x14   : > { %3890 = vmatpush.msk.msra.mxu3 %vm666_vm0, %v536_v7  ;;  %v376_v12 = vld [vmem:[%s7098_s1 + $0x378] sm:$0xff]  ;;  %v375_v13 = vld [vmem:[%s7098_s1 + $0x370] sm:$0xff]  ;;  %3857 = vmatpush.msk.msra.mxu1 %vm666_vm0, %v535_v10  ;;  %v525_v14 = vld [vmem:[%s7098_s1 + $0x820] sm:$0xff]  ;;  %s4202_s12 = smul.u32 2560, %s175_s23  ;;  %s6915_s27 = scalar_lea.vmem (%p4684_p4), %s7100_s3, %s4203_s22  }
  0x15   : > { %925 = vmatpush.msra.mxu2 %v396_v4  ;;  %699 = vmatpush.msra.mxu0 %v395_v5  ;;  %v506_v15 = vld [vmem:[%s7098_s1 + $0x788] sm:$0xff]  ;;  %v515_v16 = vld [vmem:[%s7098_s1 + $0x7d0] sm:$0xff]  ;;  %v365_v18 = vld [vmem:[%s7098_s1 + $0x320] sm:$0xff] }
  0x16   : > { %1041 = vmatpush.msra.mxu3 %v526_v9  ;;  %v366_v17 = vld [vmem:[%s7098_s1 + $0x328] sm:$0xff]  ;;  %815 = vmatpush.msra.mxu1 %v525_v14  ;;  %v496_v19 = vld [vmem:[%s7098_s1 + $0x738] sm:$0xff]  ;;  %v505_v20 = vld [vmem:[%s7098_s1 + $0x780] sm:$0xff]  ;;  %s5065_s9 = scalar_lea.vmem [#allocation2], %s4202_s12  }
  0x17   : > { %926 = vmatpush.msra.mxu2 %v386_v6  ;;  %700 = vmatpush.msra.mxu0 %v385_v8  ;;  %v356_v21 = vld [vmem:[%s7098_s1 + $0x2d8] sm:$0xff]  ;;  %v355_v22 = vld [vmem:[%s7098_s1 + $0x2d0] sm:$0xff]  ;;  %v486_v23 = vld [vmem:[%s7098_s1 + $0x6e8] sm:$0xff] }
  0x18   : > { %1042 = vmatpush.msra.mxu3 %v516_v11  ;;  %816 = vmatpush.msra.mxu1 %v515_v16  ;;  %v495_v24 = vld [vmem:[%s7098_s1 + $0x730] sm:$0xff]  ;;  %v346_v25 = vld [vmem:[%s7098_s1 + $0x288] sm:$0xff]  ;;  %v345_v26 = vld [vmem:[%s7098_s1 + $0x280] sm:$0xff] }
  0x19   : > { %927 = vmatpush.msra.mxu2 %v376_v12  ;;  %701 = vmatpush.msra.mxu0 %v375_v13  ;;  %v476_v27 = vld [vmem:[%s7098_s1 + $0x698] sm:$0xff]  ;;  %v485_v28 = vld [vmem:[%s7098_s1 + $0x6e0] sm:$0xff]  ;;  %v335_v30 = vld [vmem:[%s7098_s1 + $0x230] sm:$0xff] }
  0x1a   : > { %1043 = vmatpush.msra.mxu3 %v506_v15  ;;  %817 = vmatpush.msra.mxu1 %v505_v20  ;;  %v336_v29 = vld [vmem:[%s7098_s1 + $0x238] sm:$0xff]  ;;  %v466_v31 = vld [vmem:[%s7098_s1 + $0x648] sm:$0xff]  ;;  %v475_v32 = vld [vmem:[%s7098_s1 + $0x690] sm:$0xff] }
  0x1b   : > { %928 = vmatpush.msra.mxu2 %v366_v17  ;;  %702 = vmatpush.msra.mxu0 %v365_v18  ;;  %v326_v33 = vld [vmem:[%s7098_s1 + $0x1e8] sm:$0xff]  ;;  %v325_v34 = vld [vmem:[%s7098_s1 + $0x1e0] sm:$0xff]  ;;  %v456_v35 = vld [vmem:[%s7098_s1 + $0x5f8] sm:$0xff] }
  0x1c   : > { %1044 = vmatpush.msra.mxu3 %v496_v19  ;;  %818 = vmatpush.msra.mxu1 %v495_v24  ;;  %v465_v36 = vld [vmem:[%s7098_s1 + $0x640] sm:$0xff]  ;;  %v316_v37 = vld [vmem:[%s7098_s1 + $0x198] sm:$0xff]  ;;  %v315_v38 = vld [vmem:[%s7098_s1 + $0x190] sm:$0xff] }
  0x1d   : > { %929 = vmatpush.msra.mxu2 %v356_v21  ;;  %703 = vmatpush.msra.mxu0 %v355_v22  ;;  %v446_v39 = vld [vmem:[%s7098_s1 + $0x5a8] sm:$0xff]  ;;  %v455_v40 = vld [vmem:[%s7098_s1 + $0x5f0] sm:$0xff]  ;;  %v305_v42 = vld [vmem:[%s7098_s1 + $0x140] sm:$0xff] }
  0x1e   : > { %1045 = vmatpush.msra.mxu3 %v486_v23  ;;  %819 = vmatpush.msra.mxu1 %v485_v28  ;;  %v306_v41 = vld [vmem:[%s7098_s1 + $0x148] sm:$0xff]  ;;  %v436_v43 = vld [vmem:[%s7098_s1 + $0x558] sm:$0xff]  ;;  %v445_v44 = vld [vmem:[%s7098_s1 + $0x5a0] sm:$0xff] }
  0x1f   : > { %930 = vmatpush.msra.mxu2 %v346_v25  ;;  %704 = vmatpush.msra.mxu0 %v345_v26  ;;  %v296_v45 = vld [vmem:[%s7098_s1 + $0xf8] sm:$0xff]  ;;  %v295_v46 = vld [vmem:[%s7098_s1 + $0xf0] sm:$0xff]  ;;  %v426_v47 = vld [vmem:[%s7098_s1 + $0x508] sm:$0xff] }
  0x20   : > { %1046 = vmatpush.msra.mxu3 %v476_v27  ;;  %820 = vmatpush.msra.mxu1 %v475_v32  ;;  %v435_v48 = vld [vmem:[%s7098_s1 + $0x550] sm:$0xff]  ;;  %v286_v49 = vld [vmem:[%s7098_s1 + $0xa8] sm:$0xff]  ;;  %v285_v50 = vld [vmem:[%s7098_s1 + $0xa0] sm:$0xff] }
  0x21   : > { %931 = vmatpush.msra.mxu2 %v336_v29  ;;  %705 = vmatpush.msra.mxu0 %v335_v30  ;;  %v202_v51 = vld [vmem:[%s4844_s14 + $0x8] sm:$0xff]  ;;  %v425_v52 = vld [vmem:[%s7098_s1 + $0x500] sm:$0xff]  ;;  %v276_v53 = vld [vmem:[%s7098_s1 + $0x58] sm:$0xff] }
  0x22   : > { %1047 = vmatpush.msra.mxu3 %v466_v31  ;;  %821 = vmatpush.msra.mxu1 %v465_v36  ;;  %v275_v54 = vld [vmem:[%s7098_s1 + $0x50] sm:$0xff]  ;;  %v537_v55 = vld [vmem:[%s7098_s1 + $0x880] sm:$0xf]  ;;  %v266_v56 = vld [vmem:[%s7098_s1 + $0x8] sm:$0xff] }
  0x23   : > { %932 = vmatpush.msra.mxu2 %v326_v33  ;;  %706 = vmatpush.msra.mxu0 %v325_v34  ;;  %v265_v57 = vld [vmem:[%s7098_s1] sm:$0xff]  ;;  %v538_v59 = vld [vmem:[%s7098_s1 + $0x888] sm:$0xf]  ;;  %v527_v62 = vld [vmem:[%s7098_s1 + $0x830] sm:$0xff] }
  0x24   : > { %1048 = vmatpush.msra.mxu3 %v456_v35  ;;  %822 = vmatpush.msra.mxu1 %v455_v40  ;;  %v201_v58 = vld [vmem:[%s4844_s14] sm:$0xff]  ;;  %v418_v61 = vld [vmem:[%s7098_s1 + $0x4c8] sm:$0xff]  ;;  %v407_v63 = vld [vmem:[%s7098_s1 + $0x470] sm:$0xff] }
  0x25   : > { %933 = vmatpush.msra.mxu2 %v316_v37  ;;  %707 = vmatpush.msra.mxu0 %v315_v38  ;;  %v417_v60 = vld [vmem:[%s7098_s1 + $0x4c0] sm:$0xff]  ;;  %v528_v0 = vld [vmem:[%s7098_s1 + $0x838] sm:$0xff]  ;;  %v398_v4 = vld [vmem:[%s7098_s1 + $0x428] sm:$0xff] }
  0x26   : > { %1049 = vmatpush.msra.mxu3 %v446_v39  ;;  %823 = vmatpush.msra.mxu1 %v445_v44  ;;  %v204_v1 = vld [vmem:[%s4844_s14 + $0x18] sm:$0xff]  ;;  %v397_v3 = vld [vmem:[%s7098_s1 + $0x420] sm:$0xff]  ;;  %v4912_v5 = vld [vmem:[%s4844_s14 + $0x10] sm:$0xff] }
  0x27   : > { %934 = vmatpush.msra.mxu2 %v306_v41  ;;  %708 = vmatpush.msra.mxu0 %v305_v42  ;;  %v408_v2 = vld [vmem:[%s7098_s1 + $0x478] sm:$0xff]  ;;  %v517_v6 = vld [vmem:[%s7098_s1 + $0x7e0] sm:$0xff]  ;;  %v518_v7 = vld [vmem:[%s7098_s1 + $0x7e8] sm:$0xff] }
  0x28   : > { %1050 = vmatpush.msra.mxu3 %v436_v43  ;;  %824 = vmatpush.msra.mxu1 %v435_v48  ;;  %v206_v8 = vld [vmem:[%s4844_s14 + $0x28] sm:$0xff]  ;;  %v205_v9 = vld [vmem:[%s4844_s14 + $0x20] sm:$0xff]  ;;  %v387_v10 = vld [vmem:[%s7098_s1 + $0x3d0] sm:$0xff] }
  0x29   : > { %935 = vmatpush.msra.mxu2 %v296_v45  ;;  %709 = vmatpush.msra.mxu0 %v295_v46  ;;  %v388_v11 = vld [vmem:[%s7098_s1 + $0x3d8] sm:$0xff]  ;;  %v207_v13 = vld [vmem:[%s4844_s14 + $0x30] sm:$0xff]  ;;  %v210_v14 = vld [vmem:[%s4844_s14 + $0x48] sm:$0xff] }
  0x2a   : > { %1051 = vmatpush.msra.mxu3 %v426_v47  ;;  %825 = vmatpush.msra.mxu1 %v425_v52  ;;  %v208_v12 = vld [vmem:[%s4844_s14 + $0x38] sm:$0xff]  ;;  %v209_v15 = vld [vmem:[%s4844_s14 + $0x40] sm:$0xff]  ;;  %v507_v16 = vld [vmem:[%s7098_s1 + $0x790] sm:$0xff] }
  0x2b   : > { %936 = vmatpush.msra.mxu2 %v286_v49  ;;  %710 = vmatpush.msra.mxu0 %v285_v50  ;;  %v508_v17 = vld [vmem:[%s7098_s1 + $0x798] sm:$0xff]  ;;  %v377_v18 = vld [vmem:[%s7098_s1 + $0x380] sm:$0xff]  ;;  %v378_v20 = vld [vmem:[%s7098_s1 + $0x388] sm:$0xff] }
  0x2c   : > { %3891 = vmatmul.msk.f32.vlgmr.msra.gmra.mxu3 %vm569_vm1, %v202_v51  ;;  %3858 = vmatmul.msk.f32.vlgmr.msra.gmra.mxu1 %vm569_vm1, %v202_v51  ;;  %v212_v19 = vld [vmem:[%s4844_s14 + $0x58] sm:$0xff]  ;;  %v211_v21 = vld [vmem:[%s4844_s14 + $0x50] sm:$0xff]  ;;  %v214_v22 = vld [vmem:[%s4844_s14 + $0x68] sm:$0xff] }
  0x2d   : > { %937 = vmatpush.msra.mxu2 %v276_v53  ;;  %711 = vmatpush.msra.mxu0 %v275_v54  ;;  %v213_v23 = vld [vmem:[%s4844_s14 + $0x60] sm:$0xff]  ;;  %v367_v24 = vld [vmem:[%s7098_s1 + $0x330] sm:$0xff]  ;;  %v368_v25 = vld [vmem:[%s7098_s1 + $0x338] sm:$0xff] }
  0x2e   : > { %3923 = vmatpush.msk.msrb.mxu3 %vm666_vm0, %v537_v55  ;;  %1149 = vmatpush.msrb.mxu1 %v417_v60  ;;  %v497_v26 = vld [vmem:[%s7098_s1 + $0x740] sm:$0xff]  ;;  %v216_v27 = vld [vmem:[%s4844_s14 + $0x78] sm:$0xff]  ;;  %v498_v28 = vld [vmem:[%s7098_s1 + $0x748] sm:$0xff] }
  0x2f   : > { %938 = vmatpush.msra.mxu2 %v266_v56  ;;  %712 = vmatpush.msra.mxu0 %v265_v57  ;;  %v215_v29 = vld [vmem:[%s4844_s14 + $0x70] sm:$0xff]  ;;  %v218_v30 = vld [vmem:[%s4844_s14 + $0x88] sm:$0xff]  ;;  %v217_v31 = vld [vmem:[%s4844_s14 + $0x80] sm:$0xff] }
  0x30   : > { %939 = vmatmul.f32.vlgmr.msra.gmra.mxu2 %v201_v58  ;;  %713 = vmatmul.f32.vlgmr.msra.gmra.mxu0 %v201_v58  ;;  %v357_v32 = vld [vmem:[%s7098_s1 + $0x2e0] sm:$0xff]  ;;  %v358_v33 = vld [vmem:[%s7098_s1 + $0x2e8] sm:$0xff]  ;;  %v220_v34 = vld [vmem:[%s4844_s14 + $0x98] sm:$0xff] }
  0x31   : > { %3956 = vmatpush.msk.msrb.mxu2 %vm666_vm0, %v538_v59  ;;  %1375 = vmatpush.msrb.mxu0 %v418_v61  ;;  %v219_v35 = vld [vmem:[%s4844_s14 + $0x90] sm:$0xff]  ;;  %v488_v37 = vld [vmem:[%s7098_s1 + $0x6f8] sm:$0xff]  ;;  %v222_v38 = vld [vmem:[%s4844_s14 + $0xa8] sm:$0xff] }
  0x32   : > { %1267 = vmatpush.msrb.mxu3 %v527_v62  ;;  %1150 = vmatpush.msrb.mxu1 %v407_v63  ;;  %v487_v36 = vld [vmem:[%s7098_s1 + $0x6f0] sm:$0xff]  ;;  %v221_v39 = vld [vmem:[%s4844_s14 + $0xa0] sm:$0xff]  ;;  %v348_v41 = vld [vmem:[%s7098_s1 + $0x298] sm:$0xff] }
  0x33   : > { %1493 = vmatpush.msrb.mxu2 %v528_v0  ;;  %1376 = vmatpush.msrb.mxu0 %v408_v2  ;;  %v347_v40 = vld [vmem:[%s7098_s1 + $0x290] sm:$0xff]  ;;  %v224_v42 = vld [vmem:[%s4844_s14 + $0xb8] sm:$0xff]  ;;  %v226_v44 = vld [vmem:[%s4844_s14 + $0xc8] sm:$0xff] }
  0x34   : > { %3892 = vmatmul.msk.f32.gmra.mxu3 %vm569_vm1, %v204_v1  ;;  %1151 = vmatpush.msrb.mxu1 %v397_v3  ;;  %v223_v43 = vld [vmem:[%s4844_s14 + $0xb0] sm:$0xff]  ;;  %v225_v45 = vld [vmem:[%s4844_s14 + $0xc0] sm:$0xff]  ;;  %v478_v47 = vld [vmem:[%s7098_s1 + $0x6a8] sm:$0xff] }
  0x35   : > { %3859 = vmatmul.msk.f32.gmra.mxu1 %vm569_vm1, %v204_v1  ;;  %1377 = vmatpush.msrb.mxu0 %v398_v4  ;;  %v477_v46 = vld [vmem:[%s7098_s1 + $0x6a0] sm:$0xff]  ;;  %v228_v48 = vld [vmem:[%s4844_s14 + $0xd8] sm:$0xff]  ;;  %v227_v49 = vld [vmem:[%s4844_s14 + $0xd0] sm:$0xff] }
  0x36   : > { %1268 = vmatpush.msrb.mxu3 %v517_v6  ;;  %1494 = vmatpush.msrb.mxu2 %v518_v7  ;;  %v230_v50 = vld [vmem:[%s4844_s14 + $0xe8] sm:$0xff]  ;;  %v337_v51 = vld [vmem:[%s7098_s1 + $0x240] sm:$0xff]  ;;  %v232_v54 = vld [vmem:[%s4844_s14 + $0xf8] sm:$0xff] }
  0x37   : > { %1152 = vmatpush.msrb.mxu1 %v387_v10  ;;  %1378 = vmatpush.msrb.mxu0 %v388_v11  ;;  %v338_v52 = vld [vmem:[%s7098_s1 + $0x248] sm:$0xff]  ;;  %v229_v53 = vld [vmem:[%s4844_s14 + $0xe0] sm:$0xff]  ;;  %v231_v55 = vld [vmem:[%s4844_s14 + $0xf0] sm:$0xff] }
  0x38   : > { %942 = vmatmul.f32.gmra.mxu2 %v4912_v5  ;;  %716 = vmatmul.f32.gmra.mxu0 %v4912_v5  ;;  %v545_v56 = vld [vmem:[%s7099_s2] sm:$0xff]  ;;  %v234_v57 = vld [vmem:[%s4844_s14 + $0x108] sm:$0xff]  ;;  %v327_v59 = vld [vmem:[%s7098_s1 + $0x1f0] sm:$0xff] }
  0x39   : > { %1269 = vmatpush.msrb.mxu3 %v507_v16  ;;  %1495 = vmatpush.msrb.mxu2 %v508_v17  ;;  %v5043_v58 = vperm.slane %v545_v56, 0  ;;  %v328_v60 = vld [vmem:[%s7098_s1 + $0x1f8] sm:$0xff]  ;;  %v467_v61 = vld [vmem:[%s7098_s1 + $0x650] sm:$0xff]  ;;  %v233_v1 = vld [vmem:[%s4844_s14 + $0x100] sm:$0xff]  ;;  %v5062_v6 = vperm.slane %v545_v56, 1 }
  0x3a   : > { %1153 = vmatpush.msrb.mxu1 %v377_v18  ;;  %1379 = vmatpush.msrb.mxu0 %v378_v20  ;;  %v468_v63 = vld [vmem:[%s7098_s1 + $0x658] sm:$0xff] }
  0x3b   : > { %1270 = vmatpush.msrb.mxu3 %v497_v26  ;;  %1496 = vmatpush.msrb.mxu2 %v498_v28  ;;  %v236_v7 = vld [vmem:[%s4844_s14 + $0x118] sm:$0xff] }
  0x3c   : > { %3893 = vmatmul.msk.f32.gmra.mxu3 %vm569_vm1, %v206_v8  ;;  %1154 = vmatpush.msrb.mxu1 %v367_v24 }
  0x3d   : > { %3860 = vmatmul.msk.f32.gmra.mxu1 %vm569_vm1, %v206_v8  ;;  %1380 = vmatpush.msrb.mxu0 %v368_v25 }
  0x3e   : > { %1155 = vmatpush.msrb.mxu1 %v357_v32  ;;  %1271 = vmatpush.msrb.mxu3 %v487_v36  ;;  %v458_v36 = vld [vmem:[%s7098_s1 + $0x608] sm:$0xff] }
  0x3f   : > { %1381 = vmatpush.msrb.mxu0 %v358_v33  ;;  %1497 = vmatpush.msrb.mxu2 %v488_v37  ;;  %v240_v33 = vld [vmem:[%s4844_s14 + $0x138] sm:$0xff] }
  0x40   : > { %945 = vmatmul.f32.gmra.mxu2 %v205_v9  ;;  %719 = vmatmul.f32.gmra.mxu0 %v205_v9 }
  0x41   : > { %1156 = vmatpush.msrb.mxu1 %v347_v40  ;;  %1382 = vmatpush.msrb.mxu0 %v348_v41  ;;  %v239_v41 = vld [vmem:[%s4844_s14 + $0x130] sm:$0xff] }
  0x42   : > { %1272 = vmatpush.msrb.mxu3 %v477_v46  ;;  %1498 = vmatpush.msrb.mxu2 %v478_v47  ;;  %v242_v47 = vld [vmem:[%s4844_s14 + $0x148] sm:$0xff] }
  0x43   : > { %1157 = vmatpush.msrb.mxu1 %v337_v51  ;;  %1383 = vmatpush.msrb.mxu0 %v338_v52 }
  0x44   : > { %3894 = vmatmul.msk.f32.gmra.mxu3 %vm569_vm1, %v208_v12  ;;  %1499 = vmatpush.msrb.mxu2 %v468_v63 }
  0x45   : > { %3861 = vmatmul.msk.f32.gmra.mxu1 %vm569_vm1, %v208_v12  ;;  %1384 = vmatpush.msrb.mxu0 %v328_v60 }
  0x46   : > { %1158 = vmatpush.msrb.mxu1 %v327_v59  ;;  %1273 = vmatpush.msrb.mxu3 %v467_v61 }
  0x47   : > { %1500 = vmatpush.msrb.mxu2 %v458_v36 }
  0x48   : > { %948 = vmatmul.f32.gmra.mxu2 %v207_v13  ;;  %722 = vmatmul.f32.gmra.mxu0 %v207_v13  ;;  %v235_v13 = vld [vmem:[%s4844_s14 + $0x110] sm:$0xff] }
  0x4c   : > { %3895 = vmatmul.msk.f32.gmra.mxu3 %vm569_vm1, %v210_v14 }
  0x4d   : > { %3862 = vmatmul.msk.f32.gmra.mxu1 %vm569_vm1, %v210_v14 }
  0x50   : > { %951 = vmatmul.f32.gmra.mxu2 %v209_v15  ;;  %725 = vmatmul.f32.gmra.mxu0 %v209_v15 }
  0x54   : > { %3896 = vmatmul.msk.f32.gmra.mxu3 %vm569_vm1, %v212_v19 }
  0x55   : > { %3863 = vmatmul.msk.f32.gmra.mxu1 %vm569_vm1, %v212_v19  ;;  %v238_v19 = vld [vmem:[%s4844_s14 + $0x128] sm:$0xff] }
  0x58   : > { %954 = vmatmul.f32.gmra.mxu2 %v211_v21  ;;  %728 = vmatmul.f32.gmra.mxu0 %v211_v21  ;;  %v317_v21 = vld [vmem:[%s7098_s1 + $0x1a0] sm:$0xff] }
  0x59   : > { %1159 = vmatpush.msrb.mxu1 %v317_v21 }
  0x5c   : > { %3897 = vmatmul.msk.f32.gmra.mxu3 %vm569_vm1, %v214_v22 }
  0x5d   : > { %3864 = vmatmul.msk.f32.gmra.mxu1 %vm569_vm1, %v214_v22  ;;  %v318_v22 = vld [vmem:[%s7098_s1 + $0x1a8] sm:$0xff] }
  0x5e   : > { %1385 = vmatpush.msrb.mxu0 %v318_v22  ;;  %v245_v22 = vld [vmem:[%s4844_s14 + $0x160] sm:$0xff] }
  0x60   : > { %957 = vmatmul.f32.gmra.mxu2 %v213_v23  ;;  %731 = vmatmul.f32.gmra.mxu0 %v213_v23 }
  0x64   : > { %3898 = vmatmul.msk.f32.gmra.mxu3 %vm569_vm1, %v216_v27 }
  0x65   : > { %3865 = vmatmul.msk.f32.gmra.mxu1 %vm569_vm1, %v216_v27  ;;  %v237_v27 = vld [vmem:[%s4844_s14 + $0x120] sm:$0xff] }
  0x68   : > { %960 = vmatmul.f32.gmra.mxu2 %v215_v29  ;;  %734 = vmatmul.f32.gmra.mxu0 %v215_v29 }
  0x6c   : > { %3899 = vmatmul.msk.f32.gmra.mxu3 %vm569_vm1, %v218_v30 }
  0x6d   : > { %3866 = vmatmul.msk.f32.gmra.mxu1 %vm569_vm1, %v218_v30 }
  0x70   : > { %963 = vmatmul.f32.gmra.mxu2 %v217_v31  ;;  %737 = vmatmul.f32.gmra.mxu0 %v217_v31 }
  0x74   : > { %3900 = vmatmul.msk.f32.gmra.mxu3 %vm569_vm1, %v220_v34 }
  0x75   : > { %3867 = vmatmul.msk.f32.gmra.mxu1 %vm569_vm1, %v220_v34 }
  0x78   : > { %966 = vmatmul.f32.gmra.mxu2 %v219_v35  ;;  %740 = vmatmul.f32.gmra.mxu0 %v219_v35  ;;  %v457_v35 = vld [vmem:[%s7098_s1 + $0x600] sm:$0xff] }
  0x79   : > { %1274 = vmatpush.msrb.mxu3 %v457_v35 }
  0x7c   : > { %3901 = vmatmul.msk.f32.gmra.mxu3 %vm569_vm1, %v222_v38 }
  0x7d   : > { %3868 = vmatmul.msk.f32.gmra.mxu1 %vm569_vm1, %v222_v38 }
  0x80   : > { %969 = vmatmul.f32.gmra.mxu2 %v221_v39  ;;  %743 = vmatmul.f32.gmra.mxu0 %v221_v39 }
  0x84   : > { %3902 = vmatmul.msk.f32.gmra.mxu3 %vm569_vm1, %v224_v42 }
  0x85   : > { %3869 = vmatmul.msk.f32.gmra.mxu1 %vm569_vm1, %v224_v42 }
  0x88   : > { %972 = vmatmul.f32.gmra.mxu2 %v223_v43  ;;  %746 = vmatmul.f32.gmra.mxu0 %v223_v43 }
  0x8c   : > { %3903 = vmatmul.msk.f32.gmra.mxu3 %vm569_vm1, %v226_v44 }
  0x8d   : > { %3870 = vmatmul.msk.f32.gmra.mxu1 %vm569_vm1, %v226_v44 }
  0x90   : > { %975 = vmatmul.f32.gmra.mxu2 %v225_v45  ;;  %749 = vmatmul.f32.gmra.mxu0 %v225_v45 }
  0x94   : > { %3904 = vmatmul.msk.f32.gmra.mxu3 %vm569_vm1, %v228_v48 }
  0x95   : > { %3871 = vmatmul.msk.f32.gmra.mxu1 %vm569_vm1, %v228_v48 }
  0x98   : > { %978 = vmatmul.f32.gmra.mxu2 %v227_v49  ;;  %752 = vmatmul.f32.gmra.mxu0 %v227_v49  ;;  %v307_v49 = vld [vmem:[%s7098_s1 + $0x150] sm:$0xff] }
  0x99   : > { %1160 = vmatpush.msrb.mxu1 %v307_v49 }
  0x9c   : > { %3905 = vmatmul.msk.f32.gmra.mxu3 %vm569_vm1, %v230_v50 }
  0x9d   : > { %3872 = vmatmul.msk.f32.gmra.mxu1 %vm569_vm1, %v230_v50  ;;  %v308_v50 = vld [vmem:[%s7098_s1 + $0x158] sm:$0xff] }
  0x9e   : > { %1386 = vmatpush.msrb.mxu0 %v308_v50  ;;  %v249_v50 = vld [vmem:[%s4844_s14 + $0x180] sm:$0xff] }
  0xa0   : > { %981 = vmatmul.f32.gmra.mxu2 %v229_v53  ;;  %755 = vmatmul.f32.gmra.mxu0 %v229_v53 }
  0xa4   : > { %3906 = vmatmul.msk.f32.gmra.mxu3 %vm569_vm1, %v232_v54 }
  0xa5   : > { %3873 = vmatmul.msk.f32.gmra.mxu1 %vm569_vm1, %v232_v54 }
  0xa8   : > { %984 = vmatmul.f32.gmra.mxu2 %v231_v55  ;;  %758 = vmatmul.f32.gmra.mxu0 %v231_v55  ;;  %v241_v55 = vld [vmem:[%s4844_s14 + $0x140] sm:$0xff] }
  0xa9   : > { %v827_v62 = vpop.f32.mrf.mxu1 }
  0xac   : > { %3907 = vmatmul.msk.f32.gmra.mxu3 %vm569_vm1, %v234_v57 }
  0xad   : > { %v714_v0 = vpop.f32.mrf.mxu0  ;;  %3874 = vmatmul.msk.f32.gmra.mxu1 %vm569_vm1, %v234_v57 }
  0xae   : > { %v715_v2 = vadd.f32 %v714_v0, %v5043_v58  ;;  %v447_v0 = vld [vmem:[%s7098_s1 + $0x5b0] sm:$0xff] }
  0xaf   : > { %v1053_v3 = vpop.f32.mrf.mxu3  ;;  %1275 = vmatpush.msrb.mxu3 %v447_v0 }
  0xb0   : > { %987 = vmatmul.f32.gmra.mxu2 %v233_v1  ;;  %v828_v4 = vadd.f32 %v827_v62, %v715_v2  ;;  %761 = vmatmul.f32.gmra.mxu0 %v233_v1  ;;  %v244_v62 = vld [vmem:[%s4844_s14 + $0x158] sm:$0xff] }
  0xb1   : > { %v448_v1 = vld [vmem:[%s7098_s1 + $0x5b8] sm:$0xff] }
  0xb2   : > { %v2957_v8 = vmax.f32 %v828_v4, 0.0  ;;  %v830_v10 = vpop.f32.mrf.mxu1  ;;  %1501 = vmatpush.msrb.mxu2 %v448_v1 }
  0xb3   : > { %v940_v9 = vpop.f32.mrf.mxu2 }
  0xb4   : > { %3277 = vst [vmem:[%s5065_s9] sm:$0xff] %v2957_v8  ;;  %v941_v11 = vadd.f32 %v940_v9, %v5062_v6  ;;  %3908 = vmatmul.msk.f32.gmra.mxu3 %vm569_vm1, %v236_v7  ;;  %v243_v8 = vld [vmem:[%s4844_s14 + $0x150] sm:$0xff] }
  0xb5   : > { %v717_v12 = vpop.f32.mrf.mxu0  ;;  %3875 = vmatmul.msk.f32.gmra.mxu1 %vm569_vm1, %v236_v7 }
  0xb6   : > { %v1054_v14 = vadd.f32 %v1053_v3, %v941_v11  ;;  %v718_v15 = vadd.f32 %v717_v12, %v5043_v58 }
  0xb7   : > { %v1056_v16 = vpop.f32.mrf.mxu3 }
  0xb8   : > { %v2958_v17 = vmax.f32 %v1054_v14, 0.0  ;;  %990 = vmatmul.f32.gmra.mxu2 %v235_v13  ;;  %v831_v18 = vadd.f32 %v830_v10, %v718_v15  ;;  %764 = vmatmul.f32.gmra.mxu0 %v235_v13  ;;  %v246_v14 = vld [vmem:[%s4844_s14 + $0x168] sm:$0xff] }
  0xba   : > { %3278 = vst [vmem:[%s5065_s9 + $0x8] sm:$0xff] %v2958_v17  ;;  %v2967_v20 = vmax.f32 %v831_v18, 0.0  ;;  %v833_v24 = vpop.f32.mrf.mxu1  ;;  %v298_v17 = vld [vmem:[%s7098_s1 + $0x108] sm:$0xff] }
  0xbb   : > { %v943_v23 = vpop.f32.mrf.mxu2  ;;  %1387 = vmatpush.msrb.mxu0 %v298_v17 }
  0xbc   : > { %3288 = vst [vmem:[%s5065_s9 + $0x50] sm:$0xff] %v2967_v20  ;;  %v944_v25 = vadd.f32 %v943_v23, %v5062_v6  ;;  %3909 = vmatmul.msk.f32.gmra.mxu3 %vm569_vm1, %v238_v19 }
  0xbd   : > { %v720_v26 = vpop.f32.mrf.mxu0  ;;  %3876 = vmatmul.msk.f32.gmra.mxu1 %vm569_vm1, %v238_v19 }
  0xbe   : > { %v1057_v28 = vadd.f32 %v1056_v16, %v944_v25  ;;  %v721_v29 = vadd.f32 %v720_v26, %v5043_v58  ;;  %v297_v16 = vld [vmem:[%s7098_s1 + $0x100] sm:$0xff] }
  0xbf   : > { %v1059_v30 = vpop.f32.mrf.mxu3  ;;  %1161 = vmatpush.msrb.mxu1 %v297_v16 }
  0xc0   : > { %v2968_v31 = vmax.f32 %v1057_v28, 0.0  ;;  %993 = vmatmul.f32.gmra.mxu2 %v237_v27  ;;  %v834_v32 = vadd.f32 %v833_v24, %v721_v29  ;;  %767 = vmatmul.f32.gmra.mxu0 %v237_v27  ;;  %v248_v28 = vld [vmem:[%s4844_s14 + $0x178] sm:$0xff] }
  0xc2   : > { %3289 = vst [vmem:[%s5065_s9 + $0x58] sm:$0xff] %v2968_v31  ;;  %v2977_v34 = vmax.f32 %v834_v32, 0.0  ;;  %v836_v38 = vpop.f32.mrf.mxu1 }
  0xc3   : > { %v946_v37 = vpop.f32.mrf.mxu2 }
  0xc4   : > { %3298 = vst [vmem:[%s5065_s9 + $0xa0] sm:$0xff] %v2977_v34  ;;  %v947_v39 = vadd.f32 %v946_v37, %v5062_v6  ;;  %3910 = vmatmul.msk.f32.gmra.mxu3 %vm569_vm1, %v240_v33  ;;  %v247_v34 = vld [vmem:[%s4844_s14 + $0x170] sm:$0xff] }
  0xc5   : > { %v723_v40 = vpop.f32.mrf.mxu0  ;;  %3877 = vmatmul.msk.f32.gmra.mxu1 %vm569_vm1, %v240_v33 }
  0xc6   : > { %v1060_v42 = vadd.f32 %v1059_v30, %v947_v39  ;;  %v724_v43 = vadd.f32 %v723_v40, %v5043_v58  ;;  %v250_v40 = vld [vmem:[%s4844_s14 + $0x188] sm:$0xff] }
  0xc7   : > { %v1062_v44 = vpop.f32.mrf.mxu3 }
  0xc8   : > { %v2978_v45 = vmax.f32 %v1060_v42, 0.0  ;;  %996 = vmatmul.f32.gmra.mxu2 %v239_v41  ;;  %v837_v46 = vadd.f32 %v836_v38, %v724_v43  ;;  %770 = vmatmul.f32.gmra.mxu0 %v239_v41  ;;  %v287_v42 = vld [vmem:[%s7098_s1 + $0xb0] sm:$0xff]  ;;  %v288_v43 = vld [vmem:[%s7098_s1 + $0xb8] sm:$0xff] }
  0xc9   : > { %1162 = vmatpush.msrb.mxu1 %v287_v42  ;;  %1388 = vmatpush.msrb.mxu0 %v288_v43  ;;  %v257_v43 = vld [vmem:[%s4844_s14 + $0x1c0] sm:$0xff] }
  0xca   : > { %3299 = vst [vmem:[%s5065_s9 + $0xa8] sm:$0xff] %v2978_v45  ;;  %v2987_v48 = vmax.f32 %v837_v46, 0.0  ;;  %v839_v52 = vpop.f32.mrf.mxu1 }
  0xcb   : > { %v949_v51 = vpop.f32.mrf.mxu2 }
  0xcc   : > { %3308 = vst [vmem:[%s5065_s9 + $0xf0] sm:$0xff] %v2987_v48  ;;  %v950_v53 = vadd.f32 %v949_v51, %v5062_v6  ;;  %3911 = vmatmul.msk.f32.gmra.mxu3 %vm569_vm1, %v242_v47 }
  0xcd   : > { %v726_v54 = vpop.f32.mrf.mxu0  ;;  %3878 = vmatmul.msk.f32.gmra.mxu1 %vm569_vm1, %v242_v47  ;;  %v438_v47 = vld [vmem:[%s7098_s1 + $0x568] sm:$0xff] }
  0xce   : > { %v1063_v56 = vadd.f32 %v1062_v44, %v950_v53  ;;  %v727_v57 = vadd.f32 %v726_v54, %v5043_v58  ;;  %v437_v44 = vld [vmem:[%s7098_s1 + $0x560] sm:$0xff]  ;;  %1502 = vmatpush.msrb.mxu2 %v438_v47 }
  0xcf   : > { %v1065_v59 = vpop.f32.mrf.mxu3  ;;  %1276 = vmatpush.msrb.mxu3 %v437_v44 }
  0xd0   : > { %v2988_v60 = vmax.f32 %v1063_v56, 0.0  ;;  %999 = vmatmul.f32.gmra.mxu2 %v241_v55  ;;  %v840_v61 = vadd.f32 %v839_v52, %v727_v57  ;;  %773 = vmatmul.f32.gmra.mxu0 %v241_v55  ;;  %v252_v56 = vld [vmem:[%s4844_s14 + $0x198] sm:$0xff] }
  0xd2   : > { %3309 = vst [vmem:[%s5065_s9 + $0xf8] sm:$0xff] %v2988_v60  ;;  %v2997_v63 = vmax.f32 %v840_v61, 0.0  ;;  %v842_v3 = vpop.f32.mrf.mxu1 }
  0xd3   : > { %v952_v2 = vpop.f32.mrf.mxu2 }
  0xd4   : > { %3318 = vst [vmem:[%s5065_s9 + $0x140] sm:$0xff] %v2997_v63  ;;  %v953_v4 = vadd.f32 %v952_v2, %v5062_v6  ;;  %3912 = vmatmul.msk.f32.gmra.mxu3 %vm569_vm1, %v244_v62  ;;  %v251_v63 = vld [vmem:[%s4844_s14 + $0x190] sm:$0xff] }
  0xd5   : > { %v729_v7 = vpop.f32.mrf.mxu0  ;;  %3879 = vmatmul.msk.f32.gmra.mxu1 %vm569_vm1, %v244_v62 }
  0xd6   : > { %v1066_v9 = vadd.f32 %v1065_v59, %v953_v4  ;;  %v730_v10 = vadd.f32 %v729_v7, %v5043_v58  ;;  %v254_v7 = vld [vmem:[%s4844_s14 + $0x1a8] sm:$0xff] }
  0xd7   : > { %v1068_v11 = vpop.f32.mrf.mxu3 }
  0xd8   : > { %v2998_v12 = vmax.f32 %v1066_v9, 0.0  ;;  %1002 = vmatmul.f32.gmra.mxu2 %v243_v8  ;;  %v843_v13 = vadd.f32 %v842_v3, %v730_v10  ;;  %776 = vmatmul.f32.gmra.mxu0 %v243_v8  ;;  %v277_v9 = vld [vmem:[%s7098_s1 + $0x60] sm:$0xff]  ;;  %v278_v10 = vld [vmem:[%s7098_s1 + $0x68] sm:$0xff] }
  0xd9   : > { %1163 = vmatpush.msrb.mxu1 %v277_v9  ;;  %1389 = vmatpush.msrb.mxu0 %v278_v10  ;;  %v261_v10 = vld [vmem:[%s4844_s14 + $0x1e0] sm:$0xff] }
  0xda   : > { %3319 = vst [vmem:[%s5065_s9 + $0x148] sm:$0xff] %v2998_v12  ;;  %v3007_v15 = vmax.f32 %v843_v13, 0.0  ;;  %v845_v19 = vpop.f32.mrf.mxu1 }
  0xdb   : > { %v955_v18 = vpop.f32.mrf.mxu2 }
  0xdc   : > { %3328 = vst [vmem:[%s5065_s9 + $0x190] sm:$0xff] %v3007_v15  ;;  %v956_v20 = vadd.f32 %v955_v18, %v5062_v6  ;;  %3913 = vmatmul.msk.f32.gmra.mxu3 %vm569_vm1, %v246_v14  ;;  %v253_v15 = vld [vmem:[%s4844_s14 + $0x1a0] sm:$0xff] }
  0xdd   : > { %v732_v21 = vpop.f32.mrf.mxu0  ;;  %3880 = vmatmul.msk.f32.gmra.mxu1 %vm569_vm1, %v246_v14 }
  0xde   : > { %v1069_v23 = vadd.f32 %v1068_v11, %v956_v20  ;;  %v733_v24 = vadd.f32 %v732_v21, %v5043_v58  ;;  %v256_v21 = vld [vmem:[%s4844_s14 + $0x1b8] sm:$0xff] }
  0xdf   : > { %v1071_v25 = vpop.f32.mrf.mxu3 }
  0xe0   : > { %v3008_v26 = vmax.f32 %v1069_v23, 0.0  ;;  %1005 = vmatmul.f32.gmra.mxu2 %v245_v22  ;;  %v846_v27 = vadd.f32 %v845_v19, %v733_v24  ;;  %779 = vmatmul.f32.gmra.mxu0 %v245_v22  ;;  %v427_v23 = vld [vmem:[%s7098_s1 + $0x510] sm:$0xff]  ;;  %v428_v24 = vld [vmem:[%s7098_s1 + $0x518] sm:$0xff] }
  0xe1   : > { %1277 = vmatpush.msrb.mxu3 %v427_v23  ;;  %1503 = vmatpush.msrb.mxu2 %v428_v24 }
  0xe2   : > { %3329 = vst [vmem:[%s5065_s9 + $0x198] sm:$0xff] %v3008_v26  ;;  %v3017_v29 = vmax.f32 %v846_v27, 0.0  ;;  %v848_v31 = vpop.f32.mrf.mxu1 }
  0xe3   : > { %v958_v30 = vpop.f32.mrf.mxu2 }
  0xe4   : > { %3338 = vst [vmem:[%s5065_s9 + $0x1e0] sm:$0xff] %v3017_v29  ;;  %v959_v32 = vadd.f32 %v958_v30, %v5062_v6  ;;  %3914 = vmatmul.msk.f32.gmra.mxu3 %vm569_vm1, %v248_v28  ;;  %v255_v29 = vld [vmem:[%s4844_s14 + $0x1b0] sm:$0xff] }
  0xe5   : > { %v735_v33 = vpop.f32.mrf.mxu0  ;;  %3881 = vmatmul.msk.f32.gmra.mxu1 %vm569_vm1, %v248_v28 }
  0xe6   : > { %v1072_v35 = vadd.f32 %v1071_v25, %v959_v32  ;;  %v736_v36 = vadd.f32 %v735_v33, %v5043_v58 }
  0xe7   : > { %v1074_v37 = vpop.f32.mrf.mxu3 }
  0xe8   : > { %v3018_v38 = vmax.f32 %v1072_v35, 0.0  ;;  %1008 = vmatmul.f32.gmra.mxu2 %v247_v34  ;;  %v849_v39 = vadd.f32 %v848_v31, %v736_v36  ;;  %782 = vmatmul.f32.gmra.mxu0 %v247_v34  ;;  %v258_v35 = vld [vmem:[%s4844_s14 + $0x1c8] sm:$0xff] }
  0xea   : > { %3339 = vst [vmem:[%s5065_s9 + $0x1e8] sm:$0xff] %v3018_v38  ;;  %v3027_v41 = vmax.f32 %v849_v39, 0.0  ;;  %v851_v46 = vpop.f32.mrf.mxu1  ;;  %v268_v38 = vld [vmem:[%s7098_s1 + $0x18] sm:$0xff] }
  0xeb   : > { %v961_v45 = vpop.f32.mrf.mxu2  ;;  %1390 = vmatpush.msrb.mxu0 %v268_v38 }
  0xec   : > { %3348 = vst [vmem:[%s5065_s9 + $0x230] sm:$0xff] %v3027_v41  ;;  %v962_v48 = vadd.f32 %v961_v45, %v5062_v6  ;;  %3915 = vmatmul.msk.f32.gmra.mxu3 %vm569_vm1, %v250_v40 }
  0xed   : > { %v738_v49 = vpop.f32.mrf.mxu0  ;;  %3882 = vmatmul.msk.f32.gmra.mxu1 %vm569_vm1, %v250_v40 }
  0xee   : > { %v1075_v51 = vadd.f32 %v1074_v37, %v962_v48  ;;  %v739_v52 = vadd.f32 %v738_v49, %v5043_v58  ;;  %v267_v37 = vld [vmem:[%s7098_s1 + $0x10] sm:$0xff]  ;;  %v260_v49 = vld [vmem:[%s4844_s14 + $0x1d8] sm:$0xff] }
  0xef   : > { %v1077_v53 = vpop.f32.mrf.mxu3  ;;  %1164 = vmatpush.msrb.mxu1 %v267_v37 }
  0xf0   : > { %v3028_v54 = vmax.f32 %v1075_v51, 0.0  ;;  %1011 = vmatmul.f32.gmra.mxu2 %v249_v50  ;;  %v852_v55 = vadd.f32 %v851_v46, %v739_v52  ;;  %785 = vmatmul.f32.gmra.mxu0 %v249_v50  ;;  %v539_v51 = vld [vmem:[%s7098_s1 + $0x890] sm:$0xf]  ;;  %v540_v52 = vld [vmem:[%s7098_s1 + $0x898] sm:$0xf] }
  0xf1   : > { %3989 = vmatpush.msk.msra.mxu3 %vm666_vm0, %v539_v51  ;;  %4022 = vmatpush.msk.msra.mxu2 %vm666_vm0, %v540_v52 }
  0xf2   : > { %3349 = vst [vmem:[%s5065_s9 + $0x238] sm:$0xff] %v3028_v54  ;;  %v3037_v57 = vmax.f32 %v852_v55, 0.0  ;;  %v854_v60 = vpop.f32.mrf.mxu1 }
  0xf3   : > { %v964_v59 = vpop.f32.mrf.mxu2 }
  0xf4   : > { %3358 = vst [vmem:[%s5065_s9 + $0x280] sm:$0xff] %v3037_v57  ;;  %v965_v61 = vadd.f32 %v964_v59, %v5062_v6  ;;  %3916 = vmatmul.msk.f32.gmra.mxu3 %vm569_vm1, %v252_v56  ;;  %v259_v57 = vld [vmem:[%s4844_s14 + $0x1d0] sm:$0xff] }
  0xf5   : > { %v741_v62 = vpop.f32.mrf.mxu0  ;;  %3883 = vmatmul.msk.f32.gmra.mxu1 %vm569_vm1, %v252_v56 }
  0xf6   : > { %v1078_v0 = vadd.f32 %v1077_v53, %v965_v61  ;;  %v742_v1 = vadd.f32 %v741_v62, %v5043_v58 }
  0xf7   : > { %v1080_v2 = vpop.f32.mrf.mxu3 }
  0xf8   : > { %v3038_v3 = vmax.f32 %v1078_v0, 0.0  ;;  %1014 = vmatmul.f32.gmra.mxu2 %v251_v63  ;;  %v855_v4 = vadd.f32 %v854_v60, %v742_v1  ;;  %788 = vmatmul.f32.gmra.mxu0 %v251_v63  ;;  %v262_v0 = vld [vmem:[%s4844_s14 + $0x1e8] sm:$0xff] }
  0xfa   : > { %3359 = vst [vmem:[%s5065_s9 + $0x288] sm:$0xff] %v3038_v3  ;;  %v3047_v8 = vmax.f32 %v855_v4, 0.0  ;;  %v857_v12 = vpop.f32.mrf.mxu1  ;;  %v420_v3 = vld [vmem:[%s7098_s1 + $0x4d8] sm:$0xff] }
  0xfb   : > { %v967_v11 = vpop.f32.mrf.mxu2  ;;  %1827 = vmatpush.msra.mxu0 %v420_v3 }
  0xfc   : > { %3368 = vst [vmem:[%s5065_s9 + $0x2d0] sm:$0xff] %v3047_v8  ;;  %v968_v13 = vadd.f32 %v967_v11, %v5062_v6  ;;  %3917 = vmatmul.msk.f32.gmra.mxu3 %vm569_vm1, %v254_v7 }
  0xfd   : > { %v744_v14 = vpop.f32.mrf.mxu0  ;;  %3884 = vmatmul.msk.f32.gmra.mxu1 %vm569_vm1, %v254_v7 }
  0xfe   : > { %v1081_v16 = vadd.f32 %v1080_v2, %v968_v13  ;;  %v745_v17 = vadd.f32 %v744_v14, %v5043_v58  ;;  %v419_v2 = vld [vmem:[%s7098_s1 + $0x4d0] sm:$0xff] }
  0xff   : > { %v1083_v18 = vpop.f32.mrf.mxu3  ;;  %1601 = vmatpush.msra.mxu1 %v419_v2  ;;  %v4297_v2 = vld [vmem:[%s4844_s14 + $0x20] sm:$0xff] }
 0x100   : > { %v3048_v19 = vmax.f32 %v1081_v16, 0.0  ;;  %1017 = vmatmul.f32.gmra.mxu2 %v253_v15  ;;  %v858_v20 = vadd.f32 %v857_v12, %v745_v17  ;;  %791 = vmatmul.f32.gmra.mxu0 %v253_v15  ;;  %v264_v16 = vld [vmem:[%s4844_s14 + $0x1f8] sm:$0xff] }
 0x102   : > { %3369 = vst [vmem:[%s5065_s9 + $0x2d8] sm:$0xff] %v3048_v19  ;;  %v3057_v22 = vmax.f32 %v858_v20, 0.0  ;;  %v860_v26 = vpop.f32.mrf.mxu1 }
 0x103   : > { %v970_v25 = vpop.f32.mrf.mxu2 }
 0x104   : > { %3378 = vst [vmem:[%s5065_s9 + $0x320] sm:$0xff] %v3057_v22  ;;  %v971_v27 = vadd.f32 %v970_v25, %v5062_v6  ;;  %3918 = vmatmul.msk.f32.gmra.mxu3 %vm569_vm1, %v256_v21  ;;  %v263_v22 = vld [vmem:[%s4844_s14 + $0x1f0] sm:$0xff] }
 0x105   : > { %v747_v28 = vpop.f32.mrf.mxu0  ;;  %3885 = vmatmul.msk.f32.gmra.mxu1 %vm569_vm1, %v256_v21 }
 0x106   : > { %v1084_v30 = vadd.f32 %v1083_v18, %v971_v27  ;;  %v748_v31 = vadd.f32 %v747_v28, %v5043_v58 }
 0x107   : > { %v1086_v32 = vpop.f32.mrf.mxu3 }
 0x108   : > { %v3058_v33 = vmax.f32 %v1084_v30, 0.0  ;;  %1020 = vmatmul.f32.gmra.mxu2 %v255_v29  ;;  %v861_v34 = vadd.f32 %v860_v26, %v748_v31  ;;  %794 = vmatmul.f32.gmra.mxu0 %v255_v29  ;;  %v409_v29 = vld [vmem:[%s7098_s1 + $0x480] sm:$0xff]  ;;  %v410_v30 = vld [vmem:[%s7098_s1 + $0x488] sm:$0xff] }
 0x109   : > { %v529_v31 = vld [vmem:[%s7098_s1 + $0x840] sm:$0xff]  ;;  %1602 = vmatpush.msra.mxu1 %v409_v29  ;;  %1828 = vmatpush.msra.mxu0 %v410_v30 }
 0x10a   : > { %3379 = vst [vmem:[%s5065_s9 + $0x328] sm:$0xff] %v3058_v33  ;;  %v3067_v36 = vmax.f32 %v861_v34, 0.0  ;;  %v863_v40 = vpop.f32.mrf.mxu1  ;;  %v530_v34 = vld [vmem:[%s7098_s1 + $0x848] sm:$0xff]  ;;  %1719 = vmatpush.msra.mxu3 %v529_v31 }
 0x10b   : > { %v973_v39 = vpop.f32.mrf.mxu2  ;;  %1945 = vmatpush.msra.mxu2 %v530_v34 }
 0x10c   : > { %3388 = vst [vmem:[%s5065_s9 + $0x370] sm:$0xff] %v3067_v36  ;;  %v974_v41 = vadd.f32 %v973_v39, %v5062_v6  ;;  %3919 = vmatmul.msk.f32.gmra.mxu3 %vm569_vm1, %v258_v35  ;;  %v4292_v36 = vld [vmem:[%s4844_s14 + $0x8] sm:$0xff] }
 0x10d   : > { %v750_v42 = vpop.f32.mrf.mxu0  ;;  %3886 = vmatmul.msk.f32.gmra.mxu1 %vm569_vm1, %v258_v35 }
 0x10e   : > { %v1087_v44 = vadd.f32 %v1086_v32, %v974_v41  ;;  %v751_v45 = vadd.f32 %v750_v42, %v5043_v58 }
 0x10f   : > { %v1089_v46 = vpop.f32.mrf.mxu3 }
 0x110   : > { %v3068_v47 = vmax.f32 %v1087_v44, 0.0  ;;  %1023 = vmatmul.f32.gmra.mxu2 %v257_v43  ;;  %v864_v48 = vadd.f32 %v863_v40, %v751_v45  ;;  %797 = vmatmul.f32.gmra.mxu0 %v257_v43  ;;  %v4293_v40 = vld [vmem:[%s4844_s14] sm:$0xff] }
 0x112   : > { %3389 = vst [vmem:[%s5065_s9 + $0x378] sm:$0xff] %v3068_v47  ;;  %v3077_v50 = vmax.f32 %v864_v48, 0.0  ;;  %v866_v54 = vpop.f32.mrf.mxu1  ;;  %v4294_v48 = vld [vmem:[%s4844_s14 + $0x18] sm:$0xff] }
 0x113   : > { %v976_v53 = vpop.f32.mrf.mxu2 }
 0x114   : > { %3398 = vst [vmem:[%s5065_s9 + $0x3c0] sm:$0xff] %v3077_v50  ;;  %v977_v55 = vadd.f32 %v976_v53, %v5062_v6  ;;  %3920 = vmatmul.msk.f32.gmra.mxu3 %vm569_vm1, %v260_v49 }
 0x115   : > { %v753_v56 = vpop.f32.mrf.mxu0  ;;  %3887 = vmatmul.msk.f32.gmra.mxu1 %vm569_vm1, %v260_v49 }
 0x116   : > { %v1090_v59 = vadd.f32 %v1089_v46, %v977_v55  ;;  %v754_v60 = vadd.f32 %v753_v56, %v5043_v58  ;;  %v4295_v55 = vld [vmem:[%s4844_s14 + $0x10] sm:$0xff] }
 0x117   : > { %v1092_v61 = vpop.f32.mrf.mxu3 }
 0x118   : > { %v3078_v62 = vmax.f32 %v1090_v59, 0.0  ;;  %1026 = vmatmul.f32.gmra.mxu2 %v259_v57  ;;  %v867_v63 = vadd.f32 %v866_v54, %v754_v60  ;;  %800 = vmatmul.f32.gmra.mxu0 %v259_v57  ;;  %v399_v57 = vld [vmem:[%s7098_s1 + $0x430] sm:$0xff]  ;;  %v400_v59 = vld [vmem:[%s7098_s1 + $0x438] sm:$0xff] }
 0x119   : > { %1603 = vmatpush.msra.mxu1 %v399_v57  ;;  %1829 = vmatpush.msra.mxu0 %v400_v59 }
 0x11a   : > { %3399 = vst [vmem:[%s5065_s9 + $0x3c8] sm:$0xff] %v3078_v62  ;;  %v3087_v1 = vmax.f32 %v867_v63, 0.0  ;;  %v869_v7 = vpop.f32.mrf.mxu1  ;;  %v4296_v62 = vld [vmem:[%s4844_s14 + $0x28] sm:$0xff] }
 0x11b   : > { %v979_v4 = vpop.f32.mrf.mxu2 }
 0x11c   : > { %3408 = vst [vmem:[%s5065_s9 + $0x410] sm:$0xff] %v3087_v1  ;;  %v980_v8 = vadd.f32 %v979_v4, %v5062_v6  ;;  %3921 = vmatmul.msk.f32.gmra.mxu3 %vm569_vm1, %v262_v0 }
 0x11d   : > { %v756_v9 = vpop.f32.mrf.mxu0  ;;  %3888 = vmatmul.msk.f32.gmra.mxu1 %vm569_vm1, %v262_v0 }
 0x11e   : > { %v1093_v11 = vadd.f32 %v1092_v61, %v980_v8  ;;  %v757_v12 = vadd.f32 %v756_v9, %v5043_v58  ;;  %v519_v9 = vld [vmem:[%s7098_s1 + $0x7f0] sm:$0xff] }
 0x11f   : > { %v1095_v13 = vpop.f32.mrf.mxu3  ;;  %1720 = vmatpush.msra.mxu3 %v519_v9 }
 0x120   : > { %v3088_v14 = vmax.f32 %v1093_v11, 0.0  ;;  %1029 = vmatmul.f32.gmra.mxu2 %v261_v10  ;;  %v870_v15 = vadd.f32 %v869_v7, %v757_v12  ;;  %803 = vmatmul.f32.gmra.mxu0 %v261_v10  ;;  %v520_v10 = vld [vmem:[%s7098_s1 + $0x7f8] sm:$0xff] }
 0x121   : > { %1946 = vmatpush.msra.mxu2 %v520_v10  ;;  %v4307_v10 = vld [vmem:[%s4844_s14 + $0x70] sm:$0xff] }
 0x122   : > { %3409 = vst [vmem:[%s5065_s9 + $0x418] sm:$0xff] %v3088_v14  ;;  %v3097_v17 = vmax.f32 %v870_v15, 0.0  ;;  %v872_v19 = vpop.f32.mrf.mxu1  ;;  %v4298_v14 = vld [vmem:[%s4844_s14 + $0x38] sm:$0xff] }
 0x123   : > { %v982_v18 = vpop.f32.mrf.mxu2 }
 0x124   : > { %3418 = vst [vmem:[%s5065_s9 + $0x460] sm:$0xff] %v3097_v17  ;;  %v983_v20 = vadd.f32 %v982_v18, %v5062_v6  ;;  %3922 = vmatmul.msk.f32.gmra.mxu3 %vm569_vm1, %v264_v16  ;;  %v4299_v18 = vld [vmem:[%s4844_s14 + $0x30] sm:$0xff] }
 0x125   : > { %v759_v21 = vpop.f32.mrf.mxu0  ;;  %3889 = vmatmul.msk.f32.gmra.mxu1 %vm569_vm1, %v264_v16 }
 0x126   : > { %v1096_v23 = vadd.f32 %v1095_v13, %v983_v20  ;;  %v760_v24 = vadd.f32 %v759_v21, %v5043_v58 }
 0x127   : > { %v1098_v25 = vpop.f32.mrf.mxu3 }
 0x128   : > { %v3098_v26 = vmax.f32 %v1096_v23, 0.0  ;;  %1032 = vmatmul.f32.gmra.mxu2 %v263_v22  ;;  %v873_v27 = vadd.f32 %v872_v19, %v760_v24  ;;  %806 = vmatmul.f32.gmra.mxu0 %v263_v22  ;;  %v389_v23 = vld [vmem:[%s7098_s1 + $0x3e0] sm:$0xff]  ;;  %v390_v24 = vld [vmem:[%s7098_s1 + $0x3e8] sm:$0xff] }
 0x129   : > { %1604 = vmatpush.msra.mxu1 %v389_v23  ;;  %1830 = vmatpush.msra.mxu0 %v390_v24 }
 0x12a   : > { %3419 = vst [vmem:[%s5065_s9 + $0x468] sm:$0xff] %v3098_v26  ;;  %v3107_v28 = vmax.f32 %v873_v27, 0.0  ;;  %v875_v33 = vpop.f32.mrf.mxu1 }
 0x12b   : > { %v985_v32 = vpop.f32.mrf.mxu2 }
 0x12c   : > { %3428 = vst [vmem:[%s5065_s9 + $0x4b0] sm:$0xff] %v3107_v28  ;;  %v986_v35 = vadd.f32 %v985_v32, %v5062_v6  ;;  %3924 = vmatmul.msk.f32.vlgmr.msrb.gmra.mxu3 %vm569_vm1, %v4292_v36  ;;  %v4300_v28 = vld [vmem:[%s4844_s14 + $0x48] sm:$0xff]  ;;  %v4301_v32 = vld [vmem:[%s4844_s14 + $0x40] sm:$0xff] }
 0x12d   : > { %v762_v37 = vpop.f32.mrf.mxu0  ;;  %1165 = vmatmul.f32.vlgmr.msrb.gmra.mxu1 %v4293_v40 }
 0x12e   : > { %v1099_v38 = vadd.f32 %v1098_v25, %v986_v35  ;;  %v763_v39 = vadd.f32 %v762_v37, %v5043_v58  ;;  %v509_v37 = vld [vmem:[%s7098_s1 + $0x7a0] sm:$0xff] }
 0x12f   : > { %v1101_v41 = vpop.f32.mrf.mxu3  ;;  %1721 = vmatpush.msra.mxu3 %v509_v37 }
 0x130   : > { %v3108_v42 = vmax.f32 %v1099_v38, 0.0  ;;  %3957 = vmatmul.msk.f32.vlgmr.msrb.gmra.mxu2 %vm569_vm1, %v4292_v36  ;;  %v876_v43 = vadd.f32 %v875_v33, %v763_v39  ;;  %1391 = vmatmul.f32.vlgmr.msrb.gmra.mxu0 %v4293_v40  ;;  %v510_v38 = vld [vmem:[%s7098_s1 + $0x7a8] sm:$0xff] }
 0x131   : > { %1947 = vmatpush.msra.mxu2 %v510_v38  ;;  %v4311_v38 = vld [vmem:[%s4844_s14 + $0x90] sm:$0xff] }
 0x132   : > { %3429 = vst [vmem:[%s5065_s9 + $0x4b8] sm:$0xff] %v3108_v42  ;;  %v3117_v44 = vmax.f32 %v876_v43, 0.0  ;;  %v878_v46 = vpop.f32.mrf.mxu1  ;;  %v4302_v42 = vld [vmem:[%s4844_s14 + $0x58] sm:$0xff] }
 0x133   : > { %v988_v45 = vpop.f32.mrf.mxu2 }
 0x134   : > { %3438 = vst [vmem:[%s5065_s9 + $0x500] sm:$0xff] %v3117_v44  ;;  %v989_v47 = vadd.f32 %v988_v45, %v5062_v6  ;;  %3925 = vmatmul.msk.f32.gmra.mxu3 %vm569_vm1, %v4294_v48 }
 0x135   : > { %v765_v49 = vpop.f32.mrf.mxu0  ;;  %1168 = vmatmul.f32.gmra.mxu1 %v4912_v5 }
 0x136   : > { %v1102_v50 = vadd.f32 %v1101_v41, %v989_v47  ;;  %v766_v51 = vadd.f32 %v765_v49, %v5043_v58 }
 0x137   : > { %v1104_v52 = vpop.f32.mrf.mxu3 }
 0x138   : > { %v3118_v53 = vmax.f32 %v1102_v50, 0.0  ;;  %3958 = vmatmul.msk.f32.gmra.mxu2 %vm569_vm1, %v4294_v48  ;;  %v879_v54 = vadd.f32 %v878_v46, %v766_v51  ;;  %1394 = vmatmul.f32.gmra.mxu0 %v4295_v55  ;;  %v4303_v46 = vld [vmem:[%s4844_s14 + $0x50] sm:$0xff] }
 0x139   : > { %v379_v51 = vld [vmem:[%s7098_s1 + $0x390] sm:$0xff] }
 0x13a   : > { %3439 = vst [vmem:[%s5065_s9 + $0x508] sm:$0xff] %v3118_v53  ;;  %v3127_v56 = vmax.f32 %v879_v54, 0.0  ;;  %v881_v60 = vpop.f32.mrf.mxu1  ;;  %1605 = vmatpush.msra.mxu1 %v379_v51 }
 0x13b   : > { %v991_v5 = vpop.f32.mrf.mxu2 }
 0x13c   : > { %3448 = vst [vmem:[%s5065_s9 + $0x550] sm:$0xff] %v3127_v56  ;;  %v992_v61 = vadd.f32 %v991_v5, %v5062_v6  ;;  %3926 = vmatmul.msk.f32.gmra.mxu3 %vm569_vm1, %v4296_v62  ;;  %v4304_v56 = vld [vmem:[%s4844_s14 + $0x68] sm:$0xff] }
 0x13d   : > { %v768_v63 = vpop.f32.mrf.mxu0  ;;  %1171 = vmatmul.f32.gmra.mxu1 %v4297_v2 }
 0x13e   : > { %v1105_v0 = vadd.f32 %v1104_v52, %v992_v61  ;;  %v769_v1 = vadd.f32 %v768_v63, %v5043_v58  ;;  %v380_v52 = vld [vmem:[%s7098_s1 + $0x398] sm:$0xff] }
 0x13f   : > { %v1107_v3 = vpop.f32.mrf.mxu3  ;;  %1831 = vmatpush.msra.mxu0 %v380_v52  ;;  %v4313_v52 = vld [vmem:[%s4844_s14 + $0xa0] sm:$0xff] }
 0x140   : > { %v3128_v4 = vmax.f32 %v1105_v0, 0.0  ;;  %3959 = vmatmul.msk.f32.gmra.mxu2 %vm569_vm1, %v4296_v62  ;;  %v882_v7 = vadd.f32 %v881_v60, %v769_v1  ;;  %1397 = vmatmul.f32.gmra.mxu0 %v4297_v2  ;;  %v4305_v60 = vld [vmem:[%s4844_s14 + $0x60] sm:$0xff] }
 0x142   : > { %3449 = vst [vmem:[%s5065_s9 + $0x558] sm:$0xff] %v3128_v4  ;;  %v3137_v8 = vmax.f32 %v882_v7, 0.0  ;;  %v884_v12 = vpop.f32.mrf.mxu1  ;;  %v4306_v4 = vld [vmem:[%s4844_s14 + $0x78] sm:$0xff] }
 0x143   : > { %v994_v11 = vpop.f32.mrf.mxu2 }
 0x144   : > { %3458 = vst [vmem:[%s5065_s9 + $0x5a0] sm:$0xff] %v3137_v8  ;;  %v995_v13 = vadd.f32 %v994_v11, %v5062_v6  ;;  %3927 = vmatmul.msk.f32.gmra.mxu3 %vm569_vm1, %v4298_v14 }
 0x145   : > { %v771_v15 = vpop.f32.mrf.mxu0  ;;  %1174 = vmatmul.f32.gmra.mxu1 %v4299_v18 }
 0x146   : > { %v1108_v16 = vadd.f32 %v1107_v3, %v995_v13  ;;  %v772_v17 = vadd.f32 %v771_v15, %v5043_v58  ;;  %v369_v15 = vld [vmem:[%s7098_s1 + $0x340] sm:$0xff] }
 0x147   : > { %v1110_v19 = vpop.f32.mrf.mxu3  ;;  %1606 = vmatpush.msra.mxu1 %v369_v15 }
 0x148   : > { %v3138_v20 = vmax.f32 %v1108_v16, 0.0  ;;  %3960 = vmatmul.msk.f32.gmra.mxu2 %vm569_vm1, %v4298_v14  ;;  %v885_v21 = vadd.f32 %v884_v12, %v772_v17  ;;  %1400 = vmatmul.f32.gmra.mxu0 %v4299_v18  ;;  %v370_v16 = vld [vmem:[%s7098_s1 + $0x348] sm:$0xff]  ;;  %v499_v17 = vld [vmem:[%s7098_s1 + $0x750] sm:$0xff] }
 0x149   : > { %1832 = vmatpush.msra.mxu0 %v370_v16  ;;  %1722 = vmatpush.msra.mxu3 %v499_v17 }
 0x14a   : > { %3459 = vst [vmem:[%s5065_s9 + $0x5a8] sm:$0xff] %v3138_v20  ;;  %v3147_v22 = vmax.f32 %v885_v21, 0.0  ;;  %v887_v26 = vpop.f32.mrf.mxu1  ;;  %v500_v20 = vld [vmem:[%s7098_s1 + $0x758] sm:$0xff] }
 0x14b   : > { %v997_v25 = vpop.f32.mrf.mxu2  ;;  %1948 = vmatpush.msra.mxu2 %v500_v20 }
 0x14c   : > { %3468 = vst [vmem:[%s5065_s9 + $0x5f0] sm:$0xff] %v3147_v22  ;;  %v998_v27 = vadd.f32 %v997_v25, %v5062_v6  ;;  %3928 = vmatmul.msk.f32.gmra.mxu3 %vm569_vm1, %v4300_v28  ;;  %v4308_v22 = vld [vmem:[%s4844_s14 + $0x88] sm:$0xff] }
 0x14d   : > { %v774_v29 = vpop.f32.mrf.mxu0  ;;  %1177 = vmatmul.f32.gmra.mxu1 %v4301_v32 }
 0x14e   : > { %v1111_v30 = vadd.f32 %v1110_v19, %v998_v27  ;;  %v775_v31 = vadd.f32 %v774_v29, %v5043_v58 }
 0x14f   : > { %v1113_v33 = vpop.f32.mrf.mxu3 }
 0x150   : > { %v3148_v34 = vmax.f32 %v1111_v30, 0.0  ;;  %3961 = vmatmul.msk.f32.gmra.mxu2 %vm569_vm1, %v4300_v28  ;;  %v888_v35 = vadd.f32 %v887_v26, %v775_v31  ;;  %1403 = vmatmul.f32.gmra.mxu0 %v4301_v32  ;;  %v4309_v26 = vld [vmem:[%s4844_s14 + $0x80] sm:$0xff] }
 0x152   : > { %3469 = vst [vmem:[%s5065_s9 + $0x5f8] sm:$0xff] %v3148_v34  ;;  %v3157_v36 = vmax.f32 %v888_v35, 0.0  ;;  %v890_v40 = vpop.f32.mrf.mxu1  ;;  %v4310_v34 = vld [vmem:[%s4844_s14 + $0x98] sm:$0xff] }
 0x153   : > { %v1000_v39 = vpop.f32.mrf.mxu2 }
 0x154   : > { %3478 = vst [vmem:[%s5065_s9 + $0x640] sm:$0xff] %v3157_v36  ;;  %v1001_v41 = vadd.f32 %v1000_v39, %v5062_v6  ;;  %3929 = vmatmul.msk.f32.gmra.mxu3 %vm569_vm1, %v4302_v42 }
 0x155   : > { %v777_v43 = vpop.f32.mrf.mxu0  ;;  %1180 = vmatmul.f32.gmra.mxu1 %v4303_v46 }
 0x156   : > { %v1114_v44 = vadd.f32 %v1113_v33, %v1001_v41  ;;  %v778_v45 = vadd.f32 %v777_v43, %v5043_v58  ;;  %v359_v43 = vld [vmem:[%s7098_s1 + $0x2f0] sm:$0xff] }
 0x157   : > { %v1116_v47 = vpop.f32.mrf.mxu3  ;;  %1607 = vmatpush.msra.mxu1 %v359_v43 }
 0x158   : > { %v3158_v48 = vmax.f32 %v1114_v44, 0.0  ;;  %3962 = vmatmul.msk.f32.gmra.mxu2 %vm569_vm1, %v4302_v42  ;;  %v891_v49 = vadd.f32 %v890_v40, %v778_v45  ;;  %1406 = vmatmul.f32.gmra.mxu0 %v4303_v46  ;;  %v360_v44 = vld [vmem:[%s7098_s1 + $0x2f8] sm:$0xff] }
 0x159   : > { %1833 = vmatpush.msra.mxu0 %v360_v44 }
 0x15a   : > { %3479 = vst [vmem:[%s5065_s9 + $0x648] sm:$0xff] %v3158_v48  ;;  %v3167_v50 = vmax.f32 %v891_v49, 0.0  ;;  %v893_v54 = vpop.f32.mrf.mxu1  ;;  %v4312_v48 = vld [vmem:[%s4844_s14 + $0xa8] sm:$0xff] }
 0x15b   : > { %v1003_v53 = vpop.f32.mrf.mxu2 }
 0x15c   : > { %3488 = vst [vmem:[%s5065_s9 + $0x690] sm:$0xff] %v3167_v50  ;;  %v1004_v55 = vadd.f32 %v1003_v53, %v5062_v6  ;;  %3930 = vmatmul.msk.f32.gmra.mxu3 %vm569_vm1, %v4304_v56 }
 0x15d   : > { %v780_v57 = vpop.f32.mrf.mxu0  ;;  %1183 = vmatmul.f32.gmra.mxu1 %v4305_v60 }
 0x15e   : > { %v1117_v59 = vadd.f32 %v1116_v47, %v1004_v55  ;;  %v781_v5 = vadd.f32 %v780_v57, %v5043_v58  ;;  %v489_v57 = vld [vmem:[%s7098_s1 + $0x700] sm:$0xff] }
 0x15f   : > { %v1119_v61 = vpop.f32.mrf.mxu3  ;;  %1723 = vmatpush.msra.mxu3 %v489_v57 }
 0x160   : > { %v3168_v62 = vmax.f32 %v1117_v59, 0.0  ;;  %3963 = vmatmul.msk.f32.gmra.mxu2 %vm569_vm1, %v4304_v56  ;;  %v894_v63 = vadd.f32 %v893_v54, %v781_v5  ;;  %1409 = vmatmul.f32.gmra.mxu0 %v4305_v60  ;;  %v490_v59 = vld [vmem:[%s7098_s1 + $0x708] sm:$0xff] }
 0x161   : > { %1949 = vmatpush.msra.mxu2 %v490_v59  ;;  %v4323_v59 = vld [vmem:[%s4844_s14 + $0xf0] sm:$0xff] }
 0x162   : > { %3489 = vst [vmem:[%s5065_s9 + $0x698] sm:$0xff] %v3168_v62  ;;  %v3177_v0 = vmax.f32 %v894_v63, 0.0  ;;  %v896_v2 = vpop.f32.mrf.mxu1  ;;  %v4314_v62 = vld [vmem:[%s4844_s14 + $0xb8] sm:$0xff] }
 0x163   : > { %v1006_v1 = vpop.f32.mrf.mxu2 }
 0x164   : > { %3498 = vst [vmem:[%s5065_s9 + $0x6e0] sm:$0xff] %v3177_v0  ;;  %v1007_v3 = vadd.f32 %v1006_v1, %v5062_v6  ;;  %3931 = vmatmul.msk.f32.gmra.mxu3 %vm569_vm1, %v4306_v4 }
 0x165   : > { %v783_v7 = vpop.f32.mrf.mxu0  ;;  %1186 = vmatmul.f32.gmra.mxu1 %v4307_v10 }
 0x166   : > { %v1120_v8 = vadd.f32 %v1119_v61, %v1007_v3  ;;  %v784_v9 = vadd.f32 %v783_v7, %v5043_v58 }
 0x167   : > { %v1122_v11 = vpop.f32.mrf.mxu3 }
 0x168   : > { %v3178_v12 = vmax.f32 %v1120_v8, 0.0  ;;  %3964 = vmatmul.msk.f32.gmra.mxu2 %vm569_vm1, %v4306_v4  ;;  %v897_v13 = vadd.f32 %v896_v2, %v784_v9  ;;  %1412 = vmatmul.f32.gmra.mxu0 %v4307_v10  ;;  %v4315_v2 = vld [vmem:[%s4844_s14 + $0xb0] sm:$0xff]  ;;  %v349_v9 = vld [vmem:[%s7098_s1 + $0x2a0] sm:$0xff]  ;;  %v350_v10 = vld [vmem:[%s7098_s1 + $0x2a8] sm:$0xff] }
 0x169   : > { %1608 = vmatpush.msra.mxu1 %v349_v9  ;;  %1834 = vmatpush.msra.mxu0 %v350_v10  ;;  %v4325_v9 = vld [vmem:[%s4844_s14 + $0x108] sm:$0xff] }
 0x16a   : > { %3499 = vst [vmem:[%s5065_s9 + $0x6e8] sm:$0xff] %v3178_v12  ;;  %v3187_v14 = vmax.f32 %v897_v13, 0.0  ;;  %v899_v19 = vpop.f32.mrf.mxu1 }
 0x16b   : > { %v1009_v18 = vpop.f32.mrf.mxu2 }
 0x16c   : > { %3508 = vst [vmem:[%s5065_s9 + $0x730] sm:$0xff] %v3187_v14  ;;  %v1010_v21 = vadd.f32 %v1009_v18, %v5062_v6  ;;  %3932 = vmatmul.msk.f32.gmra.mxu3 %vm569_vm1, %v4308_v22  ;;  %v4316_v14 = vld [vmem:[%s4844_s14 + $0xc8] sm:$0xff]  ;;  %v4317_v18 = vld [vmem:[%s4844_s14 + $0xc0] sm:$0xff] }
 0x16d   : > { %v786_v23 = vpop.f32.mrf.mxu0  ;;  %1189 = vmatmul.f32.gmra.mxu1 %v4309_v26 }
 0x16e   : > { %v1123_v24 = vadd.f32 %v1122_v11, %v1010_v21  ;;  %v787_v25 = vadd.f32 %v786_v23, %v5043_v58  ;;  %v479_v23 = vld [vmem:[%s7098_s1 + $0x6b0] sm:$0xff] }
 0x16f   : > { %v1125_v27 = vpop.f32.mrf.mxu3  ;;  %1724 = vmatpush.msra.mxu3 %v479_v23 }
 0x170   : > { %v3188_v28 = vmax.f32 %v1123_v24, 0.0  ;;  %3965 = vmatmul.msk.f32.gmra.mxu2 %vm569_vm1, %v4308_v22  ;;  %v900_v29 = vadd.f32 %v899_v19, %v787_v25  ;;  %1415 = vmatmul.f32.gmra.mxu0 %v4309_v26  ;;  %v480_v24 = vld [vmem:[%s7098_s1 + $0x6b8] sm:$0xff] }
 0x171   : > { %1950 = vmatpush.msra.mxu2 %v480_v24 }
 0x172   : > { %3509 = vst [vmem:[%s5065_s9 + $0x738] sm:$0xff] %v3188_v28  ;;  %v3197_v30 = vmax.f32 %v900_v29, 0.0  ;;  %v902_v32 = vpop.f32.mrf.mxu1  ;;  %v4318_v28 = vld [vmem:[%s4844_s14 + $0xd8] sm:$0xff] }
 0x173   : > { %v1012_v31 = vpop.f32.mrf.mxu2 }
 0x174   : > { %3518 = vst [vmem:[%s5065_s9 + $0x780] sm:$0xff] %v3197_v30  ;;  %v1013_v33 = vadd.f32 %v1012_v31, %v5062_v6  ;;  %3933 = vmatmul.msk.f32.gmra.mxu3 %vm569_vm1, %v4310_v34 }
 0x175   : > { %v789_v35 = vpop.f32.mrf.mxu0  ;;  %1192 = vmatmul.f32.gmra.mxu1 %v4311_v38 }
 0x176   : > { %v1126_v36 = vadd.f32 %v1125_v27, %v1013_v33  ;;  %v790_v37 = vadd.f32 %v789_v35, %v5043_v58 }
 0x177   : > { %v1128_v39 = vpop.f32.mrf.mxu3 }
 0x178   : > { %v3198_v40 = vmax.f32 %v1126_v36, 0.0  ;;  %3966 = vmatmul.msk.f32.gmra.mxu2 %vm569_vm1, %v4310_v34  ;;  %v903_v41 = vadd.f32 %v902_v32, %v790_v37  ;;  %1418 = vmatmul.f32.gmra.mxu0 %v4311_v38  ;;  %v4319_v32 = vld [vmem:[%s4844_s14 + $0xd0] sm:$0xff]  ;;  %v340_v37 = vld [vmem:[%s7098_s1 + $0x258] sm:$0xff] }
 0x179   : > { %v339_v36 = vld [vmem:[%s7098_s1 + $0x250] sm:$0xff]  ;;  %1835 = vmatpush.msra.mxu0 %v340_v37 }
 0x17a   : > { %3519 = vst [vmem:[%s5065_s9 + $0x788] sm:$0xff] %v3198_v40  ;;  %v3207_v42 = vmax.f32 %v903_v41, 0.0  ;;  %v905_v46 = vpop.f32.mrf.mxu1  ;;  %1609 = vmatpush.msra.mxu1 %v339_v36  ;;  %v4329_v36 = vld [vmem:[%s4844_s14 + $0x128] sm:$0xff] }
 0x17b   : > { %v1015_v45 = vpop.f32.mrf.mxu2 }
 0x17c   : > { %3528 = vst [vmem:[%s5065_s9 + $0x7d0] sm:$0xff] %v3207_v42  ;;  %v1016_v47 = vadd.f32 %v1015_v45, %v5062_v6  ;;  %3934 = vmatmul.msk.f32.gmra.mxu3 %vm569_vm1, %v4312_v48  ;;  %v4320_v42 = vld [vmem:[%s4844_s14 + $0xe8] sm:$0xff] }
 0x17d   : > { %v792_v49 = vpop.f32.mrf.mxu0  ;;  %1195 = vmatmul.f32.gmra.mxu1 %v4313_v52 }
 0x17e   : > { %v1129_v50 = vadd.f32 %v1128_v39, %v1016_v47  ;;  %v793_v51 = vadd.f32 %v792_v49, %v5043_v58 }
 0x17f   : > { %v1131_v53 = vpop.f32.mrf.mxu3 }
 0x180   : > { %v3208_v54 = vmax.f32 %v1129_v50, 0.0  ;;  %3967 = vmatmul.msk.f32.gmra.mxu2 %vm569_vm1, %v4312_v48  ;;  %v906_v55 = vadd.f32 %v905_v46, %v793_v51  ;;  %1421 = vmatmul.f32.gmra.mxu0 %v4313_v52  ;;  %v4321_v46 = vld [vmem:[%s4844_s14 + $0xe0] sm:$0xff] }
 0x182   : > { %3529 = vst [vmem:[%s5065_s9 + $0x7d8] sm:$0xff] %v3208_v54  ;;  %v3217_v56 = vmax.f32 %v906_v55, 0.0  ;;  %v908_v60 = vpop.f32.mrf.mxu1  ;;  %v4322_v54 = vld [vmem:[%s4844_s14 + $0xf8] sm:$0xff] }
 0x183   : > { %v1018_v5 = vpop.f32.mrf.mxu2 }
 0x184   : > { %3538 = vst [vmem:[%s5065_s9 + $0x820] sm:$0xff] %v3217_v56  ;;  %v1019_v61 = vadd.f32 %v1018_v5, %v5062_v6  ;;  %3935 = vmatmul.msk.f32.gmra.mxu3 %vm569_vm1, %v4314_v62 }
 0x185   : > { %v795_v63 = vpop.f32.mrf.mxu0  ;;  %1198 = vmatmul.f32.gmra.mxu1 %v4315_v2 }
 0x186   : > { %v1132_v0 = vadd.f32 %v1131_v53, %v1019_v61  ;;  %v796_v1 = vadd.f32 %v795_v63, %v5043_v58 }
 0x187   : > { %v1134_v3 = vpop.f32.mrf.mxu3 }
 0x188   : > { %v3218_v4 = vmax.f32 %v1132_v0, 0.0  ;;  %3968 = vmatmul.msk.f32.gmra.mxu2 %vm569_vm1, %v4314_v62  ;;  %v909_v7 = vadd.f32 %v908_v60, %v796_v1  ;;  %1424 = vmatmul.f32.gmra.mxu0 %v4315_v2  ;;  %v4324_v62 = vld [vmem:[%s7099_s2] sm:$0xff]  ;;  %v330_v0 = vld [vmem:[%s7098_s1 + $0x208] sm:$0xff] }
 0x189   : > { %v5475_v63 = vperm.slane %v4324_v62, 2  ;;  %v469_v1 = vld [vmem:[%s7098_s1 + $0x660] sm:$0xff]  ;;  %1836 = vmatpush.msra.mxu0 %v330_v0  ;;  %v470_v2 = vld [vmem:[%s7098_s1 + $0x668] sm:$0xff] }
 0x18a   : > { %3539 = vst [vmem:[%s5065_s9 + $0x828] sm:$0xff] %v3218_v4  ;;  %v3227_v8 = vmax.f32 %v909_v7, 0.0  ;;  %v911_v12 = vpop.f32.mrf.mxu1  ;;  %1725 = vmatpush.msra.mxu3 %v469_v1  ;;  %1951 = vmatpush.msra.mxu2 %v470_v2  ;;  %v4333_v0 = vld [vmem:[%s4844_s14 + $0x148] sm:$0xff] }
 0x18b   : > { %v1021_v11 = vpop.f32.mrf.mxu2 }
 0x18c   : > { %3548 = vst [vmem:[%s5065_s9 + $0x870] sm:$0xff] %v3227_v8  ;;  %v1022_v13 = vadd.f32 %v1021_v11, %v5062_v6  ;;  %3936 = vmatmul.msk.f32.gmra.mxu3 %vm569_vm1, %v4316_v14  ;;  %v5495_v11 = vperm.slane %v4324_v62, 3 }
 0x18d   : > { %v798_v15 = vpop.f32.mrf.mxu0  ;;  %1201 = vmatmul.f32.gmra.mxu1 %v4317_v18 }
 0x18e   : > { %v1135_v16 = vadd.f32 %v1134_v3, %v1022_v13  ;;  %v799_v17 = vadd.f32 %v798_v15, %v5043_v58 }
 0x18f   : > { %v1137_v19 = vpop.f32.mrf.mxu3 }
 0x190   : > { %v3228_v20 = vmax.f32 %v1135_v16, 0.0  ;;  %3969 = vmatmul.msk.f32.gmra.mxu2 %vm569_vm1, %v4316_v14  ;;  %v912_v21 = vadd.f32 %v911_v12, %v799_v17  ;;  %1427 = vmatmul.f32.gmra.mxu0 %v4317_v18  ;;  %v4326_v14 = vld [vmem:[%s4844_s14 + $0x100] sm:$0xff] }
 0x192   : > { %3549 = vst [vmem:[%s5065_s9 + $0x878] sm:$0xff] %v3228_v20  ;;  %v3237_v22 = vmax.f32 %v912_v21, 0.0  ;;  %v914_v26 = vpop.f32.mrf.mxu1 }
 0x193   : > { %v1024_v25 = vpop.f32.mrf.mxu2 }
 0x194   : > { %3558 = vst [vmem:[%s5065_s9 + $0x8c0] sm:$0xff] %v3237_v22  ;;  %v1025_v27 = vadd.f32 %v1024_v25, %v5062_v6  ;;  %3937 = vmatmul.msk.f32.gmra.mxu3 %vm569_vm1, %v4318_v28  ;;  %v4327_v22 = vld [vmem:[%s4844_s14 + $0x118] sm:$0xff] }
 0x195   : > { %v801_v29 = vpop.f32.mrf.mxu0  ;;  %1204 = vmatmul.f32.gmra.mxu1 %v4319_v32 }
 0x196   : > { %v1138_v30 = vadd.f32 %v1137_v19, %v1025_v27  ;;  %v802_v31 = vadd.f32 %v801_v29, %v5043_v58 }
 0x197   : > { %v1140_v33 = vpop.f32.mrf.mxu3 }
 0x198   : > { %v3238_v34 = vmax.f32 %v1138_v30, 0.0  ;;  %3970 = vmatmul.msk.f32.gmra.mxu2 %vm569_vm1, %v4318_v28  ;;  %v915_v35 = vadd.f32 %v914_v26, %v802_v31  ;;  %1430 = vmatmul.f32.gmra.mxu0 %v4319_v32  ;;  %v4328_v26 = vld [vmem:[%s4844_s14 + $0x110] sm:$0xff]  ;;  %v320_v31 = vld [vmem:[%s7098_s1 + $0x1b8] sm:$0xff] }
 0x199   : > { %v319_v30 = vld [vmem:[%s7098_s1 + $0x1b0] sm:$0xff]  ;;  %1837 = vmatpush.msra.mxu0 %v320_v31 }
 0x19a   : > { %3559 = vst [vmem:[%s5065_s9 + $0x8c8] sm:$0xff] %v3238_v34  ;;  %v3247_v38 = vmax.f32 %v915_v35, 0.0  ;;  %v917_v40 = vpop.f32.mrf.mxu1 }
 0x19b   : > { %v1027_v39 = vpop.f32.mrf.mxu2 }
 0x19c   : > { %3568 = vst [vmem:[%s5065_s9 + $0x910] sm:$0xff] %v3247_v38  ;;  %v1028_v41 = vadd.f32 %v1027_v39, %v5062_v6  ;;  %3938 = vmatmul.msk.f32.gmra.mxu3 %vm569_vm1, %v4320_v42 }
 0x19d   : > { %v804_v43 = vpop.f32.mrf.mxu0  ;;  %1207 = vmatmul.f32.gmra.mxu1 %v4321_v46 }
 0x19e   : > { %v1141_v44 = vadd.f32 %v1140_v33, %v1028_v41  ;;  %v805_v45 = vadd.f32 %v804_v43, %v5043_v58 }
 0x19f   : > { %v1143_v47 = vpop.f32.mrf.mxu3 }
 0x1a0   : > { %v3248_v48 = vmax.f32 %v1141_v44, 0.0  ;;  %3971 = vmatmul.msk.f32.gmra.mxu2 %vm569_vm1, %v4320_v42  ;;  %v918_v49 = vadd.f32 %v917_v40, %v805_v45  ;;  %1433 = vmatmul.f32.gmra.mxu0 %v4321_v46  ;;  %v4330_v40 = vld [vmem:[%s4844_s14 + $0x120] sm:$0xff]  ;;  %v459_v44 = vld [vmem:[%s7098_s1 + $0x610] sm:$0xff]  ;;  %v460_v45 = vld [vmem:[%s7098_s1 + $0x618] sm:$0xff] }
 0x1a1   : > { %1726 = vmatpush.msra.mxu3 %v459_v44  ;;  %1952 = vmatpush.msra.mxu2 %v460_v45 }
 0x1a2   : > { %3569 = vst [vmem:[%s5065_s9 + $0x918] sm:$0xff] %v3248_v48  ;;  %v3257_v50 = vmax.f32 %v918_v49, 0.0  ;;  %v920_v52 = vpop.f32.mrf.mxu1 }
 0x1a3   : > { %v1030_v51 = vpop.f32.mrf.mxu2 }
 0x1a4   : > { %3578 = vst [vmem:[%s5065_s9 + $0x960] sm:$0xff] %v3257_v50  ;;  %v1031_v53 = vadd.f32 %v1030_v51, %v5062_v6  ;;  %3939 = vmatmul.msk.f32.gmra.mxu3 %vm569_vm1, %v4322_v54  ;;  %v4331_v50 = vld [vmem:[%s4844_s14 + $0x138] sm:$0xff] }
 0x1a5   : > { %v807_v55 = vpop.f32.mrf.mxu0  ;;  %1210 = vmatmul.f32.gmra.mxu1 %v4323_v59 }
 0x1a6   : > { %v1144_v56 = vadd.f32 %v1143_v47, %v1031_v53  ;;  %v808_v57 = vadd.f32 %v807_v55, %v5043_v58  ;;  %v329_v58 = vld [vmem:[%s7098_s1 + $0x200] sm:$0xff] }
 0x1a7   : > { %v1146_v5 = vpop.f32.mrf.mxu3  ;;  %1610 = vmatpush.msra.mxu1 %v329_v58 }
 0x1a8   : > { %v3258_v60 = vmax.f32 %v1144_v56, 0.0  ;;  %3972 = vmatmul.msk.f32.gmra.mxu2 %vm569_vm1, %v4322_v54  ;;  %v921_v61 = vadd.f32 %v920_v52, %v808_v57  ;;  %1436 = vmatmul.f32.gmra.mxu0 %v4323_v59  ;;  %v4332_v54 = vld [vmem:[%s4844_s14 + $0x130] sm:$0xff]  ;;  %v309_v59 = vld [vmem:[%s7098_s1 + $0x160] sm:$0xff] }
 0x1a9   : > { %1611 = vmatpush.msra.mxu1 %v319_v30  ;;  %v4337_v30 = vld [vmem:[%s4844_s14 + $0x168] sm:$0xff] }
 0x1aa   : > { %3579 = vst [vmem:[%s5065_s9 + $0x968] sm:$0xff] %v3258_v60  ;;  %v3267_v3 = vmax.f32 %v921_v61, 0.0  ;;  %v1166_v7 = vpop.f32.mrf.mxu1 }
 0x1ab   : > { %v1033_v4 = vpop.f32.mrf.mxu2  ;;  %v1167_v10 = vadd.f32 %v1166_v7, %v5475_v63  ;;  %1612 = vmatpush.msra.mxu1 %v309_v59  ;;  %v4341_v59 = vld [vmem:[%s4844_s14 + $0x188] sm:$0xff] }
 0x1ac   : > { %3588 = vst [vmem:[%s5065_s9 + $0x9b0] sm:$0xff] %v3267_v3  ;;  %v1034_v8 = vadd.f32 %v1033_v4, %v5062_v6  ;;  %3940 = vmatmul.msk.f32.gmra.mxu3 %vm569_vm1, %v4325_v9  ;;  %v4334_v4 = vld [vmem:[%s4844_s14 + $0x140] sm:$0xff] }
 0x1ad   : > { %v1392_v12 = vpop.f32.mrf.mxu0  ;;  %1213 = vmatmul.f32.gmra.mxu1 %v4326_v14 }
 0x1ae   : > { %v1147_v13 = vadd.f32 %v1146_v5, %v1034_v8  ;;  %v1393_v6 = vadd.f32 %v1392_v12, %v5495_v11  ;;  %v310_v5 = vld [vmem:[%s7098_s1 + $0x168] sm:$0xff] }
 0x1af   : > { %v1279_v15 = vpop.f32.mrf.mxu3  ;;  %1838 = vmatpush.msra.mxu0 %v310_v5  ;;  %v450_v12 = vld [vmem:[%s7098_s1 + $0x5c8] sm:$0xff] }
 0x1b0   : > { %v3268_v16 = vmax.f32 %v1147_v13, 0.0  ;;  %3973 = vmatmul.msk.f32.gmra.mxu2 %vm569_vm1, %v4325_v9  ;;  %v1280_v17 = vadd.f32 %v1279_v15, %v1167_v10  ;;  %1439 = vmatmul.f32.gmra.mxu0 %v4326_v14  ;;  %v449_v10 = vld [vmem:[%s7098_s1 + $0x5c0] sm:$0xff] }
 0x1b1   : > { %1727 = vmatpush.msra.mxu3 %v449_v10  ;;  %1953 = vmatpush.msra.mxu2 %v450_v12 }
 0x1b2   : > { %3589 = vst [vmem:[%s5065_s9 + $0x9b8] sm:$0xff] %v3268_v16  ;;  %v2959_v18 = vmax.f32 %v1280_v17, 0.0  ;;  %v1169_v20 = vpop.f32.mrf.mxu1 }
 0x1b3   : > { %v1505_v19 = vpop.f32.mrf.mxu2  ;;  %v1170_v23 = vadd.f32 %v1169_v20, %v5475_v63  ;;  %v4336_v20 = vld [vmem:[%s4844_s14 + $0x150] sm:$0xff] }
 0x1b4   : > { %3279 = vst [vmem:[%s5065_s9 + $0x10] sm:$0xff] %v2959_v18  ;;  %v1506_v21 = vadd.f32 %v1505_v19, %v1393_v6  ;;  %3941 = vmatmul.msk.f32.gmra.mxu3 %vm569_vm1, %v4327_v22  ;;  %v4335_v6 = vld [vmem:[%s4844_s14 + $0x158] sm:$0xff] }
 0x1b5   : > { %v1395_v24 = vpop.f32.mrf.mxu0  ;;  %1216 = vmatmul.f32.gmra.mxu1 %v4328_v26 }
 0x1b6   : > { %v2960_v25 = vmax.f32 %v1506_v21, 0.0  ;;  %v1396_v28 = vadd.f32 %v1395_v24, %v5495_v11  ;;  %v299_v24 = vld [vmem:[%s7098_s1 + $0x110] sm:$0xff] }
 0x1b7   : > { %v1282_v27 = vpop.f32.mrf.mxu3  ;;  %1613 = vmatpush.msra.mxu1 %v299_v24 }
 0x1b8   : > { %3280 = vst [vmem:[%s5065_s9 + $0x18] sm:$0xff] %v2960_v25  ;;  %3974 = vmatmul.msk.f32.gmra.mxu2 %vm569_vm1, %v4327_v22  ;;  %v1283_v29 = vadd.f32 %v1282_v27, %v1170_v23  ;;  %1442 = vmatmul.f32.gmra.mxu0 %v4328_v26  ;;  %v300_v25 = vld [vmem:[%s7098_s1 + $0x118] sm:$0xff] }
 0x1b9   : > { %1839 = vmatpush.msra.mxu0 %v300_v25 }
 0x1ba   : > { %v2969_v32 = vmax.f32 %v1283_v29, 0.0  ;;  %v1172_v34 = vpop.f32.mrf.mxu1 }
 0x1bb   : > { %v1508_v33 = vpop.f32.mrf.mxu2  ;;  %v1173_v37 = vadd.f32 %v1172_v34, %v5475_v63  ;;  %v4338_v34 = vld [vmem:[%s4844_s14 + $0x160] sm:$0xff] }
 0x1bc   : > { %3290 = vst [vmem:[%s5065_s9 + $0x60] sm:$0xff] %v2969_v32  ;;  %v1509_v35 = vadd.f32 %v1508_v33, %v1396_v28  ;;  %3942 = vmatmul.msk.f32.gmra.mxu3 %vm569_vm1, %v4329_v36 }
 0x1bd   : > { %v1398_v38 = vpop.f32.mrf.mxu0  ;;  %1219 = vmatmul.f32.gmra.mxu1 %v4330_v40 }
 0x1be   : > { %v2970_v39 = vmax.f32 %v1509_v35, 0.0  ;;  %v1399_v42 = vadd.f32 %v1398_v38, %v5495_v11 }
 0x1bf   : > { %v1285_v41 = vpop.f32.mrf.mxu3 }
 0x1c0   : > { %3291 = vst [vmem:[%s5065_s9 + $0x68] sm:$0xff] %v2970_v39  ;;  %3975 = vmatmul.msk.f32.gmra.mxu2 %vm569_vm1, %v4329_v36  ;;  %v1286_v43 = vadd.f32 %v1285_v41, %v1173_v37  ;;  %1445 = vmatmul.f32.gmra.mxu0 %v4330_v40 }
 0x1c2   : > { %v2979_v46 = vmax.f32 %v1286_v43, 0.0  ;;  %v1175_v48 = vpop.f32.mrf.mxu1 }
 0x1c3   : > { %v1511_v47 = vpop.f32.mrf.mxu2  ;;  %v1176_v51 = vadd.f32 %v1175_v48, %v5475_v63 }
 0x1c4   : > { %3300 = vst [vmem:[%s5065_s9 + $0xb0] sm:$0xff] %v2979_v46  ;;  %v1512_v49 = vadd.f32 %v1511_v47, %v1399_v42  ;;  %3943 = vmatmul.msk.f32.gmra.mxu3 %vm569_vm1, %v4331_v50  ;;  %v4339_v42 = vld [vmem:[%s4844_s14 + $0x178] sm:$0xff]  ;;  %v4340_v46 = vld [vmem:[%s4844_s14 + $0x170] sm:$0xff] }
 0x1c5   : > { %v1401_v52 = vpop.f32.mrf.mxu0  ;;  %1222 = vmatmul.f32.gmra.mxu1 %v4332_v54 }
 0x1c6   : > { %v2980_v53 = vmax.f32 %v1512_v49, 0.0  ;;  %v1402_v56 = vadd.f32 %v1401_v52, %v5495_v11  ;;  %v439_v52 = vld [vmem:[%s7098_s1 + $0x570] sm:$0xff] }
 0x1c7   : > { %v1288_v55 = vpop.f32.mrf.mxu3  ;;  %1728 = vmatpush.msra.mxu3 %v439_v52 }
 0x1c8   : > { %3301 = vst [vmem:[%s5065_s9 + $0xb8] sm:$0xff] %v2980_v53  ;;  %3976 = vmatmul.msk.f32.gmra.mxu2 %vm569_vm1, %v4331_v50  ;;  %v1289_v57 = vadd.f32 %v1288_v55, %v1176_v51  ;;  %1448 = vmatmul.f32.gmra.mxu0 %v4332_v54  ;;  %v289_v50 = vld [vmem:[%s7098_s1 + $0xc0] sm:$0xff]  ;;  %v290_v51 = vld [vmem:[%s7098_s1 + $0xc8] sm:$0xff]  ;;  %v440_v53 = vld [vmem:[%s7098_s1 + $0x578] sm:$0xff] }
 0x1c9   : > { %1614 = vmatpush.msra.mxu1 %v289_v50  ;;  %1840 = vmatpush.msra.mxu0 %v290_v51  ;;  %v4349_v50 = vld [vmem:[%s4844_s14 + $0x1c8] sm:$0xff] }
 0x1ca   : > { %v2989_v60 = vmax.f32 %v1289_v57, 0.0  ;;  %v1178_v62 = vpop.f32.mrf.mxu1  ;;  %1954 = vmatpush.msra.mxu2 %v440_v53 }
 0x1cb   : > { %v1514_v61 = vpop.f32.mrf.mxu2  ;;  %v1179_v1 = vadd.f32 %v1178_v62, %v5475_v63  ;;  %v4342_v62 = vld [vmem:[%s4844_s14 + $0x180] sm:$0xff] }
 0x1cc   : > { %3310 = vst [vmem:[%s5065_s9 + $0x100] sm:$0xff] %v2989_v60  ;;  %v1515_v58 = vadd.f32 %v1514_v61, %v1402_v56  ;;  %3944 = vmatmul.msk.f32.gmra.mxu3 %vm569_vm1, %v4333_v0 }
 0x1cd   : > { %v1404_v2 = vpop.f32.mrf.mxu0  ;;  %1225 = vmatmul.f32.gmra.mxu1 %v4334_v4 }
 0x1ce   : > { %v2990_v3 = vmax.f32 %v1515_v58, 0.0  ;;  %v1405_v8 = vadd.f32 %v1404_v2, %v5495_v11 }
 0x1cf   : > { %v1291_v7 = vpop.f32.mrf.mxu3 }
 0x1d0   : > { %3311 = vst [vmem:[%s5065_s9 + $0x108] sm:$0xff] %v2990_v3  ;;  %3977 = vmatmul.msk.f32.gmra.mxu2 %vm569_vm1, %v4333_v0  ;;  %v1292_v9 = vadd.f32 %v1291_v7, %v1179_v1  ;;  %1451 = vmatmul.f32.gmra.mxu0 %v4334_v4 }
 0x1d2   : > { %v2999_v13 = vmax.f32 %v1292_v9, 0.0  ;;  %v1181_v15 = vpop.f32.mrf.mxu1 }
 0x1d3   : > { %v1517_v14 = vpop.f32.mrf.mxu2  ;;  %v1182_v17 = vadd.f32 %v1181_v15, %v5475_v63 }
 0x1d4   : > { %3320 = vst [vmem:[%s5065_s9 + $0x150] sm:$0xff] %v2999_v13  ;;  %v1518_v16 = vadd.f32 %v1517_v14, %v1405_v8  ;;  %3945 = vmatmul.msk.f32.gmra.mxu3 %vm569_vm1, %v4335_v6  ;;  %v4343_v8 = vld [vmem:[%s4844_s14 + $0x198] sm:$0xff]  ;;  %v4344_v13 = vld [vmem:[%s4844_s14 + $0x190] sm:$0xff] }
 0x1d5   : > { %v1407_v18 = vpop.f32.mrf.mxu0  ;;  %1228 = vmatmul.f32.gmra.mxu1 %v4336_v20 }
 0x1d6   : > { %v3000_v19 = vmax.f32 %v1518_v16, 0.0  ;;  %v1408_v22 = vadd.f32 %v1407_v18, %v5495_v11 }
 0x1d7   : > { %v1294_v21 = vpop.f32.mrf.mxu3 }
 0x1d8   : > { %3321 = vst [vmem:[%s5065_s9 + $0x158] sm:$0xff] %v3000_v19  ;;  %3978 = vmatmul.msk.f32.gmra.mxu2 %vm569_vm1, %v4335_v6  ;;  %v1295_v23 = vadd.f32 %v1294_v21, %v1182_v17  ;;  %1454 = vmatmul.f32.gmra.mxu0 %v4336_v20  ;;  %v279_v6 = vld [vmem:[%s7098_s1 + $0x70] sm:$0xff]  ;;  %v280_v17 = vld [vmem:[%s7098_s1 + $0x78] sm:$0xff] }
 0x1d9   : > { %1615 = vmatpush.msra.mxu1 %v279_v6  ;;  %1841 = vmatpush.msra.mxu0 %v280_v17  ;;  %v4353_v6 = vld [vmem:[%s4844_s14 + $0x1e8] sm:$0xff] }
 0x1da   : > { %v3009_v26 = vmax.f32 %v1295_v23, 0.0  ;;  %v1184_v28 = vpop.f32.mrf.mxu1 }
 0x1db   : > { %v1520_v27 = vpop.f32.mrf.mxu2  ;;  %v1185_v31 = vadd.f32 %v1184_v28, %v5475_v63 }
 0x1dc   : > { %3330 = vst [vmem:[%s5065_s9 + $0x1a0] sm:$0xff] %v3009_v26  ;;  %v1521_v29 = vadd.f32 %v1520_v27, %v1408_v22  ;;  %3946 = vmatmul.msk.f32.gmra.mxu3 %vm569_vm1, %v4337_v30  ;;  %v4345_v22 = vld [vmem:[%s4844_s14 + $0x1a8] sm:$0xff]  ;;  %v4346_v26 = vld [vmem:[%s4844_s14 + $0x1a0] sm:$0xff] }
 0x1dd   : > { %v1410_v32 = vpop.f32.mrf.mxu0  ;;  %1231 = vmatmul.f32.gmra.mxu1 %v4338_v34 }
 0x1de   : > { %v3010_v33 = vmax.f32 %v1521_v29, 0.0  ;;  %v1411_v36 = vadd.f32 %v1410_v32, %v5495_v11 }
 0x1df   : > { %v1297_v35 = vpop.f32.mrf.mxu3 }
 0x1e0   : > { %3331 = vst [vmem:[%s5065_s9 + $0x1a8] sm:$0xff] %v3010_v33  ;;  %3979 = vmatmul.msk.f32.gmra.mxu2 %vm569_vm1, %v4337_v30  ;;  %v1298_v37 = vadd.f32 %v1297_v35, %v1185_v31  ;;  %1457 = vmatmul.f32.gmra.mxu0 %v4338_v34  ;;  %v429_v30 = vld [vmem:[%s7098_s1 + $0x520] sm:$0xff]  ;;  %v430_v31 = vld [vmem:[%s7098_s1 + $0x528] sm:$0xff] }
 0x1e1   : > { %1729 = vmatpush.msra.mxu3 %v429_v30  ;;  %1955 = vmatpush.msra.mxu2 %v430_v31 }
 0x1e2   : > { %v3019_v38 = vmax.f32 %v1298_v37, 0.0  ;;  %v1187_v40 = vpop.f32.mrf.mxu1 }
 0x1e3   : > { %v1523_v39 = vpop.f32.mrf.mxu2  ;;  %v1188_v43 = vadd.f32 %v1187_v40, %v5475_v63  ;;  %v4348_v40 = vld [vmem:[%s4844_s14 + $0x1b0] sm:$0xff] }
 0x1e4   : > { %3340 = vst [vmem:[%s5065_s9 + $0x1f0] sm:$0xff] %v3019_v38  ;;  %v1524_v41 = vadd.f32 %v1523_v39, %v1411_v36  ;;  %3947 = vmatmul.msk.f32.gmra.mxu3 %vm569_vm1, %v4339_v42  ;;  %v4347_v36 = vld [vmem:[%s4844_s14 + $0x1b8] sm:$0xff] }
 0x1e5   : > { %v1413_v44 = vpop.f32.mrf.mxu0  ;;  %1234 = vmatmul.f32.gmra.mxu1 %v4340_v46 }
 0x1e6   : > { %v3020_v45 = vmax.f32 %v1524_v41, 0.0  ;;  %v1414_v48 = vadd.f32 %v1413_v44, %v5495_v11  ;;  %v269_v44 = vld [vmem:[%s7098_s1 + $0x20] sm:$0xff] }
 0x1e7   : > { %v1300_v47 = vpop.f32.mrf.mxu3  ;;  %1616 = vmatpush.msra.mxu1 %v269_v44  ;;  %v4357_v44 = vld [vmem:[%s4844_s14 + $0x8] sm:$0xff] }
 0x1e8   : > { %3341 = vst [vmem:[%s5065_s9 + $0x1f8] sm:$0xff] %v3020_v45  ;;  %3980 = vmatmul.msk.f32.gmra.mxu2 %vm569_vm1, %v4339_v42  ;;  %v1301_v49 = vadd.f32 %v1300_v47, %v1188_v43  ;;  %1460 = vmatmul.f32.gmra.mxu0 %v4340_v46  ;;  %v270_v45 = vld [vmem:[%s7098_s1 + $0x28] sm:$0xff] }
 0x1e9   : > { %1842 = vmatpush.msra.mxu0 %v270_v45 }
 0x1ea   : > { %v3029_v54 = vmax.f32 %v1301_v49, 0.0  ;;  %v1190_v56 = vpop.f32.mrf.mxu1 }
 0x1eb   : > { %v1526_v55 = vpop.f32.mrf.mxu2  ;;  %v1191_v5 = vadd.f32 %v1190_v56, %v5475_v63 }
 0x1ec   : > { %3350 = vst [vmem:[%s5065_s9 + $0x240] sm:$0xff] %v3029_v54  ;;  %v1527_v57 = vadd.f32 %v1526_v55, %v1414_v48  ;;  %3948 = vmatmul.msk.f32.gmra.mxu3 %vm569_vm1, %v4341_v59  ;;  %v4350_v54 = vld [vmem:[%s4844_s14 + $0x1c0] sm:$0xff] }
 0x1ed   : > { %v1416_v60 = vpop.f32.mrf.mxu0  ;;  %1237 = vmatmul.f32.gmra.mxu1 %v4342_v62 }
 0x1ee   : > { %v3030_v61 = vmax.f32 %v1527_v57, 0.0  ;;  %v1417_v0 = vadd.f32 %v1416_v60, %v5495_v11 }
 0x1ef   : > { %v1303_v58 = vpop.f32.mrf.mxu3 }
 0x1f0   : > { %3351 = vst [vmem:[%s5065_s9 + $0x248] sm:$0xff] %v3030_v61  ;;  %3981 = vmatmul.msk.f32.gmra.mxu2 %vm569_vm1, %v4341_v59  ;;  %v1304_v1 = vadd.f32 %v1303_v58, %v1191_v5  ;;  %1463 = vmatmul.f32.gmra.mxu0 %v4342_v62  ;;  %v541_v59 = vld [vmem:[%s7098_s1 + $0x8a0] sm:$0xf]  ;;  %v542_v5 = vld [vmem:[%s7098_s1 + $0x8a8] sm:$0xf] }
 0x1f1   : > { %4055 = vmatpush.msk.msrb.mxu3 %vm666_vm0, %v541_v59  ;;  %4088 = vmatpush.msk.msrb.mxu2 %vm666_vm0, %v542_v5 }
 0x1f2   : > { %v3039_v2 = vmax.f32 %v1304_v1, 0.0  ;;  %v1193_v4 = vpop.f32.mrf.mxu1 }
 0x1f3   : > { %v1529_v3 = vpop.f32.mrf.mxu2  ;;  %v1194_v9 = vadd.f32 %v1193_v4, %v5475_v63  ;;  %v4352_v4 = vld [vmem:[%s4844_s14 + $0x1d0] sm:$0xff] }
 0x1f4   : > { %3360 = vst [vmem:[%s5065_s9 + $0x290] sm:$0xff] %v3039_v2  ;;  %v1530_v7 = vadd.f32 %v1529_v3, %v1417_v0  ;;  %3949 = vmatmul.msk.f32.gmra.mxu3 %vm569_vm1, %v4343_v8  ;;  %v4351_v0 = vld [vmem:[%s4844_s14 + $0x1d8] sm:$0xff] }
 0x1f5   : > { %v1419_v10 = vpop.f32.mrf.mxu0  ;;  %1240 = vmatmul.f32.gmra.mxu1 %v4344_v13 }
 0x1f6   : > { %v3040_v12 = vmax.f32 %v1530_v7, 0.0  ;;  %v1420_v15 = vadd.f32 %v1419_v10, %v5495_v11  ;;  %v421_v10 = vld [vmem:[%s7098_s1 + $0x4e0] sm:$0xff] }
 0x1f7   : > { %v1306_v14 = vpop.f32.mrf.mxu3  ;;  %2053 = vmatpush.msrb.mxu1 %v421_v10 }
 0x1f8   : > { %3361 = vst [vmem:[%s5065_s9 + $0x298] sm:$0xff] %v3040_v12  ;;  %3982 = vmatmul.msk.f32.gmra.mxu2 %vm569_vm1, %v4343_v8  ;;  %v1307_v16 = vadd.f32 %v1306_v14, %v1194_v9  ;;  %1466 = vmatmul.f32.gmra.mxu0 %v4344_v13  ;;  %v422_v12 = vld [vmem:[%s7098_s1 + $0x4e8] sm:$0xff] }
 0x1f9   : > { %2279 = vmatpush.msrb.mxu0 %v422_v12 }
 0x1fa   : > { %v3049_v18 = vmax.f32 %v1307_v16, 0.0  ;;  %v1196_v20 = vpop.f32.mrf.mxu1 }
 0x1fb   : > { %v1532_v19 = vpop.f32.mrf.mxu2  ;;  %v1197_v23 = vadd.f32 %v1196_v20, %v5475_v63  ;;  %v4354_v20 = vld [vmem:[%s4844_s14 + $0x1e0] sm:$0xff] }
 0x1fc   : > { %3370 = vst [vmem:[%s5065_s9 + $0x2e0] sm:$0xff] %v3049_v18  ;;  %v1533_v21 = vadd.f32 %v1532_v19, %v1420_v15  ;;  %3950 = vmatmul.msk.f32.gmra.mxu3 %vm569_vm1, %v4345_v22 }
 0x1fd   : > { %v1422_v24 = vpop.f32.mrf.mxu0  ;;  %1243 = vmatmul.f32.gmra.mxu1 %v4346_v26 }
 0x1fe   : > { %v3050_v25 = vmax.f32 %v1533_v21, 0.0  ;;  %v1423_v28 = vadd.f32 %v1422_v24, %v5495_v11 }
 0x1ff   : > { %v1309_v27 = vpop.f32.mrf.mxu3 }
 0x200   : > { %3371 = vst [vmem:[%s5065_s9 + $0x2e8] sm:$0xff] %v3050_v25  ;;  %3983 = vmatmul.msk.f32.gmra.mxu2 %vm569_vm1, %v4345_v22  ;;  %v1310_v29 = vadd.f32 %v1309_v27, %v1197_v23  ;;  %1469 = vmatmul.f32.gmra.mxu0 %v4346_v26 }
 0x202   : > { %v3059_v32 = vmax.f32 %v1310_v29, 0.0  ;;  %v1199_v34 = vpop.f32.mrf.mxu1 }
 0x203   : > { %v1535_v33 = vpop.f32.mrf.mxu2  ;;  %v1200_v37 = vadd.f32 %v1199_v34, %v5475_v63 }
 0x204   : > { %3380 = vst [vmem:[%s5065_s9 + $0x330] sm:$0xff] %v3059_v32  ;;  %v1536_v35 = vadd.f32 %v1535_v33, %v1423_v28  ;;  %3951 = vmatmul.msk.f32.gmra.mxu3 %vm569_vm1, %v4347_v36  ;;  %v4355_v28 = vld [vmem:[%s4844_s14 + $0x1f8] sm:$0xff]  ;;  %v4356_v32 = vld [vmem:[%s4844_s14 + $0x1f0] sm:$0xff] }
 0x205   : > { %v1425_v38 = vpop.f32.mrf.mxu0  ;;  %1246 = vmatmul.f32.gmra.mxu1 %v4348_v40 }
 0x206   : > { %v3060_v39 = vmax.f32 %v1536_v35, 0.0  ;;  %v1426_v42 = vadd.f32 %v1425_v38, %v5495_v11  ;;  %v531_v38 = vld [vmem:[%s7098_s1 + $0x850] sm:$0xff] }
 0x207   : > { %v1312_v41 = vpop.f32.mrf.mxu3  ;;  %2171 = vmatpush.msrb.mxu3 %v531_v38 }
 0x208   : > { %3381 = vst [vmem:[%s5065_s9 + $0x338] sm:$0xff] %v3060_v39  ;;  %3984 = vmatmul.msk.f32.gmra.mxu2 %vm569_vm1, %v4347_v36  ;;  %v1313_v43 = vadd.f32 %v1312_v41, %v1200_v37  ;;  %1472 = vmatmul.f32.gmra.mxu0 %v4348_v40  ;;  %v411_v36 = vld [vmem:[%s7098_s1 + $0x490] sm:$0xff]  ;;  %v412_v37 = vld [vmem:[%s7098_s1 + $0x498] sm:$0xff] }
 0x209   : > { %2054 = vmatpush.msrb.mxu1 %v411_v36  ;;  %2280 = vmatpush.msrb.mxu0 %v412_v37  ;;  %v532_v39 = vld [vmem:[%s7098_s1 + $0x858] sm:$0xff]  ;;  %v4365_v36 = vld [vmem:[%s4844_s14 + $0x48] sm:$0xff] }
 0x20a   : > { %v3069_v46 = vmax.f32 %v1313_v43, 0.0  ;;  %v1202_v48 = vpop.f32.mrf.mxu1  ;;  %2397 = vmatpush.msrb.mxu2 %v532_v39 }
 0x20b   : > { %v1538_v47 = vpop.f32.mrf.mxu2  ;;  %v1203_v51 = vadd.f32 %v1202_v48, %v5475_v63  ;;  %v4358_v48 = vld [vmem:[%s4844_s14] sm:$0xff] }
 0x20c   : > { %3390 = vst [vmem:[%s5065_s9 + $0x380] sm:$0xff] %v3069_v46  ;;  %v1539_v49 = vadd.f32 %v1538_v47, %v1426_v42  ;;  %3952 = vmatmul.msk.f32.gmra.mxu3 %vm569_vm1, %v4349_v50 }
 0x20d   : > { %v1428_v52 = vpop.f32.mrf.mxu0  ;;  %1249 = vmatmul.f32.gmra.mxu1 %v4350_v54 }
 0x20e   : > { %v3070_v53 = vmax.f32 %v1539_v49, 0.0  ;;  %v1429_v56 = vadd.f32 %v1428_v52, %v5495_v11 }
 0x20f   : > { %v1315_v55 = vpop.f32.mrf.mxu3 }
 0x210   : > { %3391 = vst [vmem:[%s5065_s9 + $0x388] sm:$0xff] %v3070_v53  ;;  %3985 = vmatmul.msk.f32.gmra.mxu2 %vm569_vm1, %v4349_v50  ;;  %v1316_v57 = vadd.f32 %v1315_v55, %v1203_v51  ;;  %1475 = vmatmul.f32.gmra.mxu0 %v4350_v54 }
 0x212   : > { %v3079_v60 = vmax.f32 %v1316_v57, 0.0  ;;  %v1205_v62 = vpop.f32.mrf.mxu1 }
 0x213   : > { %v1541_v61 = vpop.f32.mrf.mxu2  ;;  %v1206_v1 = vadd.f32 %v1205_v62, %v5475_v63 }
 0x214   : > { %3400 = vst [vmem:[%s5065_s9 + $0x3d0] sm:$0xff] %v3079_v60  ;;  %v1542_v58 = vadd.f32 %v1541_v61, %v1429_v56  ;;  %3953 = vmatmul.msk.f32.gmra.mxu3 %vm569_vm1, %v4351_v0  ;;  %v4359_v56 = vld [vmem:[%s4844_s14 + $0x18] sm:$0xff]  ;;  %v4360_v60 = vld [vmem:[%s4844_s14 + $0x10] sm:$0xff] }
 0x215   : > { %v1431_v2 = vpop.f32.mrf.mxu0  ;;  %1252 = vmatmul.f32.gmra.mxu1 %v4352_v4 }
 0x216   : > { %v3080_v3 = vmax.f32 %v1542_v58, 0.0  ;;  %v1432_v8 = vadd.f32 %v1431_v2, %v5495_v11 }
 0x217   : > { %v1318_v7 = vpop.f32.mrf.mxu3 }
 0x218   : > { %3401 = vst [vmem:[%s5065_s9 + $0x3d8] sm:$0xff] %v3080_v3  ;;  %3986 = vmatmul.msk.f32.gmra.mxu2 %vm569_vm1, %v4351_v0  ;;  %v1319_v9 = vadd.f32 %v1318_v7, %v1206_v1  ;;  %1478 = vmatmul.f32.gmra.mxu0 %v4352_v4  ;;  %v401_v0 = vld [vmem:[%s7098_s1 + $0x440] sm:$0xff]  ;;  %v402_v1 = vld [vmem:[%s7098_s1 + $0x448] sm:$0xff] }
 0x219   : > { %2055 = vmatpush.msrb.mxu1 %v401_v0  ;;  %2281 = vmatpush.msrb.mxu0 %v402_v1  ;;  %v4369_v0 = vld [vmem:[%s4844_s14 + $0x68] sm:$0xff] }
 0x21a   : > { %v3089_v13 = vmax.f32 %v1319_v9, 0.0  ;;  %v1208_v15 = vpop.f32.mrf.mxu1 }
 0x21b   : > { %v1544_v14 = vpop.f32.mrf.mxu2  ;;  %v1209_v17 = vadd.f32 %v1208_v15, %v5475_v63 }
 0x21c   : > { %3410 = vst [vmem:[%s5065_s9 + $0x420] sm:$0xff] %v3089_v13  ;;  %v1545_v16 = vadd.f32 %v1544_v14, %v1432_v8  ;;  %3954 = vmatmul.msk.f32.gmra.mxu3 %vm569_vm1, %v4353_v6  ;;  %v4361_v8 = vld [vmem:[%s4844_s14 + $0x28] sm:$0xff]  ;;  %v4362_v13 = vld [vmem:[%s4844_s14 + $0x20] sm:$0xff] }
 0x21d   : > { %v1434_v18 = vpop.f32.mrf.mxu0  ;;  %1255 = vmatmul.f32.gmra.mxu1 %v4354_v20 }
 0x21e   : > { %v3090_v19 = vmax.f32 %v1545_v16, 0.0  ;;  %v1435_v22 = vadd.f32 %v1434_v18, %v5495_v11 }
 0x21f   : > { %v1321_v21 = vpop.f32.mrf.mxu3 }
 0x220   : > { %3411 = vst [vmem:[%s5065_s9 + $0x428] sm:$0xff] %v3090_v19  ;;  %3987 = vmatmul.msk.f32.gmra.mxu2 %vm569_vm1, %v4353_v6  ;;  %v1322_v23 = vadd.f32 %v1321_v21, %v1209_v17  ;;  %1481 = vmatmul.f32.gmra.mxu0 %v4354_v20  ;;  %v521_v6 = vld [vmem:[%s7098_s1 + $0x800] sm:$0xff]  ;;  %v522_v17 = vld [vmem:[%s7098_s1 + $0x808] sm:$0xff] }
 0x221   : > { %2172 = vmatpush.msrb.mxu3 %v521_v6  ;;  %2398 = vmatpush.msrb.mxu2 %v522_v17 }
 0x222   : > { %v3099_v24 = vmax.f32 %v1322_v23, 0.0  ;;  %v1211_v26 = vpop.f32.mrf.mxu1 }
 0x223   : > { %v1547_v25 = vpop.f32.mrf.mxu2  ;;  %v1212_v29 = vadd.f32 %v1211_v26, %v5475_v63  ;;  %v4364_v26 = vld [vmem:[%s4844_s14 + $0x30] sm:$0xff] }
 0x224   : > { %3420 = vst [vmem:[%s5065_s9 + $0x470] sm:$0xff] %v3099_v24  ;;  %v1548_v27 = vadd.f32 %v1547_v25, %v1435_v22  ;;  %3955 = vmatmul.msk.f32.gmra.mxu3 %vm569_vm1, %v4355_v28  ;;  %v4363_v22 = vld [vmem:[%s4844_s14 + $0x38] sm:$0xff] }
 0x225   : > { %v1437_v30 = vpop.f32.mrf.mxu0  ;;  %1258 = vmatmul.f32.gmra.mxu1 %v4356_v32 }
 0x226   : > { %v3100_v31 = vmax.f32 %v1548_v27, 0.0  ;;  %v1438_v34 = vadd.f32 %v1437_v30, %v5495_v11  ;;  %v391_v30 = vld [vmem:[%s7098_s1 + $0x3f0] sm:$0xff] }
 0x227   : > { %v1324_v33 = vpop.f32.mrf.mxu3  ;;  %2056 = vmatpush.msrb.mxu1 %v391_v30  ;;  %v4373_v30 = vld [vmem:[%s4844_s14 + $0x88] sm:$0xff] }
 0x228   : > { %3421 = vst [vmem:[%s5065_s9 + $0x478] sm:$0xff] %v3100_v31  ;;  %3988 = vmatmul.msk.f32.gmra.mxu2 %vm569_vm1, %v4355_v28  ;;  %v1325_v35 = vadd.f32 %v1324_v33, %v1212_v29  ;;  %1484 = vmatmul.f32.gmra.mxu0 %v4356_v32  ;;  %v392_v31 = vld [vmem:[%s7098_s1 + $0x3f8] sm:$0xff] }
 0x229   : > { %2282 = vmatpush.msrb.mxu0 %v392_v31 }
 0x22a   : > { %v3109_v40 = vmax.f32 %v1325_v35, 0.0  ;;  %v1214_v42 = vpop.f32.mrf.mxu1 }
 0x22b   : > { %v1550_v41 = vpop.f32.mrf.mxu2  ;;  %v1215_v45 = vadd.f32 %v1214_v42, %v5475_v63 }
 0x22c   : > { %3430 = vst [vmem:[%s5065_s9 + $0x4c0] sm:$0xff] %v3109_v40  ;;  %v1551_v43 = vadd.f32 %v1550_v41, %v1438_v34  ;;  %3990 = vmatmul.msk.f32.vlgmr.msra.gmra.mxu3 %vm569_vm1, %v4357_v44  ;;  %v4366_v40 = vld [vmem:[%s4844_s14 + $0x40] sm:$0xff] }
 0x22d   : > { %v1440_v46 = vpop.f32.mrf.mxu0  ;;  %1617 = vmatmul.f32.vlgmr.msra.gmra.mxu1 %v4358_v48 }
 0x22e   : > { %v3110_v47 = vmax.f32 %v1551_v43, 0.0  ;;  %v1441_v50 = vadd.f32 %v1440_v46, %v5495_v11 }
 0x22f   : > { %v1327_v49 = vpop.f32.mrf.mxu3 }
 0x230   : > { %3431 = vst [vmem:[%s5065_s9 + $0x4c8] sm:$0xff] %v3110_v47  ;;  %4023 = vmatmul.msk.f32.vlgmr.msra.gmra.mxu2 %vm569_vm1, %v4357_v44  ;;  %v1328_v51 = vadd.f32 %v1327_v49, %v1215_v45  ;;  %1843 = vmatmul.f32.vlgmr.msra.gmra.mxu0 %v4358_v48  ;;  %v511_v44 = vld [vmem:[%s7098_s1 + $0x7b0] sm:$0xff]  ;;  %v512_v45 = vld [vmem:[%s7098_s1 + $0x7b8] sm:$0xff] }
 0x231   : > { %2173 = vmatpush.msrb.mxu3 %v511_v44  ;;  %2399 = vmatpush.msrb.mxu2 %v512_v45 }
 0x232   : > { %v3119_v52 = vmax.f32 %v1328_v51, 0.0  ;;  %v1217_v54 = vpop.f32.mrf.mxu1 }
 0x233   : > { %v1553_v53 = vpop.f32.mrf.mxu2  ;;  %v1218_v57 = vadd.f32 %v1217_v54, %v5475_v63  ;;  %v4368_v54 = vld [vmem:[%s4844_s14 + $0x50] sm:$0xff] }
 0x234   : > { %3440 = vst [vmem:[%s5065_s9 + $0x510] sm:$0xff] %v3119_v52  ;;  %v1554_v55 = vadd.f32 %v1553_v53, %v1441_v50  ;;  %3991 = vmatmul.msk.f32.gmra.mxu3 %vm569_vm1, %v4359_v56  ;;  %v4367_v50 = vld [vmem:[%s4844_s14 + $0x58] sm:$0xff] }
 0x235   : > { %v1443_v59 = vpop.f32.mrf.mxu0  ;;  %1620 = vmatmul.f32.gmra.mxu1 %v4360_v60 }
 0x236   : > { %v3120_v5 = vmax.f32 %v1554_v55, 0.0  ;;  %v1444_v62 = vadd.f32 %v1443_v59, %v5495_v11  ;;  %v381_v59 = vld [vmem:[%s7098_s1 + $0x3a0] sm:$0xff] }
 0x237   : > { %v1330_v61 = vpop.f32.mrf.mxu3  ;;  %2057 = vmatpush.msrb.mxu1 %v381_v59 }
 0x238   : > { %3441 = vst [vmem:[%s5065_s9 + $0x518] sm:$0xff] %v3120_v5  ;;  %4024 = vmatmul.msk.f32.gmra.mxu2 %vm569_vm1, %v4359_v56  ;;  %v1331_v58 = vadd.f32 %v1330_v61, %v1218_v57  ;;  %1846 = vmatmul.f32.gmra.mxu0 %v4360_v60  ;;  %v382_v5 = vld [vmem:[%s7098_s1 + $0x3a8] sm:$0xff] }
 0x239   : > { %2283 = vmatpush.msrb.mxu0 %v382_v5 }
 0x23a   : > { %v3129_v2 = vmax.f32 %v1331_v58, 0.0  ;;  %v1220_v4 = vpop.f32.mrf.mxu1 }
 0x23b   : > { %v1556_v3 = vpop.f32.mrf.mxu2  ;;  %v1221_v9 = vadd.f32 %v1220_v4, %v5475_v63  ;;  %v4370_v4 = vld [vmem:[%s4844_s14 + $0x60] sm:$0xff] }
 0x23c   : > { %3450 = vst [vmem:[%s5065_s9 + $0x560] sm:$0xff] %v3129_v2  ;;  %v1557_v7 = vadd.f32 %v1556_v3, %v1444_v62  ;;  %3992 = vmatmul.msk.f32.gmra.mxu3 %vm569_vm1, %v4361_v8 }
 0x23d   : > { %v1446_v10 = vpop.f32.mrf.mxu0  ;;  %1623 = vmatmul.f32.gmra.mxu1 %v4362_v13 }
 0x23e   : > { %v3130_v12 = vmax.f32 %v1557_v7, 0.0  ;;  %v1447_v15 = vadd.f32 %v1446_v10, %v5495_v11 }
 0x23f   : > { %v1333_v14 = vpop.f32.mrf.mxu3 }
 0x240   : > { %3451 = vst [vmem:[%s5065_s9 + $0x568] sm:$0xff] %v3130_v12  ;;  %4025 = vmatmul.msk.f32.gmra.mxu2 %vm569_vm1, %v4361_v8  ;;  %v1334_v16 = vadd.f32 %v1333_v14, %v1221_v9  ;;  %1849 = vmatmul.f32.gmra.mxu0 %v4362_v13 }
 0x242   : > { %v3139_v18 = vmax.f32 %v1334_v16, 0.0  ;;  %v1223_v20 = vpop.f32.mrf.mxu1 }
 0x243   : > { %v1559_v19 = vpop.f32.mrf.mxu2  ;;  %v1224_v23 = vadd.f32 %v1223_v20, %v5475_v63 }
 0x244   : > { %3460 = vst [vmem:[%s5065_s9 + $0x5b0] sm:$0xff] %v3139_v18  ;;  %v1560_v21 = vadd.f32 %v1559_v19, %v1447_v15  ;;  %3993 = vmatmul.msk.f32.gmra.mxu3 %vm569_vm1, %v4363_v22  ;;  %v4371_v15 = vld [vmem:[%s4844_s14 + $0x78] sm:$0xff]  ;;  %v4372_v18 = vld [vmem:[%s4844_s14 + $0x70] sm:$0xff] }
 0x245   : > { %v1449_v24 = vpop.f32.mrf.mxu0  ;;  %1626 = vmatmul.f32.gmra.mxu1 %v4364_v26 }
 0x246   : > { %v3140_v25 = vmax.f32 %v1560_v21, 0.0  ;;  %v1450_v28 = vadd.f32 %v1449_v24, %v5495_v11  ;;  %v501_v24 = vld [vmem:[%s7098_s1 + $0x760] sm:$0xff] }
 0x247   : > { %v1336_v27 = vpop.f32.mrf.mxu3  ;;  %2174 = vmatpush.msrb.mxu3 %v501_v24 }
 0x248   : > { %3461 = vst [vmem:[%s5065_s9 + $0x5b8] sm:$0xff] %v3140_v25  ;;  %4026 = vmatmul.msk.f32.gmra.mxu2 %vm569_vm1, %v4363_v22  ;;  %v1337_v29 = vadd.f32 %v1336_v27, %v1224_v23  ;;  %1852 = vmatmul.f32.gmra.mxu0 %v4364_v26  ;;  %v371_v22 = vld [vmem:[%s7098_s1 + $0x350] sm:$0xff]  ;;  %v372_v23 = vld [vmem:[%s7098_s1 + $0x358] sm:$0xff]  ;;  %v502_v25 = vld [vmem:[%s7098_s1 + $0x768] sm:$0xff] }
 0x249   : > { %2058 = vmatpush.msrb.mxu1 %v371_v22  ;;  %2284 = vmatpush.msrb.mxu0 %v372_v23  ;;  %v4381_v22 = vld [vmem:[%s4844_s14 + $0xc8] sm:$0xff] }
 0x24a   : > { %v3149_v32 = vmax.f32 %v1337_v29, 0.0  ;;  %v1226_v34 = vpop.f32.mrf.mxu1  ;;  %2400 = vmatpush.msrb.mxu2 %v502_v25 }
 0x24b   : > { %v1562_v33 = vpop.f32.mrf.mxu2  ;;  %v1227_v37 = vadd.f32 %v1226_v34, %v5475_v63  ;;  %v4374_v34 = vld [vmem:[%s4844_s14 + $0x80] sm:$0xff] }
 0x24c   : > { %3470 = vst [vmem:[%s5065_s9 + $0x600] sm:$0xff] %v3149_v32  ;;  %v1563_v35 = vadd.f32 %v1562_v33, %v1450_v28  ;;  %3994 = vmatmul.msk.f32.gmra.mxu3 %vm569_vm1, %v4365_v36 }
 0x24d   : > { %v1452_v38 = vpop.f32.mrf.mxu0  ;;  %1629 = vmatmul.f32.gmra.mxu1 %v4366_v40 }
 0x24e   : > { %v3150_v39 = vmax.f32 %v1563_v35, 0.0  ;;  %v1453_v42 = vadd.f32 %v1452_v38, %v5495_v11 }
 0x24f   : > { %v1339_v41 = vpop.f32.mrf.mxu3 }
 0x250   : > { %3471 = vst [vmem:[%s5065_s9 + $0x608] sm:$0xff] %v3150_v39  ;;  %4027 = vmatmul.msk.f32.gmra.mxu2 %vm569_vm1, %v4365_v36  ;;  %v1340_v43 = vadd.f32 %v1339_v41, %v1227_v37  ;;  %1855 = vmatmul.f32.gmra.mxu0 %v4366_v40 }
 0x252   : > { %v3159_v46 = vmax.f32 %v1340_v43, 0.0  ;;  %v1229_v48 = vpop.f32.mrf.mxu1 }
 0x253   : > { %v1565_v47 = vpop.f32.mrf.mxu2  ;;  %v1230_v51 = vadd.f32 %v1229_v48, %v5475_v63 }
 0x254   : > { %3480 = vst [vmem:[%s5065_s9 + $0x650] sm:$0xff] %v3159_v46  ;;  %v1566_v49 = vadd.f32 %v1565_v47, %v1453_v42  ;;  %3995 = vmatmul.msk.f32.gmra.mxu3 %vm569_vm1, %v4367_v50  ;;  %v4375_v42 = vld [vmem:[%s4844_s14 + $0x98] sm:$0xff]  ;;  %v4376_v46 = vld [vmem:[%s4844_s14 + $0x90] sm:$0xff] }
 0x255   : > { %v1455_v52 = vpop.f32.mrf.mxu0  ;;  %1632 = vmatmul.f32.gmra.mxu1 %v4368_v54 }
 0x256   : > { %v3160_v53 = vmax.f32 %v1566_v49, 0.0  ;;  %v1456_v56 = vadd.f32 %v1455_v52, %v5495_v11 }
 0x257   : > { %v1342_v55 = vpop.f32.mrf.mxu3 }
 0x258   : > { %3481 = vst [vmem:[%s5065_s9 + $0x658] sm:$0xff] %v3160_v53  ;;  %4028 = vmatmul.msk.f32.gmra.mxu2 %vm569_vm1, %v4367_v50  ;;  %v1343_v57 = vadd.f32 %v1342_v55, %v1230_v51  ;;  %1858 = vmatmul.f32.gmra.mxu0 %v4368_v54  ;;  %v361_v50 = vld [vmem:[%s7098_s1 + $0x300] sm:$0xff]  ;;  %v362_v51 = vld [vmem:[%s7098_s1 + $0x308] sm:$0xff] }
 0x259   : > { %2059 = vmatpush.msrb.mxu1 %v361_v50  ;;  %2285 = vmatpush.msrb.mxu0 %v362_v51  ;;  %v4385_v50 = vld [vmem:[%s4844_s14 + $0xe8] sm:$0xff] }
 0x25a   : > { %v3169_v60 = vmax.f32 %v1343_v57, 0.0  ;;  %v1232_v62 = vpop.f32.mrf.mxu1 }
 0x25b   : > { %v1568_v61 = vpop.f32.mrf.mxu2  ;;  %v1233_v1 = vadd.f32 %v1232_v62, %v5475_v63 }
 0x25c   : > { %3490 = vst [vmem:[%s5065_s9 + $0x6a0] sm:$0xff] %v3169_v60  ;;  %v1569_v58 = vadd.f32 %v1568_v61, %v1456_v56  ;;  %3996 = vmatmul.msk.f32.gmra.mxu3 %vm569_vm1, %v4369_v0  ;;  %v4377_v56 = vld [vmem:[%s4844_s14 + $0xa8] sm:$0xff]  ;;  %v4378_v60 = vld [vmem:[%s4844_s14 + $0xa0] sm:$0xff] }
 0x25d   : > { %v1458_v2 = vpop.f32.mrf.mxu0  ;;  %1635 = vmatmul.f32.gmra.mxu1 %v4370_v4 }
 0x25e   : > { %v3170_v3 = vmax.f32 %v1569_v58, 0.0  ;;  %v1459_v8 = vadd.f32 %v1458_v2, %v5495_v11 }
 0x25f   : > { %v1345_v7 = vpop.f32.mrf.mxu3 }
 0x260   : > { %3491 = vst [vmem:[%s5065_s9 + $0x6a8] sm:$0xff] %v3170_v3  ;;  %4029 = vmatmul.msk.f32.gmra.mxu2 %vm569_vm1, %v4369_v0  ;;  %v1346_v9 = vadd.f32 %v1345_v7, %v1233_v1  ;;  %1861 = vmatmul.f32.gmra.mxu0 %v4370_v4  ;;  %v491_v0 = vld [vmem:[%s7098_s1 + $0x710] sm:$0xff]  ;;  %v492_v1 = vld [vmem:[%s7098_s1 + $0x718] sm:$0xff] }
 0x261   : > { %2175 = vmatpush.msrb.mxu3 %v491_v0  ;;  %2401 = vmatpush.msrb.mxu2 %v492_v1 }
 0x262   : > { %v3179_v10 = vmax.f32 %v1346_v9, 0.0  ;;  %v1235_v13 = vpop.f32.mrf.mxu1 }
 0x263   : > { %v1571_v12 = vpop.f32.mrf.mxu2  ;;  %v1236_v16 = vadd.f32 %v1235_v13, %v5475_v63  ;;  %v4380_v13 = vld [vmem:[%s4844_s14 + $0xb0] sm:$0xff] }
 0x264   : > { %3500 = vst [vmem:[%s5065_s9 + $0x6f0] sm:$0xff] %v3179_v10  ;;  %v1572_v14 = vadd.f32 %v1571_v12, %v1459_v8  ;;  %3997 = vmatmul.msk.f32.gmra.mxu3 %vm569_vm1, %v4371_v15  ;;  %v4379_v8 = vld [vmem:[%s4844_s14 + $0xb8] sm:$0xff] }
 0x265   : > { %v1461_v6 = vpop.f32.mrf.mxu0  ;;  %1638 = vmatmul.f32.gmra.mxu1 %v4372_v18 }
 0x266   : > { %v3180_v17 = vmax.f32 %v1572_v14, 0.0  ;;  %v1462_v20 = vadd.f32 %v1461_v6, %v5495_v11  ;;  %v351_v6 = vld [vmem:[%s7098_s1 + $0x2b0] sm:$0xff] }
 0x267   : > { %v1348_v19 = vpop.f32.mrf.mxu3  ;;  %2060 = vmatpush.msrb.mxu1 %v351_v6  ;;  %v4390_v6 = vld [vmem:[%s4844_s14 + $0x108] sm:$0xff] }
 0x268   : > { %3501 = vst [vmem:[%s5065_s9 + $0x6f8] sm:$0xff] %v3180_v17  ;;  %4030 = vmatmul.msk.f32.gmra.mxu2 %vm569_vm1, %v4371_v15  ;;  %v1349_v21 = vadd.f32 %v1348_v19, %v1236_v16  ;;  %1864 = vmatmul.f32.gmra.mxu0 %v4372_v18  ;;  %v352_v17 = vld [vmem:[%s7098_s1 + $0x2b8] sm:$0xff] }
 0x269   : > { %2286 = vmatpush.msrb.mxu0 %v352_v17 }
 0x26a   : > { %v3189_v26 = vmax.f32 %v1349_v21, 0.0  ;;  %v1238_v28 = vpop.f32.mrf.mxu1 }
 0x26b   : > { %v1574_v27 = vpop.f32.mrf.mxu2  ;;  %v1239_v31 = vadd.f32 %v1238_v28, %v5475_v63 }
 0x26c   : > { %3510 = vst [vmem:[%s5065_s9 + $0x740] sm:$0xff] %v3189_v26  ;;  %v1575_v29 = vadd.f32 %v1574_v27, %v1462_v20  ;;  %3998 = vmatmul.msk.f32.gmra.mxu3 %vm569_vm1, %v4373_v30  ;;  %v4382_v26 = vld [vmem:[%s4844_s14 + $0xc0] sm:$0xff] }
 0x26d   : > { %v1464_v32 = vpop.f32.mrf.mxu0  ;;  %1641 = vmatmul.f32.gmra.mxu1 %v4374_v34 }
 0x26e   : > { %v3190_v33 = vmax.f32 %v1575_v29, 0.0  ;;  %v1465_v36 = vadd.f32 %v1464_v32, %v5495_v11 }
 0x26f   : > { %v1351_v35 = vpop.f32.mrf.mxu3 }
 0x270   : > { %3511 = vst [vmem:[%s5065_s9 + $0x748] sm:$0xff] %v3190_v33  ;;  %4031 = vmatmul.msk.f32.gmra.mxu2 %vm569_vm1, %v4373_v30  ;;  %v1352_v37 = vadd.f32 %v1351_v35, %v1239_v31  ;;  %1867 = vmatmul.f32.gmra.mxu0 %v4374_v34  ;;  %v481_v30 = vld [vmem:[%s7098_s1 + $0x6c0] sm:$0xff]  ;;  %v482_v31 = vld [vmem:[%s7098_s1 + $0x6c8] sm:$0xff] }
 0x271   : > { %2176 = vmatpush.msrb.mxu3 %v481_v30  ;;  %2402 = vmatpush.msrb.mxu2 %v482_v31 }
 0x272   : > { %v3199_v38 = vmax.f32 %v1352_v37, 0.0  ;;  %v1241_v40 = vpop.f32.mrf.mxu1 }
 0x273   : > { %v1577_v39 = vpop.f32.mrf.mxu2  ;;  %v1242_v43 = vadd.f32 %v1241_v40, %v5475_v63  ;;  %v4384_v40 = vld [vmem:[%s4844_s14 + $0xd0] sm:$0xff] }
 0x274   : > { %3520 = vst [vmem:[%s5065_s9 + $0x790] sm:$0xff] %v3199_v38  ;;  %v1578_v41 = vadd.f32 %v1577_v39, %v1465_v36  ;;  %3999 = vmatmul.msk.f32.gmra.mxu3 %vm569_vm1, %v4375_v42  ;;  %v4383_v36 = vld [vmem:[%s4844_s14 + $0xd8] sm:$0xff] }
 0x275   : > { %v1467_v44 = vpop.f32.mrf.mxu0  ;;  %1644 = vmatmul.f32.gmra.mxu1 %v4376_v46 }
 0x276   : > { %v3200_v45 = vmax.f32 %v1578_v41, 0.0  ;;  %v1468_v48 = vadd.f32 %v1467_v44, %v5495_v11  ;;  %v341_v44 = vld [vmem:[%s7098_s1 + $0x260] sm:$0xff] }
 0x277   : > { %v1354_v47 = vpop.f32.mrf.mxu3  ;;  %2061 = vmatpush.msrb.mxu1 %v341_v44 }
 0x278   : > { %3521 = vst [vmem:[%s5065_s9 + $0x798] sm:$0xff] %v3200_v45  ;;  %4032 = vmatmul.msk.f32.gmra.mxu2 %vm569_vm1, %v4375_v42  ;;  %v1355_v49 = vadd.f32 %v1354_v47, %v1242_v43  ;;  %1870 = vmatmul.f32.gmra.mxu0 %v4376_v46  ;;  %v342_v45 = vld [vmem:[%s7098_s1 + $0x268] sm:$0xff] }
 0x279   : > { %2287 = vmatpush.msrb.mxu0 %v342_v45 }
 0x27a   : > { %v3209_v52 = vmax.f32 %v1355_v49, 0.0  ;;  %v1244_v54 = vpop.f32.mrf.mxu1 }
 0x27b   : > { %v1580_v53 = vpop.f32.mrf.mxu2  ;;  %v1245_v57 = vadd.f32 %v1244_v54, %v5475_v63  ;;  %v4386_v54 = vld [vmem:[%s4844_s14 + $0xe0] sm:$0xff] }
 0x27c   : > { %3530 = vst [vmem:[%s5065_s9 + $0x7e0] sm:$0xff] %v3209_v52  ;;  %v1581_v55 = vadd.f32 %v1580_v53, %v1468_v48  ;;  %4000 = vmatmul.msk.f32.gmra.mxu3 %vm569_vm1, %v4377_v56 }
 0x27d   : > { %v1470_v59 = vpop.f32.mrf.mxu0  ;;  %1647 = vmatmul.f32.gmra.mxu1 %v4378_v60 }
 0x27e   : > { %v3210_v5 = vmax.f32 %v1581_v55, 0.0  ;;  %v1471_v62 = vadd.f32 %v1470_v59, %v5495_v11 }
 0x27f   : > { %v1357_v61 = vpop.f32.mrf.mxu3 }
 0x280   : > { %3531 = vst [vmem:[%s5065_s9 + $0x7e8] sm:$0xff] %v3210_v5  ;;  %4033 = vmatmul.msk.f32.gmra.mxu2 %vm569_vm1, %v4377_v56  ;;  %v1358_v58 = vadd.f32 %v1357_v61, %v1245_v57  ;;  %1873 = vmatmul.f32.gmra.mxu0 %v4378_v60 }
 0x282   : > { %v3219_v2 = vmax.f32 %v1358_v58, 0.0  ;;  %v1247_v4 = vpop.f32.mrf.mxu1 }
 0x283   : > { %v1583_v3 = vpop.f32.mrf.mxu2  ;;  %v1248_v9 = vadd.f32 %v1247_v4, %v5475_v63 }
 0x284   : > { %3540 = vst [vmem:[%s5065_s9 + $0x830] sm:$0xff] %v3219_v2  ;;  %v1584_v7 = vadd.f32 %v1583_v3, %v1471_v62  ;;  %4001 = vmatmul.msk.f32.gmra.mxu3 %vm569_vm1, %v4379_v8  ;;  %v4387_v62 = vld [vmem:[%s4844_s14 + $0xf8] sm:$0xff]  ;;  %v4388_v2 = vld [vmem:[%s4844_s14 + $0xf0] sm:$0xff] }
 0x285   : > { %v1473_v10 = vpop.f32.mrf.mxu0  ;;  %1650 = vmatmul.f32.gmra.mxu1 %v4380_v13 }
 0x286   : > { %v3220_v12 = vmax.f32 %v1584_v7, 0.0  ;;  %v1474_v15 = vadd.f32 %v1473_v10, %v5495_v11  ;;  %v332_v10 = vld [vmem:[%s7098_s1 + $0x218] sm:$0xff] }
 0x287   : > { %v1360_v14 = vpop.f32.mrf.mxu3  ;;  %2288 = vmatpush.msrb.mxu0 %v332_v10 }
 0x288   : > { %3541 = vst [vmem:[%s5065_s9 + $0x838] sm:$0xff] %v3220_v12  ;;  %4034 = vmatmul.msk.f32.gmra.mxu2 %vm569_vm1, %v4379_v8  ;;  %v1361_v16 = vadd.f32 %v1360_v14, %v1248_v9  ;;  %1876 = vmatmul.f32.gmra.mxu0 %v4380_v13  ;;  %v4389_v8 = vld [vmem:[%s7099_s2] sm:$0xff]  ;;  %v472_v12 = vld [vmem:[%s7098_s1 + $0x678] sm:$0xff] }
 0x289   : > { %v5910_v9 = vperm.slane %v4389_v8, 4  ;;  %2403 = vmatpush.msrb.mxu2 %v472_v12 }
 0x28a   : > { %v3229_v18 = vmax.f32 %v1361_v16, 0.0  ;;  %v1250_v20 = vpop.f32.mrf.mxu1 }
 0x28b   : > { %v1586_v19 = vpop.f32.mrf.mxu2  ;;  %v1251_v23 = vadd.f32 %v1250_v20, %v5475_v63 }
 0x28c   : > { %3550 = vst [vmem:[%s5065_s9 + $0x880] sm:$0xff] %v3229_v18  ;;  %v1587_v21 = vadd.f32 %v1586_v19, %v1474_v15  ;;  %4002 = vmatmul.msk.f32.gmra.mxu3 %vm569_vm1, %v4381_v22  ;;  %v5928_v18 = vperm.slane %v4389_v8, 5 }
 0x28d   : > { %v1476_v24 = vpop.f32.mrf.mxu0  ;;  %1653 = vmatmul.f32.gmra.mxu1 %v4382_v26 }
 0x28e   : > { %v3230_v25 = vmax.f32 %v1587_v21, 0.0  ;;  %v1477_v28 = vadd.f32 %v1476_v24, %v5495_v11  ;;  %v4391_v21 = vld [vmem:[%s4844_s14 + $0x100] sm:$0xff] }
 0x28f   : > { %v1363_v27 = vpop.f32.mrf.mxu3 }
 0x290   : > { %3551 = vst [vmem:[%s5065_s9 + $0x888] sm:$0xff] %v3230_v25  ;;  %4035 = vmatmul.msk.f32.gmra.mxu2 %vm569_vm1, %v4381_v22  ;;  %v1364_v29 = vadd.f32 %v1363_v27, %v1251_v23  ;;  %1879 = vmatmul.f32.gmra.mxu0 %v4382_v26 }
 0x292   : > { %v3239_v32 = vmax.f32 %v1364_v29, 0.0  ;;  %v1253_v34 = vpop.f32.mrf.mxu1  ;;  %v4392_v29 = vld [vmem:[%s4844_s14 + $0x118] sm:$0xff] }
 0x293   : > { %v1589_v33 = vpop.f32.mrf.mxu2  ;;  %v1254_v37 = vadd.f32 %v1253_v34, %v5475_v63 }
 0x294   : > { %3560 = vst [vmem:[%s5065_s9 + $0x8d0] sm:$0xff] %v3239_v32  ;;  %v1590_v35 = vadd.f32 %v1589_v33, %v1477_v28  ;;  %4003 = vmatmul.msk.f32.gmra.mxu3 %vm569_vm1, %v4383_v36  ;;  %v4393_v33 = vld [vmem:[%s4844_s14 + $0x110] sm:$0xff] }
 0x295   : > { %v1479_v38 = vpop.f32.mrf.mxu0  ;;  %1656 = vmatmul.f32.gmra.mxu1 %v4384_v40 }
 0x296   : > { %v3240_v39 = vmax.f32 %v1590_v35, 0.0  ;;  %v1480_v42 = vadd.f32 %v1479_v38, %v5495_v11  ;;  %v322_v38 = vld [vmem:[%s7098_s1 + $0x1c8] sm:$0xff] }
 0x297   : > { %v1366_v41 = vpop.f32.mrf.mxu3  ;;  %2289 = vmatpush.msrb.mxu0 %v322_v38 }
 0x298   : > { %3561 = vst [vmem:[%s5065_s9 + $0x8d8] sm:$0xff] %v3240_v39  ;;  %4036 = vmatmul.msk.f32.gmra.mxu2 %vm569_vm1, %v4383_v36  ;;  %v1367_v43 = vadd.f32 %v1366_v41, %v1254_v37  ;;  %1882 = vmatmul.f32.gmra.mxu0 %v4384_v40  ;;  %v321_v37 = vld [vmem:[%s7098_s1 + $0x1c0] sm:$0xff] }
 0x29a   : > { %v3249_v46 = vmax.f32 %v1367_v43, 0.0  ;;  %v1256_v48 = vpop.f32.mrf.mxu1  ;;  %v4394_v43 = vld [vmem:[%s4844_s14 + $0x128] sm:$0xff] }
 0x29b   : > { %v1592_v47 = vpop.f32.mrf.mxu2  ;;  %v1257_v51 = vadd.f32 %v1256_v48, %v5475_v63 }
 0x29c   : > { %3570 = vst [vmem:[%s5065_s9 + $0x920] sm:$0xff] %v3249_v46  ;;  %v1593_v49 = vadd.f32 %v1592_v47, %v1480_v42  ;;  %4004 = vmatmul.msk.f32.gmra.mxu3 %vm569_vm1, %v4385_v50  ;;  %v4395_v47 = vld [vmem:[%s4844_s14 + $0x120] sm:$0xff] }
 0x29d   : > { %v1482_v52 = vpop.f32.mrf.mxu0  ;;  %1659 = vmatmul.f32.gmra.mxu1 %v4386_v54 }
 0x29e   : > { %v3250_v53 = vmax.f32 %v1593_v49, 0.0  ;;  %v1483_v56 = vadd.f32 %v1482_v52, %v5495_v11  ;;  %v462_v52 = vld [vmem:[%s7098_s1 + $0x628] sm:$0xff] }
 0x29f   : > { %v1369_v55 = vpop.f32.mrf.mxu3  ;;  %2404 = vmatpush.msrb.mxu2 %v462_v52 }
 0x2a0   : > { %3571 = vst [vmem:[%s5065_s9 + $0x928] sm:$0xff] %v3250_v53  ;;  %4037 = vmatmul.msk.f32.gmra.mxu2 %vm569_vm1, %v4385_v50  ;;  %v1370_v57 = vadd.f32 %v1369_v55, %v1257_v51  ;;  %1885 = vmatmul.f32.gmra.mxu0 %v4386_v54  ;;  %v461_v51 = vld [vmem:[%s7098_s1 + $0x620] sm:$0xff] }
 0x2a2   : > { %v3259_v59 = vmax.f32 %v1370_v57, 0.0  ;;  %v1259_v60 = vpop.f32.mrf.mxu1  ;;  %v4396_v57 = vld [vmem:[%s4844_s14 + $0x138] sm:$0xff] }
 0x2a3   : > { %v1595_v5 = vpop.f32.mrf.mxu2  ;;  %v1260_v58 = vadd.f32 %v1259_v60, %v5475_v63  ;;  %v331_v63 = vld [vmem:[%s7098_s1 + $0x210] sm:$0xff] }
 0x2a4   : > { %3580 = vst [vmem:[%s5065_s9 + $0x970] sm:$0xff] %v3259_v59  ;;  %v1596_v61 = vadd.f32 %v1595_v5, %v1483_v56  ;;  %4005 = vmatmul.msk.f32.gmra.mxu3 %vm569_vm1, %v4387_v62  ;;  %2062 = vmatpush.msrb.mxu1 %v331_v63  ;;  %v4398_v63 = vld [vmem:[%s4844_s14 + $0x148] sm:$0xff] }
 0x2a5   : > { %v1485_v0 = vpop.f32.mrf.mxu0  ;;  %1662 = vmatmul.f32.gmra.mxu1 %v4388_v2 }
 0x2a6   : > { %v3260_v1 = vmax.f32 %v1596_v61, 0.0  ;;  %v1486_v4 = vadd.f32 %v1485_v0, %v5495_v11  ;;  %v471_v11 = vld [vmem:[%s7098_s1 + $0x670] sm:$0xff]  ;;  %2063 = vmatpush.msrb.mxu1 %v321_v37  ;;  %v4402_v37 = vld [vmem:[%s4844_s14 + $0x168] sm:$0xff] }
 0x2a7   : > { %v1372_v3 = vpop.f32.mrf.mxu3  ;;  %2177 = vmatpush.msrb.mxu3 %v471_v11  ;;  %v4397_v61 = vld [vmem:[%s4844_s14 + $0x130] sm:$0xff] }
 0x2a8   : > { %3581 = vst [vmem:[%s5065_s9 + $0x978] sm:$0xff] %v3260_v1  ;;  %4038 = vmatmul.msk.f32.gmra.mxu2 %vm569_vm1, %v4387_v62  ;;  %v1373_v7 = vadd.f32 %v1372_v3, %v1260_v58  ;;  %1888 = vmatmul.f32.gmra.mxu0 %v4388_v2  ;;  %v311_v1 = vld [vmem:[%s7098_s1 + $0x170] sm:$0xff]  ;;  %v312_v2 = vld [vmem:[%s7098_s1 + $0x178] sm:$0xff] }
 0x2a9   : > { %2178 = vmatpush.msrb.mxu3 %v461_v51  ;;  %2064 = vmatpush.msrb.mxu1 %v311_v1  ;;  %v4406_v1 = vld [vmem:[%s4844_s14 + $0x188] sm:$0xff] }
 0x2aa   : > { %v3269_v13 = vmax.f32 %v1373_v7, 0.0  ;;  %v1618_v15 = vpop.f32.mrf.mxu1  ;;  %2290 = vmatpush.msrb.mxu0 %v312_v2 }
 0x2ab   : > { %v1598_v14 = vpop.f32.mrf.mxu2  ;;  %v1619_v17 = vadd.f32 %v1618_v15, %v5910_v9 }
 0x2ac   : > { %3590 = vst [vmem:[%s5065_s9 + $0x9c0] sm:$0xff] %v3269_v13  ;;  %v1599_v16 = vadd.f32 %v1598_v14, %v1486_v4  ;;  %4006 = vmatmul.msk.f32.gmra.mxu3 %vm569_vm1, %v4390_v6  ;;  %v4399_v13 = vld [vmem:[%s4844_s14 + $0x140] sm:$0xff] }
 0x2ad   : > { %v1844_v19 = vpop.f32.mrf.mxu0  ;;  %1665 = vmatmul.f32.gmra.mxu1 %v4391_v21 }
 0x2ae   : > { %v3270_v20 = vmax.f32 %v1599_v16, 0.0  ;;  %v1845_v23 = vadd.f32 %v1844_v19, %v5928_v18 }
 0x2af   : > { %v1731_v22 = vpop.f32.mrf.mxu3 }
 0x2b0   : > { %3591 = vst [vmem:[%s5065_s9 + $0x9c8] sm:$0xff] %v3270_v20  ;;  %4039 = vmatmul.msk.f32.gmra.mxu2 %vm569_vm1, %v4390_v6  ;;  %v1732_v24 = vadd.f32 %v1731_v22, %v1619_v17  ;;  %1891 = vmatmul.f32.gmra.mxu0 %v4391_v21  ;;  %v451_v6 = vld [vmem:[%s7098_s1 + $0x5d0] sm:$0xff]  ;;  %v452_v17 = vld [vmem:[%s7098_s1 + $0x5d8] sm:$0xff] }
 0x2b1   : > { %2179 = vmatpush.msrb.mxu3 %v451_v6  ;;  %2405 = vmatpush.msrb.mxu2 %v452_v17 }
 0x2b2   : > { %v2961_v25 = vmax.f32 %v1732_v24, 0.0  ;;  %v1621_v27 = vpop.f32.mrf.mxu1 }
 0x2b3   : > { %v1957_v26 = vpop.f32.mrf.mxu2  ;;  %v1622_v30 = vadd.f32 %v1621_v27, %v5910_v9  ;;  %v4401_v27 = vld [vmem:[%s4844_s14 + $0x150] sm:$0xff] }
 0x2b4   : > { %3281 = vst [vmem:[%s5065_s9 + $0x20] sm:$0xff] %v2961_v25  ;;  %v1958_v28 = vadd.f32 %v1957_v26, %v1845_v23  ;;  %4007 = vmatmul.msk.f32.gmra.mxu3 %vm569_vm1, %v4392_v29  ;;  %v4400_v23 = vld [vmem:[%s4844_s14 + $0x158] sm:$0xff] }
 0x2b5   : > { %v1847_v31 = vpop.f32.mrf.mxu0  ;;  %1668 = vmatmul.f32.gmra.mxu1 %v4393_v33 }
 0x2b6   : > { %v2962_v32 = vmax.f32 %v1958_v28, 0.0  ;;  %v1848_v35 = vadd.f32 %v1847_v31, %v5928_v18  ;;  %v301_v31 = vld [vmem:[%s7098_s1 + $0x120] sm:$0xff] }
 0x2b7   : > { %v1734_v34 = vpop.f32.mrf.mxu3  ;;  %2065 = vmatpush.msrb.mxu1 %v301_v31 }
 0x2b8   : > { %3282 = vst [vmem:[%s5065_s9 + $0x28] sm:$0xff] %v2962_v32  ;;  %4040 = vmatmul.msk.f32.gmra.mxu2 %vm569_vm1, %v4392_v29  ;;  %v1735_v36 = vadd.f32 %v1734_v34, %v1622_v30  ;;  %1894 = vmatmul.f32.gmra.mxu0 %v4393_v33  ;;  %v302_v32 = vld [vmem:[%s7098_s1 + $0x128] sm:$0xff] }
 0x2b9   : > { %2291 = vmatpush.msrb.mxu0 %v302_v32 }
 0x2ba   : > { %v2971_v39 = vmax.f32 %v1735_v36, 0.0  ;;  %v1624_v41 = vpop.f32.mrf.mxu1 }
 0x2bb   : > { %v1960_v40 = vpop.f32.mrf.mxu2  ;;  %v1625_v44 = vadd.f32 %v1624_v41, %v5910_v9  ;;  %v4403_v41 = vld [vmem:[%s4844_s14 + $0x160] sm:$0xff] }
 0x2bc   : > { %3292 = vst [vmem:[%s5065_s9 + $0x70] sm:$0xff] %v2971_v39  ;;  %v1961_v42 = vadd.f32 %v1960_v40, %v1848_v35  ;;  %4008 = vmatmul.msk.f32.gmra.mxu3 %vm569_vm1, %v4394_v43 }
 0x2bd   : > { %v1850_v45 = vpop.f32.mrf.mxu0  ;;  %1671 = vmatmul.f32.gmra.mxu1 %v4395_v47 }
 0x2be   : > { %v2972_v46 = vmax.f32 %v1961_v42, 0.0  ;;  %v1851_v49 = vadd.f32 %v1850_v45, %v5928_v18 }
 0x2bf   : > { %v1737_v48 = vpop.f32.mrf.mxu3 }
 0x2c0   : > { %3293 = vst [vmem:[%s5065_s9 + $0x78] sm:$0xff] %v2972_v46  ;;  %4041 = vmatmul.msk.f32.gmra.mxu2 %vm569_vm1, %v4394_v43  ;;  %v1738_v50 = vadd.f32 %v1737_v48, %v1625_v44  ;;  %1897 = vmatmul.f32.gmra.mxu0 %v4395_v47 }
 0x2c2   : > { %v2981_v53 = vmax.f32 %v1738_v50, 0.0  ;;  %v1627_v55 = vpop.f32.mrf.mxu1 }
 0x2c3   : > { %v1963_v54 = vpop.f32.mrf.mxu2  ;;  %v1628_v59 = vadd.f32 %v1627_v55, %v5910_v9 }
 0x2c4   : > { %3302 = vst [vmem:[%s5065_s9 + $0xc0] sm:$0xff] %v2981_v53  ;;  %v1964_v56 = vadd.f32 %v1963_v54, %v1851_v49  ;;  %4009 = vmatmul.msk.f32.gmra.mxu3 %vm569_vm1, %v4396_v57  ;;  %v4404_v49 = vld [vmem:[%s4844_s14 + $0x178] sm:$0xff]  ;;  %v4405_v53 = vld [vmem:[%s4844_s14 + $0x170] sm:$0xff] }
 0x2c5   : > { %v1853_v5 = vpop.f32.mrf.mxu0  ;;  %1674 = vmatmul.f32.gmra.mxu1 %v4397_v61 }
 0x2c6   : > { %v2982_v60 = vmax.f32 %v1964_v56, 0.0  ;;  %v1854_v58 = vadd.f32 %v1853_v5, %v5928_v18  ;;  %v441_v5 = vld [vmem:[%s7098_s1 + $0x580] sm:$0xff] }
 0x2c7   : > { %v1740_v62 = vpop.f32.mrf.mxu3  ;;  %2180 = vmatpush.msrb.mxu3 %v441_v5 }
 0x2c8   : > { %3303 = vst [vmem:[%s5065_s9 + $0xc8] sm:$0xff] %v2982_v60  ;;  %4042 = vmatmul.msk.f32.gmra.mxu2 %vm569_vm1, %v4396_v57  ;;  %v1741_v0 = vadd.f32 %v1740_v62, %v1628_v59  ;;  %1900 = vmatmul.f32.gmra.mxu0 %v4397_v61  ;;  %v291_v57 = vld [vmem:[%s7098_s1 + $0xd0] sm:$0xff]  ;;  %v292_v59 = vld [vmem:[%s7098_s1 + $0xd8] sm:$0xff]  ;;  %v442_v60 = vld [vmem:[%s7098_s1 + $0x588] sm:$0xff] }
 0x2c9   : > { %2066 = vmatpush.msrb.mxu1 %v291_v57  ;;  %2292 = vmatpush.msrb.mxu0 %v292_v59  ;;  %v4414_v57 = vld [vmem:[%s4844_s14 + $0x1c8] sm:$0xff] }
 0x2ca   : > { %v2991_v3 = vmax.f32 %v1741_v0, 0.0  ;;  %v1630_v7 = vpop.f32.mrf.mxu1  ;;  %2406 = vmatpush.msrb.mxu2 %v442_v60 }
 0x2cb   : > { %v1966_v4 = vpop.f32.mrf.mxu2  ;;  %v1631_v10 = vadd.f32 %v1630_v7, %v5910_v9  ;;  %v4407_v7 = vld [vmem:[%s4844_s14 + $0x180] sm:$0xff] }
 0x2cc   : > { %3312 = vst [vmem:[%s5065_s9 + $0x110] sm:$0xff] %v2991_v3  ;;  %v1967_v8 = vadd.f32 %v1966_v4, %v1854_v58  ;;  %4010 = vmatmul.msk.f32.gmra.mxu3 %vm569_vm1, %v4398_v63 }
 0x2cd   : > { %v1856_v11 = vpop.f32.mrf.mxu0  ;;  %1677 = vmatmul.f32.gmra.mxu1 %v4399_v13 }
 0x2ce   : > { %v2992_v12 = vmax.f32 %v1967_v8, 0.0  ;;  %v1857_v15 = vadd.f32 %v1856_v11, %v5928_v18 }
 0x2cf   : > { %v1743_v14 = vpop.f32.mrf.mxu3 }
 0x2d0   : > { %3313 = vst [vmem:[%s5065_s9 + $0x118] sm:$0xff] %v2992_v12  ;;  %4043 = vmatmul.msk.f32.gmra.mxu2 %vm569_vm1, %v4398_v63  ;;  %v1744_v16 = vadd.f32 %v1743_v14, %v1631_v10  ;;  %1903 = vmatmul.f32.gmra.mxu0 %v4399_v13 }
 0x2d2   : > { %v3001_v19 = vmax.f32 %v1744_v16, 0.0  ;;  %v1633_v21 = vpop.f32.mrf.mxu1 }
 0x2d3   : > { %v1969_v20 = vpop.f32.mrf.mxu2  ;;  %v1634_v24 = vadd.f32 %v1633_v21, %v5910_v9 }
 0x2d4   : > { %3322 = vst [vmem:[%s5065_s9 + $0x160] sm:$0xff] %v3001_v19  ;;  %v1970_v22 = vadd.f32 %v1969_v20, %v1857_v15  ;;  %4011 = vmatmul.msk.f32.gmra.mxu3 %vm569_vm1, %v4400_v23  ;;  %v4408_v15 = vld [vmem:[%s4844_s14 + $0x198] sm:$0xff]  ;;  %v4409_v19 = vld [vmem:[%s4844_s14 + $0x190] sm:$0xff] }
 0x2d5   : > { %v1859_v25 = vpop.f32.mrf.mxu0  ;;  %1680 = vmatmul.f32.gmra.mxu1 %v4401_v27 }
 0x2d6   : > { %v3002_v26 = vmax.f32 %v1970_v22, 0.0  ;;  %v1860_v29 = vadd.f32 %v1859_v25, %v5928_v18 }
 0x2d7   : > { %v1746_v28 = vpop.f32.mrf.mxu3 }
 0x2d8   : > { %3323 = vst [vmem:[%s5065_s9 + $0x168] sm:$0xff] %v3002_v26  ;;  %4044 = vmatmul.msk.f32.gmra.mxu2 %vm569_vm1, %v4400_v23  ;;  %v1747_v30 = vadd.f32 %v1746_v28, %v1634_v24  ;;  %1906 = vmatmul.f32.gmra.mxu0 %v4401_v27  ;;  %v281_v23 = vld [vmem:[%s7098_s1 + $0x80] sm:$0xff]  ;;  %v282_v24 = vld [vmem:[%s7098_s1 + $0x88] sm:$0xff] }
 0x2d9   : > { %2067 = vmatpush.msrb.mxu1 %v281_v23  ;;  %2293 = vmatpush.msrb.mxu0 %v282_v24  ;;  %v4418_v23 = vld [vmem:[%s4844_s14 + $0x1e8] sm:$0xff] }
 0x2da   : > { %v3011_v33 = vmax.f32 %v1747_v30, 0.0  ;;  %v1636_v35 = vpop.f32.mrf.mxu1 }
 0x2db   : > { %v1972_v34 = vpop.f32.mrf.mxu2  ;;  %v1637_v38 = vadd.f32 %v1636_v35, %v5910_v9 }
 0x2dc   : > { %3332 = vst [vmem:[%s5065_s9 + $0x1b0] sm:$0xff] %v3011_v33  ;;  %v1973_v36 = vadd.f32 %v1972_v34, %v1860_v29  ;;  %4012 = vmatmul.msk.f32.gmra.mxu3 %vm569_vm1, %v4402_v37  ;;  %v4410_v29 = vld [vmem:[%s4844_s14 + $0x1a8] sm:$0xff]  ;;  %v4411_v33 = vld [vmem:[%s4844_s14 + $0x1a0] sm:$0xff] }
 0x2dd   : > { %v1862_v39 = vpop.f32.mrf.mxu0  ;;  %1683 = vmatmul.f32.gmra.mxu1 %v4403_v41 }
 0x2de   : > { %v3012_v40 = vmax.f32 %v1973_v36, 0.0  ;;  %v1863_v43 = vadd.f32 %v1862_v39, %v5928_v18 }
 0x2df   : > { %v1749_v42 = vpop.f32.mrf.mxu3 }
 0x2e0   : > { %3333 = vst [vmem:[%s5065_s9 + $0x1b8] sm:$0xff] %v3012_v40  ;;  %4045 = vmatmul.msk.f32.gmra.mxu2 %vm569_vm1, %v4402_v37  ;;  %v1750_v44 = vadd.f32 %v1749_v42, %v1637_v38  ;;  %1909 = vmatmul.f32.gmra.mxu0 %v4403_v41  ;;  %v431_v37 = vld [vmem:[%s7098_s1 + $0x530] sm:$0xff]  ;;  %v432_v38 = vld [vmem:[%s7098_s1 + $0x538] sm:$0xff] }
 0x2e1   : > { %2181 = vmatpush.msrb.mxu3 %v431_v37  ;;  %2407 = vmatpush.msrb.mxu2 %v432_v38 }
 0x2e2   : > { %v3021_v45 = vmax.f32 %v1750_v44, 0.0  ;;  %v1639_v47 = vpop.f32.mrf.mxu1 }
 0x2e3   : > { %v1975_v46 = vpop.f32.mrf.mxu2  ;;  %v1640_v50 = vadd.f32 %v1639_v47, %v5910_v9  ;;  %v4413_v47 = vld [vmem:[%s4844_s14 + $0x1b0] sm:$0xff] }
 0x2e4   : > { %3342 = vst [vmem:[%s5065_s9 + $0x200] sm:$0xff] %v3021_v45  ;;  %v1976_v48 = vadd.f32 %v1975_v46, %v1863_v43  ;;  %4013 = vmatmul.msk.f32.gmra.mxu3 %vm569_vm1, %v4404_v49  ;;  %v4412_v43 = vld [vmem:[%s4844_s14 + $0x1b8] sm:$0xff] }
 0x2e5   : > { %v1865_v51 = vpop.f32.mrf.mxu0  ;;  %1686 = vmatmul.f32.gmra.mxu1 %v4405_v53 }
 0x2e6   : > { %v3022_v52 = vmax.f32 %v1976_v48, 0.0  ;;  %v1866_v55 = vadd.f32 %v1865_v51, %v5928_v18  ;;  %v271_v51 = vld [vmem:[%s7098_s1 + $0x30] sm:$0xff] }
 0x2e7   : > { %v1752_v54 = vpop.f32.mrf.mxu3  ;;  %2068 = vmatpush.msrb.mxu1 %v271_v51  ;;  %v4422_v51 = vld [vmem:[%s4844_s14 + $0x8] sm:$0xff] }
 0x2e8   : > { %3343 = vst [vmem:[%s5065_s9 + $0x208] sm:$0xff] %v3022_v52  ;;  %4046 = vmatmul.msk.f32.gmra.mxu2 %vm569_vm1, %v4404_v49  ;;  %v1753_v56 = vadd.f32 %v1752_v54, %v1640_v50  ;;  %1912 = vmatmul.f32.gmra.mxu0 %v4405_v53  ;;  %v272_v52 = vld [vmem:[%s7098_s1 + $0x38] sm:$0xff] }
 0x2e9   : > { %2294 = vmatpush.msrb.mxu0 %v272_v52 }
 0x2ea   : > { %v3031_v61 = vmax.f32 %v1753_v56, 0.0  ;;  %v1642_v58 = vpop.f32.mrf.mxu1 }
 0x2eb   : > { %v1978_v62 = vpop.f32.mrf.mxu2  ;;  %v1643_v2 = vadd.f32 %v1642_v58, %v5910_v9 }
 0x2ec   : > { %3352 = vst [vmem:[%s5065_s9 + $0x250] sm:$0xff] %v3031_v61  ;;  %v1979_v0 = vadd.f32 %v1978_v62, %v1866_v55  ;;  %4014 = vmatmul.msk.f32.gmra.mxu3 %vm569_vm1, %v4406_v1  ;;  %v4415_v61 = vld [vmem:[%s4844_s14 + $0x1c0] sm:$0xff] }
 0x2ed   : > { %v1868_v3 = vpop.f32.mrf.mxu0  ;;  %1689 = vmatmul.f32.gmra.mxu1 %v4407_v7 }
 0x2ee   : > { %v3032_v4 = vmax.f32 %v1979_v0, 0.0  ;;  %v1869_v63 = vadd.f32 %v1868_v3, %v5928_v18 }
 0x2ef   : > { %v1755_v8 = vpop.f32.mrf.mxu3 }
 0x2f0   : > { %3353 = vst [vmem:[%s5065_s9 + $0x258] sm:$0xff] %v3032_v4  ;;  %4047 = vmatmul.msk.f32.gmra.mxu2 %vm569_vm1, %v4406_v1  ;;  %v1756_v10 = vadd.f32 %v1755_v8, %v1643_v2  ;;  %1915 = vmatmul.f32.gmra.mxu0 %v4407_v7  ;;  %v543_v1 = vld [vmem:[%s7098_s1 + $0x8b0] sm:$0xf]  ;;  %v544_v2 = vld [vmem:[%s7098_s1 + $0x8b8] sm:$0xf] }
 0x2f1   : > { %4121 = vmatpush.msk.msra.mxu3 %vm666_vm0, %v543_v1  ;;  %4154 = vmatpush.msk.msra.mxu2 %vm666_vm0, %v544_v2 }
 0x2f2   : > { %v3041_v11 = vmax.f32 %v1756_v10, 0.0  ;;  %v1645_v13 = vpop.f32.mrf.mxu1 }
 0x2f3   : > { %v1981_v12 = vpop.f32.mrf.mxu2  ;;  %v1646_v16 = vadd.f32 %v1645_v13, %v5910_v9  ;;  %v4417_v13 = vld [vmem:[%s4844_s14 + $0x1d0] sm:$0xff] }
 0x2f4   : > { %3362 = vst [vmem:[%s5065_s9 + $0x2a0] sm:$0xff] %v3041_v11  ;;  %v1982_v14 = vadd.f32 %v1981_v12, %v1869_v63  ;;  %4015 = vmatmul.msk.f32.gmra.mxu3 %vm569_vm1, %v4408_v15  ;;  %v4416_v63 = vld [vmem:[%s4844_s14 + $0x1d8] sm:$0xff] }
 0x2f5   : > { %v1871_v6 = vpop.f32.mrf.mxu0  ;;  %1692 = vmatmul.f32.gmra.mxu1 %v4409_v19 }
 0x2f6   : > { %v3042_v17 = vmax.f32 %v1982_v14, 0.0  ;;  %v1872_v21 = vadd.f32 %v1871_v6, %v5928_v18  ;;  %v423_v6 = vld [vmem:[%s7098_s1 + $0x4f0] sm:$0xff] }
 0x2f7   : > { %v1758_v20 = vpop.f32.mrf.mxu3  ;;  %2505 = vmatpush.msra.mxu1 %v423_v6 }
 0x2f8   : > { %3363 = vst [vmem:[%s5065_s9 + $0x2a8] sm:$0xff] %v3042_v17  ;;  %4048 = vmatmul.msk.f32.gmra.mxu2 %vm569_vm1, %v4408_v15  ;;  %v1759_v22 = vadd.f32 %v1758_v20, %v1646_v16  ;;  %1918 = vmatmul.f32.gmra.mxu0 %v4409_v19  ;;  %v424_v17 = vld [vmem:[%s7098_s1 + $0x4f8] sm:$0xff] }
 0x2f9   : > { %2731 = vmatpush.msra.mxu0 %v424_v17 }
 0x2fa   : > { %v3051_v25 = vmax.f32 %v1759_v22, 0.0  ;;  %v1648_v27 = vpop.f32.mrf.mxu1 }
 0x2fb   : > { %v1984_v26 = vpop.f32.mrf.mxu2  ;;  %v1649_v30 = vadd.f32 %v1648_v27, %v5910_v9  ;;  %v4419_v27 = vld [vmem:[%s4844_s14 + $0x1e0] sm:$0xff] }
 0x2fc   : > { %3372 = vst [vmem:[%s5065_s9 + $0x2f0] sm:$0xff] %v3051_v25  ;;  %v1985_v28 = vadd.f32 %v1984_v26, %v1872_v21  ;;  %4016 = vmatmul.msk.f32.gmra.mxu3 %vm569_vm1, %v4410_v29 }
 0x2fd   : > { %v1874_v31 = vpop.f32.mrf.mxu0  ;;  %1695 = vmatmul.f32.gmra.mxu1 %v4411_v33 }
 0x2fe   : > { %v3052_v32 = vmax.f32 %v1985_v28, 0.0  ;;  %v1875_v35 = vadd.f32 %v1874_v31, %v5928_v18 }
 0x2ff   : > { %v1761_v34 = vpop.f32.mrf.mxu3 }
 0x300   : > { %3373 = vst [vmem:[%s5065_s9 + $0x2f8] sm:$0xff] %v3052_v32  ;;  %4049 = vmatmul.msk.f32.gmra.mxu2 %vm569_vm1, %v4410_v29  ;;  %v1762_v36 = vadd.f32 %v1761_v34, %v1649_v30  ;;  %1921 = vmatmul.f32.gmra.mxu0 %v4411_v33 }
 0x302   : > { %v3061_v39 = vmax.f32 %v1762_v36, 0.0  ;;  %v1651_v41 = vpop.f32.mrf.mxu1 }
 0x303   : > { %v1987_v40 = vpop.f32.mrf.mxu2  ;;  %v1652_v44 = vadd.f32 %v1651_v41, %v5910_v9 }
 0x304   : > { %3382 = vst [vmem:[%s5065_s9 + $0x340] sm:$0xff] %v3061_v39  ;;  %v1988_v42 = vadd.f32 %v1987_v40, %v1875_v35  ;;  %4017 = vmatmul.msk.f32.gmra.mxu3 %vm569_vm1, %v4412_v43  ;;  %v4420_v35 = vld [vmem:[%s4844_s14 + $0x1f8] sm:$0xff]  ;;  %v4421_v39 = vld [vmem:[%s4844_s14 + $0x1f0] sm:$0xff] }
 0x305   : > { %v1877_v45 = vpop.f32.mrf.mxu0  ;;  %1698 = vmatmul.f32.gmra.mxu1 %v4413_v47 }
 0x306   : > { %v3062_v46 = vmax.f32 %v1988_v42, 0.0  ;;  %v1878_v49 = vadd.f32 %v1877_v45, %v5928_v18  ;;  %v533_v45 = vld [vmem:[%s7098_s1 + $0x860] sm:$0xff] }
 0x307   : > { %v1764_v48 = vpop.f32.mrf.mxu3  ;;  %2623 = vmatpush.msra.mxu3 %v533_v45 }
 0x308   : > { %3383 = vst [vmem:[%s5065_s9 + $0x348] sm:$0xff] %v3062_v46  ;;  %4050 = vmatmul.msk.f32.gmra.mxu2 %vm569_vm1, %v4412_v43  ;;  %v1765_v50 = vadd.f32 %v1764_v48, %v1652_v44  ;;  %1924 = vmatmul.f32.gmra.mxu0 %v4413_v47  ;;  %v413_v43 = vld [vmem:[%s7098_s1 + $0x4a0] sm:$0xff]  ;;  %v414_v44 = vld [vmem:[%s7098_s1 + $0x4a8] sm:$0xff] }
 0x309   : > { %2506 = vmatpush.msra.mxu1 %v413_v43  ;;  %2732 = vmatpush.msra.mxu0 %v414_v44  ;;  %v534_v46 = vld [vmem:[%s7098_s1 + $0x868] sm:$0xff] }
 0x30a   : > { %v3071_v53 = vmax.f32 %v1765_v50, 0.0  ;;  %v1654_v55 = vpop.f32.mrf.mxu1  ;;  %2849 = vmatpush.msra.mxu2 %v534_v46  ;;  %v4430_v43 = vld [vmem:[%s4844_s14 + $0x48] sm:$0xff] }
 0x30b   : > { %v1990_v54 = vpop.f32.mrf.mxu2  ;;  %v1655_v59 = vadd.f32 %v1654_v55, %v5910_v9  ;;  %v4423_v55 = vld [vmem:[%s4844_s14] sm:$0xff] }
 0x30c   : > { %3392 = vst [vmem:[%s5065_s9 + $0x390] sm:$0xff] %v3071_v53  ;;  %v1991_v56 = vadd.f32 %v1990_v54, %v1878_v49  ;;  %4018 = vmatmul.msk.f32.gmra.mxu3 %vm569_vm1, %v4414_v57 }
 0x30d   : > { %v1880_v5 = vpop.f32.mrf.mxu0  ;;  %1701 = vmatmul.f32.gmra.mxu1 %v4415_v61 }
 0x30e   : > { %v3072_v60 = vmax.f32 %v1991_v56, 0.0  ;;  %v1881_v58 = vadd.f32 %v1880_v5, %v5928_v18 }
 0x30f   : > { %v1767_v62 = vpop.f32.mrf.mxu3 }
 0x310   : > { %3393 = vst [vmem:[%s5065_s9 + $0x398] sm:$0xff] %v3072_v60  ;;  %4051 = vmatmul.msk.f32.gmra.mxu2 %vm569_vm1, %v4414_v57  ;;  %v1768_v0 = vadd.f32 %v1767_v62, %v1655_v59  ;;  %1927 = vmatmul.f32.gmra.mxu0 %v4415_v61 }
 0x312   : > { %v3081_v3 = vmax.f32 %v1768_v0, 0.0  ;;  %v1657_v7 = vpop.f32.mrf.mxu1 }
 0x313   : > { %v1993_v4 = vpop.f32.mrf.mxu2  ;;  %v1658_v10 = vadd.f32 %v1657_v7, %v5910_v9 }
 0x314   : > { %3402 = vst [vmem:[%s5065_s9 + $0x3e0] sm:$0xff] %v3081_v3  ;;  %v1994_v8 = vadd.f32 %v1993_v4, %v1881_v58  ;;  %4019 = vmatmul.msk.f32.gmra.mxu3 %vm569_vm1, %v4416_v63  ;;  %v4424_v58 = vld [vmem:[%s4844_s14 + $0x18] sm:$0xff]  ;;  %v4425_v3 = vld [vmem:[%s4844_s14 + $0x10] sm:$0xff] }
 0x315   : > { %v1883_v11 = vpop.f32.mrf.mxu0  ;;  %1704 = vmatmul.f32.gmra.mxu1 %v4417_v13 }
 0x316   : > { %v3082_v12 = vmax.f32 %v1994_v8, 0.0  ;;  %v1884_v15 = vadd.f32 %v1883_v11, %v5928_v18 }
 0x317   : > { %v1770_v14 = vpop.f32.mrf.mxu3 }
 0x318   : > { %3403 = vst [vmem:[%s5065_s9 + $0x3e8] sm:$0xff] %v3082_v12  ;;  %4052 = vmatmul.msk.f32.gmra.mxu2 %vm569_vm1, %v4416_v63  ;;  %v1771_v16 = vadd.f32 %v1770_v14, %v1658_v10  ;;  %1930 = vmatmul.f32.gmra.mxu0 %v4417_v13  ;;  %v403_v63 = vld [vmem:[%s7098_s1 + $0x450] sm:$0xff]  ;;  %v404_v10 = vld [vmem:[%s7098_s1 + $0x458] sm:$0xff] }
 0x319   : > { %2507 = vmatpush.msra.mxu1 %v403_v63  ;;  %2733 = vmatpush.msra.mxu0 %v404_v10  ;;  %v4434_v63 = vld [vmem:[%s4844_s14 + $0x68] sm:$0xff] }
 0x31a   : > { %v3091_v19 = vmax.f32 %v1771_v16, 0.0  ;;  %v1660_v21 = vpop.f32.mrf.mxu1 }
 0x31b   : > { %v1996_v20 = vpop.f32.mrf.mxu2  ;;  %v1661_v24 = vadd.f32 %v1660_v21, %v5910_v9 }
 0x31c   : > { %3412 = vst [vmem:[%s5065_s9 + $0x430] sm:$0xff] %v3091_v19  ;;  %v1997_v22 = vadd.f32 %v1996_v20, %v1884_v15  ;;  %4020 = vmatmul.msk.f32.gmra.mxu3 %vm569_vm1, %v4418_v23  ;;  %v4426_v15 = vld [vmem:[%s4844_s14 + $0x28] sm:$0xff]  ;;  %v4427_v19 = vld [vmem:[%s4844_s14 + $0x20] sm:$0xff] }
 0x31d   : > { %v1886_v25 = vpop.f32.mrf.mxu0  ;;  %1707 = vmatmul.f32.gmra.mxu1 %v4419_v27 }
 0x31e   : > { %v3092_v26 = vmax.f32 %v1997_v22, 0.0  ;;  %v1887_v29 = vadd.f32 %v1886_v25, %v5928_v18 }
 0x31f   : > { %v1773_v28 = vpop.f32.mrf.mxu3 }
 0x320   : > { %3413 = vst [vmem:[%s5065_s9 + $0x438] sm:$0xff] %v3092_v26  ;;  %4053 = vmatmul.msk.f32.gmra.mxu2 %vm569_vm1, %v4418_v23  ;;  %v1774_v30 = vadd.f32 %v1773_v28, %v1661_v24  ;;  %1933 = vmatmul.f32.gmra.mxu0 %v4419_v27  ;;  %v523_v23 = vld [vmem:[%s7098_s1 + $0x810] sm:$0xff]  ;;  %v524_v24 = vld [vmem:[%s7098_s1 + $0x818] sm:$0xff] }
 0x321   : > { %2624 = vmatpush.msra.mxu3 %v523_v23  ;;  %2850 = vmatpush.msra.mxu2 %v524_v24 }
 0x322   : > { %v3101_v31 = vmax.f32 %v1774_v30, 0.0  ;;  %v1663_v33 = vpop.f32.mrf.mxu1 }
 0x323   : > { %v1999_v32 = vpop.f32.mrf.mxu2  ;;  %v1664_v36 = vadd.f32 %v1663_v33, %v5910_v9  ;;  %v4429_v33 = vld [vmem:[%s4844_s14 + $0x30] sm:$0xff] }
 0x324   : > { %3422 = vst [vmem:[%s5065_s9 + $0x480] sm:$0xff] %v3101_v31  ;;  %v2000_v34 = vadd.f32 %v1999_v32, %v1887_v29  ;;  %4021 = vmatmul.msk.f32.gmra.mxu3 %vm569_vm1, %v4420_v35  ;;  %v4428_v29 = vld [vmem:[%s4844_s14 + $0x38] sm:$0xff] }
 0x325   : > { %v1889_v37 = vpop.f32.mrf.mxu0  ;;  %1710 = vmatmul.f32.gmra.mxu1 %v4421_v39 }
 0x326   : > { %v3102_v38 = vmax.f32 %v2000_v34, 0.0  ;;  %v1890_v41 = vadd.f32 %v1889_v37, %v5928_v18  ;;  %v393_v37 = vld [vmem:[%s7098_s1 + $0x400] sm:$0xff] }
 0x327   : > { %v1776_v40 = vpop.f32.mrf.mxu3  ;;  %2508 = vmatpush.msra.mxu1 %v393_v37  ;;  %v4438_v37 = vld [vmem:[%s4844_s14 + $0x88] sm:$0xff] }
 0x328   : > { %3423 = vst [vmem:[%s5065_s9 + $0x488] sm:$0xff] %v3102_v38  ;;  %4054 = vmatmul.msk.f32.gmra.mxu2 %vm569_vm1, %v4420_v35  ;;  %v1777_v42 = vadd.f32 %v1776_v40, %v1664_v36  ;;  %1936 = vmatmul.f32.gmra.mxu0 %v4421_v39  ;;  %v394_v38 = vld [vmem:[%s7098_s1 + $0x408] sm:$0xff] }
 0x329   : > { %2734 = vmatpush.msra.mxu0 %v394_v38 }
 0x32a   : > { %v3111_v47 = vmax.f32 %v1777_v42, 0.0  ;;  %v1666_v49 = vpop.f32.mrf.mxu1 }
 0x32b   : > { %v2002_v48 = vpop.f32.mrf.mxu2  ;;  %v1667_v52 = vadd.f32 %v1666_v49, %v5910_v9 }
 0x32c   : > { %3432 = vst [vmem:[%s5065_s9 + $0x4d0] sm:$0xff] %v3111_v47  ;;  %v2003_v50 = vadd.f32 %v2002_v48, %v1890_v41  ;;  %4056 = vmatmul.msk.f32.vlgmr.msrb.gmra.mxu3 %vm569_vm1, %v4422_v51  ;;  %v4431_v47 = vld [vmem:[%s4844_s14 + $0x40] sm:$0xff] }
 0x32d   : > { %v1892_v53 = vpop.f32.mrf.mxu0  ;;  %2069 = vmatmul.f32.vlgmr.msrb.gmra.mxu1 %v4423_v55 }
 0x32e   : > { %v3112_v54 = vmax.f32 %v2003_v50, 0.0  ;;  %v1893_v57 = vadd.f32 %v1892_v53, %v5928_v18 }
 0x32f   : > { %v1779_v56 = vpop.f32.mrf.mxu3 }
 0x330   : > { %3433 = vst [vmem:[%s5065_s9 + $0x4d8] sm:$0xff] %v3112_v54  ;;  %4089 = vmatmul.msk.f32.vlgmr.msrb.gmra.mxu2 %vm569_vm1, %v4422_v51  ;;  %v1780_v59 = vadd.f32 %v1779_v56, %v1667_v52  ;;  %2295 = vmatmul.f32.vlgmr.msrb.gmra.mxu0 %v4423_v55  ;;  %v513_v51 = vld [vmem:[%s7098_s1 + $0x7c0] sm:$0xff]  ;;  %v514_v52 = vld [vmem:[%s7098_s1 + $0x7c8] sm:$0xff] }
 0x331   : > { %2625 = vmatpush.msra.mxu3 %v513_v51  ;;  %2851 = vmatpush.msra.mxu2 %v514_v52 }
 0x332   : > { %v3121_v5 = vmax.f32 %v1780_v59, 0.0  ;;  %v1669_v61 = vpop.f32.mrf.mxu1 }
 0x333   : > { %v2005_v60 = vpop.f32.mrf.mxu2  ;;  %v1670_v0 = vadd.f32 %v1669_v61, %v5910_v9  ;;  %v4433_v61 = vld [vmem:[%s4844_s14 + $0x50] sm:$0xff] }
 0x334   : > { %3442 = vst [vmem:[%s5065_s9 + $0x520] sm:$0xff] %v3121_v5  ;;  %v2006_v62 = vadd.f32 %v2005_v60, %v1893_v57  ;;  %4057 = vmatmul.msk.f32.gmra.mxu3 %vm569_vm1, %v4424_v58  ;;  %v4432_v57 = vld [vmem:[%s4844_s14 + $0x58] sm:$0xff] }
 0x335   : > { %v1895_v1 = vpop.f32.mrf.mxu0  ;;  %2072 = vmatmul.f32.gmra.mxu1 %v4425_v3 }
 0x336   : > { %v3122_v2 = vmax.f32 %v2006_v62, 0.0  ;;  %v1896_v7 = vadd.f32 %v1895_v1, %v5928_v18  ;;  %v383_v1 = vld [vmem:[%s7098_s1 + $0x3b0] sm:$0xff] }
 0x337   : > { %v1782_v4 = vpop.f32.mrf.mxu3  ;;  %2509 = vmatpush.msra.mxu1 %v383_v1 }
 0x338   : > { %3443 = vst [vmem:[%s5065_s9 + $0x528] sm:$0xff] %v3122_v2  ;;  %4090 = vmatmul.msk.f32.gmra.mxu2 %vm569_vm1, %v4424_v58  ;;  %v1783_v8 = vadd.f32 %v1782_v4, %v1670_v0  ;;  %2298 = vmatmul.f32.gmra.mxu0 %v4425_v3  ;;  %v384_v2 = vld [vmem:[%s7098_s1 + $0x3b8] sm:$0xff] }
 0x339   : > { %2735 = vmatpush.msra.mxu0 %v384_v2 }
 0x33a   : > { %v3131_v11 = vmax.f32 %v1783_v8, 0.0  ;;  %v1672_v13 = vpop.f32.mrf.mxu1 }
 0x33b   : > { %v2008_v12 = vpop.f32.mrf.mxu2  ;;  %v1673_v16 = vadd.f32 %v1672_v13, %v5910_v9  ;;  %v4435_v13 = vld [vmem:[%s4844_s14 + $0x60] sm:$0xff] }
 0x33c   : > { %3452 = vst [vmem:[%s5065_s9 + $0x570] sm:$0xff] %v3131_v11  ;;  %v2009_v14 = vadd.f32 %v2008_v12, %v1896_v7  ;;  %4058 = vmatmul.msk.f32.gmra.mxu3 %vm569_vm1, %v4426_v15 }
 0x33d   : > { %v1898_v6 = vpop.f32.mrf.mxu0  ;;  %2075 = vmatmul.f32.gmra.mxu1 %v4427_v19 }
 0x33e   : > { %v3132_v17 = vmax.f32 %v2009_v14, 0.0  ;;  %v1899_v21 = vadd.f32 %v1898_v6, %v5928_v18 }
 0x33f   : > { %v1785_v20 = vpop.f32.mrf.mxu3 }
 0x340   : > { %3453 = vst [vmem:[%s5065_s9 + $0x578] sm:$0xff] %v3132_v17  ;;  %4091 = vmatmul.msk.f32.gmra.mxu2 %vm569_vm1, %v4426_v15  ;;  %v1786_v22 = vadd.f32 %v1785_v20, %v1673_v16  ;;  %2301 = vmatmul.f32.gmra.mxu0 %v4427_v19 }
 0x342   : > { %v3141_v25 = vmax.f32 %v1786_v22, 0.0  ;;  %v1675_v27 = vpop.f32.mrf.mxu1 }
 0x343   : > { %v2011_v26 = vpop.f32.mrf.mxu2  ;;  %v1676_v30 = vadd.f32 %v1675_v27, %v5910_v9 }
 0x344   : > { %3462 = vst [vmem:[%s5065_s9 + $0x5c0] sm:$0xff] %v3141_v25  ;;  %v2012_v28 = vadd.f32 %v2011_v26, %v1899_v21  ;;  %4059 = vmatmul.msk.f32.gmra.mxu3 %vm569_vm1, %v4428_v29  ;;  %v4436_v21 = vld [vmem:[%s4844_s14 + $0x78] sm:$0xff]  ;;  %v4437_v25 = vld [vmem:[%s4844_s14 + $0x70] sm:$0xff] }
 0x345   : > { %v1901_v31 = vpop.f32.mrf.mxu0  ;;  %2078 = vmatmul.f32.gmra.mxu1 %v4429_v33 }
 0x346   : > { %v3142_v32 = vmax.f32 %v2012_v28, 0.0  ;;  %v1902_v35 = vadd.f32 %v1901_v31, %v5928_v18  ;;  %v503_v31 = vld [vmem:[%s7098_s1 + $0x770] sm:$0xff] }
 0x347   : > { %v1788_v34 = vpop.f32.mrf.mxu3  ;;  %2626 = vmatpush.msra.mxu3 %v503_v31 }
 0x348   : > { %3463 = vst [vmem:[%s5065_s9 + $0x5c8] sm:$0xff] %v3142_v32  ;;  %4092 = vmatmul.msk.f32.gmra.mxu2 %vm569_vm1, %v4428_v29  ;;  %v1789_v36 = vadd.f32 %v1788_v34, %v1676_v30  ;;  %2304 = vmatmul.f32.gmra.mxu0 %v4429_v33  ;;  %v373_v29 = vld [vmem:[%s7098_s1 + $0x360] sm:$0xff]  ;;  %v374_v30 = vld [vmem:[%s7098_s1 + $0x368] sm:$0xff]  ;;  %v504_v32 = vld [vmem:[%s7098_s1 + $0x778] sm:$0xff] }
 0x349   : > { %2510 = vmatpush.msra.mxu1 %v373_v29  ;;  %2736 = vmatpush.msra.mxu0 %v374_v30  ;;  %v4446_v29 = vld [vmem:[%s4844_s14 + $0xc8] sm:$0xff] }
 0x34a   : > { %v3151_v39 = vmax.f32 %v1789_v36, 0.0  ;;  %v1678_v41 = vpop.f32.mrf.mxu1  ;;  %2852 = vmatpush.msra.mxu2 %v504_v32 }
 0x34b   : > { %v2014_v40 = vpop.f32.mrf.mxu2  ;;  %v1679_v44 = vadd.f32 %v1678_v41, %v5910_v9  ;;  %v4439_v41 = vld [vmem:[%s4844_s14 + $0x80] sm:$0xff] }
 0x34c   : > { %3472 = vst [vmem:[%s5065_s9 + $0x610] sm:$0xff] %v3151_v39  ;;  %v2015_v42 = vadd.f32 %v2014_v40, %v1902_v35  ;;  %4060 = vmatmul.msk.f32.gmra.mxu3 %vm569_vm1, %v4430_v43 }
 0x34d   : > { %v1904_v45 = vpop.f32.mrf.mxu0  ;;  %2081 = vmatmul.f32.gmra.mxu1 %v4431_v47 }
 0x34e   : > { %v3152_v46 = vmax.f32 %v2015_v42, 0.0  ;;  %v1905_v49 = vadd.f32 %v1904_v45, %v5928_v18 }
 0x34f   : > { %v1791_v48 = vpop.f32.mrf.mxu3 }
 0x350   : > { %3473 = vst [vmem:[%s5065_s9 + $0x618] sm:$0xff] %v3152_v46  ;;  %4093 = vmatmul.msk.f32.gmra.mxu2 %vm569_vm1, %v4430_v43  ;;  %v1792_v50 = vadd.f32 %v1791_v48, %v1679_v44  ;;  %2307 = vmatmul.f32.gmra.mxu0 %v4431_v47 }
 0x352   : > { %v3161_v53 = vmax.f32 %v1792_v50, 0.0  ;;  %v1681_v55 = vpop.f32.mrf.mxu1 }
 0x353   : > { %v2017_v54 = vpop.f32.mrf.mxu2  ;;  %v1682_v59 = vadd.f32 %v1681_v55, %v5910_v9 }
 0x354   : > { %3482 = vst [vmem:[%s5065_s9 + $0x660] sm:$0xff] %v3161_v53  ;;  %v2018_v56 = vadd.f32 %v2017_v54, %v1905_v49  ;;  %4061 = vmatmul.msk.f32.gmra.mxu3 %vm569_vm1, %v4432_v57  ;;  %v4440_v49 = vld [vmem:[%s4844_s14 + $0x98] sm:$0xff]  ;;  %v4441_v53 = vld [vmem:[%s4844_s14 + $0x90] sm:$0xff] }
 0x355   : > { %v1907_v5 = vpop.f32.mrf.mxu0  ;;  %2084 = vmatmul.f32.gmra.mxu1 %v4433_v61 }
 0x356   : > { %v3162_v60 = vmax.f32 %v2018_v56, 0.0  ;;  %v1908_v58 = vadd.f32 %v1907_v5, %v5928_v18 }
 0x357   : > { %v1794_v62 = vpop.f32.mrf.mxu3 }
 0x358   : > { %3483 = vst [vmem:[%s5065_s9 + $0x668] sm:$0xff] %v3162_v60  ;;  %4094 = vmatmul.msk.f32.gmra.mxu2 %vm569_vm1, %v4432_v57  ;;  %v1795_v0 = vadd.f32 %v1794_v62, %v1682_v59  ;;  %2310 = vmatmul.f32.gmra.mxu0 %v4433_v61  ;;  %v363_v57 = vld [vmem:[%s7098_s1 + $0x310] sm:$0xff]  ;;  %v364_v59 = vld [vmem:[%s7098_s1 + $0x318] sm:$0xff] }
 0x359   : > { %2511 = vmatpush.msra.mxu1 %v363_v57  ;;  %2737 = vmatpush.msra.mxu0 %v364_v59  ;;  %v4450_v57 = vld [vmem:[%s4844_s14 + $0xe8] sm:$0xff] }
 0x35a   : > { %v3171_v3 = vmax.f32 %v1795_v0, 0.0  ;;  %v1684_v7 = vpop.f32.mrf.mxu1 }
 0x35b   : > { %v2020_v4 = vpop.f32.mrf.mxu2  ;;  %v1685_v10 = vadd.f32 %v1684_v7, %v5910_v9 }
 0x35c   : > { %3492 = vst [vmem:[%s5065_s9 + $0x6b0] sm:$0xff] %v3171_v3  ;;  %v2021_v8 = vadd.f32 %v2020_v4, %v1908_v58  ;;  %4062 = vmatmul.msk.f32.gmra.mxu3 %vm569_vm1, %v4434_v63  ;;  %v4442_v58 = vld [vmem:[%s4844_s14 + $0xa8] sm:$0xff]  ;;  %v4443_v3 = vld [vmem:[%s4844_s14 + $0xa0] sm:$0xff] }
 0x35d   : > { %v1910_v11 = vpop.f32.mrf.mxu0  ;;  %2087 = vmatmul.f32.gmra.mxu1 %v4435_v13 }
 0x35e   : > { %v3172_v12 = vmax.f32 %v2021_v8, 0.0  ;;  %v1911_v15 = vadd.f32 %v1910_v11, %v5928_v18 }
 0x35f   : > { %v1797_v14 = vpop.f32.mrf.mxu3 }
 0x360   : > { %3493 = vst [vmem:[%s5065_s9 + $0x6b8] sm:$0xff] %v3172_v12  ;;  %4095 = vmatmul.msk.f32.gmra.mxu2 %vm569_vm1, %v4434_v63  ;;  %v1798_v16 = vadd.f32 %v1797_v14, %v1685_v10  ;;  %2313 = vmatmul.f32.gmra.mxu0 %v4435_v13  ;;  %v493_v63 = vld [vmem:[%s7098_s1 + $0x720] sm:$0xff]  ;;  %v494_v10 = vld [vmem:[%s7098_s1 + $0x728] sm:$0xff] }
 0x361   : > { %2627 = vmatpush.msra.mxu3 %v493_v63  ;;  %2853 = vmatpush.msra.mxu2 %v494_v10 }
 0x362   : > { %v3181_v6 = vmax.f32 %v1798_v16, 0.0  ;;  %v1687_v19 = vpop.f32.mrf.mxu1 }
 0x363   : > { %v2023_v17 = vpop.f32.mrf.mxu2  ;;  %v1688_v22 = vadd.f32 %v1687_v19, %v5910_v9  ;;  %v4445_v19 = vld [vmem:[%s4844_s14 + $0xb0] sm:$0xff] }
 0x364   : > { %3502 = vst [vmem:[%s5065_s9 + $0x700] sm:$0xff] %v3181_v6  ;;  %v2024_v20 = vadd.f32 %v2023_v17, %v1911_v15  ;;  %4063 = vmatmul.msk.f32.gmra.mxu3 %vm569_vm1, %v4436_v21  ;;  %v4444_v15 = vld [vmem:[%s4844_s14 + $0xb8] sm:$0xff] }
 0x365   : > { %v1913_v23 = vpop.f32.mrf.mxu0  ;;  %2090 = vmatmul.f32.gmra.mxu1 %v4437_v25 }
 0x366   : > { %v3182_v24 = vmax.f32 %v2024_v20, 0.0  ;;  %v1914_v27 = vadd.f32 %v1913_v23, %v5928_v18  ;;  %v353_v23 = vld [vmem:[%s7098_s1 + $0x2c0] sm:$0xff] }
 0x367   : > { %v1800_v26 = vpop.f32.mrf.mxu3  ;;  %2512 = vmatpush.msra.mxu1 %v353_v23  ;;  %v4455_v23 = vld [vmem:[%s4844_s14 + $0x108] sm:$0xff] }
 0x368   : > { %3503 = vst [vmem:[%s5065_s9 + $0x708] sm:$0xff] %v3182_v24  ;;  %4096 = vmatmul.msk.f32.gmra.mxu2 %vm569_vm1, %v4436_v21  ;;  %v1801_v28 = vadd.f32 %v1800_v26, %v1688_v22  ;;  %2316 = vmatmul.f32.gmra.mxu0 %v4437_v25  ;;  %v354_v24 = vld [vmem:[%s7098_s1 + $0x2c8] sm:$0xff] }
 0x369   : > { %2738 = vmatpush.msra.mxu0 %v354_v24 }
 0x36a   : > { %v3191_v33 = vmax.f32 %v1801_v28, 0.0  ;;  %v1690_v35 = vpop.f32.mrf.mxu1 }
 0x36b   : > { %v2026_v34 = vpop.f32.mrf.mxu2  ;;  %v1691_v38 = vadd.f32 %v1690_v35, %v5910_v9 }
 0x36c   : > { %3512 = vst [vmem:[%s5065_s9 + $0x750] sm:$0xff] %v3191_v33  ;;  %v2027_v36 = vadd.f32 %v2026_v34, %v1914_v27  ;;  %4064 = vmatmul.msk.f32.gmra.mxu3 %vm569_vm1, %v4438_v37  ;;  %v4447_v33 = vld [vmem:[%s4844_s14 + $0xc0] sm:$0xff] }
 0x36d   : > { %v1916_v39 = vpop.f32.mrf.mxu0  ;;  %2093 = vmatmul.f32.gmra.mxu1 %v4439_v41 }
 0x36e   : > { %v3192_v40 = vmax.f32 %v2027_v36, 0.0  ;;  %v1917_v43 = vadd.f32 %v1916_v39, %v5928_v18 }
 0x36f   : > { %v1803_v42 = vpop.f32.mrf.mxu3 }
 0x370   : > { %3513 = vst [vmem:[%s5065_s9 + $0x758] sm:$0xff] %v3192_v40  ;;  %4097 = vmatmul.msk.f32.gmra.mxu2 %vm569_vm1, %v4438_v37  ;;  %v1804_v44 = vadd.f32 %v1803_v42, %v1691_v38  ;;  %2319 = vmatmul.f32.gmra.mxu0 %v4439_v41  ;;  %v483_v37 = vld [vmem:[%s7098_s1 + $0x6d0] sm:$0xff]  ;;  %v484_v38 = vld [vmem:[%s7098_s1 + $0x6d8] sm:$0xff] }
 0x371   : > { %2628 = vmatpush.msra.mxu3 %v483_v37  ;;  %2854 = vmatpush.msra.mxu2 %v484_v38 }
 0x372   : > { %v3201_v45 = vmax.f32 %v1804_v44, 0.0  ;;  %v1693_v47 = vpop.f32.mrf.mxu1 }
 0x373   : > { %v2029_v46 = vpop.f32.mrf.mxu2  ;;  %v1694_v50 = vadd.f32 %v1693_v47, %v5910_v9  ;;  %v4449_v47 = vld [vmem:[%s4844_s14 + $0xd0] sm:$0xff] }
 0x374   : > { %3522 = vst [vmem:[%s5065_s9 + $0x7a0] sm:$0xff] %v3201_v45  ;;  %v2030_v48 = vadd.f32 %v2029_v46, %v1917_v43  ;;  %4065 = vmatmul.msk.f32.gmra.mxu3 %vm569_vm1, %v4440_v49  ;;  %v4448_v43 = vld [vmem:[%s4844_s14 + $0xd8] sm:$0xff] }
 0x375   : > { %v1919_v51 = vpop.f32.mrf.mxu0  ;;  %2096 = vmatmul.f32.gmra.mxu1 %v4441_v53 }
 0x376   : > { %v3202_v52 = vmax.f32 %v2030_v48, 0.0  ;;  %v1920_v55 = vadd.f32 %v1919_v51, %v5928_v18  ;;  %v343_v51 = vld [vmem:[%s7098_s1 + $0x270] sm:$0xff] }
 0x377   : > { %v1806_v54 = vpop.f32.mrf.mxu3  ;;  %2513 = vmatpush.msra.mxu1 %v343_v51 }
 0x378   : > { %3523 = vst [vmem:[%s5065_s9 + $0x7a8] sm:$0xff] %v3202_v52  ;;  %4098 = vmatmul.msk.f32.gmra.mxu2 %vm569_vm1, %v4440_v49  ;;  %v1807_v56 = vadd.f32 %v1806_v54, %v1694_v50  ;;  %2322 = vmatmul.f32.gmra.mxu0 %v4441_v53  ;;  %v344_v52 = vld [vmem:[%s7098_s1 + $0x278] sm:$0xff] }
 0x379   : > { %2739 = vmatpush.msra.mxu0 %v344_v52 }
 0x37a   : > { %v3211_v5 = vmax.f32 %v1807_v56, 0.0  ;;  %v1696_v61 = vpop.f32.mrf.mxu1 }
 0x37b   : > { %v2032_v60 = vpop.f32.mrf.mxu2  ;;  %v1697_v0 = vadd.f32 %v1696_v61, %v5910_v9  ;;  %v4451_v61 = vld [vmem:[%s4844_s14 + $0xe0] sm:$0xff] }
 0x37c   : > { %3532 = vst [vmem:[%s5065_s9 + $0x7f0] sm:$0xff] %v3211_v5  ;;  %v2033_v62 = vadd.f32 %v2032_v60, %v1920_v55  ;;  %4066 = vmatmul.msk.f32.gmra.mxu3 %vm569_vm1, %v4442_v58 }
 0x37d   : > { %v1922_v1 = vpop.f32.mrf.mxu0  ;;  %2099 = vmatmul.f32.gmra.mxu1 %v4443_v3 }
 0x37e   : > { %v3212_v2 = vmax.f32 %v2033_v62, 0.0  ;;  %v1923_v7 = vadd.f32 %v1922_v1, %v5928_v18 }
 0x37f   : > { %v1809_v4 = vpop.f32.mrf.mxu3 }
 0x380   : > { %3533 = vst [vmem:[%s5065_s9 + $0x7f8] sm:$0xff] %v3212_v2  ;;  %4099 = vmatmul.msk.f32.gmra.mxu2 %vm569_vm1, %v4442_v58  ;;  %v1810_v8 = vadd.f32 %v1809_v4, %v1697_v0  ;;  %2325 = vmatmul.f32.gmra.mxu0 %v4443_v3 }
 0x382   : > { %v3221_v11 = vmax.f32 %v1810_v8, 0.0  ;;  %v1699_v13 = vpop.f32.mrf.mxu1 }
 0x383   : > { %v2035_v12 = vpop.f32.mrf.mxu2  ;;  %v1700_v16 = vadd.f32 %v1699_v13, %v5910_v9 }
 0x384   : > { %3542 = vst [vmem:[%s5065_s9 + $0x840] sm:$0xff] %v3221_v11  ;;  %v2036_v14 = vadd.f32 %v2035_v12, %v1923_v7  ;;  %4067 = vmatmul.msk.f32.gmra.mxu3 %vm569_vm1, %v4444_v15  ;;  %v4452_v7 = vld [vmem:[%s4844_s14 + $0xf8] sm:$0xff]  ;;  %v4453_v11 = vld [vmem:[%s4844_s14 + $0xf0] sm:$0xff] }
 0x385   : > { %v1925_v6 = vpop.f32.mrf.mxu0  ;;  %2102 = vmatmul.f32.gmra.mxu1 %v4445_v19 }
 0x386   : > { %v3222_v17 = vmax.f32 %v2036_v14, 0.0  ;;  %v1926_v21 = vadd.f32 %v1925_v6, %v5928_v18  ;;  %v334_v6 = vld [vmem:[%s7098_s1 + $0x228] sm:$0xff] }
 0x387   : > { %v1812_v20 = vpop.f32.mrf.mxu3  ;;  %2740 = vmatpush.msra.mxu0 %v334_v6 }
 0x388   : > { %3543 = vst [vmem:[%s5065_s9 + $0x848] sm:$0xff] %v3222_v17  ;;  %4100 = vmatmul.msk.f32.gmra.mxu2 %vm569_vm1, %v4444_v15  ;;  %v1813_v22 = vadd.f32 %v1812_v20, %v1700_v16  ;;  %2328 = vmatmul.f32.gmra.mxu0 %v4445_v19  ;;  %v4454_v15 = vld [vmem:[%s7099_s2] sm:$0xff]  ;;  %v474_v17 = vld [vmem:[%s7098_s1 + $0x688] sm:$0xff] }
 0x389   : > { %v6343_v16 = vperm.slane %v4454_v15, 6  ;;  %2855 = vmatpush.msra.mxu2 %v474_v17 }
 0x38a   : > { %v3231_v25 = vmax.f32 %v1813_v22, 0.0  ;;  %v1702_v27 = vpop.f32.mrf.mxu1 }
 0x38b   : > { %v2038_v26 = vpop.f32.mrf.mxu2  ;;  %v1703_v30 = vadd.f32 %v1702_v27, %v5910_v9 }
 0x38c   : > { %3552 = vst [vmem:[%s5065_s9 + $0x890] sm:$0xff] %v3231_v25  ;;  %v2039_v28 = vadd.f32 %v2038_v26, %v1926_v21  ;;  %4068 = vmatmul.msk.f32.gmra.mxu3 %vm569_vm1, %v4446_v29  ;;  %v6361_v25 = vperm.slane %v4454_v15, 7 }
 0x38d   : > { %v1928_v31 = vpop.f32.mrf.mxu0  ;;  %2105 = vmatmul.f32.gmra.mxu1 %v4447_v33 }
 0x38e   : > { %v3232_v32 = vmax.f32 %v2039_v28, 0.0  ;;  %v1929_v35 = vadd.f32 %v1928_v31, %v5928_v18  ;;  %v4456_v28 = vld [vmem:[%s4844_s14 + $0x100] sm:$0xff] }
 0x38f   : > { %v1815_v34 = vpop.f32.mrf.mxu3 }
 0x390   : > { %3553 = vst [vmem:[%s5065_s9 + $0x898] sm:$0xff] %v3232_v32  ;;  %4101 = vmatmul.msk.f32.gmra.mxu2 %vm569_vm1, %v4446_v29  ;;  %v1816_v36 = vadd.f32 %v1815_v34, %v1703_v30  ;;  %2331 = vmatmul.f32.gmra.mxu0 %v4447_v33 }
 0x392   : > { %v3241_v39 = vmax.f32 %v1816_v36, 0.0  ;;  %v1705_v41 = vpop.f32.mrf.mxu1  ;;  %v4457_v36 = vld [vmem:[%s4844_s14 + $0x118] sm:$0xff] }
 0x393   : > { %v2041_v40 = vpop.f32.mrf.mxu2  ;;  %v1706_v44 = vadd.f32 %v1705_v41, %v5910_v9 }
 0x394   : > { %3562 = vst [vmem:[%s5065_s9 + $0x8e0] sm:$0xff] %v3241_v39  ;;  %v2042_v42 = vadd.f32 %v2041_v40, %v1929_v35  ;;  %4069 = vmatmul.msk.f32.gmra.mxu3 %vm569_vm1, %v4448_v43  ;;  %v4458_v40 = vld [vmem:[%s4844_s14 + $0x110] sm:$0xff] }
 0x395   : > { %v1931_v45 = vpop.f32.mrf.mxu0  ;;  %2108 = vmatmul.f32.gmra.mxu1 %v4449_v47 }
 0x396   : > { %v3242_v46 = vmax.f32 %v2042_v42, 0.0  ;;  %v1932_v49 = vadd.f32 %v1931_v45, %v5928_v18  ;;  %v324_v45 = vld [vmem:[%s7098_s1 + $0x1d8] sm:$0xff] }
 0x397   : > { %v1818_v48 = vpop.f32.mrf.mxu3  ;;  %2741 = vmatpush.msra.mxu0 %v324_v45 }
 0x398   : > { %3563 = vst [vmem:[%s5065_s9 + $0x8e8] sm:$0xff] %v3242_v46  ;;  %4102 = vmatmul.msk.f32.gmra.mxu2 %vm569_vm1, %v4448_v43  ;;  %v1819_v50 = vadd.f32 %v1818_v48, %v1706_v44  ;;  %2334 = vmatmul.f32.gmra.mxu0 %v4449_v47  ;;  %v323_v44 = vld [vmem:[%s7098_s1 + $0x1d0] sm:$0xff] }
 0x39a   : > { %v3251_v53 = vmax.f32 %v1819_v50, 0.0  ;;  %v1708_v55 = vpop.f32.mrf.mxu1  ;;  %v4459_v50 = vld [vmem:[%s4844_s14 + $0x128] sm:$0xff] }
 0x39b   : > { %v2044_v54 = vpop.f32.mrf.mxu2  ;;  %v1709_v59 = vadd.f32 %v1708_v55, %v5910_v9 }
 0x39c   : > { %3572 = vst [vmem:[%s5065_s9 + $0x930] sm:$0xff] %v3251_v53  ;;  %v2045_v56 = vadd.f32 %v2044_v54, %v1932_v49  ;;  %4070 = vmatmul.msk.f32.gmra.mxu3 %vm569_vm1, %v4450_v57  ;;  %v4460_v54 = vld [vmem:[%s4844_s14 + $0x120] sm:$0xff] }
 0x39d   : > { %v1934_v5 = vpop.f32.mrf.mxu0  ;;  %2111 = vmatmul.f32.gmra.mxu1 %v4451_v61 }
 0x39e   : > { %v3252_v60 = vmax.f32 %v2045_v56, 0.0  ;;  %v1935_v58 = vadd.f32 %v1934_v5, %v5928_v18  ;;  %v464_v5 = vld [vmem:[%s7098_s1 + $0x638] sm:$0xff] }
 0x39f   : > { %v1821_v62 = vpop.f32.mrf.mxu3  ;;  %2856 = vmatpush.msra.mxu2 %v464_v5 }
 0x3a0   : > { %3573 = vst [vmem:[%s5065_s9 + $0x938] sm:$0xff] %v3252_v60  ;;  %4103 = vmatmul.msk.f32.gmra.mxu2 %vm569_vm1, %v4450_v57  ;;  %v1822_v0 = vadd.f32 %v1821_v62, %v1709_v59  ;;  %2337 = vmatmul.f32.gmra.mxu0 %v4451_v61  ;;  %v463_v59 = vld [vmem:[%s7098_s1 + $0x630] sm:$0xff] }
 0x3a2   : > { %v3261_v1 = vmax.f32 %v1822_v0, 0.0  ;;  %v1711_v3 = vpop.f32.mrf.mxu1  ;;  %v4461_v0 = vld [vmem:[%s4844_s14 + $0x138] sm:$0xff] }
 0x3a3   : > { %v2047_v2 = vpop.f32.mrf.mxu2  ;;  %v1712_v8 = vadd.f32 %v1711_v3, %v5910_v9  ;;  %v333_v9 = vld [vmem:[%s7098_s1 + $0x220] sm:$0xff] }
 0x3a4   : > { %3582 = vst [vmem:[%s5065_s9 + $0x980] sm:$0xff] %v3261_v1  ;;  %v2048_v4 = vadd.f32 %v2047_v2, %v1935_v58  ;;  %4071 = vmatmul.msk.f32.gmra.mxu3 %vm569_vm1, %v4452_v7  ;;  %2514 = vmatpush.msra.mxu1 %v333_v9  ;;  %v4463_v9 = vld [vmem:[%s4844_s14 + $0x148] sm:$0xff] }
 0x3a5   : > { %v1937_v63 = vpop.f32.mrf.mxu0  ;;  %2114 = vmatmul.f32.gmra.mxu1 %v4453_v11 }
 0x3a6   : > { %v3262_v10 = vmax.f32 %v2048_v4, 0.0  ;;  %v1938_v13 = vadd.f32 %v1937_v63, %v5928_v18  ;;  %v473_v18 = vld [vmem:[%s7098_s1 + $0x680] sm:$0xff]  ;;  %2515 = vmatpush.msra.mxu1 %v323_v44  ;;  %v4462_v4 = vld [vmem:[%s4844_s14 + $0x130] sm:$0xff]  ;;  %v4467_v44 = vld [vmem:[%s4844_s14 + $0x168] sm:$0xff] }
 0x3a7   : > { %v1824_v12 = vpop.f32.mrf.mxu3  ;;  %2629 = vmatpush.msra.mxu3 %v473_v18 }
 0x3a8   : > { %3583 = vst [vmem:[%s5065_s9 + $0x988] sm:$0xff] %v3262_v10  ;;  %4104 = vmatmul.msk.f32.gmra.mxu2 %vm569_vm1, %v4452_v7  ;;  %v1825_v14 = vadd.f32 %v1824_v12, %v1712_v8  ;;  %2340 = vmatmul.f32.gmra.mxu0 %v4453_v11  ;;  %v313_v10 = vld [vmem:[%s7098_s1 + $0x180] sm:$0xff]  ;;  %v314_v11 = vld [vmem:[%s7098_s1 + $0x188] sm:$0xff] }
 0x3a9   : > { %2630 = vmatpush.msra.mxu3 %v463_v59  ;;  %2516 = vmatpush.msra.mxu1 %v313_v10  ;;  %v4471_v10 = vld [vmem:[%s4844_s14 + $0x188] sm:$0xff] }
 0x3aa   : > { %v3271_v19 = vmax.f32 %v1825_v14, 0.0  ;;  %v2070_v21 = vpop.f32.mrf.mxu1  ;;  %2742 = vmatpush.msra.mxu0 %v314_v11 }
 0x3ab   : > { %v2050_v20 = vpop.f32.mrf.mxu2  ;;  %v2071_v24 = vadd.f32 %v2070_v21, %v6343_v16 }
 0x3ac   : > { %3592 = vst [vmem:[%s5065_s9 + $0x9d0] sm:$0xff] %v3271_v19  ;;  %v2051_v22 = vadd.f32 %v2050_v20, %v1938_v13  ;;  %4072 = vmatmul.msk.f32.gmra.mxu3 %vm569_vm1, %v4455_v23  ;;  %v4464_v19 = vld [vmem:[%s4844_s14 + $0x140] sm:$0xff] }
 0x3ad   : > { %v2296_v26 = vpop.f32.mrf.mxu0  ;;  %2117 = vmatmul.f32.gmra.mxu1 %v4456_v28 }
 0x3ae   : > { %v3272_v27 = vmax.f32 %v2051_v22, 0.0  ;;  %v2297_v30 = vadd.f32 %v2296_v26, %v6361_v25 }
 0x3af   : > { %v2183_v29 = vpop.f32.mrf.mxu3 }
 0x3b0   : > { %3593 = vst [vmem:[%s5065_s9 + $0x9d8] sm:$0xff] %v3272_v27  ;;  %4105 = vmatmul.msk.f32.gmra.mxu2 %vm569_vm1, %v4455_v23  ;;  %v2184_v31 = vadd.f32 %v2183_v29, %v2071_v24  ;;  %2343 = vmatmul.f32.gmra.mxu0 %v4456_v28  ;;  %v453_v23 = vld [vmem:[%s7098_s1 + $0x5e0] sm:$0xff]  ;;  %v454_v24 = vld [vmem:[%s7098_s1 + $0x5e8] sm:$0xff] }
 0x3b1   : > { %2631 = vmatpush.msra.mxu3 %v453_v23  ;;  %2857 = vmatpush.msra.mxu2 %v454_v24 }
 0x3b2   : > { %v2963_v32 = vmax.f32 %v2184_v31, 0.0  ;;  %v2073_v34 = vpop.f32.mrf.mxu1 }
 0x3b3   : > { %v2409_v33 = vpop.f32.mrf.mxu2  ;;  %v2074_v37 = vadd.f32 %v2073_v34, %v6343_v16  ;;  %v4466_v34 = vld [vmem:[%s4844_s14 + $0x150] sm:$0xff] }
 0x3b4   : > { %3283 = vst [vmem:[%s5065_s9 + $0x30] sm:$0xff] %v2963_v32  ;;  %v2410_v35 = vadd.f32 %v2409_v33, %v2297_v30  ;;  %4073 = vmatmul.msk.f32.gmra.mxu3 %vm569_vm1, %v4457_v36  ;;  %v4465_v30 = vld [vmem:[%s4844_s14 + $0x158] sm:$0xff] }
 0x3b5   : > { %v2299_v38 = vpop.f32.mrf.mxu0  ;;  %2120 = vmatmul.f32.gmra.mxu1 %v4458_v40 }
 0x3b6   : > { %v2964_v39 = vmax.f32 %v2410_v35, 0.0  ;;  %v2300_v42 = vadd.f32 %v2299_v38, %v6361_v25  ;;  %v303_v38 = vld [vmem:[%s7098_s1 + $0x130] sm:$0xff] }
 0x3b7   : > { %v2186_v41 = vpop.f32.mrf.mxu3  ;;  %2517 = vmatpush.msra.mxu1 %v303_v38 }
 0x3b8   : > { %3284 = vst [vmem:[%s5065_s9 + $0x38] sm:$0xff] %v2964_v39  ;;  %4106 = vmatmul.msk.f32.gmra.mxu2 %vm569_vm1, %v4457_v36  ;;  %v2187_v43 = vadd.f32 %v2186_v41, %v2074_v37  ;;  %2346 = vmatmul.f32.gmra.mxu0 %v4458_v40  ;;  %v304_v39 = vld [vmem:[%s7098_s1 + $0x138] sm:$0xff] }
 0x3b9   : > { %2743 = vmatpush.msra.mxu0 %v304_v39 }
 0x3ba   : > { %v2973_v46 = vmax.f32 %v2187_v43, 0.0  ;;  %v2076_v48 = vpop.f32.mrf.mxu1 }
 0x3bb   : > { %v2412_v47 = vpop.f32.mrf.mxu2  ;;  %v2077_v51 = vadd.f32 %v2076_v48, %v6343_v16  ;;  %v4468_v48 = vld [vmem:[%s4844_s14 + $0x160] sm:$0xff] }
 0x3bc   : > { %3294 = vst [vmem:[%s5065_s9 + $0x80] sm:$0xff] %v2973_v46  ;;  %v2413_v49 = vadd.f32 %v2412_v47, %v2300_v42  ;;  %4074 = vmatmul.msk.f32.gmra.mxu3 %vm569_vm1, %v4459_v50 }
 0x3bd   : > { %v2302_v52 = vpop.f32.mrf.mxu0  ;;  %2123 = vmatmul.f32.gmra.mxu1 %v4460_v54 }
 0x3be   : > { %v2974_v53 = vmax.f32 %v2413_v49, 0.0  ;;  %v2303_v56 = vadd.f32 %v2302_v52, %v6361_v25 }
 0x3bf   : > { %v2189_v55 = vpop.f32.mrf.mxu3 }
 0x3c0   : > { %3295 = vst [vmem:[%s5065_s9 + $0x88] sm:$0xff] %v2974_v53  ;;  %4107 = vmatmul.msk.f32.gmra.mxu2 %vm569_vm1, %v4459_v50  ;;  %v2190_v57 = vadd.f32 %v2189_v55, %v2077_v51  ;;  %2349 = vmatmul.f32.gmra.mxu0 %v4460_v54 }
 0x3c2   : > { %v2983_v60 = vmax.f32 %v2190_v57, 0.0  ;;  %v2079_v62 = vpop.f32.mrf.mxu1 }
 0x3c3   : > { %v2415_v61 = vpop.f32.mrf.mxu2  ;;  %v2080_v1 = vadd.f32 %v2079_v62, %v6343_v16 }
 0x3c4   : > { %3304 = vst [vmem:[%s5065_s9 + $0xd0] sm:$0xff] %v2983_v60  ;;  %v2416_v58 = vadd.f32 %v2415_v61, %v2303_v56  ;;  %4075 = vmatmul.msk.f32.gmra.mxu3 %vm569_vm1, %v4461_v0  ;;  %v4469_v56 = vld [vmem:[%s4844_s14 + $0x178] sm:$0xff]  ;;  %v4470_v60 = vld [vmem:[%s4844_s14 + $0x170] sm:$0xff] }
 0x3c5   : > { %v2305_v2 = vpop.f32.mrf.mxu0  ;;  %2126 = vmatmul.f32.gmra.mxu1 %v4462_v4 }
 0x3c6   : > { %v2984_v3 = vmax.f32 %v2416_v58, 0.0  ;;  %v2306_v8 = vadd.f32 %v2305_v2, %v6361_v25  ;;  %v443_v2 = vld [vmem:[%s7098_s1 + $0x590] sm:$0xff] }
 0x3c7   : > { %v2192_v7 = vpop.f32.mrf.mxu3  ;;  %2632 = vmatpush.msra.mxu3 %v443_v2 }
 0x3c8   : > { %3305 = vst [vmem:[%s5065_s9 + $0xd8] sm:$0xff] %v2984_v3  ;;  %4108 = vmatmul.msk.f32.gmra.mxu2 %vm569_vm1, %v4461_v0  ;;  %v2193_v63 = vadd.f32 %v2192_v7, %v2080_v1  ;;  %2352 = vmatmul.f32.gmra.mxu0 %v4462_v4  ;;  %v293_v0 = vld [vmem:[%s7098_s1 + $0xe0] sm:$0xff]  ;;  %v294_v1 = vld [vmem:[%s7098_s1 + $0xe8] sm:$0xff]  ;;  %v444_v3 = vld [vmem:[%s7098_s1 + $0x598] sm:$0xff] }
 0x3c9   : > { %2518 = vmatpush.msra.mxu1 %v293_v0  ;;  %2744 = vmatpush.msra.mxu0 %v294_v1  ;;  %v4479_v0 = vld [vmem:[%s4844_s14 + $0x1c8] sm:$0xff] }
 0x3ca   : > { %v2993_v12 = vmax.f32 %v2193_v63, 0.0  ;;  %v2082_v14 = vpop.f32.mrf.mxu1  ;;  %2858 = vmatpush.msra.mxu2 %v444_v3 }
 0x3cb   : > { %v2418_v13 = vpop.f32.mrf.mxu2  ;;  %v2083_v6 = vadd.f32 %v2082_v14, %v6343_v16  ;;  %v4472_v14 = vld [vmem:[%s4844_s14 + $0x180] sm:$0xff] }
 0x3cc   : > { %3314 = vst [vmem:[%s5065_s9 + $0x120] sm:$0xff] %v2993_v12  ;;  %v2419_v15 = vadd.f32 %v2418_v13, %v2306_v8  ;;  %4076 = vmatmul.msk.f32.gmra.mxu3 %vm569_vm1, %v4463_v9 }
 0x3cd   : > { %v2308_v18 = vpop.f32.mrf.mxu0  ;;  %2129 = vmatmul.f32.gmra.mxu1 %v4464_v19 }
 0x3ce   : > { %v2994_v17 = vmax.f32 %v2419_v15, 0.0  ;;  %v2309_v21 = vadd.f32 %v2308_v18, %v6361_v25 }
 0x3cf   : > { %v2195_v20 = vpop.f32.mrf.mxu3 }
 0x3d0   : > { %3315 = vst [vmem:[%s5065_s9 + $0x128] sm:$0xff] %v2994_v17  ;;  %4109 = vmatmul.msk.f32.gmra.mxu2 %vm569_vm1, %v4463_v9  ;;  %v2196_v22 = vadd.f32 %v2195_v20, %v2083_v6  ;;  %2355 = vmatmul.f32.gmra.mxu0 %v4464_v19 }
 0x3d2   : > { %v3003_v26 = vmax.f32 %v2196_v22, 0.0  ;;  %v2085_v28 = vpop.f32.mrf.mxu1 }
 0x3d3   : > { %v2421_v27 = vpop.f32.mrf.mxu2  ;;  %v2086_v31 = vadd.f32 %v2085_v28, %v6343_v16 }
 0x3d4   : > { %3324 = vst [vmem:[%s5065_s9 + $0x170] sm:$0xff] %v3003_v26  ;;  %v2422_v29 = vadd.f32 %v2421_v27, %v2309_v21  ;;  %4077 = vmatmul.msk.f32.gmra.mxu3 %vm569_vm1, %v4465_v30  ;;  %v4473_v21 = vld [vmem:[%s4844_s14 + $0x198] sm:$0xff]  ;;  %v4474_v26 = vld [vmem:[%s4844_s14 + $0x190] sm:$0xff] }
 0x3d5   : > { %v2311_v32 = vpop.f32.mrf.mxu0  ;;  %2132 = vmatmul.f32.gmra.mxu1 %v4466_v34 }
 0x3d6   : > { %v3004_v33 = vmax.f32 %v2422_v29, 0.0  ;;  %v2312_v36 = vadd.f32 %v2311_v32, %v6361_v25 }
 0x3d7   : > { %v2198_v35 = vpop.f32.mrf.mxu3 }
 0x3d8   : > { %3325 = vst [vmem:[%s5065_s9 + $0x178] sm:$0xff] %v3004_v33  ;;  %4110 = vmatmul.msk.f32.gmra.mxu2 %vm569_vm1, %v4465_v30  ;;  %v2199_v37 = vadd.f32 %v2198_v35, %v2086_v31  ;;  %2358 = vmatmul.f32.gmra.mxu0 %v4466_v34  ;;  %v283_v30 = vld [vmem:[%s7098_s1 + $0x90] sm:$0xff]  ;;  %v284_v31 = vld [vmem:[%s7098_s1 + $0x98] sm:$0xff] }
 0x3d9   : > { %2519 = vmatpush.msra.mxu1 %v283_v30  ;;  %2745 = vmatpush.msra.mxu0 %v284_v31  ;;  %v4484_v30 = vld [vmem:[%s4844_s14 + $0x1e0] sm:$0xff] }
 0x3da   : > { %v3013_v40 = vmax.f32 %v2199_v37, 0.0  ;;  %v2088_v42 = vpop.f32.mrf.mxu1 }
 0x3db   : > { %v2424_v41 = vpop.f32.mrf.mxu2  ;;  %v2089_v45 = vadd.f32 %v2088_v42, %v6343_v16 }
 0x3dc   : > { %3334 = vst [vmem:[%s5065_s9 + $0x1c0] sm:$0xff] %v3013_v40  ;;  %v2425_v43 = vadd.f32 %v2424_v41, %v2312_v36  ;;  %4078 = vmatmul.msk.f32.gmra.mxu3 %vm569_vm1, %v4467_v44  ;;  %v4475_v36 = vld [vmem:[%s4844_s14 + $0x1a8] sm:$0xff]  ;;  %v4476_v40 = vld [vmem:[%s4844_s14 + $0x1a0] sm:$0xff] }
 0x3dd   : > { %v2314_v46 = vpop.f32.mrf.mxu0  ;;  %2135 = vmatmul.f32.gmra.mxu1 %v4468_v48 }
 0x3de   : > { %v3014_v47 = vmax.f32 %v2425_v43, 0.0  ;;  %v2315_v50 = vadd.f32 %v2314_v46, %v6361_v25 }
 0x3df   : > { %v2201_v49 = vpop.f32.mrf.mxu3 }
 0x3e0   : > { %3335 = vst [vmem:[%s5065_s9 + $0x1c8] sm:$0xff] %v3014_v47  ;;  %4111 = vmatmul.msk.f32.gmra.mxu2 %vm569_vm1, %v4467_v44  ;;  %v2202_v51 = vadd.f32 %v2201_v49, %v2089_v45  ;;  %2361 = vmatmul.f32.gmra.mxu0 %v4468_v48  ;;  %v433_v44 = vld [vmem:[%s7098_s1 + $0x540] sm:$0xff]  ;;  %v434_v45 = vld [vmem:[%s7098_s1 + $0x548] sm:$0xff] }
 0x3e1   : > { %2633 = vmatpush.msra.mxu3 %v433_v44  ;;  %2859 = vmatpush.msra.mxu2 %v434_v45 }
 0x3e2   : > { %v3023_v52 = vmax.f32 %v2202_v51, 0.0  ;;  %v2091_v54 = vpop.f32.mrf.mxu1 }
 0x3e3   : > { %v2427_v53 = vpop.f32.mrf.mxu2  ;;  %v2092_v57 = vadd.f32 %v2091_v54, %v6343_v16  ;;  %v4478_v54 = vld [vmem:[%s4844_s14 + $0x1b0] sm:$0xff] }
 0x3e4   : > { %3344 = vst [vmem:[%s5065_s9 + $0x210] sm:$0xff] %v3023_v52  ;;  %v2428_v55 = vadd.f32 %v2427_v53, %v2315_v50  ;;  %4079 = vmatmul.msk.f32.gmra.mxu3 %vm569_vm1, %v4469_v56  ;;  %v4477_v50 = vld [vmem:[%s4844_s14 + $0x1b8] sm:$0xff] }
 0x3e5   : > { %v2317_v59 = vpop.f32.mrf.mxu0  ;;  %2138 = vmatmul.f32.gmra.mxu1 %v4470_v60 }
 0x3e6   : > { %v3024_v5 = vmax.f32 %v2428_v55, 0.0  ;;  %v2318_v62 = vadd.f32 %v2317_v59, %v6361_v25  ;;  %v273_v59 = vld [vmem:[%s7098_s1 + $0x40] sm:$0xff] }
 0x3e7   : > { %v2204_v61 = vpop.f32.mrf.mxu3  ;;  %2520 = vmatpush.msra.mxu1 %v273_v59 }
 0x3e8   : > { %3345 = vst [vmem:[%s5065_s9 + $0x218] sm:$0xff] %v3024_v5  ;;  %4112 = vmatmul.msk.f32.gmra.mxu2 %vm569_vm1, %v4469_v56  ;;  %v2205_v58 = vadd.f32 %v2204_v61, %v2092_v57  ;;  %2364 = vmatmul.f32.gmra.mxu0 %v4470_v60  ;;  %v274_v5 = vld [vmem:[%s7098_s1 + $0x48] sm:$0xff] }
 0x3e9   : > { %2746 = vmatpush.msra.mxu0 %v274_v5 }
 0x3ea   : > { %v3033_v4 = vmax.f32 %v2205_v58, 0.0  ;;  %v2094_v8 = vpop.f32.mrf.mxu1 }
 0x3eb   : > { %v2430_v7 = vpop.f32.mrf.mxu2  ;;  %v2095_v11 = vadd.f32 %v2094_v8, %v6343_v16 }
 0x3ec   : > { %3354 = vst [vmem:[%s5065_s9 + $0x260] sm:$0xff] %v3033_v4  ;;  %v2431_v63 = vadd.f32 %v2430_v7, %v2318_v62  ;;  %4080 = vmatmul.msk.f32.gmra.mxu3 %vm569_vm1, %v4471_v10  ;;  %v4480_v4 = vld [vmem:[%s4844_s14 + $0x1c0] sm:$0xff] }
 0x3ed   : > { %v2320_v12 = vpop.f32.mrf.mxu0  ;;  %2141 = vmatmul.f32.gmra.mxu1 %v4472_v14 }
 0x3ee   : > { %v3034_v13 = vmax.f32 %v2431_v63, 0.0  ;;  %v2321_v9 = vadd.f32 %v2320_v12, %v6361_v25 }
 0x3ef   : > { %v2207_v15 = vpop.f32.mrf.mxu3 }
 0x3f0   : > { %3355 = vst [vmem:[%s5065_s9 + $0x268] sm:$0xff] %v3034_v13  ;;  %4113 = vmatmul.msk.f32.gmra.mxu2 %vm569_vm1, %v4471_v10  ;;  %v2208_v6 = vadd.f32 %v2207_v15, %v2095_v11  ;;  %2367 = vmatmul.f32.gmra.mxu0 %v4472_v14  ;;  %v4481_v14 = vld [vmem:[%s4844_s14 + $0x1d8] sm:$0xff] }
 0x3f2   : > { %v3043_v18 = vmax.f32 %v2208_v6, 0.0  ;;  %v2097_v19 = vpop.f32.mrf.mxu1 }
 0x3f3   : > { %v2433_v17 = vpop.f32.mrf.mxu2  ;;  %v2098_v22 = vadd.f32 %v2097_v19, %v6343_v16 }
 0x3f4   : > { %3364 = vst [vmem:[%s5065_s9 + $0x2b0] sm:$0xff] %v3043_v18  ;;  %v2434_v20 = vadd.f32 %v2433_v17, %v2321_v9  ;;  %4081 = vmatmul.msk.f32.gmra.mxu3 %vm569_vm1, %v4473_v21  ;;  %v4482_v18 = vld [vmem:[%s4844_s14 + $0x1d0] sm:$0xff] }
 0x3f5   : > { %v2323_v23 = vpop.f32.mrf.mxu0  ;;  %2144 = vmatmul.f32.gmra.mxu1 %v4474_v26 }
 0x3f6   : > { %v3044_v24 = vmax.f32 %v2434_v20, 0.0  ;;  %v2324_v28 = vadd.f32 %v2323_v23, %v6361_v25 }
 0x3f7   : > { %v2210_v27 = vpop.f32.mrf.mxu3 }
 0x3f8   : > { %3365 = vst [vmem:[%s5065_s9 + $0x2b8] sm:$0xff] %v3044_v24  ;;  %4114 = vmatmul.msk.f32.gmra.mxu2 %vm569_vm1, %v4473_v21  ;;  %v2211_v29 = vadd.f32 %v2210_v27, %v2098_v22  ;;  %2370 = vmatmul.f32.gmra.mxu0 %v4474_v26  ;;  %v4483_v26 = vld [vmem:[%s4844_s14 + $0x1e8] sm:$0xff] }
 0x3fa   : > { %v3053_v32 = vmax.f32 %v2211_v29, 0.0  ;;  %v2100_v34 = vpop.f32.mrf.mxu1 }
 0x3fb   : > { %v2436_v33 = vpop.f32.mrf.mxu2  ;;  %v2101_v37 = vadd.f32 %v2100_v34, %v6343_v16 }
 0x3fc   : > { %3374 = vst [vmem:[%s5065_s9 + $0x300] sm:$0xff] %v3053_v32  ;;  %v2437_v35 = vadd.f32 %v2436_v33, %v2324_v28  ;;  %4082 = vmatmul.msk.f32.gmra.mxu3 %vm569_vm1, %v4475_v36 }
 0x3fd   : > { %v2326_v38 = vpop.f32.mrf.mxu0  ;;  %2147 = vmatmul.f32.gmra.mxu1 %v4476_v40 }
 0x3fe   : > { %v3054_v39 = vmax.f32 %v2437_v35, 0.0  ;;  %v2327_v42 = vadd.f32 %v2326_v38, %v6361_v25  ;;  %v4485_v38 = vld [vmem:[%s4844_s14 + $0x1f8] sm:$0xff] }
 0x3ff   : > { %v2213_v41 = vpop.f32.mrf.mxu3 }
 0x400   : > { %3375 = vst [vmem:[%s5065_s9 + $0x308] sm:$0xff] %v3054_v39  ;;  %4115 = vmatmul.msk.f32.gmra.mxu2 %vm569_vm1, %v4475_v36  ;;  %v2214_v43 = vadd.f32 %v2213_v41, %v2101_v37  ;;  %2373 = vmatmul.f32.gmra.mxu0 %v4476_v40 }
 0x402   : > { %v3063_v46 = vmax.f32 %v2214_v43, 0.0  ;;  %v2103_v48 = vpop.f32.mrf.mxu1 }
 0x403   : > { %v2439_v47 = vpop.f32.mrf.mxu2  ;;  %v2104_v51 = vadd.f32 %v2103_v48, %v6343_v16 }
 0x404   : > { %3384 = vst [vmem:[%s5065_s9 + $0x350] sm:$0xff] %v3063_v46  ;;  %v2440_v49 = vadd.f32 %v2439_v47, %v2327_v42  ;;  %4083 = vmatmul.msk.f32.gmra.mxu3 %vm569_vm1, %v4477_v50  ;;  %v4486_v42 = vld [vmem:[%s4844_s14 + $0x1f0] sm:$0xff] }
 0x405   : > { %v2329_v52 = vpop.f32.mrf.mxu0  ;;  %2150 = vmatmul.f32.gmra.mxu1 %v4478_v54 }
 0x406   : > { %v3064_v53 = vmax.f32 %v2440_v49, 0.0  ;;  %v2330_v56 = vadd.f32 %v2329_v52, %v6361_v25 }
 0x407   : > { %v2216_v55 = vpop.f32.mrf.mxu3 }
 0x408   : > { %3385 = vst [vmem:[%s5065_s9 + $0x358] sm:$0xff] %v3064_v53  ;;  %4116 = vmatmul.msk.f32.gmra.mxu2 %vm569_vm1, %v4477_v50  ;;  %v2217_v57 = vadd.f32 %v2216_v55, %v2104_v51  ;;  %2376 = vmatmul.f32.gmra.mxu0 %v4478_v54  ;;  %v4487_v50 = vld [vmem:[%s4844_s14 + $0x8] sm:$0xff]  ;;  %v4488_v54 = vld [vmem:[%s4844_s14] sm:$0xff] }
 0x40a   : > { %v3073_v60 = vmax.f32 %v2217_v57, 0.0  ;;  %v2106_v62 = vpop.f32.mrf.mxu1 }
 0x40b   : > { %v2442_v61 = vpop.f32.mrf.mxu2  ;;  %v2107_v1 = vadd.f32 %v2106_v62, %v6343_v16  ;;  %v4489_v62 = vld [vmem:[%s4844_s14 + $0x18] sm:$0xff] }
 0x40c   : > { %3394 = vst [vmem:[%s5065_s9 + $0x3a0] sm:$0xff] %v3073_v60  ;;  %v2443_v58 = vadd.f32 %v2442_v61, %v2330_v56  ;;  %4084 = vmatmul.msk.f32.gmra.mxu3 %vm569_vm1, %v4479_v0 }
 0x40d   : > { %v2332_v2 = vpop.f32.mrf.mxu0  ;;  %2153 = vmatmul.f32.gmra.mxu1 %v4480_v4 }
 0x40e   : > { %v3074_v3 = vmax.f32 %v2443_v58, 0.0  ;;  %v2333_v8 = vadd.f32 %v2332_v2, %v6361_v25  ;;  %v4490_v2 = vld [vmem:[%s4844_s14 + $0x10] sm:$0xff] }
 0x40f   : > { %v2219_v7 = vpop.f32.mrf.mxu3 }
 0x410   : > { %3395 = vst [vmem:[%s5065_s9 + $0x3a8] sm:$0xff] %v3074_v3  ;;  %4117 = vmatmul.msk.f32.gmra.mxu2 %vm569_vm1, %v4479_v0  ;;  %v2220_v63 = vadd.f32 %v2219_v7, %v2107_v1  ;;  %2379 = vmatmul.f32.gmra.mxu0 %v4480_v4 }
 0x412   : > { %v3083_v10 = vmax.f32 %v2220_v63, 0.0  ;;  %v2109_v12 = vpop.f32.mrf.mxu1 }
 0x413   : > { %v2445_v11 = vpop.f32.mrf.mxu2  ;;  %v2110_v15 = vadd.f32 %v2109_v12, %v6343_v16  ;;  %v4491_v12 = vld [vmem:[%s4844_s14 + $0x28] sm:$0xff] }
 0x414   : > { %3404 = vst [vmem:[%s5065_s9 + $0x3f0] sm:$0xff] %v3083_v10  ;;  %v2446_v13 = vadd.f32 %v2445_v11, %v2333_v8  ;;  %4085 = vmatmul.msk.f32.gmra.mxu3 %vm569_vm1, %v4481_v14 }
 0x415   : > { %v2335_v9 = vpop.f32.mrf.mxu0  ;;  %2156 = vmatmul.f32.gmra.mxu1 %v4482_v18 }
 0x416   : > { %v3084_v6 = vmax.f32 %v2446_v13, 0.0  ;;  %v2336_v19 = vadd.f32 %v2335_v9, %v6361_v25  ;;  %v4492_v9 = vld [vmem:[%s4844_s14 + $0x20] sm:$0xff] }
 0x417   : > { %v2222_v17 = vpop.f32.mrf.mxu3 }
 0x418   : > { %3405 = vst [vmem:[%s5065_s9 + $0x3f8] sm:$0xff] %v3084_v6  ;;  %4118 = vmatmul.msk.f32.gmra.mxu2 %vm569_vm1, %v4481_v14  ;;  %v2223_v20 = vadd.f32 %v2222_v17, %v2110_v15  ;;  %2382 = vmatmul.f32.gmra.mxu0 %v4482_v18 }
 0x41a   : > { %v3093_v21 = vmax.f32 %v2223_v20, 0.0  ;;  %v2112_v23 = vpop.f32.mrf.mxu1 }
 0x41b   : > { %v2448_v22 = vpop.f32.mrf.mxu2  ;;  %v2113_v27 = vadd.f32 %v2112_v23, %v6343_v16  ;;  %v4493_v23 = vld [vmem:[%s4844_s14 + $0x38] sm:$0xff] }
 0x41c   : > { %3414 = vst [vmem:[%s5065_s9 + $0x440] sm:$0xff] %v3093_v21  ;;  %v2449_v24 = vadd.f32 %v2448_v22, %v2336_v19  ;;  %4086 = vmatmul.msk.f32.gmra.mxu3 %vm569_vm1, %v4483_v26 }
 0x41d   : > { %v2338_v28 = vpop.f32.mrf.mxu0  ;;  %2159 = vmatmul.f32.gmra.mxu1 %v4484_v30 }
 0x41e   : > { %v3094_v29 = vmax.f32 %v2449_v24, 0.0  ;;  %v2339_v32 = vadd.f32 %v2338_v28, %v6361_v25  ;;  %v4494_v28 = vld [vmem:[%s4844_s14 + $0x30] sm:$0xff] }
 0x41f   : > { %v2225_v31 = vpop.f32.mrf.mxu3 }
 0x420   : > { %3415 = vst [vmem:[%s5065_s9 + $0x448] sm:$0xff] %v3094_v29  ;;  %4119 = vmatmul.msk.f32.gmra.mxu2 %vm569_vm1, %v4483_v26  ;;  %v2226_v33 = vadd.f32 %v2225_v31, %v2113_v27  ;;  %2385 = vmatmul.f32.gmra.mxu0 %v4484_v30 }
 0x422   : > { %v3103_v34 = vmax.f32 %v2226_v33, 0.0  ;;  %v2115_v36 = vpop.f32.mrf.mxu1 }
 0x423   : > { %v2451_v35 = vpop.f32.mrf.mxu2  ;;  %v2116_v39 = vadd.f32 %v2115_v36, %v6343_v16  ;;  %v4495_v36 = vld [vmem:[%s4844_s14 + $0x48] sm:$0xff] }
 0x424   : > { %3424 = vst [vmem:[%s5065_s9 + $0x490] sm:$0xff] %v3103_v34  ;;  %v2452_v37 = vadd.f32 %v2451_v35, %v2339_v32  ;;  %4087 = vmatmul.msk.f32.gmra.mxu3 %vm569_vm1, %v4485_v38 }
 0x425   : > { %v2341_v40 = vpop.f32.mrf.mxu0  ;;  %2162 = vmatmul.f32.gmra.mxu1 %v4486_v42 }
 0x426   : > { %v3104_v41 = vmax.f32 %v2452_v37, 0.0  ;;  %v2342_v44 = vadd.f32 %v2341_v40, %v6361_v25  ;;  %v4496_v40 = vld [vmem:[%s4844_s14 + $0x40] sm:$0xff] }
 0x427   : > { %v2228_v43 = vpop.f32.mrf.mxu3 }
 0x428   : > { %3425 = vst [vmem:[%s5065_s9 + $0x498] sm:$0xff] %v3104_v41  ;;  %4120 = vmatmul.msk.f32.gmra.mxu2 %vm569_vm1, %v4485_v38  ;;  %v2229_v45 = vadd.f32 %v2228_v43, %v2116_v39  ;;  %2388 = vmatmul.f32.gmra.mxu0 %v4486_v42 }
 0x42a   : > { %v3113_v46 = vmax.f32 %v2229_v45, 0.0  ;;  %v2118_v48 = vpop.f32.mrf.mxu1 }
 0x42b   : > { %v2454_v47 = vpop.f32.mrf.mxu2  ;;  %v2119_v51 = vadd.f32 %v2118_v48, %v6343_v16  ;;  %v4497_v48 = vld [vmem:[%s4844_s14 + $0x58] sm:$0xff] }
 0x42c   : > { %3434 = vst [vmem:[%s5065_s9 + $0x4e0] sm:$0xff] %v3113_v46  ;;  %v2455_v49 = vadd.f32 %v2454_v47, %v2342_v44  ;;  %4122 = vmatmul.msk.f32.vlgmr.msra.gmra.mxu3 %vm569_vm1, %v4487_v50 }
 0x42d   : > { %v2344_v52 = vpop.f32.mrf.mxu0  ;;  %2521 = vmatmul.f32.vlgmr.msra.gmra.mxu1 %v4488_v54 }
 0x42e   : > { %v3114_v53 = vmax.f32 %v2455_v49, 0.0  ;;  %v2345_v56 = vadd.f32 %v2344_v52, %v6361_v25  ;;  %v4498_v52 = vld [vmem:[%s4844_s14 + $0x50] sm:$0xff] }
 0x42f   : > { %v2231_v55 = vpop.f32.mrf.mxu3 }
 0x430   : > { %3435 = vst [vmem:[%s5065_s9 + $0x4e8] sm:$0xff] %v3114_v53  ;;  %4155 = vmatmul.msk.f32.vlgmr.msra.gmra.mxu2 %vm569_vm1, %v4487_v50  ;;  %v2232_v57 = vadd.f32 %v2231_v55, %v2119_v51  ;;  %2747 = vmatmul.f32.vlgmr.msra.gmra.mxu0 %v4488_v54 }
 0x432   : > { %v3123_v59 = vmax.f32 %v2232_v57, 0.0  ;;  %v2121_v60 = vpop.f32.mrf.mxu1 }
 0x433   : > { %v2457_v5 = vpop.f32.mrf.mxu2  ;;  %v2122_v58 = vadd.f32 %v2121_v60, %v6343_v16  ;;  %v4499_v60 = vld [vmem:[%s4844_s14 + $0x68] sm:$0xff] }
 0x434   : > { %3444 = vst [vmem:[%s5065_s9 + $0x530] sm:$0xff] %v3123_v59  ;;  %v2458_v61 = vadd.f32 %v2457_v5, %v2345_v56  ;;  %4123 = vmatmul.msk.f32.gmra.mxu3 %vm569_vm1, %v4489_v62 }
 0x435   : > { %v2347_v0 = vpop.f32.mrf.mxu0  ;;  %2524 = vmatmul.f32.gmra.mxu1 %v4490_v2 }
 0x436   : > { %v3124_v1 = vmax.f32 %v2458_v61, 0.0  ;;  %v2348_v4 = vadd.f32 %v2347_v0, %v6361_v25  ;;  %v4500_v0 = vld [vmem:[%s4844_s14 + $0x60] sm:$0xff] }
 0x437   : > { %v2234_v3 = vpop.f32.mrf.mxu3 }
 0x438   : > { %3445 = vst [vmem:[%s5065_s9 + $0x538] sm:$0xff] %v3124_v1  ;;  %4156 = vmatmul.msk.f32.gmra.mxu2 %vm569_vm1, %v4489_v62  ;;  %v2235_v7 = vadd.f32 %v2234_v3, %v2122_v58  ;;  %2750 = vmatmul.f32.gmra.mxu0 %v4490_v2 }
 0x43a   : > { %v3133_v8 = vmax.f32 %v2235_v7, 0.0  ;;  %v2124_v10 = vpop.f32.mrf.mxu1 }
 0x43b   : > { %v2460_v63 = vpop.f32.mrf.mxu2  ;;  %v2125_v13 = vadd.f32 %v2124_v10, %v6343_v16  ;;  %v4501_v10 = vld [vmem:[%s4844_s14 + $0x78] sm:$0xff] }
 0x43c   : > { %3454 = vst [vmem:[%s5065_s9 + $0x580] sm:$0xff] %v3133_v8  ;;  %v2461_v11 = vadd.f32 %v2460_v63, %v2348_v4  ;;  %4124 = vmatmul.msk.f32.gmra.mxu3 %vm569_vm1, %v4491_v12 }
 0x43d   : > { %v2350_v14 = vpop.f32.mrf.mxu0  ;;  %2527 = vmatmul.f32.gmra.mxu1 %v4492_v9 }
 0x43e   : > { %v3134_v15 = vmax.f32 %v2461_v11, 0.0  ;;  %v2351_v18 = vadd.f32 %v2350_v14, %v6361_v25  ;;  %v4502_v14 = vld [vmem:[%s4844_s14 + $0x70] sm:$0xff] }
 0x43f   : > { %v2237_v6 = vpop.f32.mrf.mxu3 }
 0x440   : > { %3455 = vst [vmem:[%s5065_s9 + $0x588] sm:$0xff] %v3134_v15  ;;  %4157 = vmatmul.msk.f32.gmra.mxu2 %vm569_vm1, %v4491_v12  ;;  %v2238_v17 = vadd.f32 %v2237_v6, %v2125_v13  ;;  %2753 = vmatmul.f32.gmra.mxu0 %v4492_v9 }
 0x442   : > { %v3143_v19 = vmax.f32 %v2238_v17, 0.0  ;;  %v2127_v21 = vpop.f32.mrf.mxu1 }
 0x443   : > { %v2463_v20 = vpop.f32.mrf.mxu2  ;;  %v2128_v24 = vadd.f32 %v2127_v21, %v6343_v16  ;;  %v4503_v21 = vld [vmem:[%s4844_s14 + $0x88] sm:$0xff] }
 0x444   : > { %3464 = vst [vmem:[%s5065_s9 + $0x5d0] sm:$0xff] %v3143_v19  ;;  %v2464_v22 = vadd.f32 %v2463_v20, %v2351_v18  ;;  %4125 = vmatmul.msk.f32.gmra.mxu3 %vm569_vm1, %v4493_v23 }
 0x445   : > { %v2353_v26 = vpop.f32.mrf.mxu0  ;;  %2530 = vmatmul.f32.gmra.mxu1 %v4494_v28 }
 0x446   : > { %v3144_v27 = vmax.f32 %v2464_v22, 0.0  ;;  %v2354_v30 = vadd.f32 %v2353_v26, %v6361_v25  ;;  %v4504_v26 = vld [vmem:[%s4844_s14 + $0x80] sm:$0xff] }
 0x447   : > { %v2240_v29 = vpop.f32.mrf.mxu3 }
 0x448   : > { %3465 = vst [vmem:[%s5065_s9 + $0x5d8] sm:$0xff] %v3144_v27  ;;  %4158 = vmatmul.msk.f32.gmra.mxu2 %vm569_vm1, %v4493_v23  ;;  %v2241_v31 = vadd.f32 %v2240_v29, %v2128_v24  ;;  %2756 = vmatmul.f32.gmra.mxu0 %v4494_v28 }
 0x44a   : > { %v3153_v32 = vmax.f32 %v2241_v31, 0.0  ;;  %v2130_v34 = vpop.f32.mrf.mxu1 }
 0x44b   : > { %v2466_v33 = vpop.f32.mrf.mxu2  ;;  %v2131_v37 = vadd.f32 %v2130_v34, %v6343_v16  ;;  %v4505_v34 = vld [vmem:[%s4844_s14 + $0x98] sm:$0xff] }
 0x44c   : > { %3474 = vst [vmem:[%s5065_s9 + $0x620] sm:$0xff] %v3153_v32  ;;  %v2467_v35 = vadd.f32 %v2466_v33, %v2354_v30  ;;  %4126 = vmatmul.msk.f32.gmra.mxu3 %vm569_vm1, %v4495_v36 }
 0x44d   : > { %v2356_v38 = vpop.f32.mrf.mxu0  ;;  %2533 = vmatmul.f32.gmra.mxu1 %v4496_v40 }
 0x44e   : > { %v3154_v39 = vmax.f32 %v2467_v35, 0.0  ;;  %v2357_v42 = vadd.f32 %v2356_v38, %v6361_v25  ;;  %v4506_v38 = vld [vmem:[%s4844_s14 + $0x90] sm:$0xff] }
 0x44f   : > { %v2243_v41 = vpop.f32.mrf.mxu3 }
 0x450   : > { %3475 = vst [vmem:[%s5065_s9 + $0x628] sm:$0xff] %v3154_v39  ;;  %4159 = vmatmul.msk.f32.gmra.mxu2 %vm569_vm1, %v4495_v36  ;;  %v2244_v43 = vadd.f32 %v2243_v41, %v2131_v37  ;;  %2759 = vmatmul.f32.gmra.mxu0 %v4496_v40 }
 0x452   : > { %v3163_v44 = vmax.f32 %v2244_v43, 0.0  ;;  %v2133_v46 = vpop.f32.mrf.mxu1 }
 0x453   : > { %v2469_v45 = vpop.f32.mrf.mxu2  ;;  %v2134_v49 = vadd.f32 %v2133_v46, %v6343_v16  ;;  %v4507_v46 = vld [vmem:[%s4844_s14 + $0xa8] sm:$0xff] }
 0x454   : > { %3484 = vst [vmem:[%s5065_s9 + $0x670] sm:$0xff] %v3163_v44  ;;  %v2470_v47 = vadd.f32 %v2469_v45, %v2357_v42  ;;  %4127 = vmatmul.msk.f32.gmra.mxu3 %vm569_vm1, %v4497_v48 }
 0x455   : > { %v2359_v50 = vpop.f32.mrf.mxu0  ;;  %2536 = vmatmul.f32.gmra.mxu1 %v4498_v52 }
 0x456   : > { %v3164_v51 = vmax.f32 %v2470_v47, 0.0  ;;  %v2360_v54 = vadd.f32 %v2359_v50, %v6361_v25  ;;  %v4508_v50 = vld [vmem:[%s4844_s14 + $0xa0] sm:$0xff] }
 0x457   : > { %v2246_v53 = vpop.f32.mrf.mxu3 }
 0x458   : > { %3485 = vst [vmem:[%s5065_s9 + $0x678] sm:$0xff] %v3164_v51  ;;  %4160 = vmatmul.msk.f32.gmra.mxu2 %vm569_vm1, %v4497_v48  ;;  %v2247_v55 = vadd.f32 %v2246_v53, %v2134_v49  ;;  %2762 = vmatmul.f32.gmra.mxu0 %v4498_v52 }
 0x45a   : > { %v3173_v56 = vmax.f32 %v2247_v55, 0.0  ;;  %v2136_v59 = vpop.f32.mrf.mxu1 }
 0x45b   : > { %v2472_v57 = vpop.f32.mrf.mxu2  ;;  %v2137_v61 = vadd.f32 %v2136_v59, %v6343_v16  ;;  %v4509_v59 = vld [vmem:[%s4844_s14 + $0xb8] sm:$0xff] }
 0x45c   : > { %3494 = vst [vmem:[%s5065_s9 + $0x6c0] sm:$0xff] %v3173_v56  ;;  %v2473_v5 = vadd.f32 %v2472_v57, %v2360_v54  ;;  %4128 = vmatmul.msk.f32.gmra.mxu3 %vm569_vm1, %v4499_v60 }
 0x45d   : > { %v2362_v62 = vpop.f32.mrf.mxu0  ;;  %2539 = vmatmul.f32.gmra.mxu1 %v4500_v0 }
 0x45e   : > { %v3174_v58 = vmax.f32 %v2473_v5, 0.0  ;;  %v2363_v2 = vadd.f32 %v2362_v62, %v6361_v25  ;;  %v4510_v62 = vld [vmem:[%s4844_s14 + $0xb0] sm:$0xff] }
 0x45f   : > { %v2249_v1 = vpop.f32.mrf.mxu3 }
 0x460   : > { %3495 = vst [vmem:[%s5065_s9 + $0x6c8] sm:$0xff] %v3174_v58  ;;  %4161 = vmatmul.msk.f32.gmra.mxu2 %vm569_vm1, %v4499_v60  ;;  %v2250_v3 = vadd.f32 %v2249_v1, %v2137_v61  ;;  %2765 = vmatmul.f32.gmra.mxu0 %v4500_v0 }
 0x462   : > { %v3183_v4 = vmax.f32 %v2250_v3, 0.0  ;;  %v2139_v8 = vpop.f32.mrf.mxu1 }
 0x463   : > { %v2475_v7 = vpop.f32.mrf.mxu2  ;;  %v2140_v11 = vadd.f32 %v2139_v8, %v6343_v16  ;;  %v4511_v8 = vld [vmem:[%s4844_s14 + $0xc8] sm:$0xff] }
 0x464   : > { %3504 = vst [vmem:[%s5065_s9 + $0x710] sm:$0xff] %v3183_v4  ;;  %v2476_v63 = vadd.f32 %v2475_v7, %v2363_v2  ;;  %4129 = vmatmul.msk.f32.gmra.mxu3 %vm569_vm1, %v4501_v10 }
 0x465   : > { %v2365_v12 = vpop.f32.mrf.mxu0  ;;  %2542 = vmatmul.f32.gmra.mxu1 %v4502_v14 }
 0x466   : > { %v3184_v13 = vmax.f32 %v2476_v63, 0.0  ;;  %v2366_v9 = vadd.f32 %v2365_v12, %v6361_v25  ;;  %v4512_v12 = vld [vmem:[%s4844_s14 + $0xc0] sm:$0xff] }
 0x467   : > { %v2252_v15 = vpop.f32.mrf.mxu3 }
 0x468   : > { %3505 = vst [vmem:[%s5065_s9 + $0x718] sm:$0xff] %v3184_v13  ;;  %4162 = vmatmul.msk.f32.gmra.mxu2 %vm569_vm1, %v4501_v10  ;;  %v2253_v6 = vadd.f32 %v2252_v15, %v2140_v11  ;;  %2768 = vmatmul.f32.gmra.mxu0 %v4502_v14 }
 0x46a   : > { %v3193_v18 = vmax.f32 %v2253_v6, 0.0  ;;  %v2142_v19 = vpop.f32.mrf.mxu1 }
 0x46b   : > { %v2478_v17 = vpop.f32.mrf.mxu2  ;;  %v2143_v22 = vadd.f32 %v2142_v19, %v6343_v16  ;;  %v4513_v19 = vld [vmem:[%s4844_s14 + $0xd8] sm:$0xff] }
 0x46c   : > { %3514 = vst [vmem:[%s5065_s9 + $0x760] sm:$0xff] %v3193_v18  ;;  %v2479_v20 = vadd.f32 %v2478_v17, %v2366_v9  ;;  %4130 = vmatmul.msk.f32.gmra.mxu3 %vm569_vm1, %v4503_v21 }
 0x46d   : > { %v2368_v23 = vpop.f32.mrf.mxu0  ;;  %2545 = vmatmul.f32.gmra.mxu1 %v4504_v26 }
 0x46e   : > { %v3194_v24 = vmax.f32 %v2479_v20, 0.0  ;;  %v2369_v28 = vadd.f32 %v2368_v23, %v6361_v25  ;;  %v4514_v23 = vld [vmem:[%s4844_s14 + $0xd0] sm:$0xff] }
 0x46f   : > { %v2255_v27 = vpop.f32.mrf.mxu3 }
 0x470   : > { %3515 = vst [vmem:[%s5065_s9 + $0x768] sm:$0xff] %v3194_v24  ;;  %4163 = vmatmul.msk.f32.gmra.mxu2 %vm569_vm1, %v4503_v21  ;;  %v2256_v29 = vadd.f32 %v2255_v27, %v2143_v22  ;;  %2771 = vmatmul.f32.gmra.mxu0 %v4504_v26 }
 0x472   : > { %v3203_v30 = vmax.f32 %v2256_v29, 0.0  ;;  %v2145_v32 = vpop.f32.mrf.mxu1 }
 0x473   : > { %v2481_v31 = vpop.f32.mrf.mxu2  ;;  %v2146_v35 = vadd.f32 %v2145_v32, %v6343_v16  ;;  %v4515_v32 = vld [vmem:[%s4844_s14 + $0xe8] sm:$0xff] }
 0x474   : > { %3524 = vst [vmem:[%s5065_s9 + $0x7b0] sm:$0xff] %v3203_v30  ;;  %v2482_v33 = vadd.f32 %v2481_v31, %v2369_v28  ;;  %4131 = vmatmul.msk.f32.gmra.mxu3 %vm569_vm1, %v4505_v34 }
 0x475   : > { %v2371_v36 = vpop.f32.mrf.mxu0  ;;  %2548 = vmatmul.f32.gmra.mxu1 %v4506_v38 }
 0x476   : > { %v3204_v37 = vmax.f32 %v2482_v33, 0.0  ;;  %v2372_v40 = vadd.f32 %v2371_v36, %v6361_v25  ;;  %v4516_v36 = vld [vmem:[%s4844_s14 + $0xe0] sm:$0xff] }
 0x477   : > { %v2258_v39 = vpop.f32.mrf.mxu3 }
 0x478   : > { %3525 = vst [vmem:[%s5065_s9 + $0x7b8] sm:$0xff] %v3204_v37  ;;  %4164 = vmatmul.msk.f32.gmra.mxu2 %vm569_vm1, %v4505_v34  ;;  %v2259_v41 = vadd.f32 %v2258_v39, %v2146_v35  ;;  %2774 = vmatmul.f32.gmra.mxu0 %v4506_v38 }
 0x47a   : > { %v3213_v42 = vmax.f32 %v2259_v41, 0.0  ;;  %v2148_v44 = vpop.f32.mrf.mxu1 }
 0x47b   : > { %v2484_v43 = vpop.f32.mrf.mxu2  ;;  %v2149_v47 = vadd.f32 %v2148_v44, %v6343_v16  ;;  %v4517_v44 = vld [vmem:[%s4844_s14 + $0xf8] sm:$0xff] }
 0x47c   : > { %3534 = vst [vmem:[%s5065_s9 + $0x800] sm:$0xff] %v3213_v42  ;;  %v2485_v45 = vadd.f32 %v2484_v43, %v2372_v40  ;;  %4132 = vmatmul.msk.f32.gmra.mxu3 %vm569_vm1, %v4507_v46 }
 0x47d   : > { %v2374_v48 = vpop.f32.mrf.mxu0  ;;  %2551 = vmatmul.f32.gmra.mxu1 %v4508_v50 }
 0x47e   : > { %v3214_v49 = vmax.f32 %v2485_v45, 0.0  ;;  %v2375_v52 = vadd.f32 %v2374_v48, %v6361_v25 }
 0x47f   : > { %v2261_v51 = vpop.f32.mrf.mxu3 }
 0x480   : > { %3535 = vst [vmem:[%s5065_s9 + $0x808] sm:$0xff] %v3214_v49  ;;  %4165 = vmatmul.msk.f32.gmra.mxu2 %vm569_vm1, %v4507_v46  ;;  %v2262_v53 = vadd.f32 %v2261_v51, %v2149_v47  ;;  %2777 = vmatmul.f32.gmra.mxu0 %v4508_v50  ;;  %v546_v47 = vld [vmem:[%s7099_s2 + $0x8] sm:$0x3]  ;;  %v4518_v49 = vld [vmem:[%s4844_s14 + $0xf0] sm:$0xff] }
 0x482   : > { %v3223_v54 = vmax.f32 %v2262_v53, 0.0  ;;  %v2151_v56 = vpop.f32.mrf.mxu1 }
 0x483   : > { %v2487_v55 = vpop.f32.mrf.mxu2  ;;  %v2152_v5 = vadd.f32 %v2151_v56, %v6343_v16 }
 0x484   : > { %3544 = vst [vmem:[%s5065_s9 + $0x850] sm:$0xff] %v3223_v54  ;;  %v2488_v57 = vadd.f32 %v2487_v55, %v2375_v52  ;;  %4133 = vmatmul.msk.f32.gmra.mxu3 %vm569_vm1, %v4509_v59 }
 0x485   : > { %v2377_v60 = vpop.f32.mrf.mxu0  ;;  %2554 = vmatmul.f32.gmra.mxu1 %v4510_v62 }
 0x486   : > { %v3224_v61 = vmax.f32 %v2488_v57, 0.0  ;;  %v2378_v0 = vadd.f32 %v2377_v60, %v6361_v25  ;;  %v4519_v57 = vld [vmem:[%s4844_s14 + $0x108] sm:$0xff] }
 0x487   : > { %v2264_v58 = vpop.f32.mrf.mxu3 }
 0x488   : > { %3545 = vst [vmem:[%s5065_s9 + $0x858] sm:$0xff] %v3224_v61  ;;  %4166 = vmatmul.msk.f32.gmra.mxu2 %vm569_vm1, %v4509_v59  ;;  %v2265_v1 = vadd.f32 %v2264_v58, %v2152_v5  ;;  %2780 = vmatmul.f32.gmra.mxu0 %v4510_v62  ;;  %v6684_v5 = vperm.slane %v546_v47, 1  ;;  %v4520_v61 = vld [vmem:[%s4844_s14 + $0x100] sm:$0xff] }
 0x48a   : > { %v3233_v2 = vmax.f32 %v2265_v1, 0.0  ;;  %v2154_v4 = vpop.f32.mrf.mxu1 }
 0x48b   : > { %v2490_v3 = vpop.f32.mrf.mxu2  ;;  %v2155_v63 = vadd.f32 %v2154_v4, %v6343_v16 }
 0x48c   : > { %3554 = vst [vmem:[%s5065_s9 + $0x8a0] sm:$0xff] %v3233_v2  ;;  %v2491_v7 = vadd.f32 %v2490_v3, %v2378_v0  ;;  %4134 = vmatmul.msk.f32.gmra.mxu3 %vm569_vm1, %v4511_v8 }
 0x48d   : > { %v2380_v10 = vpop.f32.mrf.mxu0  ;;  %2557 = vmatmul.f32.gmra.mxu1 %v4512_v12 }
 0x48e   : > { %v3234_v11 = vmax.f32 %v2491_v7, 0.0  ;;  %v2381_v14 = vadd.f32 %v2380_v10, %v6361_v25  ;;  %v4521_v7 = vld [vmem:[%s4844_s14 + $0x118] sm:$0xff] }
 0x48f   : > { %v2267_v13 = vpop.f32.mrf.mxu3 }
 0x490   : > { %3555 = vst [vmem:[%s5065_s9 + $0x8a8] sm:$0xff] %v3234_v11  ;;  %4167 = vmatmul.msk.f32.gmra.mxu2 %vm569_vm1, %v4511_v8  ;;  %v2268_v15 = vadd.f32 %v2267_v13, %v2155_v63  ;;  %2783 = vmatmul.f32.gmra.mxu0 %v4512_v12  ;;  %v4522_v11 = vld [vmem:[%s4844_s14 + $0x110] sm:$0xff] }
 0x492   : > { %v3243_v9 = vmax.f32 %v2268_v15, 0.0  ;;  %v2157_v18 = vpop.f32.mrf.mxu1 }
 0x493   : > { %v2493_v6 = vpop.f32.mrf.mxu2  ;;  %v2158_v20 = vadd.f32 %v2157_v18, %v6343_v16 }
 0x494   : > { %3564 = vst [vmem:[%s5065_s9 + $0x8f0] sm:$0xff] %v3243_v9  ;;  %v2494_v17 = vadd.f32 %v2493_v6, %v2381_v14  ;;  %4135 = vmatmul.msk.f32.gmra.mxu3 %vm569_vm1, %v4513_v19 }
 0x495   : > { %v2383_v21 = vpop.f32.mrf.mxu0  ;;  %2560 = vmatmul.f32.gmra.mxu1 %v4514_v23 }
 0x496   : > { %v3244_v22 = vmax.f32 %v2494_v17, 0.0  ;;  %v2384_v26 = vadd.f32 %v2383_v21, %v6361_v25  ;;  %v4523_v17 = vld [vmem:[%s4844_s14 + $0x128] sm:$0xff] }
 0x497   : > { %v2270_v24 = vpop.f32.mrf.mxu3 }
 0x498   : > { %3565 = vst [vmem:[%s5065_s9 + $0x8f8] sm:$0xff] %v3244_v22  ;;  %4168 = vmatmul.msk.f32.gmra.mxu2 %vm569_vm1, %v4513_v19  ;;  %v2271_v27 = vadd.f32 %v2270_v24, %v2158_v20  ;;  %2786 = vmatmul.f32.gmra.mxu0 %v4514_v23  ;;  %v4524_v22 = vld [vmem:[%s4844_s14 + $0x120] sm:$0xff] }
 0x49a   : > { %v3253_v28 = vmax.f32 %v2271_v27, 0.0  ;;  %v2160_v30 = vpop.f32.mrf.mxu1 }
 0x49b   : > { %v2496_v29 = vpop.f32.mrf.mxu2  ;;  %v2161_v33 = vadd.f32 %v2160_v30, %v6343_v16 }
 0x49c   : > { %3574 = vst [vmem:[%s5065_s9 + $0x940] sm:$0xff] %v3253_v28  ;;  %v2497_v31 = vadd.f32 %v2496_v29, %v2384_v26  ;;  %4136 = vmatmul.msk.f32.gmra.mxu3 %vm569_vm1, %v4515_v32 }
 0x49d   : > { %v2386_v34 = vpop.f32.mrf.mxu0  ;;  %2563 = vmatmul.f32.gmra.mxu1 %v4516_v36 }
 0x49e   : > { %v3254_v35 = vmax.f32 %v2497_v31, 0.0  ;;  %v2387_v38 = vadd.f32 %v2386_v34, %v6361_v25  ;;  %v4525_v31 = vld [vmem:[%s4844_s14 + $0x138] sm:$0xff] }
 0x49f   : > { %v2273_v37 = vpop.f32.mrf.mxu3 }
 0x4a0   : > { %3575 = vst [vmem:[%s5065_s9 + $0x948] sm:$0xff] %v3254_v35  ;;  %4169 = vmatmul.msk.f32.gmra.mxu2 %vm569_vm1, %v4515_v32  ;;  %v2274_v39 = vadd.f32 %v2273_v37, %v2161_v33  ;;  %2789 = vmatmul.f32.gmra.mxu0 %v4516_v36  ;;  %v4526_v35 = vld [vmem:[%s4844_s14 + $0x130] sm:$0xff] }
 0x4a2   : > { %v3263_v40 = vmax.f32 %v2274_v39, 0.0  ;;  %v2163_v42 = vpop.f32.mrf.mxu1 }
 0x4a3   : > { %v2499_v41 = vpop.f32.mrf.mxu2  ;;  %v2164_v45 = vadd.f32 %v2163_v42, %v6343_v16  ;;  %v6678_v16 = vperm.slane %v546_v47, 0  ;;  %v4528_v47 = vld [vmem:[%s4844_s14 + $0x140] sm:$0xff] }
 0x4a4   : > { %3584 = vst [vmem:[%s5065_s9 + $0x990] sm:$0xff] %v3263_v40  ;;  %v2500_v43 = vadd.f32 %v2499_v41, %v2387_v38  ;;  %4137 = vmatmul.msk.f32.gmra.mxu3 %vm569_vm1, %v4517_v44 }
 0x4a5   : > { %v2389_v46 = vpop.f32.mrf.mxu0  ;;  %2566 = vmatmul.f32.gmra.mxu1 %v4518_v49 }
 0x4a6   : > { %v3264_v48 = vmax.f32 %v2500_v43, 0.0  ;;  %v2390_v51 = vadd.f32 %v2389_v46, %v6361_v25  ;;  %v4527_v43 = vld [vmem:[%s4844_s14 + $0x148] sm:$0xff] }
 0x4a7   : > { %v2276_v50 = vpop.f32.mrf.mxu3 }
 0x4a8   : > { %3585 = vst [vmem:[%s5065_s9 + $0x998] sm:$0xff] %v3264_v48  ;;  %4170 = vmatmul.msk.f32.gmra.mxu2 %vm569_vm1, %v4517_v44  ;;  %v2277_v52 = vadd.f32 %v2276_v50, %v2164_v45  ;;  %2792 = vmatmul.f32.gmra.mxu0 %v4518_v49 }
 0x4aa   : > { %v3273_v53 = vmax.f32 %v2277_v52, 0.0  ;;  %v2522_v55 = vpop.f32.mrf.mxu1 }
 0x4ab   : > { %v2502_v54 = vpop.f32.mrf.mxu2  ;;  %v2523_v59 = vadd.f32 %v2522_v55, %v6678_v16  ;;  %v4529_v55 = vld [vmem:[%s4844_s14 + $0x158] sm:$0xff] }
 0x4ac   : > { %3594 = vst [vmem:[%s5065_s9 + $0x9e0] sm:$0xff] %v3273_v53  ;;  %v2503_v56 = vadd.f32 %v2502_v54, %v2390_v51  ;;  %4138 = vmatmul.msk.f32.gmra.mxu3 %vm569_vm1, %v4519_v57 }
 0x4ad   : > { %v2748_v25 = vpop.f32.mrf.mxu0  ;;  %2569 = vmatmul.f32.gmra.mxu1 %v4520_v61 }
 0x4ae   : > { %v3274_v60 = vmax.f32 %v2503_v56, 0.0  ;;  %v2749_v58 = vadd.f32 %v2748_v25, %v6684_v5  ;;  %v4530_v25 = vld [vmem:[%s4844_s14 + $0x150] sm:$0xff] }
 0x4af   : > { %v2635_v62 = vpop.f32.mrf.mxu3 }
 0x4b0   : > { %3595 = vst [vmem:[%s5065_s9 + $0x9e8] sm:$0xff] %v3274_v60  ;;  %4171 = vmatmul.msk.f32.gmra.mxu2 %vm569_vm1, %v4519_v57  ;;  %v2636_v0 = vadd.f32 %v2635_v62, %v2523_v59  ;;  %2795 = vmatmul.f32.gmra.mxu0 %v4520_v61 }
 0x4b2   : > { %v2965_v1 = vmax.f32 %v2636_v0, 0.0  ;;  %v2525_v3 = vpop.f32.mrf.mxu1 }
 0x4b3   : > { %v2861_v2 = vpop.f32.mrf.mxu2  ;;  %v2526_v8 = vadd.f32 %v2525_v3, %v6678_v16  ;;  %v4531_v3 = vld [vmem:[%s4844_s14 + $0x168] sm:$0xff] }
 0x4b4   : > { %3285 = vst [vmem:[%s5065_s9 + $0x40] sm:$0xff] %v2965_v1  ;;  %v2862_v4 = vadd.f32 %v2861_v2, %v2749_v58  ;;  %4139 = vmatmul.msk.f32.gmra.mxu3 %vm569_vm1, %v4521_v7 }
 0x4b5   : > { %v2751_v63 = vpop.f32.mrf.mxu0  ;;  %2572 = vmatmul.f32.gmra.mxu1 %v4522_v11 }
 0x4b6   : > { %v2966_v10 = vmax.f32 %v2862_v4, 0.0  ;;  %v2752_v13 = vadd.f32 %v2751_v63, %v6684_v5  ;;  %v4532_v63 = vld [vmem:[%s4844_s14 + $0x160] sm:$0xff] }
 0x4b7   : > { %v2638_v12 = vpop.f32.mrf.mxu3 }
 0x4b8   : > { %3287 = vst.msk [vmem:[%s5065_s9 + $0x48] sm:$0xff] %vm3286_vm2, %v2966_v10  ;;  %4172 = vmatmul.msk.f32.gmra.mxu2 %vm569_vm1, %v4521_v7  ;;  %v2639_v14 = vadd.f32 %v2638_v12, %v2526_v8  ;;  %2798 = vmatmul.f32.gmra.mxu0 %v4522_v11 }
 0x4ba   : > { %v2975_v15 = vmax.f32 %v2639_v14, 0.0  ;;  %v2528_v6 = vpop.f32.mrf.mxu1 }
 0x4bb   : > { %v2864_v9 = vpop.f32.mrf.mxu2  ;;  %v2529_v19 = vadd.f32 %v2528_v6, %v6678_v16  ;;  %v4533_v6 = vld [vmem:[%s4844_s14 + $0x178] sm:$0xff] }
 0x4bc   : > { %3296 = vst [vmem:[%s5065_s9 + $0x90] sm:$0xff] %v2975_v15  ;;  %v2865_v18 = vadd.f32 %v2864_v9, %v2752_v13  ;;  %4140 = vmatmul.msk.f32.gmra.mxu3 %vm569_vm1, %v4523_v17 }
 0x4bd   : > { %v2754_v20 = vpop.f32.mrf.mxu0  ;;  %2575 = vmatmul.f32.gmra.mxu1 %v4524_v22 }
 0x4be   : > { %v2976_v21 = vmax.f32 %v2865_v18, 0.0  ;;  %v2755_v24 = vadd.f32 %v2754_v20, %v6684_v5  ;;  %v4534_v20 = vld [vmem:[%s4844_s14 + $0x170] sm:$0xff] }
 0x4bf   : > { %v2641_v23 = vpop.f32.mrf.mxu3 }
 0x4c0   : > { %3297 = vst.msk [vmem:[%s5065_s9 + $0x98] sm:$0xff] %vm3286_vm2, %v2976_v21  ;;  %4173 = vmatmul.msk.f32.gmra.mxu2 %vm569_vm1, %v4523_v17  ;;  %v2642_v26 = vadd.f32 %v2641_v23, %v2529_v19  ;;  %2801 = vmatmul.f32.gmra.mxu0 %v4524_v22 }
 0x4c2   : > { %v2985_v27 = vmax.f32 %v2642_v26, 0.0  ;;  %v2531_v29 = vpop.f32.mrf.mxu1 }
 0x4c3   : > { %v2867_v28 = vpop.f32.mrf.mxu2  ;;  %v2532_v32 = vadd.f32 %v2531_v29, %v6678_v16  ;;  %v4535_v29 = vld [vmem:[%s4844_s14 + $0x188] sm:$0xff] }
 0x4c4   : > { %3306 = vst [vmem:[%s5065_s9 + $0xe0] sm:$0xff] %v2985_v27  ;;  %v2868_v30 = vadd.f32 %v2867_v28, %v2755_v24  ;;  %4141 = vmatmul.msk.f32.gmra.mxu3 %vm569_vm1, %v4525_v31 }
 0x4c5   : > { %v2757_v33 = vpop.f32.mrf.mxu0  ;;  %2578 = vmatmul.f32.gmra.mxu1 %v4526_v35 }
 0x4c6   : > { %v2986_v34 = vmax.f32 %v2868_v30, 0.0  ;;  %v2758_v37 = vadd.f32 %v2757_v33, %v6684_v5  ;;  %v4536_v33 = vld [vmem:[%s4844_s14 + $0x180] sm:$0xff] }
 0x4c7   : > { %v2644_v36 = vpop.f32.mrf.mxu3 }
 0x4c8   : > { %3307 = vst.msk [vmem:[%s5065_s9 + $0xe8] sm:$0xff] %vm3286_vm2, %v2986_v34  ;;  %4174 = vmatmul.msk.f32.gmra.mxu2 %vm569_vm1, %v4525_v31  ;;  %v2645_v38 = vadd.f32 %v2644_v36, %v2532_v32  ;;  %2804 = vmatmul.f32.gmra.mxu0 %v4526_v35 }
 0x4ca   : > { %v2995_v39 = vmax.f32 %v2645_v38, 0.0  ;;  %v2534_v41 = vpop.f32.mrf.mxu1 }
 0x4cb   : > { %v2870_v40 = vpop.f32.mrf.mxu2  ;;  %v2535_v44 = vadd.f32 %v2534_v41, %v6678_v16  ;;  %v4537_v41 = vld [vmem:[%s4844_s14 + $0x198] sm:$0xff] }
 0x4cc   : > { %3316 = vst [vmem:[%s5065_s9 + $0x130] sm:$0xff] %v2995_v39  ;;  %v2871_v42 = vadd.f32 %v2870_v40, %v2758_v37  ;;  %4142 = vmatmul.msk.f32.gmra.mxu3 %vm569_vm1, %v4527_v43 }
 0x4cd   : > { %v2760_v45 = vpop.f32.mrf.mxu0  ;;  %2581 = vmatmul.f32.gmra.mxu1 %v4528_v47 }
 0x4ce   : > { %v2996_v46 = vmax.f32 %v2871_v42, 0.0  ;;  %v2761_v49 = vadd.f32 %v2760_v45, %v6684_v5  ;;  %v4538_v45 = vld [vmem:[%s4844_s14 + $0x190] sm:$0xff] }
 0x4cf   : > { %v2647_v48 = vpop.f32.mrf.mxu3 }
 0x4d0   : > { %3317 = vst.msk [vmem:[%s5065_s9 + $0x138] sm:$0xff] %vm3286_vm2, %v2996_v46  ;;  %4175 = vmatmul.msk.f32.gmra.mxu2 %vm569_vm1, %v4527_v43  ;;  %v2648_v50 = vadd.f32 %v2647_v48, %v2535_v44  ;;  %2807 = vmatmul.f32.gmra.mxu0 %v4528_v47 }
 0x4d2   : > { %v3005_v51 = vmax.f32 %v2648_v50, 0.0  ;;  %v2537_v53 = vpop.f32.mrf.mxu1 }
 0x4d3   : > { %v2873_v52 = vpop.f32.mrf.mxu2  ;;  %v2538_v56 = vadd.f32 %v2537_v53, %v6678_v16  ;;  %v4539_v53 = vld [vmem:[%s4844_s14 + $0x1a8] sm:$0xff] }
 0x4d4   : > { %3326 = vst [vmem:[%s5065_s9 + $0x180] sm:$0xff] %v3005_v51  ;;  %v2874_v54 = vadd.f32 %v2873_v52, %v2761_v49  ;;  %4143 = vmatmul.msk.f32.gmra.mxu3 %vm569_vm1, %v4529_v55 }
 0x4d5   : > { %v2763_v57 = vpop.f32.mrf.mxu0  ;;  %2584 = vmatmul.f32.gmra.mxu1 %v4530_v25 }
 0x4d6   : > { %v3006_v59 = vmax.f32 %v2874_v54, 0.0  ;;  %v2764_v61 = vadd.f32 %v2763_v57, %v6684_v5  ;;  %v4540_v57 = vld [vmem:[%s4844_s14 + $0x1a0] sm:$0xff] }
 0x4d7   : > { %v2650_v60 = vpop.f32.mrf.mxu3 }
 0x4d8   : > { %3327 = vst.msk [vmem:[%s5065_s9 + $0x188] sm:$0xff] %vm3286_vm2, %v3006_v59  ;;  %4176 = vmatmul.msk.f32.gmra.mxu2 %vm569_vm1, %v4529_v55  ;;  %v2651_v62 = vadd.f32 %v2650_v60, %v2538_v56  ;;  %2810 = vmatmul.f32.gmra.mxu0 %v4530_v25 }
 0x4da   : > { %v3015_v58 = vmax.f32 %v2651_v62, 0.0  ;;  %v2540_v1 = vpop.f32.mrf.mxu1 }
 0x4db   : > { %v2876_v0 = vpop.f32.mrf.mxu2  ;;  %v2541_v4 = vadd.f32 %v2540_v1, %v6678_v16  ;;  %v4541_v1 = vld [vmem:[%s4844_s14 + $0x1b8] sm:$0xff] }
 0x4dc   : > { %3336 = vst [vmem:[%s5065_s9 + $0x1d0] sm:$0xff] %v3015_v58  ;;  %v2877_v2 = vadd.f32 %v2876_v0, %v2764_v61  ;;  %4144 = vmatmul.msk.f32.gmra.mxu3 %vm569_vm1, %v4531_v3 }
 0x4dd   : > { %v2766_v7 = vpop.f32.mrf.mxu0  ;;  %2587 = vmatmul.f32.gmra.mxu1 %v4532_v63 }
 0x4de   : > { %v3016_v8 = vmax.f32 %v2877_v2, 0.0  ;;  %v2767_v11 = vadd.f32 %v2766_v7, %v6684_v5  ;;  %v4542_v7 = vld [vmem:[%s4844_s14 + $0x1b0] sm:$0xff] }
 0x4df   : > { %v2653_v10 = vpop.f32.mrf.mxu3 }
 0x4e0   : > { %3337 = vst.msk [vmem:[%s5065_s9 + $0x1d8] sm:$0xff] %vm3286_vm2, %v3016_v8  ;;  %4177 = vmatmul.msk.f32.gmra.mxu2 %vm569_vm1, %v4531_v3  ;;  %v2654_v12 = vadd.f32 %v2653_v10, %v2541_v4  ;;  %2813 = vmatmul.f32.gmra.mxu0 %v4532_v63 }
 0x4e2   : > { %v3025_v13 = vmax.f32 %v2654_v12, 0.0  ;;  %v2543_v15 = vpop.f32.mrf.mxu1 }
 0x4e3   : > { %v2879_v14 = vpop.f32.mrf.mxu2  ;;  %v2544_v18 = vadd.f32 %v2543_v15, %v6678_v16  ;;  %v4543_v15 = vld [vmem:[%s4844_s14 + $0x1c8] sm:$0xff] }
 0x4e4   : > { %3346 = vst [vmem:[%s5065_s9 + $0x220] sm:$0xff] %v3025_v13  ;;  %v2880_v9 = vadd.f32 %v2879_v14, %v2767_v11  ;;  %4145 = vmatmul.msk.f32.gmra.mxu3 %vm569_vm1, %v4533_v6 }
 0x4e5   : > { %v2769_v17 = vpop.f32.mrf.mxu0  ;;  %2590 = vmatmul.f32.gmra.mxu1 %v4534_v20 }
 0x4e6   : > { %v3026_v19 = vmax.f32 %v2880_v9, 0.0  ;;  %v2770_v22 = vadd.f32 %v2769_v17, %v6684_v5  ;;  %v4544_v17 = vld [vmem:[%s4844_s14 + $0x1c0] sm:$0xff] }
 0x4e7   : > { %v2656_v21 = vpop.f32.mrf.mxu3 }
 0x4e8   : > { %3347 = vst.msk [vmem:[%s5065_s9 + $0x228] sm:$0xff] %vm3286_vm2, %v3026_v19  ;;  %4178 = vmatmul.msk.f32.gmra.mxu2 %vm569_vm1, %v4533_v6  ;;  %v2657_v23 = vadd.f32 %v2656_v21, %v2544_v18  ;;  %2816 = vmatmul.f32.gmra.mxu0 %v4534_v20 }
 0x4ea   : > { %v3035_v24 = vmax.f32 %v2657_v23, 0.0  ;;  %v2546_v27 = vpop.f32.mrf.mxu1 }
 0x4eb   : > { %v2882_v26 = vpop.f32.mrf.mxu2  ;;  %v2547_v30 = vadd.f32 %v2546_v27, %v6678_v16  ;;  %v4545_v27 = vld [vmem:[%s4844_s14 + $0x1d8] sm:$0xff] }
 0x4ec   : > { %3356 = vst [vmem:[%s5065_s9 + $0x270] sm:$0xff] %v3035_v24  ;;  %v2883_v28 = vadd.f32 %v2882_v26, %v2770_v22  ;;  %4146 = vmatmul.msk.f32.gmra.mxu3 %vm569_vm1, %v4535_v29 }
 0x4ed   : > { %v2772_v31 = vpop.f32.mrf.mxu0  ;;  %2593 = vmatmul.f32.gmra.mxu1 %v4536_v33 }
 0x4ee   : > { %v3036_v32 = vmax.f32 %v2883_v28, 0.0  ;;  %v2773_v35 = vadd.f32 %v2772_v31, %v6684_v5  ;;  %v4546_v31 = vld [vmem:[%s4844_s14 + $0x1d0] sm:$0xff] }
 0x4ef   : > { %v2659_v34 = vpop.f32.mrf.mxu3 }
 0x4f0   : > { %3357 = vst.msk [vmem:[%s5065_s9 + $0x278] sm:$0xff] %vm3286_vm2, %v3036_v32  ;;  %4179 = vmatmul.msk.f32.gmra.mxu2 %vm569_vm1, %v4535_v29  ;;  %v2660_v36 = vadd.f32 %v2659_v34, %v2547_v30  ;;  %2819 = vmatmul.f32.gmra.mxu0 %v4536_v33 }
 0x4f2   : > { %v3045_v37 = vmax.f32 %v2660_v36, 0.0  ;;  %v2549_v39 = vpop.f32.mrf.mxu1 }
 0x4f3   : > { %v2885_v38 = vpop.f32.mrf.mxu2  ;;  %v2550_v42 = vadd.f32 %v2549_v39, %v6678_v16  ;;  %v4547_v39 = vld [vmem:[%s4844_s14 + $0x1e8] sm:$0xff] }
 0x4f4   : > { %3366 = vst [vmem:[%s5065_s9 + $0x2c0] sm:$0xff] %v3045_v37  ;;  %v2886_v40 = vadd.f32 %v2885_v38, %v2773_v35  ;;  %4147 = vmatmul.msk.f32.gmra.mxu3 %vm569_vm1, %v4537_v41 }
 0x4f5   : > { %v2775_v43 = vpop.f32.mrf.mxu0  ;;  %2596 = vmatmul.f32.gmra.mxu1 %v4538_v45 }
 0x4f6   : > { %v3046_v44 = vmax.f32 %v2886_v40, 0.0  ;;  %v2776_v47 = vadd.f32 %v2775_v43, %v6684_v5  ;;  %v4548_v43 = vld [vmem:[%s4844_s14 + $0x1e0] sm:$0xff] }
 0x4f7   : > { %v2662_v46 = vpop.f32.mrf.mxu3 }
 0x4f8   : > { %3367 = vst.msk [vmem:[%s5065_s9 + $0x2c8] sm:$0xff] %vm3286_vm2, %v3046_v44  ;;  %4180 = vmatmul.msk.f32.gmra.mxu2 %vm569_vm1, %v4537_v41  ;;  %v2663_v48 = vadd.f32 %v2662_v46, %v2550_v42  ;;  %2822 = vmatmul.f32.gmra.mxu0 %v4538_v45 }
 0x4fa   : > { %v3055_v49 = vmax.f32 %v2663_v48, 0.0  ;;  %v2552_v51 = vpop.f32.mrf.mxu1 }
 0x4fb   : > { %v2888_v50 = vpop.f32.mrf.mxu2  ;;  %v2553_v54 = vadd.f32 %v2552_v51, %v6678_v16  ;;  %v4549_v51 = vld [vmem:[%s4844_s14 + $0x1f8] sm:$0xff] }
 0x4fc   : > { %3376 = vst [vmem:[%s5065_s9 + $0x310] sm:$0xff] %v3055_v49  ;;  %v2889_v52 = vadd.f32 %v2888_v50, %v2776_v47  ;;  %4148 = vmatmul.msk.f32.gmra.mxu3 %vm569_vm1, %v4539_v53 }
 0x4fd   : > { %v2778_v55 = vpop.f32.mrf.mxu0  ;;  %2599 = vmatmul.f32.gmra.mxu1 %v4540_v57 }
 0x4fe   : > { %v3056_v56 = vmax.f32 %v2889_v52, 0.0  ;;  %v2779_v25 = vadd.f32 %v2778_v55, %v6684_v5  ;;  %v4550_v55 = vld [vmem:[%s4844_s14 + $0x1f0] sm:$0xff]  ;;  %s3606_s14 = ssub.s32 (%p4684_p4), 38, %s4748_s11 }
 0x4ff   : > { %v2665_v59 = vpop.f32.mrf.mxu3  ;;  %p3607_p8 = scmp.lt.s32.totalorder (%p4684_p4), %s3606_s14, 32 }
 0x500   : > { %3377 = vst.msk [vmem:[%s5065_s9 + $0x318] sm:$0xff] %vm3286_vm2, %v3056_v56  ;;  %4181 = vmatmul.msk.f32.gmra.mxu2 %vm569_vm1, %v4539_v53  ;;  %v2666_v60 = vadd.f32 %v2665_v59, %v2553_v54  ;;  %2825 = vmatmul.f32.gmra.mxu0 %v4540_v57 }
 0x502   : > { %v3065_v61 = vmax.f32 %v2666_v60, 0.0  ;;  %v2555_v58 = vpop.f32.mrf.mxu1 }
 0x503   : > { %v2891_v62 = vpop.f32.mrf.mxu2  ;;  %v2556_v2 = vadd.f32 %v2555_v58, %v6678_v16 }
 0x504   : > { %3386 = vst [vmem:[%s5065_s9 + $0x360] sm:$0xff] %v3065_v61  ;;  %v2892_v0 = vadd.f32 %v2891_v62, %v2779_v25  ;;  %4149 = vmatmul.msk.f32.gmra.mxu3 %vm569_vm1, %v4541_v1 }
 0x505   : > { %v2781_v3 = vpop.f32.mrf.mxu0  ;;  %2602 = vmatmul.f32.gmra.mxu1 %v4542_v7 }
 0x506   : > { %v3066_v4 = vmax.f32 %v2892_v0, 0.0  ;;  %v2782_v63 = vadd.f32 %v2781_v3, %v6684_v5 }
 0x507   : > { %v2668_v8 = vpop.f32.mrf.mxu3 }
 0x508   : > { %3387 = vst.msk [vmem:[%s5065_s9 + $0x368] sm:$0xff] %vm3286_vm2, %v3066_v4  ;;  %4182 = vmatmul.msk.f32.gmra.mxu2 %vm569_vm1, %v4541_v1  ;;  %v2669_v10 = vadd.f32 %v2668_v8, %v2556_v2  ;;  %2828 = vmatmul.f32.gmra.mxu0 %v4542_v7 }
 0x50a   : > { %v3075_v11 = vmax.f32 %v2669_v10, 0.0  ;;  %v2558_v13 = vpop.f32.mrf.mxu1 }
 0x50b   : > { %v2894_v12 = vpop.f32.mrf.mxu2  ;;  %v2559_v9 = vadd.f32 %v2558_v13, %v6678_v16 }
 0x50c   : > { %3396 = vst [vmem:[%s5065_s9 + $0x3b0] sm:$0xff] %v3075_v11  ;;  %v2895_v14 = vadd.f32 %v2894_v12, %v2782_v63  ;;  %4150 = vmatmul.msk.f32.gmra.mxu3 %vm569_vm1, %v4543_v15 }
 0x50d   : > { %v2784_v6 = vpop.f32.mrf.mxu0  ;;  %2605 = vmatmul.f32.gmra.mxu1 %v4544_v17 }
 0x50e   : > { %v3076_v18 = vmax.f32 %v2895_v14, 0.0  ;;  %v2785_v20 = vadd.f32 %v2784_v6, %v6684_v5 }
 0x50f   : > { %v2671_v19 = vpop.f32.mrf.mxu3 }
 0x510   : > { %3397 = vst.msk [vmem:[%s5065_s9 + $0x3b8] sm:$0xff] %vm3286_vm2, %v3076_v18  ;;  %4183 = vmatmul.msk.f32.gmra.mxu2 %vm569_vm1, %v4543_v15  ;;  %v2672_v21 = vadd.f32 %v2671_v19, %v2559_v9  ;;  %2831 = vmatmul.f32.gmra.mxu0 %v4544_v17 }
 0x512   : > { %v3085_v22 = vmax.f32 %v2672_v21, 0.0  ;;  %v2561_v24 = vpop.f32.mrf.mxu1 }
 0x513   : > { %v2897_v23 = vpop.f32.mrf.mxu2  ;;  %v2562_v28 = vadd.f32 %v2561_v24, %v6678_v16 }
 0x514   : > { %3406 = vst [vmem:[%s5065_s9 + $0x400] sm:$0xff] %v3085_v22  ;;  %v2898_v26 = vadd.f32 %v2897_v23, %v2785_v20  ;;  %4151 = vmatmul.msk.f32.gmra.mxu3 %vm569_vm1, %v4545_v27 }
 0x515   : > { %v2787_v29 = vpop.f32.mrf.mxu0  ;;  %2608 = vmatmul.f32.gmra.mxu1 %v4546_v31 }
 0x516   : > { %v3086_v30 = vmax.f32 %v2898_v26, 0.0  ;;  %v2788_v33 = vadd.f32 %v2787_v29, %v6684_v5 }
 0x517   : > { %v2674_v32 = vpop.f32.mrf.mxu3 }
 0x518   : > { %3407 = vst.msk [vmem:[%s5065_s9 + $0x408] sm:$0xff] %vm3286_vm2, %v3086_v30  ;;  %4184 = vmatmul.msk.f32.gmra.mxu2 %vm569_vm1, %v4545_v27  ;;  %v2675_v34 = vadd.f32 %v2674_v32, %v2562_v28  ;;  %2834 = vmatmul.f32.gmra.mxu0 %v4546_v31 }
 0x51a   : > { %v3095_v35 = vmax.f32 %v2675_v34, 0.0  ;;  %v2564_v37 = vpop.f32.mrf.mxu1 }
 0x51b   : > { %v2900_v36 = vpop.f32.mrf.mxu2  ;;  %v2565_v40 = vadd.f32 %v2564_v37, %v6678_v16 }
 0x51c   : > { %3416 = vst [vmem:[%s5065_s9 + $0x450] sm:$0xff] %v3095_v35  ;;  %v2901_v38 = vadd.f32 %v2900_v36, %v2788_v33  ;;  %4152 = vmatmul.msk.f32.gmra.mxu3 %vm569_vm1, %v4547_v39 }
 0x51d   : > { %v2790_v41 = vpop.f32.mrf.mxu0  ;;  %2611 = vmatmul.f32.gmra.mxu1 %v4548_v43 }
 0x51e   : > { %v3096_v42 = vmax.f32 %v2901_v38, 0.0  ;;  %v2791_v45 = vadd.f32 %v2790_v41, %v6684_v5 }
 0x51f   : > { %v2677_v44 = vpop.f32.mrf.mxu3 }
 0x520   : > { %3417 = vst.msk [vmem:[%s5065_s9 + $0x458] sm:$0xff] %vm3286_vm2, %v3096_v42  ;;  %4185 = vmatmul.msk.f32.gmra.mxu2 %vm569_vm1, %v4547_v39  ;;  %v2678_v46 = vadd.f32 %v2677_v44, %v2565_v40  ;;  %2837 = vmatmul.f32.gmra.mxu0 %v4548_v43 }
 0x522   : > { %v3105_v47 = vmax.f32 %v2678_v46, 0.0  ;;  %v2567_v49 = vpop.f32.mrf.mxu1 }
 0x523   : > { %v2903_v48 = vpop.f32.mrf.mxu2  ;;  %v2568_v52 = vadd.f32 %v2567_v49, %v6678_v16 }
 0x524   : > { %3426 = vst [vmem:[%s5065_s9 + $0x4a0] sm:$0xff] %v3105_v47  ;;  %v2904_v50 = vadd.f32 %v2903_v48, %v2791_v45  ;;  %4153 = vmatmul.msk.f32.gmra.mxu3 %vm569_vm1, %v4549_v51 }
 0x525   : > { %v2793_v53 = vpop.f32.mrf.mxu0  ;;  %2614 = vmatmul.f32.gmra.mxu1 %v4550_v55 }
 0x526   : > { %v3106_v54 = vmax.f32 %v2904_v50, 0.0  ;;  %v2794_v57 = vadd.f32 %v2793_v53, %v6684_v5 }
 0x527   : > { %v2680_v56 = vpop.f32.mrf.mxu3 }
 0x528   : > { %3427 = vst.msk [vmem:[%s5065_s9 + $0x4a8] sm:$0xff] %vm3286_vm2, %v3106_v54  ;;  %4186 = vmatmul.msk.f32.gmra.mxu2 %vm569_vm1, %v4549_v51  ;;  %v2681_v59 = vadd.f32 %v2680_v56, %v2568_v52  ;;  %2840 = vmatmul.f32.gmra.mxu0 %v4550_v55 }
 0x52a   : > { %v3115_v25 = vmax.f32 %v2681_v59, 0.0  ;;  %v2570_v61 = vpop.f32.mrf.mxu1 }
 0x52b   : > { %v2906_v60 = vpop.f32.mrf.mxu2  ;;  %v2571_v58 = vadd.f32 %v2570_v61, %v6678_v16 }
 0x52c   : > { %3436 = vst [vmem:[%s5065_s9 + $0x4f0] sm:$0xff] %v3115_v25  ;;  %v2907_v62 = vadd.f32 %v2906_v60, %v2794_v57 }
 0x52d   : > { %v2796_v0 = vpop.f32.mrf.mxu0 }
 0x52e   : > { %v3116_v1 = vmax.f32 %v2907_v62, 0.0  ;;  %v2797_v3 = vadd.f32 %v2796_v0, %v6684_v5 }
 0x52f   : > { %v2683_v2 = vpop.f32.mrf.mxu3 }
 0x530   : > { %3437 = vst.msk [vmem:[%s5065_s9 + $0x4f8] sm:$0xff] %vm3286_vm2, %v3116_v1  ;;  %v2684_v4 = vadd.f32 %v2683_v2, %v2571_v58 }
 0x532   : > { %v3125_v7 = vmax.f32 %v2684_v4, 0.0  ;;  %v2573_v63 = vpop.f32.mrf.mxu1 }
 0x533   : > { %v2909_v8 = vpop.f32.mrf.mxu2  ;;  %v2574_v11 = vadd.f32 %v2573_v63, %v6678_v16 }
 0x534   : > { %3446 = vst [vmem:[%s5065_s9 + $0x540] sm:$0xff] %v3125_v7  ;;  %v2910_v10 = vadd.f32 %v2909_v8, %v2797_v3 }
 0x535   : > { %v2799_v12 = vpop.f32.mrf.mxu0 }
 0x536   : > { %v3126_v13 = vmax.f32 %v2910_v10, 0.0  ;;  %v2800_v15 = vadd.f32 %v2799_v12, %v6684_v5 }
 0x537   : > { %v2686_v14 = vpop.f32.mrf.mxu3 }
 0x538   : > { %3447 = vst.msk [vmem:[%s5065_s9 + $0x548] sm:$0xff] %vm3286_vm2, %v3126_v13  ;;  %v2687_v9 = vadd.f32 %v2686_v14, %v2574_v11 }
 0x53a   : > { %v3135_v6 = vmax.f32 %v2687_v9, 0.0  ;;  %v2576_v17 = vpop.f32.mrf.mxu1 }
 0x53b   : > { %v2912_v18 = vpop.f32.mrf.mxu2  ;;  %v2577_v20 = vadd.f32 %v2576_v17, %v6678_v16 }
 0x53c   : > { %3456 = vst [vmem:[%s5065_s9 + $0x590] sm:$0xff] %v3135_v6  ;;  %v2913_v19 = vadd.f32 %v2912_v18, %v2800_v15 }
 0x53d   : > { %v2802_v21 = vpop.f32.mrf.mxu0 }
 0x53e   : > { %v3136_v22 = vmax.f32 %v2913_v19, 0.0  ;;  %v2803_v24 = vadd.f32 %v2802_v21, %v6684_v5 }
 0x53f   : > { %v2689_v23 = vpop.f32.mrf.mxu3 }
 0x540   : > { %3457 = vst.msk [vmem:[%s5065_s9 + $0x598] sm:$0xff] %vm3286_vm2, %v3136_v22  ;;  %v2690_v26 = vadd.f32 %v2689_v23, %v2577_v20 }
 0x542   : > { %v3145_v27 = vmax.f32 %v2690_v26, 0.0  ;;  %v2579_v29 = vpop.f32.mrf.mxu1 }
 0x543   : > { %v2915_v28 = vpop.f32.mrf.mxu2  ;;  %v2580_v31 = vadd.f32 %v2579_v29, %v6678_v16 }
 0x544   : > { %3466 = vst [vmem:[%s5065_s9 + $0x5e0] sm:$0xff] %v3145_v27  ;;  %v2916_v30 = vadd.f32 %v2915_v28, %v2803_v24 }
 0x545   : > { %v2805_v32 = vpop.f32.mrf.mxu0 }
 0x546   : > { %v3146_v33 = vmax.f32 %v2916_v30, 0.0  ;;  %v2806_v35 = vadd.f32 %v2805_v32, %v6684_v5 }
 0x547   : > { %v2692_v34 = vpop.f32.mrf.mxu3 }
 0x548   : > { %3467 = vst.msk [vmem:[%s5065_s9 + $0x5e8] sm:$0xff] %vm3286_vm2, %v3146_v33  ;;  %v2693_v36 = vadd.f32 %v2692_v34, %v2580_v31 }
 0x54a   : > { %v3155_v37 = vmax.f32 %v2693_v36, 0.0  ;;  %v2582_v39 = vpop.f32.mrf.mxu1 }
 0x54b   : > { %v2918_v38 = vpop.f32.mrf.mxu2  ;;  %v2583_v41 = vadd.f32 %v2582_v39, %v6678_v16 }
 0x54c   : > { %3476 = vst [vmem:[%s5065_s9 + $0x630] sm:$0xff] %v3155_v37  ;;  %v2919_v40 = vadd.f32 %v2918_v38, %v2806_v35 }
 0x54d   : > { %v2808_v42 = vpop.f32.mrf.mxu0 }
 0x54e   : > { %v3156_v43 = vmax.f32 %v2919_v40, 0.0  ;;  %v2809_v45 = vadd.f32 %v2808_v42, %v6684_v5 }
 0x54f   : > { %v2695_v44 = vpop.f32.mrf.mxu3 }
 0x550   : > { %3477 = vst.msk [vmem:[%s5065_s9 + $0x638] sm:$0xff] %vm3286_vm2, %v3156_v43  ;;  %v2696_v46 = vadd.f32 %v2695_v44, %v2583_v41 }
 0x552   : > { %v3165_v47 = vmax.f32 %v2696_v46, 0.0  ;;  %v2585_v49 = vpop.f32.mrf.mxu1 }
 0x553   : > { %v2921_v48 = vpop.f32.mrf.mxu2  ;;  %v2586_v51 = vadd.f32 %v2585_v49, %v6678_v16 }
 0x554   : > { %3486 = vst [vmem:[%s5065_s9 + $0x680] sm:$0xff] %v3165_v47  ;;  %v2922_v50 = vadd.f32 %v2921_v48, %v2809_v45 }
 0x555   : > { %v2811_v52 = vpop.f32.mrf.mxu0 }
 0x556   : > { %v3166_v53 = vmax.f32 %v2922_v50, 0.0  ;;  %v2812_v55 = vadd.f32 %v2811_v52, %v6684_v5 }
 0x557   : > { %v2698_v54 = vpop.f32.mrf.mxu3 }
 0x558   : > { %3487 = vst.msk [vmem:[%s5065_s9 + $0x688] sm:$0xff] %vm3286_vm2, %v3166_v53  ;;  %v2699_v56 = vadd.f32 %v2698_v54, %v2586_v51 }
 0x55a   : > { %v3175_v57 = vmax.f32 %v2699_v56, 0.0  ;;  %v2588_v25 = vpop.f32.mrf.mxu1 }
 0x55b   : > { %v2924_v59 = vpop.f32.mrf.mxu2  ;;  %v2589_v61 = vadd.f32 %v2588_v25, %v6678_v16 }
 0x55c   : > { %3496 = vst [vmem:[%s5065_s9 + $0x6d0] sm:$0xff] %v3175_v57  ;;  %v2925_v60 = vadd.f32 %v2924_v59, %v2812_v55 }
 0x55d   : > { %v2814_v62 = vpop.f32.mrf.mxu0 }
 0x55e   : > { %v3176_v58 = vmax.f32 %v2925_v60, 0.0  ;;  %v2815_v1 = vadd.f32 %v2814_v62, %v6684_v5 }
 0x55f   : > { %v2701_v0 = vpop.f32.mrf.mxu3 }
 0x560   : > { %3497 = vst.msk [vmem:[%s5065_s9 + $0x6d8] sm:$0xff] %vm3286_vm2, %v3176_v58  ;;  %v2702_v2 = vadd.f32 %v2701_v0, %v2589_v61 }
 0x562   : > { %v3185_v3 = vmax.f32 %v2702_v2, 0.0  ;;  %v2591_v7 = vpop.f32.mrf.mxu1 }
 0x563   : > { %v2927_v4 = vpop.f32.mrf.mxu2  ;;  %v2592_v63 = vadd.f32 %v2591_v7, %v6678_v16 }
 0x564   : > { %3506 = vst [vmem:[%s5065_s9 + $0x720] sm:$0xff] %v3185_v3  ;;  %v2928_v8 = vadd.f32 %v2927_v4, %v2815_v1 }
 0x565   : > { %v2817_v10 = vpop.f32.mrf.mxu0 }
 0x566   : > { %v3186_v11 = vmax.f32 %v2928_v8, 0.0  ;;  %v2818_v13 = vadd.f32 %v2817_v10, %v6684_v5 }
 0x567   : > { %v2704_v12 = vpop.f32.mrf.mxu3 }
 0x568   : > { %3507 = vst.msk [vmem:[%s5065_s9 + $0x728] sm:$0xff] %vm3286_vm2, %v3186_v11  ;;  %v2705_v14 = vadd.f32 %v2704_v12, %v2592_v63 }
 0x56a   : > { %v3195_v15 = vmax.f32 %v2705_v14, 0.0  ;;  %v2594_v6 = vpop.f32.mrf.mxu1 }
 0x56b   : > { %v2930_v9 = vpop.f32.mrf.mxu2  ;;  %v2595_v17 = vadd.f32 %v2594_v6, %v6678_v16 }
 0x56c   : > { %3516 = vst [vmem:[%s5065_s9 + $0x770] sm:$0xff] %v3195_v15  ;;  %v2931_v18 = vadd.f32 %v2930_v9, %v2818_v13 }
 0x56d   : > { %v2820_v19 = vpop.f32.mrf.mxu0 }
 0x56e   : > { %v3196_v20 = vmax.f32 %v2931_v18, 0.0  ;;  %v2821_v22 = vadd.f32 %v2820_v19, %v6684_v5 }
 0x56f   : > { %v2707_v21 = vpop.f32.mrf.mxu3 }
 0x570   : > { %3517 = vst.msk [vmem:[%s5065_s9 + $0x778] sm:$0xff] %vm3286_vm2, %v3196_v20  ;;  %v2708_v23 = vadd.f32 %v2707_v21, %v2595_v17 }
 0x572   : > { %v3205_v24 = vmax.f32 %v2708_v23, 0.0  ;;  %v2597_v27 = vpop.f32.mrf.mxu1 }
 0x573   : > { %v2933_v26 = vpop.f32.mrf.mxu2  ;;  %v2598_v29 = vadd.f32 %v2597_v27, %v6678_v16 }
 0x574   : > { %3526 = vst [vmem:[%s5065_s9 + $0x7c0] sm:$0xff] %v3205_v24  ;;  %v2934_v28 = vadd.f32 %v2933_v26, %v2821_v22 }
 0x575   : > { %v2823_v30 = vpop.f32.mrf.mxu0 }
 0x576   : > { %v3206_v31 = vmax.f32 %v2934_v28, 0.0  ;;  %v2824_v33 = vadd.f32 %v2823_v30, %v6684_v5 }
 0x577   : > { %v2710_v32 = vpop.f32.mrf.mxu3 }
 0x578   : > { %3527 = vst.msk [vmem:[%s5065_s9 + $0x7c8] sm:$0xff] %vm3286_vm2, %v3206_v31  ;;  %v2711_v34 = vadd.f32 %v2710_v32, %v2598_v29 }
 0x57a   : > { %v3215_v35 = vmax.f32 %v2711_v34, 0.0  ;;  %v2600_v37 = vpop.f32.mrf.mxu1 }
 0x57b   : > { %v2936_v36 = vpop.f32.mrf.mxu2  ;;  %v2601_v39 = vadd.f32 %v2600_v37, %v6678_v16 }
 0x57c   : > { %3536 = vst [vmem:[%s5065_s9 + $0x810] sm:$0xff] %v3215_v35  ;;  %v2937_v38 = vadd.f32 %v2936_v36, %v2824_v33 }
 0x57d   : > { %v2826_v40 = vpop.f32.mrf.mxu0 }
 0x57e   : > { %v3216_v41 = vmax.f32 %v2937_v38, 0.0  ;;  %v2827_v43 = vadd.f32 %v2826_v40, %v6684_v5 }
 0x57f   : > { %v2713_v42 = vpop.f32.mrf.mxu3 }
 0x580   : > { %3537 = vst.msk [vmem:[%s5065_s9 + $0x818] sm:$0xff] %vm3286_vm2, %v3216_v41  ;;  %v2714_v44 = vadd.f32 %v2713_v42, %v2601_v39 }
 0x582   : > { %v3225_v45 = vmax.f32 %v2714_v44, 0.0  ;;  %v2603_v47 = vpop.f32.mrf.mxu1 }
 0x583   : > { %v2939_v46 = vpop.f32.mrf.mxu2  ;;  %v2604_v49 = vadd.f32 %v2603_v47, %v6678_v16 }
 0x584   : > { %3546 = vst [vmem:[%s5065_s9 + $0x860] sm:$0xff] %v3225_v45  ;;  %v2940_v48 = vadd.f32 %v2939_v46, %v2827_v43 }
 0x585   : > { %v2829_v50 = vpop.f32.mrf.mxu0 }
 0x586   : > { %v3226_v51 = vmax.f32 %v2940_v48, 0.0  ;;  %v2830_v53 = vadd.f32 %v2829_v50, %v6684_v5 }
 0x587   : > { %v2716_v52 = vpop.f32.mrf.mxu3 }
 0x588   : > { %3547 = vst.msk [vmem:[%s5065_s9 + $0x868] sm:$0xff] %vm3286_vm2, %v3226_v51  ;;  %v2717_v54 = vadd.f32 %v2716_v52, %v2604_v49 }
 0x58a   : > { %v3235_v55 = vmax.f32 %v2717_v54, 0.0  ;;  %v2606_v57 = vpop.f32.mrf.mxu1 }
 0x58b   : > { %v2942_v56 = vpop.f32.mrf.mxu2  ;;  %v2607_v25 = vadd.f32 %v2606_v57, %v6678_v16 }
 0x58c   : > { %3556 = vst [vmem:[%s5065_s9 + $0x8b0] sm:$0xff] %v3235_v55  ;;  %v2943_v59 = vadd.f32 %v2942_v56, %v2830_v53 }
 0x58d   : > { %v2832_v60 = vpop.f32.mrf.mxu0 }
 0x58e   : > { %v3236_v61 = vmax.f32 %v2943_v59, 0.0  ;;  %v2833_v58 = vadd.f32 %v2832_v60, %v6684_v5 }
 0x58f   : > { %v2719_v62 = vpop.f32.mrf.mxu3 }
 0x590   : > { %3557 = vst.msk [vmem:[%s5065_s9 + $0x8b8] sm:$0xff] %vm3286_vm2, %v3236_v61  ;;  %v2720_v0 = vadd.f32 %v2719_v62, %v2607_v25 }
 0x592   : > { %v3245_v1 = vmax.f32 %v2720_v0, 0.0  ;;  %v2609_v3 = vpop.f32.mrf.mxu1 }
 0x593   : > { %v2945_v2 = vpop.f32.mrf.mxu2  ;;  %v2610_v7 = vadd.f32 %v2609_v3, %v6678_v16 }
 0x594   : > { %3566 = vst [vmem:[%s5065_s9 + $0x900] sm:$0xff] %v3245_v1  ;;  %v2946_v4 = vadd.f32 %v2945_v2, %v2833_v58 }
 0x595   : > { %v2835_v8 = vpop.f32.mrf.mxu0 }
 0x596   : > { %v3246_v63 = vmax.f32 %v2946_v4, 0.0  ;;  %v2836_v11 = vadd.f32 %v2835_v8, %v6684_v5 }
 0x597   : > { %v2722_v10 = vpop.f32.mrf.mxu3 }
 0x598   : > { %3567 = vst.msk [vmem:[%s5065_s9 + $0x908] sm:$0xff] %vm3286_vm2, %v3246_v63  ;;  %v2723_v12 = vadd.f32 %v2722_v10, %v2610_v7 }
 0x59a   : > { %v3255_v13 = vmax.f32 %v2723_v12, 0.0  ;;  %v2612_v15 = vpop.f32.mrf.mxu1 }
 0x59b   : > { %v2948_v14 = vpop.f32.mrf.mxu2  ;;  %v2613_v6 = vadd.f32 %v2612_v15, %v6678_v16 }
 0x59c   : > { %3576 = vst [vmem:[%s5065_s9 + $0x950] sm:$0xff] %v3255_v13  ;;  %v2949_v9 = vadd.f32 %v2948_v14, %v2836_v11 }
 0x59d   : > { %v2838_v18 = vpop.f32.mrf.mxu0 }
 0x59e   : > { %v3256_v17 = vmax.f32 %v2949_v9, 0.0  ;;  %v2839_v20 = vadd.f32 %v2838_v18, %v6684_v5 }
 0x59f   : > { %v2725_v19 = vpop.f32.mrf.mxu3 }
 0x5a0   : > { %3577 = vst.msk [vmem:[%s5065_s9 + $0x958] sm:$0xff] %vm3286_vm2, %v3256_v17  ;;  %v2726_v21 = vadd.f32 %v2725_v19, %v2613_v6 }
 0x5a2   : > { %v3265_v22 = vmax.f32 %v2726_v21, 0.0  ;;  %v2615_v24 = vpop.f32.mrf.mxu1 }
 0x5a3   : > { %v2951_v23 = vpop.f32.mrf.mxu2  ;;  %v2616_v27 = vadd.f32 %v2615_v24, %v6678_v16 }
 0x5a4   : > { %3586 = vst [vmem:[%s5065_s9 + $0x9a0] sm:$0xff] %v3265_v22  ;;  %v2952_v26 = vadd.f32 %v2951_v23, %v2839_v20 }
 0x5a5   : > { %v2841_v28 = vpop.f32.mrf.mxu0 }
 0x5a6   : > { %v3266_v29 = vmax.f32 %v2952_v26, 0.0  ;;  %v2842_v31 = vadd.f32 %v2841_v28, %v6684_v5 }
 0x5a7   : > { %v2728_v30 = vpop.f32.mrf.mxu3 }
 0x5a8   : > { %3587 = vst.msk [vmem:[%s5065_s9 + $0x9a8] sm:$0xff] %vm3286_vm2, %v3266_v29  ;;  %v2729_v32 = vadd.f32 %v2728_v30, %v2616_v27 }
 0x5aa   : > { %v3275_v33 = vmax.f32 %v2729_v32, 0.0 }
 0x5ab   : > { %v2954_v34 = vpop.f32.mrf.mxu2 }
 0x5ac   : > { %3596 = vst [vmem:[%s5065_s9 + $0x9f0] sm:$0xff] %v3275_v33  ;;  %v2955_v35 = vadd.f32 %v2954_v34, %v2842_v31  ;;  %3604 = sbr.rel (!%p4684_p4) target bundleno = 1533 (0x5fd), region = 36 }
 0x5ae   : > { %v3276_v36 = vmax.f32 %v2955_v35, 0.0 }
 0x5b0   : > { %3597 = vst.msk [vmem:[%s5065_s9 + $0x9f8] sm:$0xff] %vm3286_vm2, %v3276_v36 }
 0x5b1   : > { %s7115_s14 = smov (!%p3607_p8, %s3606_s14), 32 }
 0x5b2   : > { %s4189_s28 = smul.u32 80, %s7115_s14 }
 0x5b4   : > { %p4193_p9 = scmp.eq.s32.totalorder %s4189_s28, 0 }
 0x5b5   : > { %s6921_s23 = sshrl.u32 (!%p4193_p9), %s7115_s14, 2 }
 0x5b6   : > { %3617 = sbr.rel (%p4193_p9) target bundleno = 1533 (0x5fd), region = 40  ;;  %p4194_p10 = scmp.le.s32.totalorder (!%p4193_p9), %s6921_s23, 0 }
 0x5bb   : > { %3806 = sbr.rel (%p4194_p10) target bundleno = 1513 (0x5e9), region = 88  ;;  %s7102_s15 = smov (!%p4194_p10), %s6915_s27 }
 0x5bc   : > { %s7103_s20 = smov (!%p4194_p10), %s5065_s9  ;;  %s6930_s11 = smov (!%p4194_p10), 0  }
 0x5bd   : > { %s6932_s29 = smov (!%p4194_p10), 0  }
 0x5c0 LB: >> { %v3630_v16 = vld [vmem:[%s4613_s20] sm:$0xff]  ;;  %v3632_v5 = vld [vmem:[%s4613_s20 + $0x50] sm:$0xff]  ;;  %s3710_s30 = sadd.s32 1, %s4617_s11  ;;  %v3638_v39 = vld [vmem:[%s4613_s20 + $0x8] sm:$0xff]  ;;  %s3624_s29 = sadd.s32 1, %s4621_s29   ;;  %s4621_s29 = sphi %s6932_s29, %s3624_s29   ;;  %s4617_s11 = sphi %s6930_s11, %s7106_s11   ;;  %s4613_s20 = sphi %s7103_s20, %s7105_s20   ;;  %s4609_s15 = sphi %s7102_s15, %s7104_s15  }
 0x5c1   : >> { %v3634_v37 = vld [vmem:[%s4613_s20 + $0xa0] sm:$0xff]  ;;  %3631 = vst [vmem:[%s4609_s15] sm:$0xff] %v3630_v16  ;;  %v3636_v38 = vld [vmem:[%s4613_s20 + $0xf0] sm:$0xff]  ;;  %p3711_p11 = scmp.ge.s32.totalorder %s3710_s30, %s6921_s23  ;;  %v3640_v40 = vld [vmem:[%s4613_s20 + $0x58] sm:$0xff]  ;;  %p3623_p12 = scmp.ge.s32.totalorder %s3624_s29, %s6921_s23 }
 0x5c2   : >> { %3633 = vst [vmem:[%s4609_s15 + $0x50] sm:$0xff] %v3632_v5  ;;  %v3642_v41 = vld [vmem:[%s4613_s20 + $0xa8] sm:$0xff]  ;;  %v3644_v42 = vld [vmem:[%s4613_s20 + $0xf8] sm:$0xff]  ;;  %v3646_v43 = vld [vmem:[%s4613_s20 + $0x10] sm:$0xff] }
 0x5c3   : >> { %3635 = vst [vmem:[%s4609_s15 + $0xa0] sm:$0xff] %v3634_v37  ;;  %s7117_s30 = smov (%p3711_p11, %s3710_s30), 0  ;;  %v3648_v44 = vld [vmem:[%s4613_s20 + $0x60] sm:$0xff]  ;;  %v3650_v45 = vld [vmem:[%s4613_s20 + $0xb0] sm:$0xff]  ;;  %v3654_v47 = vld [vmem:[%s4613_s20 + $0x18] sm:$0xff] }
 0x5c4   : >> { %3637 = vst [vmem:[%s4609_s15 + $0xf0] sm:$0xff] %v3636_v38  ;;  %s3713_s4 = smul.u32 320, %s7117_s30  ;;  %v3652_v46 = vld [vmem:[%s4613_s20 + $0x100] sm:$0xff]  ;;  %v3656_v48 = vld [vmem:[%s4613_s20 + $0x68] sm:$0xff]  ;;  %v3658_v49 = vld [vmem:[%s4613_s20 + $0xb8] sm:$0xff]  ;;  %s7106_s11 = smov %s7117_s30 }
 0x5c5   : >> { %3639 = vst [vmem:[%s4609_s15 + $0x8] sm:$0xff] %v3638_v39  ;;  %v3660_v50 = vld [vmem:[%s4613_s20 + $0x108] sm:$0xff]  ;;  %v3662_v51 = vld [vmem:[%s4613_s20 + $0x20] sm:$0xff]  ;;  %v3664_v52 = vld [vmem:[%s4613_s20 + $0x70] sm:$0xff] }
 0x5c6   : >> { %3641 = vst [vmem:[%s4609_s15 + $0x58] sm:$0xff] %v3640_v40  ;;  %s6966_s5 = scalar_lea.vmem %s5065_s9, %s3713_s4 [#allocation2]   ;;  %s6969_s26 = scalar_lea.vmem %s6915_s27, %s3713_s4   ;;  %v3666_v53 = vld [vmem:[%s4613_s20 + $0xc0] sm:$0xff]  ;;  %v3668_v54 = vld [vmem:[%s4613_s20 + $0x110] sm:$0xff]  ;;  %v3670_v55 = vld [vmem:[%s4613_s20 + $0x28] sm:$0xff] }
 0x5c7   : >> { %3643 = vst [vmem:[%s4609_s15 + $0xa8] sm:$0xff] %v3642_v41  ;;  %v3672_v56 = vld [vmem:[%s4613_s20 + $0x78] sm:$0xff]  ;;  %v3674_v57 = vld [vmem:[%s4613_s20 + $0xc8] sm:$0xff]  ;;  %v3678_v25 = vld [vmem:[%s4613_s20 + $0x30] sm:$0xff] }
 0x5c8   : >> { %3645 = vst [vmem:[%s4609_s15 + $0xf8] sm:$0xff] %v3644_v42  ;;  %v3676_v59 = vld [vmem:[%s4613_s20 + $0x118] sm:$0xff]  ;;  %v3680_v60 = vld [vmem:[%s4613_s20 + $0x80] sm:$0xff]  ;;  %v3682_v61 = vld [vmem:[%s4613_s20 + $0xd0] sm:$0xff] }
 0x5c9   : >> { %3647 = vst [vmem:[%s4609_s15 + $0x10] sm:$0xff] %v3646_v43  ;;  %v3684_v62 = vld [vmem:[%s4613_s20 + $0x120] sm:$0xff]  ;;  %v3686_v58 = vld [vmem:[%s4613_s20 + $0x38] sm:$0xff]  ;;  %v3688_v0 = vld [vmem:[%s4613_s20 + $0x88] sm:$0xff] }
 0x5ca   : >> { %3649 = vst [vmem:[%s4609_s15 + $0x60] sm:$0xff] %v3648_v44  ;;  %v3690_v1 = vld [vmem:[%s4613_s20 + $0xd8] sm:$0xff]  ;;  %v3692_v2 = vld [vmem:[%s4613_s20 + $0x128] sm:$0xff]  ;;  %v3694_v3 = vld [vmem:[%s4613_s20 + $0x40] sm:$0xff] }
 0x5cb   : >> { %3651 = vst [vmem:[%s4609_s15 + $0xb0] sm:$0xff] %v3650_v45  ;;  %v3696_v4 = vld [vmem:[%s4613_s20 + $0x90] sm:$0xff]  ;;  %v3698_v7 = vld [vmem:[%s4613_s20 + $0xe0] sm:$0xff]  ;;  %v3702_v63 = vld [vmem:[%s4613_s20 + $0x48] sm:$0xff] }
 0x5cc   : >> { %3653 = vst [vmem:[%s4609_s15 + $0x100] sm:$0xff] %v3652_v46  ;;  %v3700_v8 = vld [vmem:[%s4613_s20 + $0x130] sm:$0xff]  ;;  %v3704_v10 = vld [vmem:[%s4613_s20 + $0x98] sm:$0xff]  ;;  %v3706_v11 = vld [vmem:[%s4613_s20 + $0xe8] sm:$0xff] }
 0x5cd   : >> { %3655 = vst [vmem:[%s4609_s15 + $0x18] sm:$0xff] %v3654_v47  ;;  %v3708_v12 = vld [vmem:[%s4613_s20 + $0x138] sm:$0xff]  ;;  %s7105_s20 = smov %s6966_s5 }
 0x5ce   : >> { %3657 = vst [vmem:[%s4609_s15 + $0x68] sm:$0xff] %v3656_v48 }
 0x5cf   : >> { %3659 = vst [vmem:[%s4609_s15 + $0xb8] sm:$0xff] %v3658_v49 }
 0x5d0   : >> { %3661 = vst [vmem:[%s4609_s15 + $0x108] sm:$0xff] %v3660_v50 }
 0x5d1   : >> { %3663 = vst [vmem:[%s4609_s15 + $0x20] sm:$0xff] %v3662_v51 }
 0x5d2   : >> { %3665 = vst [vmem:[%s4609_s15 + $0x70] sm:$0xff] %v3664_v52 }
 0x5d3   : >> { %3667 = vst [vmem:[%s4609_s15 + $0xc0] sm:$0xff] %v3666_v53 }
 0x5d4   : >> { %3669 = vst [vmem:[%s4609_s15 + $0x110] sm:$0xff] %v3668_v54 }
 0x5d5   : >> { %3671 = vst [vmem:[%s4609_s15 + $0x28] sm:$0xff] %v3670_v55 }
 0x5d6   : >> { %3673 = vst [vmem:[%s4609_s15 + $0x78] sm:$0xff] %v3672_v56 }
 0x5d7   : >> { %3675 = vst [vmem:[%s4609_s15 + $0xc8] sm:$0xff] %v3674_v57 }
 0x5d8   : >> { %3677 = vst [vmem:[%s4609_s15 + $0x118] sm:$0xff] %v3676_v59 }
 0x5d9   : >> { %3679 = vst [vmem:[%s4609_s15 + $0x30] sm:$0xff] %v3678_v25 }
 0x5da   : >> { %3681 = vst [vmem:[%s4609_s15 + $0x80] sm:$0xff] %v3680_v60 }
 0x5db   : >> { %3683 = vst [vmem:[%s4609_s15 + $0xd0] sm:$0xff] %v3682_v61 }
 0x5dc   : >> { %3685 = vst [vmem:[%s4609_s15 + $0x120] sm:$0xff] %v3684_v62 }
 0x5dd   : >> { %3687 = vst [vmem:[%s4609_s15 + $0x38] sm:$0xff] %v3686_v58 }
 0x5de   : >> { %3689 = vst [vmem:[%s4609_s15 + $0x88] sm:$0xff] %v3688_v0 }
 0x5df   : >> { %3691 = vst [vmem:[%s4609_s15 + $0xd8] sm:$0xff] %v3690_v1 }
 0x5e0   : >> { %3693 = vst [vmem:[%s4609_s15 + $0x128] sm:$0xff] %v3692_v2 }
 0x5e1   : >> { %3695 = vst [vmem:[%s4609_s15 + $0x40] sm:$0xff] %v3694_v3 }
 0x5e2   : >> { %3697 = vst [vmem:[%s4609_s15 + $0x90] sm:$0xff] %v3696_v4 }
 0x5e3   : >> { %3699 = vst [vmem:[%s4609_s15 + $0xe0] sm:$0xff] %v3698_v7 }
 0x5e4   : >> { %3701 = vst [vmem:[%s4609_s15 + $0x130] sm:$0xff] %v3700_v8  ;;  %3626 = sbr.rel (!%p3623_p12) target bundleno = 1472 (0x5c0), region = 94 }
 0x5e5   : >> { %3703 = vst [vmem:[%s4609_s15 + $0x48] sm:$0xff] %v3702_v63 }
 0x5e6   : >> { %3705 = vst [vmem:[%s4609_s15 + $0x98] sm:$0xff] %v3704_v10 }
 0x5e7   : >> { %3707 = vst [vmem:[%s4609_s15 + $0xe8] sm:$0xff] %v3706_v11 }
 0x5e8   : >> { %3709 = vst [vmem:[%s4609_s15 + $0x138] sm:$0xff] %v3708_v12  ;;  %s7104_s15 = smov %s6969_s26 }
 0x5e9 PF: > { %s7048_s6 = sand.u32 3, %s7115_s14   ;;  %s4196_s7 = smul.u32 320, %s6921_s23 }
 0x5ea   : > { %p4198_p13 = scmp.le.s32.totalorder %s7048_s6, 0 }
 0x5eb   : > { %s7052_s8 = scalar_lea.vmem %s5065_s9, %s4196_s7 [#allocation2]   ;;  %s7055_s12 = scalar_lea.vmem %s6915_s27, %s4196_s7  }
 0x5ec   : > { %3820 = sbr.rel (%p4198_p13) target bundleno = 1533 (0x5fd), region = 99  ;;  %s7107_s10 = smov (!%p4198_p13), %s7055_s12 }
 0x5ed   : > { %s7108_s17 = smov (!%p4198_p13), %s7052_s8  ;;  %s7064_s18 = smov (!%p4198_p13), 0  }
 0x5ee   : > { %s7066_s21 = smov (!%p4198_p13), 0  }
 0x5f1 LB: >> { %v3733_v13 = vld [vmem:[%s4629_s17] sm:$0xff]  ;;  %v3735_v14 = vld [vmem:[%s4629_s17 + $0x8] sm:$0xff]  ;;  %v3737_v15 = vld [vmem:[%s4629_s17 + $0x10] sm:$0xff]  ;;  %s3753_s9 = sadd.s32 1, %s4633_s18  ;;  %s3727_s21 = sadd.s32 1, %s4637_s21   ;;  %s4637_s21 = sphi %s7066_s21, %s3727_s21   ;;  %s4633_s18 = sphi %s7064_s18, %s7110_s18   ;;  %s4629_s17 = sphi %s7108_s17, %s3758_s17   ;;  %s4625_s10 = sphi %s7107_s10, %s7109_s10  }
 0x5f2   : >> { %3734 = vst [vmem:[%s4625_s10] sm:$0xff] %v3733_v13  ;;  %v3739_v9 = vld [vmem:[%s4629_s17 + $0x18] sm:$0xff]  ;;  %p3754_p0 = scmp.ge.s32.totalorder %s3753_s9, %s7048_s6  ;;  %v3741_v6 = vld [vmem:[%s4629_s17 + $0x20] sm:$0xff]  ;;  %v3743_v18 = vld [vmem:[%s4629_s17 + $0x28] sm:$0xff]  ;;  %p3726_p1 = scmp.ge.s32.totalorder %s3727_s21, %s7048_s6 }
 0x5f3   : >> { %3736 = vst [vmem:[%s4625_s10 + $0x8] sm:$0xff] %v3735_v14  ;;  %v3745_v17 = vld [vmem:[%s4629_s17 + $0x30] sm:$0xff]  ;;  %v3747_v19 = vld [vmem:[%s4629_s17 + $0x38] sm:$0xff]  ;;  %v3749_v20 = vld [vmem:[%s4629_s17 + $0x40] sm:$0xff] }
 0x5f4   : >> { %3738 = vst [vmem:[%s4625_s10 + $0x10] sm:$0xff] %v3737_v15  ;;  %s7119_s9 = smov (%p3754_p0, %s3753_s9), 0  ;;  %v3751_v21 = vld [vmem:[%s4629_s17 + $0x48] sm:$0xff] }
 0x5f5   : >> { %3740 = vst [vmem:[%s4625_s10 + $0x18] sm:$0xff] %v3739_v9  ;;  %s3756_s14 = smul.u32 80, %s7119_s9  ;;  %s7110_s18 = smov %s7119_s9 }
 0x5f6   : >> { %3742 = vst [vmem:[%s4625_s10 + $0x20] sm:$0xff] %v3741_v6 }
 0x5f7   : >> { %3744 = vst [vmem:[%s4625_s10 + $0x28] sm:$0xff] %v3743_v18  ;;  %s3758_s17 = scalar_lea.vmem %s7052_s8, %s3756_s14 [#allocation2]   ;;  %s3759_s22 = scalar_lea.vmem %s7055_s12, %s3756_s14  }
 0x5f8   : >> { %3746 = vst [vmem:[%s4625_s10 + $0x30] sm:$0xff] %v3745_v17  ;;  %3729 = sbr.rel (!%p3726_p1) target bundleno = 1521 (0x5f1), region = 105 }
 0x5f9   : >> { %3748 = vst [vmem:[%s4625_s10 + $0x38] sm:$0xff] %v3747_v19 }
 0x5fa   : >> { %3750 = vst [vmem:[%s4625_s10 + $0x40] sm:$0xff] %v3749_v20 }
 0x5fb   : >> { %3752 = vst [vmem:[%s4625_s10 + $0x48] sm:$0xff] %v3751_v21  ;;  %s7109_s10 = smov %s3759_s22 }
 0x5fd PF: > { %p10_p2 = scmp.ge.s32.totalorder %s4674_s16, 4   ;;  %s7111_s12 = smov %s4601_s13 }
 0x5fe   : > { %s7112_s13 = smov %s4682_s19  ;;  %s7113_s14 = smov %s4674_s16 }
 0x5ff   :  { %12 = sbr.rel (!%p10_p2) target bundleno = 2 (0x2), region = 116 }

</bundles_post_ra>
